<compile_context>
chip_gen: v7x
topology: tpu7x:2x2x1
jax: 0.10.0
libtpu: 0.0.40
codegen_flags: <defaults>
</compile_context>

<pallas_src>
import math

import jax
import jax.numpy as jnp
from jax.experimental import pallas as pl
from jax.experimental.pallas import tpu as pltpu

DMODEL = 512
NUM_HEADS = 8
HEAD_DIM = DMODEL // NUM_HEADS
FF_HIDDEN = 2048
LN_EPS = 1e-5


def _layernorm(h, gamma, beta):
    mu = jnp.mean(h, axis=-1, keepdims=True)
    var = jnp.mean((h - mu) ** 2, axis=-1, keepdims=True)
    return (h - mu) * jax.lax.rsqrt(var + LN_EPS) * gamma + beta


def decoder_block_kernel(
    x_ref,                     # (Bb, T, D)  f32
    wqkv_ref, bqkv_ref,        # (D, 3D) bf16, (1, 3D) f32
    wo_ref, bo_ref,            # (D, D)  bf16, (1, D)  f32
    g1_ref, b1_ref,            # (1, D) f32
    g2_ref, b2_ref,            # (1, D) f32
    w1_ref, bf1_ref,           # (D, F) bf16, (1, F) f32
    w2_ref, bf2_ref,           # (F, D) bf16, (1, D) f32
    o_ref,                     # (Bb, T, D)  f32
):
    bb, t, d = x_ref.shape
    rows = bb * t

    x = x_ref[...].reshape(rows, d)                       # (R, D) f32

    # ---- norm1 + fused QKV projection (bf16 MXU, f32 accumulation) ----
    h = _layernorm(x, g1_ref[...], b1_ref[...])
    qkv = jnp.dot(h.astype(jnp.bfloat16), wqkv_ref[...],
                  preferred_element_type=jnp.float32) + bqkv_ref[...]   # (R, 3D) f32

    # ---- causal multi-head self-attention, batched over the Bb sub-batch ----
    # TODO(synk): for large T (>~512) tile the KV axis (flash-style online
    # softmax) instead of materializing the full (Bb, T, T) score matrix.
    row_id = jax.lax.broadcasted_iota(jnp.int32, (t, t), 0)
    col_id = jax.lax.broadcasted_iota(jnp.int32, (t, t), 1)
    causal = (row_id >= col_id)[None]                     # (1, T, T)
    scale = 1.0 / math.sqrt(HEAD_DIM)

    wo = wo_ref[...]                                      # (D, D) bf16
    # Accumulate each head's contribution through its slice of Wo instead of
    # concatenating head outputs along the lane axis.
    attn = jnp.zeros((rows, d), jnp.float32)
    for hh in range(NUM_HEADS):
        q_off = hh * HEAD_DIM
        k_off = d + hh * HEAD_DIM
        v_off = 2 * d + hh * HEAD_DIM
        q = (qkv[:, q_off:q_off + HEAD_DIM] * scale).astype(jnp.bfloat16)
        q = q.reshape(bb, t, HEAD_DIM)
        k = qkv[:, k_off:k_off + HEAD_DIM].astype(jnp.bfloat16).reshape(bb, t, HEAD_DIM)
        v = qkv[:, v_off:v_off + HEAD_DIM].astype(jnp.bfloat16).reshape(bb, t, HEAD_DIM)

        s = jnp.einsum("bqd,bkd->bqk", q, k,
                       preferred_element_type=jnp.float32)            # (Bb, T, T) f32
        s = jnp.where(causal, s, -jnp.inf)
        m = jnp.max(s, axis=-1, keepdims=True)
        e = jnp.exp(s - m)
        p = e * pl.reciprocal(jnp.sum(e, axis=-1, keepdims=True), approx=True)
        o_h = jnp.einsum("bqk,bkd->bqd", p.astype(jnp.bfloat16), v,
                         preferred_element_type=jnp.float32)          # (Bb, T, hd) f32
        attn = attn + jnp.dot(o_h.reshape(rows, HEAD_DIM).astype(jnp.bfloat16),
                              wo[q_off:q_off + HEAD_DIM, :],
                              preferred_element_type=jnp.float32)
    attn = attn + bo_ref[...]

    # residual (dropout == identity in eval mode)
    x1 = x + attn

    # ---- norm2 + feed-forward (bf16 matmuls, f32 accumulate) ----
    h2 = _layernorm(x1, g2_ref[...], b2_ref[...])
    f = jnp.dot(h2.astype(jnp.bfloat16), w1_ref[...],
                preferred_element_type=jnp.float32) + bf1_ref[...]
    f = jnp.maximum(f, 0.0)
    f = jnp.dot(f.astype(jnp.bfloat16), w2_ref[...],
                preferred_element_type=jnp.float32) + bf2_ref[...]

    o_ref[...] = (x1 + f).reshape(bb, t, d)


def _pick_block_b(B, T, max_rows=512):
    """Largest divisor of B such that block_b*T <= max_rows (>=1)."""
    bb = max(1, min(B, max_rows // max(T, 1)))
    while B % bb != 0:
        bb -= 1
    return bb


def decoder_block(x, params, *, block_b=None):
    B, T, D = x.shape
    assert D == DMODEL
    if block_b is None:
        block_b = _pick_block_b(B, T)
    assert B % block_b == 0

    # Cast matmul weights to bf16 once outside the kernel; biases / LN params stay f32.
    wqkv = params["wqkv"].astype(jnp.bfloat16)
    wo = params["wo"].astype(jnp.bfloat16)
    w1 = params["w1"].astype(jnp.bfloat16)
    w2 = params["w2"].astype(jnp.bfloat16)

    def resident():
        # Grid-invariant operand: whole array resident in VMEM, single copy,
        # no per-grid-step DMA and no double buffering.
        return pl.BlockSpec(memory_space=pltpu.MemorySpace.VMEM)

    in_specs = [
        pl.BlockSpec((block_b, T, D), lambda b: (b, 0, 0)),   # x (pipelined over batch blocks)
        resident(), resident(),                               # qkv proj W, b
        resident(), resident(),                               # out proj W, b
        resident(), resident(),                               # norm1 gamma/beta
        resident(), resident(),                               # norm2 gamma/beta
        resident(), resident(),                               # ff linear1 W, b
        resident(), resident(),                               # ff linear2 W, b
    ]

    return pl.pallas_call(
        decoder_block_kernel,
        out_shape=jax.ShapeDtypeStruct((B, T, D), jnp.float32),
        grid_spec=pltpu.PrefetchScalarGridSpec(
            num_scalar_prefetch=0,
            grid=(B // block_b,),
            in_specs=in_specs,
            out_specs=pl.BlockSpec((block_b, T, D), lambda b: (b, 0, 0)),
        ),
        compiler_params=pltpu.CompilerParams(
            dimension_semantics=("parallel",),
            vmem_limit_bytes=48 << 20,      # fits v7x's 64 MiB VMEM per TC
        ),
    )(
        x,
        wqkv, params["bqkv"],
        wo, params["bo"],
        params["g1"], params["b1"],
        params["g2"], params["b2"],
        w1, params["bf1"],
        w2, params["bf2"],
    )


def decoder_block_ref(x, p):
    """Pure-JAX f32 reference matching the PyTorch forward (eval mode)."""
    B, T, D = x.shape

    def ln(h, g, b):
        mu = jnp.mean(h, axis=-1, keepdims=True)
        var = jnp.mean((h - mu) ** 2, axis=-1, keepdims=True)
        return (h - mu) * jax.lax.rsqrt(var + LN_EPS) * g + b

    h = ln(x, p["g1"], p["b1"])
    qkv = h @ p["wqkv"] + p["bqkv"]                           # (B, T, 3D)
    qkv = qkv.reshape(B, T, 3, NUM_HEADS, HEAD_DIM).transpose(2, 0, 3, 1, 4)
    q, k, v = qkv[0], qkv[1], qkv[2]                          # (B, H, T, hd)
    s = jnp.einsum("bhtd,bhsd->bhts", q, k) / math.sqrt(HEAD_DIM)
    mask = jnp.tril(jnp.ones((T, T), bool))
    s = jnp.where(mask[None, None], s, -jnp.inf)
    w = jax.nn.softmax(s, axis=-1)
    a = jnp.einsum("bhts,bhsd->bhtd", w, v)
    a = a.transpose(0, 2, 1, 3).reshape(B, T, D)
    a = a @ p["wo"] + p["bo"]
    x1 = x + a
    h2 = ln(x1, p["g2"], p["b2"])
    f = jnp.maximum(h2 @ p["w1"] + p["bf1"], 0.0) @ p["w2"] + p["bf2"]
    return x1 + f


def make_params(key):
    ks = jax.random.split(key, 8)
    s = 0.02
    return {
        "wqkv": s * jax.random.normal(ks[0], (DMODEL, 3 * DMODEL), jnp.float32),
        "bqkv": s * jax.random.normal(ks[1], (1, 3 * DMODEL), jnp.float32),
        "wo":   s * jax.random.normal(ks[2], (DMODEL, DMODEL), jnp.float32),
        "bo":   s * jax.random.normal(ks[3], (1, DMODEL), jnp.float32),
        "g1":   jnp.ones((1, DMODEL), jnp.float32),
        "b1":   jnp.zeros((1, DMODEL), jnp.float32),
        "g2":   jnp.ones((1, DMODEL), jnp.float32),
        "b2":   jnp.zeros((1, DMODEL), jnp.float32),
        "w1":   s * jax.random.normal(ks[4], (DMODEL, FF_HIDDEN), jnp.float32),
        "bf1":  s * jax.random.normal(ks[5], (1, FF_HIDDEN), jnp.float32),
        "w2":   s * jax.random.normal(ks[6], (FF_HIDDEN, DMODEL), jnp.float32),
        "bf2":  s * jax.random.normal(ks[7], (1, DMODEL), jnp.float32),
    }


if __name__ == "__main__":
    key = jax.random.PRNGKey(0)
    kx, kp = jax.random.split(key)
    B, T = 2, 8
    x = jax.random.normal(kx, (B, T, DMODEL), jnp.float32)
    params = make_params(kp)

    out = jax.block_until_ready(decoder_block(x, params))
    ref = decoder_block_ref(x, params)

    assert out.shape == (B, T, DMODEL)
    err = float(jnp.max(jnp.abs(out - ref)))
    # bf16 matmuls (f32 accumulation) vs f32 reference -> loose tolerance.
    assert err < 3e-2, err

    print("KERNEL_OK")
</pallas_src>

<mosaic_0001>
module attributes {stable_mosaic.version = 11 : i64} {
  func.func @decoder_block_kernel(%arg0: i32, %arg1: memref<2x8x512xf32, #tpu.memory_space<vmem>>, %arg2: memref<512x1536xbf16, #tpu.memory_space<vmem>>, %arg3: memref<1x1536xf32, #tpu.memory_space<vmem>>, %arg4: memref<512x512xbf16, #tpu.memory_space<vmem>>, %arg5: memref<1x512xf32, #tpu.memory_space<vmem>>, %arg6: memref<1x512xf32, #tpu.memory_space<vmem>>, %arg7: memref<1x512xf32, #tpu.memory_space<vmem>>, %arg8: memref<1x512xf32, #tpu.memory_space<vmem>>, %arg9: memref<1x512xf32, #tpu.memory_space<vmem>>, %arg10: memref<512x2048xbf16, #tpu.memory_space<vmem>>, %arg11: memref<1x2048xf32, #tpu.memory_space<vmem>>, %arg12: memref<2048x512xbf16, #tpu.memory_space<vmem>>, %arg13: memref<1x512xf32, #tpu.memory_space<vmem>>, %arg14: memref<2x8x512xf32, #tpu.memory_space<vmem>>) attributes {dimension_semantics = [#tpu.dimension_semantics<parallel>], iteration_bounds = array<i64: 1>, scalar_prefetch = 0 : i64, scratch_operands = 0 : i64, tpu.core_type = #tpu.core_type<tc>, window_params = [{transform_indices = @transform_0, window_bounds = array<i64: 2, 8, 512>}, {pipeline_mode = #tpu.pipeline_mode<synchronous>, transform_indices = @transform_1, window_bounds = array<i64: 512, 1536>}, {pipeline_mode = #tpu.pipeline_mode<synchronous>, transform_indices = @transform_2, window_bounds = array<i64: 1, 1536>}, {pipeline_mode = #tpu.pipeline_mode<synchronous>, transform_indices = @transform_3, window_bounds = array<i64: 512, 512>}, {pipeline_mode = #tpu.pipeline_mode<synchronous>, transform_indices = @transform_4, window_bounds = array<i64: 1, 512>}, {pipeline_mode = #tpu.pipeline_mode<synchronous>, transform_indices = @transform_5, window_bounds = array<i64: 1, 512>}, {pipeline_mode = #tpu.pipeline_mode<synchronous>, transform_indices = @transform_6, window_bounds = array<i64: 1, 512>}, {pipeline_mode = #tpu.pipeline_mode<synchronous>, transform_indices = @transform_7, window_bounds = array<i64: 1, 512>}, {pipeline_mode = #tpu.pipeline_mode<synchronous>, transform_indices = @transform_8, window_bounds = array<i64: 1, 512>}, {pipeline_mode = #tpu.pipeline_mode<synchronous>, transform_indices = @transform_9, window_bounds = array<i64: 512, 2048>}, {pipeline_mode = #tpu.pipeline_mode<synchronous>, transform_indices = @transform_10, window_bounds = array<i64: 1, 2048>}, {pipeline_mode = #tpu.pipeline_mode<synchronous>, transform_indices = @transform_11, window_bounds = array<i64: 2048, 512>}, {pipeline_mode = #tpu.pipeline_mode<synchronous>, transform_indices = @transform_12, window_bounds = array<i64: 1, 512>}, {transform_indices = @transform_13, window_bounds = array<i64: 2, 8, 512>}]} {
    %c0 = arith.constant 0 : index
    %c0_0 = arith.constant 0 : index
    %c0_1 = arith.constant 0 : index
    %0 = vector.load %arg1[%c0, %c0_0, %c0_1] : memref<2x8x512xf32, #tpu.memory_space<vmem>>, vector<2x8x512xf32>
    %1 = vector.shape_cast %0 : vector<2x8x512xf32> to vector<16x512xf32>
    %c0_2 = arith.constant 0 : index
    %c0_3 = arith.constant 0 : index
    %2 = vector.load %arg6[%c0_2, %c0_3] : memref<1x512xf32, #tpu.memory_space<vmem>>, vector<1x512xf32>
    %c0_4 = arith.constant 0 : index
    %c0_5 = arith.constant 0 : index
    %3 = vector.load %arg7[%c0_4, %c0_5] : memref<1x512xf32, #tpu.memory_space<vmem>>, vector<1x512xf32>
    %cst = arith.constant dense<0.000000e+00> : vector<16xf32>
    %4 = vector.multi_reduction <add>, %1, %cst [1] : vector<16x512xf32> to vector<16xf32>
    %5 = vector.shape_cast %4 : vector<16xf32> to vector<16x1xf32>
    %cst_6 = arith.constant 5.120000e+02 : f32
    %6 = vector.broadcast %cst_6 : f32 to vector<16x1xf32>
    %7 = arith.divf %5, %6 : vector<16x1xf32>
    %8 = vector.broadcast %7 : vector<16x1xf32> to vector<16x512xf32>
    %9 = arith.subf %1, %8 : vector<16x512xf32>
    %10 = arith.mulf %9, %9 : vector<16x512xf32>
    %cst_7 = arith.constant dense<0.000000e+00> : vector<16xf32>
    %11 = vector.multi_reduction <add>, %10, %cst_7 [1] : vector<16x512xf32> to vector<16xf32>
    %12 = vector.shape_cast %11 : vector<16xf32> to vector<16x1xf32>
    %cst_8 = arith.constant 5.120000e+02 : f32
    %13 = vector.broadcast %cst_8 : f32 to vector<16x1xf32>
    %14 = arith.divf %12, %13 : vector<16x1xf32>
    %15 = vector.broadcast %7 : vector<16x1xf32> to vector<16x512xf32>
    %16 = arith.subf %1, %15 : vector<16x512xf32>
    %cst_9 = arith.constant 9.99999974E-6 : f32
    %17 = vector.broadcast %cst_9 : f32 to vector<16x1xf32>
    %18 = arith.addf %14, %17 : vector<16x1xf32>
    %19 = math.rsqrt %18 : vector<16x1xf32>
    %20 = vector.broadcast %19 : vector<16x1xf32> to vector<16x512xf32>
    %21 = arith.mulf %16, %20 : vector<16x512xf32>
    %22 = vector.broadcast %2 : vector<1x512xf32> to vector<16x512xf32>
    %23 = arith.mulf %21, %22 : vector<16x512xf32>
    %24 = vector.broadcast %3 : vector<1x512xf32> to vector<16x512xf32>
    %25 = arith.addf %23, %24 : vector<16x512xf32>
    %26 = arith.truncf %25 : vector<16x512xf32> to vector<16x512xbf16>
    %c0_10 = arith.constant 0 : index
    %c0_11 = arith.constant 0 : index
    %27 = vector.load %arg2[%c0_10, %c0_11] : memref<512x1536xbf16, #tpu.memory_space<vmem>>, vector<512x1536xbf16>
    %cst_12 = arith.constant dense<0.000000e+00> : vector<16x1536xf32>
    %28 = tpu.matmul %26, %27, %cst_12 {dimension_numbers = #tpu.dot_dimension_numbers<[1], [0], [0], [1], [0, 0, 1, 1], [], []>} : vector<16x512xbf16>, vector<512x1536xbf16>, vector<16x1536xf32> -> vector<16x1536xf32>
    %c0_13 = arith.constant 0 : index
    %c0_14 = arith.constant 0 : index
    %29 = vector.load %arg3[%c0_13, %c0_14] : memref<1x1536xf32, #tpu.memory_space<vmem>>, vector<1x1536xf32>
    %30 = vector.broadcast %29 : vector<1x1536xf32> to vector<16x1536xf32>
    %31 = arith.addf %28, %30 : vector<16x1536xf32>
    %32 = tpu.iota {dimensions = array<i32: 0>} : vector<8x8xi32>
    %33 = tpu.iota {dimensions = array<i32: 1>} : vector<8x8xi32>
    %34 = arith.cmpi sge, %32, %33 : vector<8x8xi32>
    %35 = vector.shape_cast %34 : vector<8x8xi1> to vector<1x8x8xi1>
    %c0_15 = arith.constant 0 : index
    %c0_16 = arith.constant 0 : index
    %36 = vector.load %arg4[%c0_15, %c0_16] : memref<512x512xbf16, #tpu.memory_space<vmem>>, vector<512x512xbf16>
    %cst_17 = arith.constant 0.000000e+00 : f32
    %37 = vector.broadcast %cst_17 : f32 to vector<16x512xf32>
    %38 = vector.extract_strided_slice %31 {offsets = [0, 0], sizes = [16, 64], strides = [1, 1]} : vector<16x1536xf32> to vector<16x64xf32>
    %cst_18 = arith.constant 1.250000e-01 : f32
    %39 = vector.broadcast %cst_18 : f32 to vector<16x64xf32>
    %40 = arith.mulf %38, %39 : vector<16x64xf32>
    %41 = arith.truncf %40 : vector<16x64xf32> to vector<16x64xbf16>
    %42 = vector.shape_cast %41 : vector<16x64xbf16> to vector<2x8x64xbf16>
    %43 = vector.extract_strided_slice %31 {offsets = [0, 512], sizes = [16, 64], strides = [1, 1]} : vector<16x1536xf32> to vector<16x64xf32>
    %44 = arith.truncf %43 : vector<16x64xf32> to vector<16x64xbf16>
    %45 = vector.shape_cast %44 : vector<16x64xbf16> to vector<2x8x64xbf16>
    %46 = vector.extract_strided_slice %31 {offsets = [0, 1024], sizes = [16, 64], strides = [1, 1]} : vector<16x1536xf32> to vector<16x64xf32>
    %47 = arith.truncf %46 : vector<16x64xf32> to vector<16x64xbf16>
    %48 = vector.shape_cast %47 : vector<16x64xbf16> to vector<2x8x64xbf16>
    "tpu.trace_start"() <{level = 10 : i32, message = "bqd,bkd->bqk"}> : () -> ()
    %cst_19 = arith.constant dense<0.000000e+00> : vector<2x8x8xf32>
    %49 = tpu.matmul %42, %45, %cst_19 {dimension_numbers = #tpu.dot_dimension_numbers<[2], [2], [1], [1], [0, 0, 0, 1, 1, 1], [0], [0]>} : vector<2x8x64xbf16>, vector<2x8x64xbf16>, vector<2x8x8xf32> -> vector<2x8x8xf32>
    %cst_20 = arith.constant 0xFF800000 : f32
    "tpu.trace_stop"() : () -> ()
    %50 = vector.shape_cast %35 : vector<1x8x8xi1> to vector<1x8x8xi1>
    %51 = vector.broadcast %50 : vector<1x8x8xi1> to vector<2x8x8xi1>
    %52 = vector.broadcast %cst_20 : f32 to vector<2x8x8xf32>
    %53 = arith.select %51, %49, %52 : vector<2x8x8xi1>, vector<2x8x8xf32>
    %cst_21 = arith.constant dense<0xFF800000> : vector<2x8xf32>
    %54 = vector.multi_reduction <maximumf>, %53, %cst_21 [2] : vector<2x8x8xf32> to vector<2x8xf32>
    %55 = vector.shape_cast %54 : vector<2x8xf32> to vector<2x8x1xf32>
    %56 = vector.broadcast %55 : vector<2x8x1xf32> to vector<2x8x8xf32>
    %57 = arith.subf %53, %56 : vector<2x8x8xf32>
    %58 = math.exp %57 : vector<2x8x8xf32>
    %cst_22 = arith.constant dense<0.000000e+00> : vector<2x8xf32>
    %59 = vector.multi_reduction <add>, %58, %cst_22 [2] : vector<2x8x8xf32> to vector<2x8xf32>
    %60 = vector.shape_cast %59 : vector<2x8xf32> to vector<2x8x1xf32>
    %61 = tpu.reciprocal %60 {approx = true} : vector<2x8x1xf32> -> vector<2x8x1xf32>
    %62 = vector.broadcast %61 : vector<2x8x1xf32> to vector<2x8x8xf32>
    %63 = arith.mulf %58, %62 : vector<2x8x8xf32>
    %64 = arith.truncf %63 : vector<2x8x8xf32> to vector<2x8x8xbf16>
    "tpu.trace_start"() <{level = 10 : i32, message = "bqk,bkd->bqd"}> : () -> ()
    %cst_23 = arith.constant dense<0.000000e+00> : vector<2x8x64xf32>
    %65 = tpu.matmul %64, %48, %cst_23 {dimension_numbers = #tpu.dot_dimension_numbers<[2], [1], [1], [2], [0, 0, 0, 1, 1, 2], [0], [0]>} : vector<2x8x8xbf16>, vector<2x8x64xbf16>, vector<2x8x64xf32> -> vector<2x8x64xf32>
    "tpu.trace_stop"() : () -> ()
    %66 = vector.shape_cast %65 : vector<2x8x64xf32> to vector<16x64xf32>
    %67 = arith.truncf %66 : vector<16x64xf32> to vector<16x64xbf16>
    %68 = vector.extract_strided_slice %36 {offsets = [0, 0], sizes = [64, 512], strides = [1, 1]} : vector<512x512xbf16> to vector<64x512xbf16>
    %cst_24 = arith.constant dense<0.000000e+00> : vector<16x512xf32>
    %69 = tpu.matmul %67, %68, %cst_24 {dimension_numbers = #tpu.dot_dimension_numbers<[1], [0], [0], [1], [0, 0, 1, 1], [], []>} : vector<16x64xbf16>, vector<64x512xbf16>, vector<16x512xf32> -> vector<16x512xf32>
    %70 = arith.addf %37, %69 : vector<16x512xf32>
    %71 = vector.extract_strided_slice %31 {offsets = [0, 64], sizes = [16, 64], strides = [1, 1]} : vector<16x1536xf32> to vector<16x64xf32>
    %cst_25 = arith.constant 1.250000e-01 : f32
    %72 = vector.broadcast %cst_25 : f32 to vector<16x64xf32>
    %73 = arith.mulf %71, %72 : vector<16x64xf32>
    %74 = arith.truncf %73 : vector<16x64xf32> to vector<16x64xbf16>
    %75 = vector.shape_cast %74 : vector<16x64xbf16> to vector<2x8x64xbf16>
    %76 = vector.extract_strided_slice %31 {offsets = [0, 576], sizes = [16, 64], strides = [1, 1]} : vector<16x1536xf32> to vector<16x64xf32>
    %77 = arith.truncf %76 : vector<16x64xf32> to vector<16x64xbf16>
    %78 = vector.shape_cast %77 : vector<16x64xbf16> to vector<2x8x64xbf16>
    %79 = vector.extract_strided_slice %31 {offsets = [0, 1088], sizes = [16, 64], strides = [1, 1]} : vector<16x1536xf32> to vector<16x64xf32>
    %80 = arith.truncf %79 : vector<16x64xf32> to vector<16x64xbf16>
    %81 = vector.shape_cast %80 : vector<16x64xbf16> to vector<2x8x64xbf16>
    "tpu.trace_start"() <{level = 10 : i32, message = "bqd,bkd->bqk"}> : () -> ()
    %cst_26 = arith.constant dense<0.000000e+00> : vector<2x8x8xf32>
    %82 = tpu.matmul %75, %78, %cst_26 {dimension_numbers = #tpu.dot_dimension_numbers<[2], [2], [1], [1], [0, 0, 0, 1, 1, 1], [0], [0]>} : vector<2x8x64xbf16>, vector<2x8x64xbf16>, vector<2x8x8xf32> -> vector<2x8x8xf32>
    %cst_27 = arith.constant 0xFF800000 : f32
    "tpu.trace_stop"() : () -> ()
    %83 = vector.shape_cast %35 : vector<1x8x8xi1> to vector<1x8x8xi1>
    %84 = vector.broadcast %83 : vector<1x8x8xi1> to vector<2x8x8xi1>
    %85 = vector.broadcast %cst_27 : f32 to vector<2x8x8xf32>
    %86 = arith.select %84, %82, %85 : vector<2x8x8xi1>, vector<2x8x8xf32>
    %cst_28 = arith.constant dense<0xFF800000> : vector<2x8xf32>
    %87 = vector.multi_reduction <maximumf>, %86, %cst_28 [2] : vector<2x8x8xf32> to vector<2x8xf32>
    %88 = vector.shape_cast %87 : vector<2x8xf32> to vector<2x8x1xf32>
    %89 = vector.broadcast %88 : vector<2x8x1xf32> to vector<2x8x8xf32>
    %90 = arith.subf %86, %89 : vector<2x8x8xf32>
    %91 = math.exp %90 : vector<2x8x8xf32>
    %cst_29 = arith.constant dense<0.000000e+00> : vector<2x8xf32>
    %92 = vector.multi_reduction <add>, %91, %cst_29 [2] : vector<2x8x8xf32> to vector<2x8xf32>
    %93 = vector.shape_cast %92 : vector<2x8xf32> to vector<2x8x1xf32>
    %94 = tpu.reciprocal %93 {approx = true} : vector<2x8x1xf32> -> vector<2x8x1xf32>
    %95 = vector.broadcast %94 : vector<2x8x1xf32> to vector<2x8x8xf32>
    %96 = arith.mulf %91, %95 : vector<2x8x8xf32>
    %97 = arith.truncf %96 : vector<2x8x8xf32> to vector<2x8x8xbf16>
    "tpu.trace_start"() <{level = 10 : i32, message = "bqk,bkd->bqd"}> : () -> ()
    %cst_30 = arith.constant dense<0.000000e+00> : vector<2x8x64xf32>
    %98 = tpu.matmul %97, %81, %cst_30 {dimension_numbers = #tpu.dot_dimension_numbers<[2], [1], [1], [2], [0, 0, 0, 1, 1, 2], [0], [0]>} : vector<2x8x8xbf16>, vector<2x8x64xbf16>, vector<2x8x64xf32> -> vector<2x8x64xf32>
    "tpu.trace_stop"() : () -> ()
    %99 = vector.shape_cast %98 : vector<2x8x64xf32> to vector<16x64xf32>
    %100 = arith.truncf %99 : vector<16x64xf32> to vector<16x64xbf16>
    %101 = vector.extract_strided_slice %36 {offsets = [64, 0], sizes = [64, 512], strides = [1, 1]} : vector<512x512xbf16> to vector<64x512xbf16>
    %cst_31 = arith.constant dense<0.000000e+00> : vector<16x512xf32>
    %102 = tpu.matmul %100, %101, %cst_31 {dimension_numbers = #tpu.dot_dimension_numbers<[1], [0], [0], [1], [0, 0, 1, 1], [], []>} : vector<16x64xbf16>, vector<64x512xbf16>, vector<16x512xf32> -> vector<16x512xf32>
    %103 = arith.addf %70, %102 : vector<16x512xf32>
    %104 = vector.extract_strided_slice %31 {offsets = [0, 128], sizes = [16, 64], strides = [1, 1]} : vector<16x1536xf32> to vector<16x64xf32>
    %cst_32 = arith.constant 1.250000e-01 : f32
    %105 = vector.broadcast %cst_32 : f32 to vector<16x64xf32>
    %106 = arith.mulf %104, %105 : vector<16x64xf32>
    %107 = arith.truncf %106 : vector<16x64xf32> to vector<16x64xbf16>
    %108 = vector.shape_cast %107 : vector<16x64xbf16> to vector<2x8x64xbf16>
    %109 = vector.extract_strided_slice %31 {offsets = [0, 640], sizes = [16, 64], strides = [1, 1]} : vector<16x1536xf32> to vector<16x64xf32>
    %110 = arith.truncf %109 : vector<16x64xf32> to vector<16x64xbf16>
    %111 = vector.shape_cast %110 : vector<16x64xbf16> to vector<2x8x64xbf16>
    %112 = vector.extract_strided_slice %31 {offsets = [0, 1152], sizes = [16, 64], strides = [1, 1]} : vector<16x1536xf32> to vector<16x64xf32>
    %113 = arith.truncf %112 : vector<16x64xf32> to vector<16x64xbf16>
    %114 = vector.shape_cast %113 : vector<16x64xbf16> to vector<2x8x64xbf16>
    "tpu.trace_start"() <{level = 10 : i32, message = "bqd,bkd->bqk"}> : () -> ()
    %cst_33 = arith.constant dense<0.000000e+00> : vector<2x8x8xf32>
    %115 = tpu.matmul %108, %111, %cst_33 {dimension_numbers = #tpu.dot_dimension_numbers<[2], [2], [1], [1], [0, 0, 0, 1, 1, 1], [0], [0]>} : vector<2x8x64xbf16>, vector<2x8x64xbf16>, vector<2x8x8xf32> -> vector<2x8x8xf32>
    %cst_34 = arith.constant 0xFF800000 : f32
    "tpu.trace_stop"() : () -> ()
    %116 = vector.shape_cast %35 : vector<1x8x8xi1> to vector<1x8x8xi1>
    %117 = vector.broadcast %116 : vector<1x8x8xi1> to vector<2x8x8xi1>
    %118 = vector.broadcast %cst_34 : f32 to vector<2x8x8xf32>
    %119 = arith.select %117, %115, %118 : vector<2x8x8xi1>, vector<2x8x8xf32>
    %cst_35 = arith.constant dense<0xFF800000> : vector<2x8xf32>
    %120 = vector.multi_reduction <maximumf>, %119, %cst_35 [2] : vector<2x8x8xf32> to vector<2x8xf32>
    %121 = vector.shape_cast %120 : vector<2x8xf32> to vector<2x8x1xf32>
    %122 = vector.broadcast %121 : vector<2x8x1xf32> to vector<2x8x8xf32>
    %123 = arith.subf %119, %122 : vector<2x8x8xf32>
    %124 = math.exp %123 : vector<2x8x8xf32>
    %cst_36 = arith.constant dense<0.000000e+00> : vector<2x8xf32>
    %125 = vector.multi_reduction <add>, %124, %cst_36 [2] : vector<2x8x8xf32> to vector<2x8xf32>
    %126 = vector.shape_cast %125 : vector<2x8xf32> to vector<2x8x1xf32>
    %127 = tpu.reciprocal %126 {approx = true} : vector<2x8x1xf32> -> vector<2x8x1xf32>
    %128 = vector.broadcast %127 : vector<2x8x1xf32> to vector<2x8x8xf32>
    %129 = arith.mulf %124, %128 : vector<2x8x8xf32>
    %130 = arith.truncf %129 : vector<2x8x8xf32> to vector<2x8x8xbf16>
    "tpu.trace_start"() <{level = 10 : i32, message = "bqk,bkd->bqd"}> : () -> ()
    %cst_37 = arith.constant dense<0.000000e+00> : vector<2x8x64xf32>
    %131 = tpu.matmul %130, %114, %cst_37 {dimension_numbers = #tpu.dot_dimension_numbers<[2], [1], [1], [2], [0, 0, 0, 1, 1, 2], [0], [0]>} : vector<2x8x8xbf16>, vector<2x8x64xbf16>, vector<2x8x64xf32> -> vector<2x8x64xf32>
    "tpu.trace_stop"() : () -> ()
    %132 = vector.shape_cast %131 : vector<2x8x64xf32> to vector<16x64xf32>
    %133 = arith.truncf %132 : vector<16x64xf32> to vector<16x64xbf16>
    %134 = vector.extract_strided_slice %36 {offsets = [128, 0], sizes = [64, 512], strides = [1, 1]} : vector<512x512xbf16> to vector<64x512xbf16>
    %cst_38 = arith.constant dense<0.000000e+00> : vector<16x512xf32>
    %135 = tpu.matmul %133, %134, %cst_38 {dimension_numbers = #tpu.dot_dimension_numbers<[1], [0], [0], [1], [0, 0, 1, 1], [], []>} : vector<16x64xbf16>, vector<64x512xbf16>, vector<16x512xf32> -> vector<16x512xf32>
    %136 = arith.addf %103, %135 : vector<16x512xf32>
    %137 = vector.extract_strided_slice %31 {offsets = [0, 192], sizes = [16, 64], strides = [1, 1]} : vector<16x1536xf32> to vector<16x64xf32>
    %cst_39 = arith.constant 1.250000e-01 : f32
    %138 = vector.broadcast %cst_39 : f32 to vector<16x64xf32>
    %139 = arith.mulf %137, %138 : vector<16x64xf32>
    %140 = arith.truncf %139 : vector<16x64xf32> to vector<16x64xbf16>
    %141 = vector.shape_cast %140 : vector<16x64xbf16> to vector<2x8x64xbf16>
    %142 = vector.extract_strided_slice %31 {offsets = [0, 704], sizes = [16, 64], strides = [1, 1]} : vector<16x1536xf32> to vector<16x64xf32>
    %143 = arith.truncf %142 : vector<16x64xf32> to vector<16x64xbf16>
    %144 = vector.shape_cast %143 : vector<16x64xbf16> to vector<2x8x64xbf16>
    %145 = vector.extract_strided_slice %31 {offsets = [0, 1216], sizes = [16, 64], strides = [1, 1]} : vector<16x1536xf32> to vector<16x64xf32>
    %146 = arith.truncf %145 : vector<16x64xf32> to vector<16x64xbf16>
    %147 = vector.shape_cast %146 : vector<16x64xbf16> to vector<2x8x64xbf16>
    "tpu.trace_start"() <{level = 10 : i32, message = "bqd,bkd->bqk"}> : () -> ()
    %cst_40 = arith.constant dense<0.000000e+00> : vector<2x8x8xf32>
    %148 = tpu.matmul %141, %144, %cst_40 {dimension_numbers = #tpu.dot_dimension_numbers<[2], [2], [1], [1], [0, 0, 0, 1, 1, 1], [0], [0]>} : vector<2x8x64xbf16>, vector<2x8x64xbf16>, vector<2x8x8xf32> -> vector<2x8x8xf32>
    %cst_41 = arith.constant 0xFF800000 : f32
    "tpu.trace_stop"() : () -> ()
    %149 = vector.shape_cast %35 : vector<1x8x8xi1> to vector<1x8x8xi1>
    %150 = vector.broadcast %149 : vector<1x8x8xi1> to vector<2x8x8xi1>
    %151 = vector.broadcast %cst_41 : f32 to vector<2x8x8xf32>
    %152 = arith.select %150, %148, %151 : vector<2x8x8xi1>, vector<2x8x8xf32>
    %cst_42 = arith.constant dense<0xFF800000> : vector<2x8xf32>
    %153 = vector.multi_reduction <maximumf>, %152, %cst_42 [2] : vector<2x8x8xf32> to vector<2x8xf32>
    %154 = vector.shape_cast %153 : vector<2x8xf32> to vector<2x8x1xf32>
    %155 = vector.broadcast %154 : vector<2x8x1xf32> to vector<2x8x8xf32>
    %156 = arith.subf %152, %155 : vector<2x8x8xf32>
    %157 = math.exp %156 : vector<2x8x8xf32>
    %cst_43 = arith.constant dense<0.000000e+00> : vector<2x8xf32>
    %158 = vector.multi_reduction <add>, %157, %cst_43 [2] : vector<2x8x8xf32> to vector<2x8xf32>
    %159 = vector.shape_cast %158 : vector<2x8xf32> to vector<2x8x1xf32>
    %160 = tpu.reciprocal %159 {approx = true} : vector<2x8x1xf32> -> vector<2x8x1xf32>
    %161 = vector.broadcast %160 : vector<2x8x1xf32> to vector<2x8x8xf32>
    %162 = arith.mulf %157, %161 : vector<2x8x8xf32>
    %163 = arith.truncf %162 : vector<2x8x8xf32> to vector<2x8x8xbf16>
    "tpu.trace_start"() <{level = 10 : i32, message = "bqk,bkd->bqd"}> : () -> ()
    %cst_44 = arith.constant dense<0.000000e+00> : vector<2x8x64xf32>
    %164 = tpu.matmul %163, %147, %cst_44 {dimension_numbers = #tpu.dot_dimension_numbers<[2], [1], [1], [2], [0, 0, 0, 1, 1, 2], [0], [0]>} : vector<2x8x8xbf16>, vector<2x8x64xbf16>, vector<2x8x64xf32> -> vector<2x8x64xf32>
    "tpu.trace_stop"() : () -> ()
    %165 = vector.shape_cast %164 : vector<2x8x64xf32> to vector<16x64xf32>
    %166 = arith.truncf %165 : vector<16x64xf32> to vector<16x64xbf16>
    %167 = vector.extract_strided_slice %36 {offsets = [192, 0], sizes = [64, 512], strides = [1, 1]} : vector<512x512xbf16> to vector<64x512xbf16>
    %cst_45 = arith.constant dense<0.000000e+00> : vector<16x512xf32>
    %168 = tpu.matmul %166, %167, %cst_45 {dimension_numbers = #tpu.dot_dimension_numbers<[1], [0], [0], [1], [0, 0, 1, 1], [], []>} : vector<16x64xbf16>, vector<64x512xbf16>, vector<16x512xf32> -> vector<16x512xf32>
    %169 = arith.addf %136, %168 : vector<16x512xf32>
    %170 = vector.extract_strided_slice %31 {offsets = [0, 256], sizes = [16, 64], strides = [1, 1]} : vector<16x1536xf32> to vector<16x64xf32>
    %cst_46 = arith.constant 1.250000e-01 : f32
    %171 = vector.broadcast %cst_46 : f32 to vector<16x64xf32>
    %172 = arith.mulf %170, %171 : vector<16x64xf32>
    %173 = arith.truncf %172 : vector<16x64xf32> to vector<16x64xbf16>
    %174 = vector.shape_cast %173 : vector<16x64xbf16> to vector<2x8x64xbf16>
    %175 = vector.extract_strided_slice %31 {offsets = [0, 768], sizes = [16, 64], strides = [1, 1]} : vector<16x1536xf32> to vector<16x64xf32>
    %176 = arith.truncf %175 : vector<16x64xf32> to vector<16x64xbf16>
    %177 = vector.shape_cast %176 : vector<16x64xbf16> to vector<2x8x64xbf16>
    %178 = vector.extract_strided_slice %31 {offsets = [0, 1280], sizes = [16, 64], strides = [1, 1]} : vector<16x1536xf32> to vector<16x64xf32>
    %179 = arith.truncf %178 : vector<16x64xf32> to vector<16x64xbf16>
    %180 = vector.shape_cast %179 : vector<16x64xbf16> to vector<2x8x64xbf16>
    "tpu.trace_start"() <{level = 10 : i32, message = "bqd,bkd->bqk"}> : () -> ()
    %cst_47 = arith.constant dense<0.000000e+00> : vector<2x8x8xf32>
    %181 = tpu.matmul %174, %177, %cst_47 {dimension_numbers = #tpu.dot_dimension_numbers<[2], [2], [1], [1], [0, 0, 0, 1, 1, 1], [0], [0]>} : vector<2x8x64xbf16>, vector<2x8x64xbf16>, vector<2x8x8xf32> -> vector<2x8x8xf32>
    %cst_48 = arith.constant 0xFF800000 : f32
    "tpu.trace_stop"() : () -> ()
    %182 = vector.shape_cast %35 : vector<1x8x8xi1> to vector<1x8x8xi1>
    %183 = vector.broadcast %182 : vector<1x8x8xi1> to vector<2x8x8xi1>
    %184 = vector.broadcast %cst_48 : f32 to vector<2x8x8xf32>
    %185 = arith.select %183, %181, %184 : vector<2x8x8xi1>, vector<2x8x8xf32>
    %cst_49 = arith.constant dense<0xFF800000> : vector<2x8xf32>
    %186 = vector.multi_reduction <maximumf>, %185, %cst_49 [2] : vector<2x8x8xf32> to vector<2x8xf32>
    %187 = vector.shape_cast %186 : vector<2x8xf32> to vector<2x8x1xf32>
    %188 = vector.broadcast %187 : vector<2x8x1xf32> to vector<2x8x8xf32>
    %189 = arith.subf %185, %188 : vector<2x8x8xf32>
    %190 = math.exp %189 : vector<2x8x8xf32>
    %cst_50 = arith.constant dense<0.000000e+00> : vector<2x8xf32>
    %191 = vector.multi_reduction <add>, %190, %cst_50 [2] : vector<2x8x8xf32> to vector<2x8xf32>
    %192 = vector.shape_cast %191 : vector<2x8xf32> to vector<2x8x1xf32>
    %193 = tpu.reciprocal %192 {approx = true} : vector<2x8x1xf32> -> vector<2x8x1xf32>
    %194 = vector.broadcast %193 : vector<2x8x1xf32> to vector<2x8x8xf32>
    %195 = arith.mulf %190, %194 : vector<2x8x8xf32>
    %196 = arith.truncf %195 : vector<2x8x8xf32> to vector<2x8x8xbf16>
    "tpu.trace_start"() <{level = 10 : i32, message = "bqk,bkd->bqd"}> : () -> ()
    %cst_51 = arith.constant dense<0.000000e+00> : vector<2x8x64xf32>
    %197 = tpu.matmul %196, %180, %cst_51 {dimension_numbers = #tpu.dot_dimension_numbers<[2], [1], [1], [2], [0, 0, 0, 1, 1, 2], [0], [0]>} : vector<2x8x8xbf16>, vector<2x8x64xbf16>, vector<2x8x64xf32> -> vector<2x8x64xf32>
    "tpu.trace_stop"() : () -> ()
    %198 = vector.shape_cast %197 : vector<2x8x64xf32> to vector<16x64xf32>
    %199 = arith.truncf %198 : vector<16x64xf32> to vector<16x64xbf16>
    %200 = vector.extract_strided_slice %36 {offsets = [256, 0], sizes = [64, 512], strides = [1, 1]} : vector<512x512xbf16> to vector<64x512xbf16>
    %cst_52 = arith.constant dense<0.000000e+00> : vector<16x512xf32>
    %201 = tpu.matmul %199, %200, %cst_52 {dimension_numbers = #tpu.dot_dimension_numbers<[1], [0], [0], [1], [0, 0, 1, 1], [], []>} : vector<16x64xbf16>, vector<64x512xbf16>, vector<16x512xf32> -> vector<16x512xf32>
    %202 = arith.addf %169, %201 : vector<16x512xf32>
    %203 = vector.extract_strided_slice %31 {offsets = [0, 320], sizes = [16, 64], strides = [1, 1]} : vector<16x1536xf32> to vector<16x64xf32>
    %cst_53 = arith.constant 1.250000e-01 : f32
    %204 = vector.broadcast %cst_53 : f32 to vector<16x64xf32>
    %205 = arith.mulf %203, %204 : vector<16x64xf32>
    %206 = arith.truncf %205 : vector<16x64xf32> to vector<16x64xbf16>
    %207 = vector.shape_cast %206 : vector<16x64xbf16> to vector<2x8x64xbf16>
    %208 = vector.extract_strided_slice %31 {offsets = [0, 832], sizes = [16, 64], strides = [1, 1]} : vector<16x1536xf32> to vector<16x64xf32>
    %209 = arith.truncf %208 : vector<16x64xf32> to vector<16x64xbf16>
    %210 = vector.shape_cast %209 : vector<16x64xbf16> to vector<2x8x64xbf16>
    %211 = vector.extract_strided_slice %31 {offsets = [0, 1344], sizes = [16, 64], strides = [1, 1]} : vector<16x1536xf32> to vector<16x64xf32>
    %212 = arith.truncf %211 : vector<16x64xf32> to vector<16x64xbf16>
    %213 = vector.shape_cast %212 : vector<16x64xbf16> to vector<2x8x64xbf16>
    "tpu.trace_start"() <{level = 10 : i32, message = "bqd,bkd->bqk"}> : () -> ()
    %cst_54 = arith.constant dense<0.000000e+00> : vector<2x8x8xf32>
    %214 = tpu.matmul %207, %210, %cst_54 {dimension_numbers = #tpu.dot_dimension_numbers<[2], [2], [1], [1], [0, 0, 0, 1, 1, 1], [0], [0]>} : vector<2x8x64xbf16>, vector<2x8x64xbf16>, vector<2x8x8xf32> -> vector<2x8x8xf32>
    %cst_55 = arith.constant 0xFF800000 : f32
    "tpu.trace_stop"() : () -> ()
    %215 = vector.shape_cast %35 : vector<1x8x8xi1> to vector<1x8x8xi1>
    %216 = vector.broadcast %215 : vector<1x8x8xi1> to vector<2x8x8xi1>
    %217 = vector.broadcast %cst_55 : f32 to vector<2x8x8xf32>
    %218 = arith.select %216, %214, %217 : vector<2x8x8xi1>, vector<2x8x8xf32>
    %cst_56 = arith.constant dense<0xFF800000> : vector<2x8xf32>
    %219 = vector.multi_reduction <maximumf>, %218, %cst_56 [2] : vector<2x8x8xf32> to vector<2x8xf32>
    %220 = vector.shape_cast %219 : vector<2x8xf32> to vector<2x8x1xf32>
    %221 = vector.broadcast %220 : vector<2x8x1xf32> to vector<2x8x8xf32>
    %222 = arith.subf %218, %221 : vector<2x8x8xf32>
    %223 = math.exp %222 : vector<2x8x8xf32>
    %cst_57 = arith.constant dense<0.000000e+00> : vector<2x8xf32>
    %224 = vector.multi_reduction <add>, %223, %cst_57 [2] : vector<2x8x8xf32> to vector<2x8xf32>
    %225 = vector.shape_cast %224 : vector<2x8xf32> to vector<2x8x1xf32>
    %226 = tpu.reciprocal %225 {approx = true} : vector<2x8x1xf32> -> vector<2x8x1xf32>
    %227 = vector.broadcast %226 : vector<2x8x1xf32> to vector<2x8x8xf32>
    %228 = arith.mulf %223, %227 : vector<2x8x8xf32>
    %229 = arith.truncf %228 : vector<2x8x8xf32> to vector<2x8x8xbf16>
    "tpu.trace_start"() <{level = 10 : i32, message = "bqk,bkd->bqd"}> : () -> ()
    %cst_58 = arith.constant dense<0.000000e+00> : vector<2x8x64xf32>
    %230 = tpu.matmul %229, %213, %cst_58 {dimension_numbers = #tpu.dot_dimension_numbers<[2], [1], [1], [2], [0, 0, 0, 1, 1, 2], [0], [0]>} : vector<2x8x8xbf16>, vector<2x8x64xbf16>, vector<2x8x64xf32> -> vector<2x8x64xf32>
    "tpu.trace_stop"() : () -> ()
    %231 = vector.shape_cast %230 : vector<2x8x64xf32> to vector<16x64xf32>
    %232 = arith.truncf %231 : vector<16x64xf32> to vector<16x64xbf16>
    %233 = vector.extract_strided_slice %36 {offsets = [320, 0], sizes = [64, 512], strides = [1, 1]} : vector<512x512xbf16> to vector<64x512xbf16>
    %cst_59 = arith.constant dense<0.000000e+00> : vector<16x512xf32>
    %234 = tpu.matmul %232, %233, %cst_59 {dimension_numbers = #tpu.dot_dimension_numbers<[1], [0], [0], [1], [0, 0, 1, 1], [], []>} : vector<16x64xbf16>, vector<64x512xbf16>, vector<16x512xf32> -> vector<16x512xf32>
    %235 = arith.addf %202, %234 : vector<16x512xf32>
    %236 = vector.extract_strided_slice %31 {offsets = [0, 384], sizes = [16, 64], strides = [1, 1]} : vector<16x1536xf32> to vector<16x64xf32>
    %cst_60 = arith.constant 1.250000e-01 : f32
    %237 = vector.broadcast %cst_60 : f32 to vector<16x64xf32>
    %238 = arith.mulf %236, %237 : vector<16x64xf32>
    %239 = arith.truncf %238 : vector<16x64xf32> to vector<16x64xbf16>
    %240 = vector.shape_cast %239 : vector<16x64xbf16> to vector<2x8x64xbf16>
    %241 = vector.extract_strided_slice %31 {offsets = [0, 896], sizes = [16, 64], strides = [1, 1]} : vector<16x1536xf32> to vector<16x64xf32>
    %242 = arith.truncf %241 : vector<16x64xf32> to vector<16x64xbf16>
    %243 = vector.shape_cast %242 : vector<16x64xbf16> to vector<2x8x64xbf16>
    %244 = vector.extract_strided_slice %31 {offsets = [0, 1408], sizes = [16, 64], strides = [1, 1]} : vector<16x1536xf32> to vector<16x64xf32>
    %245 = arith.truncf %244 : vector<16x64xf32> to vector<16x64xbf16>
    %246 = vector.shape_cast %245 : vector<16x64xbf16> to vector<2x8x64xbf16>
    "tpu.trace_start"() <{level = 10 : i32, message = "bqd,bkd->bqk"}> : () -> ()
    %cst_61 = arith.constant dense<0.000000e+00> : vector<2x8x8xf32>
    %247 = tpu.matmul %240, %243, %cst_61 {dimension_numbers = #tpu.dot_dimension_numbers<[2], [2], [1], [1], [0, 0, 0, 1, 1, 1], [0], [0]>} : vector<2x8x64xbf16>, vector<2x8x64xbf16>, vector<2x8x8xf32> -> vector<2x8x8xf32>
    %cst_62 = arith.constant 0xFF800000 : f32
    "tpu.trace_stop"() : () -> ()
    %248 = vector.shape_cast %35 : vector<1x8x8xi1> to vector<1x8x8xi1>
    %249 = vector.broadcast %248 : vector<1x8x8xi1> to vector<2x8x8xi1>
    %250 = vector.broadcast %cst_62 : f32 to vector<2x8x8xf32>
    %251 = arith.select %249, %247, %250 : vector<2x8x8xi1>, vector<2x8x8xf32>
    %cst_63 = arith.constant dense<0xFF800000> : vector<2x8xf32>
    %252 = vector.multi_reduction <maximumf>, %251, %cst_63 [2] : vector<2x8x8xf32> to vector<2x8xf32>
    %253 = vector.shape_cast %252 : vector<2x8xf32> to vector<2x8x1xf32>
    %254 = vector.broadcast %253 : vector<2x8x1xf32> to vector<2x8x8xf32>
    %255 = arith.subf %251, %254 : vector<2x8x8xf32>
    %256 = math.exp %255 : vector<2x8x8xf32>
    %cst_64 = arith.constant dense<0.000000e+00> : vector<2x8xf32>
    %257 = vector.multi_reduction <add>, %256, %cst_64 [2] : vector<2x8x8xf32> to vector<2x8xf32>
    %258 = vector.shape_cast %257 : vector<2x8xf32> to vector<2x8x1xf32>
    %259 = tpu.reciprocal %258 {approx = true} : vector<2x8x1xf32> -> vector<2x8x1xf32>
    %260 = vector.broadcast %259 : vector<2x8x1xf32> to vector<2x8x8xf32>
    %261 = arith.mulf %256, %260 : vector<2x8x8xf32>
    %262 = arith.truncf %261 : vector<2x8x8xf32> to vector<2x8x8xbf16>
    "tpu.trace_start"() <{level = 10 : i32, message = "bqk,bkd->bqd"}> : () -> ()
    %cst_65 = arith.constant dense<0.000000e+00> : vector<2x8x64xf32>
    %263 = tpu.matmul %262, %246, %cst_65 {dimension_numbers = #tpu.dot_dimension_numbers<[2], [1], [1], [2], [0, 0, 0, 1, 1, 2], [0], [0]>} : vector<2x8x8xbf16>, vector<2x8x64xbf16>, vector<2x8x64xf32> -> vector<2x8x64xf32>
    "tpu.trace_stop"() : () -> ()
    %264 = vector.shape_cast %263 : vector<2x8x64xf32> to vector<16x64xf32>
    %265 = arith.truncf %264 : vector<16x64xf32> to vector<16x64xbf16>
    %266 = vector.extract_strided_slice %36 {offsets = [384, 0], sizes = [64, 512], strides = [1, 1]} : vector<512x512xbf16> to vector<64x512xbf16>
    %cst_66 = arith.constant dense<0.000000e+00> : vector<16x512xf32>
    %267 = tpu.matmul %265, %266, %cst_66 {dimension_numbers = #tpu.dot_dimension_numbers<[1], [0], [0], [1], [0, 0, 1, 1], [], []>} : vector<16x64xbf16>, vector<64x512xbf16>, vector<16x512xf32> -> vector<16x512xf32>
    %268 = arith.addf %235, %267 : vector<16x512xf32>
    %269 = vector.extract_strided_slice %31 {offsets = [0, 448], sizes = [16, 64], strides = [1, 1]} : vector<16x1536xf32> to vector<16x64xf32>
    %cst_67 = arith.constant 1.250000e-01 : f32
    %270 = vector.broadcast %cst_67 : f32 to vector<16x64xf32>
    %271 = arith.mulf %269, %270 : vector<16x64xf32>
    %272 = arith.truncf %271 : vector<16x64xf32> to vector<16x64xbf16>
    %273 = vector.shape_cast %272 : vector<16x64xbf16> to vector<2x8x64xbf16>
    %274 = vector.extract_strided_slice %31 {offsets = [0, 960], sizes = [16, 64], strides = [1, 1]} : vector<16x1536xf32> to vector<16x64xf32>
    %275 = arith.truncf %274 : vector<16x64xf32> to vector<16x64xbf16>
    %276 = vector.shape_cast %275 : vector<16x64xbf16> to vector<2x8x64xbf16>
    %277 = vector.extract_strided_slice %31 {offsets = [0, 1472], sizes = [16, 64], strides = [1, 1]} : vector<16x1536xf32> to vector<16x64xf32>
    %278 = arith.truncf %277 : vector<16x64xf32> to vector<16x64xbf16>
    %279 = vector.shape_cast %278 : vector<16x64xbf16> to vector<2x8x64xbf16>
    "tpu.trace_start"() <{level = 10 : i32, message = "bqd,bkd->bqk"}> : () -> ()
    %cst_68 = arith.constant dense<0.000000e+00> : vector<2x8x8xf32>
    %280 = tpu.matmul %273, %276, %cst_68 {dimension_numbers = #tpu.dot_dimension_numbers<[2], [2], [1], [1], [0, 0, 0, 1, 1, 1], [0], [0]>} : vector<2x8x64xbf16>, vector<2x8x64xbf16>, vector<2x8x8xf32> -> vector<2x8x8xf32>
    %cst_69 = arith.constant 0xFF800000 : f32
    "tpu.trace_stop"() : () -> ()
    %281 = vector.shape_cast %35 : vector<1x8x8xi1> to vector<1x8x8xi1>
    %282 = vector.broadcast %281 : vector<1x8x8xi1> to vector<2x8x8xi1>
    %283 = vector.broadcast %cst_69 : f32 to vector<2x8x8xf32>
    %284 = arith.select %282, %280, %283 : vector<2x8x8xi1>, vector<2x8x8xf32>
    %cst_70 = arith.constant dense<0xFF800000> : vector<2x8xf32>
    %285 = vector.multi_reduction <maximumf>, %284, %cst_70 [2] : vector<2x8x8xf32> to vector<2x8xf32>
    %286 = vector.shape_cast %285 : vector<2x8xf32> to vector<2x8x1xf32>
    %287 = vector.broadcast %286 : vector<2x8x1xf32> to vector<2x8x8xf32>
    %288 = arith.subf %284, %287 : vector<2x8x8xf32>
    %289 = math.exp %288 : vector<2x8x8xf32>
    %cst_71 = arith.constant dense<0.000000e+00> : vector<2x8xf32>
    %290 = vector.multi_reduction <add>, %289, %cst_71 [2] : vector<2x8x8xf32> to vector<2x8xf32>
    %291 = vector.shape_cast %290 : vector<2x8xf32> to vector<2x8x1xf32>
    %292 = tpu.reciprocal %291 {approx = true} : vector<2x8x1xf32> -> vector<2x8x1xf32>
    %293 = vector.broadcast %292 : vector<2x8x1xf32> to vector<2x8x8xf32>
    %294 = arith.mulf %289, %293 : vector<2x8x8xf32>
    %295 = arith.truncf %294 : vector<2x8x8xf32> to vector<2x8x8xbf16>
    "tpu.trace_start"() <{level = 10 : i32, message = "bqk,bkd->bqd"}> : () -> ()
    %cst_72 = arith.constant dense<0.000000e+00> : vector<2x8x64xf32>
    %296 = tpu.matmul %295, %279, %cst_72 {dimension_numbers = #tpu.dot_dimension_numbers<[2], [1], [1], [2], [0, 0, 0, 1, 1, 2], [0], [0]>} : vector<2x8x8xbf16>, vector<2x8x64xbf16>, vector<2x8x64xf32> -> vector<2x8x64xf32>
    "tpu.trace_stop"() : () -> ()
    %297 = vector.shape_cast %296 : vector<2x8x64xf32> to vector<16x64xf32>
    %298 = arith.truncf %297 : vector<16x64xf32> to vector<16x64xbf16>
    %299 = vector.extract_strided_slice %36 {offsets = [448, 0], sizes = [64, 512], strides = [1, 1]} : vector<512x512xbf16> to vector<64x512xbf16>
    %cst_73 = arith.constant dense<0.000000e+00> : vector<16x512xf32>
    %300 = tpu.matmul %298, %299, %cst_73 {dimension_numbers = #tpu.dot_dimension_numbers<[1], [0], [0], [1], [0, 0, 1, 1], [], []>} : vector<16x64xbf16>, vector<64x512xbf16>, vector<16x512xf32> -> vector<16x512xf32>
    %301 = arith.addf %268, %300 : vector<16x512xf32>
    %c0_74 = arith.constant 0 : index
    %c0_75 = arith.constant 0 : index
    %302 = vector.load %arg5[%c0_74, %c0_75] : memref<1x512xf32, #tpu.memory_space<vmem>>, vector<1x512xf32>
    %303 = vector.broadcast %302 : vector<1x512xf32> to vector<16x512xf32>
    %304 = arith.addf %301, %303 : vector<16x512xf32>
    %305 = arith.addf %1, %304 : vector<16x512xf32>
    %c0_76 = arith.constant 0 : index
    %c0_77 = arith.constant 0 : index
    %306 = vector.load %arg8[%c0_76, %c0_77] : memref<1x512xf32, #tpu.memory_space<vmem>>, vector<1x512xf32>
    %c0_78 = arith.constant 0 : index
    %c0_79 = arith.constant 0 : index
    %307 = vector.load %arg9[%c0_78, %c0_79] : memref<1x512xf32, #tpu.memory_space<vmem>>, vector<1x512xf32>
    %cst_80 = arith.constant dense<0.000000e+00> : vector<16xf32>
    %308 = vector.multi_reduction <add>, %305, %cst_80 [1] : vector<16x512xf32> to vector<16xf32>
    %309 = vector.shape_cast %308 : vector<16xf32> to vector<16x1xf32>
    %cst_81 = arith.constant 5.120000e+02 : f32
    %310 = vector.broadcast %cst_81 : f32 to vector<16x1xf32>
    %311 = arith.divf %309, %310 : vector<16x1xf32>
    %312 = vector.broadcast %311 : vector<16x1xf32> to vector<16x512xf32>
    %313 = arith.subf %305, %312 : vector<16x512xf32>
    %314 = arith.mulf %313, %313 : vector<16x512xf32>
    %cst_82 = arith.constant dense<0.000000e+00> : vector<16xf32>
    %315 = vector.multi_reduction <add>, %314, %cst_82 [1] : vector<16x512xf32> to vector<16xf32>
    %316 = vector.shape_cast %315 : vector<16xf32> to vector<16x1xf32>
    %cst_83 = arith.constant 5.120000e+02 : f32
    %317 = vector.broadcast %cst_83 : f32 to vector<16x1xf32>
    %318 = arith.divf %316, %317 : vector<16x1xf32>
    %319 = vector.broadcast %311 : vector<16x1xf32> to vector<16x512xf32>
    %320 = arith.subf %305, %319 : vector<16x512xf32>
    %cst_84 = arith.constant 9.99999974E-6 : f32
    %321 = vector.broadcast %cst_84 : f32 to vector<16x1xf32>
    %322 = arith.addf %318, %321 : vector<16x1xf32>
    %323 = math.rsqrt %322 : vector<16x1xf32>
    %324 = vector.broadcast %323 : vector<16x1xf32> to vector<16x512xf32>
    %325 = arith.mulf %320, %324 : vector<16x512xf32>
    %326 = vector.broadcast %306 : vector<1x512xf32> to vector<16x512xf32>
    %327 = arith.mulf %325, %326 : vector<16x512xf32>
    %328 = vector.broadcast %307 : vector<1x512xf32> to vector<16x512xf32>
    %329 = arith.addf %327, %328 : vector<16x512xf32>
    %330 = arith.truncf %329 : vector<16x512xf32> to vector<16x512xbf16>
    %c0_85 = arith.constant 0 : index
    %c0_86 = arith.constant 0 : index
    %331 = vector.load %arg10[%c0_85, %c0_86] : memref<512x2048xbf16, #tpu.memory_space<vmem>>, vector<512x2048xbf16>
    %cst_87 = arith.constant dense<0.000000e+00> : vector<16x2048xf32>
    %332 = tpu.matmul %330, %331, %cst_87 {dimension_numbers = #tpu.dot_dimension_numbers<[1], [0], [0], [1], [0, 0, 1, 1], [], []>} : vector<16x512xbf16>, vector<512x2048xbf16>, vector<16x2048xf32> -> vector<16x2048xf32>
    %c0_88 = arith.constant 0 : index
    %c0_89 = arith.constant 0 : index
    %333 = vector.load %arg11[%c0_88, %c0_89] : memref<1x2048xf32, #tpu.memory_space<vmem>>, vector<1x2048xf32>
    %334 = vector.broadcast %333 : vector<1x2048xf32> to vector<16x2048xf32>
    %335 = arith.addf %332, %334 : vector<16x2048xf32>
    %cst_90 = arith.constant 0.000000e+00 : f32
    %336 = vector.broadcast %cst_90 : f32 to vector<16x2048xf32>
    %337 = arith.maximumf %335, %336 : vector<16x2048xf32>
    %338 = arith.truncf %337 : vector<16x2048xf32> to vector<16x2048xbf16>
    %c0_91 = arith.constant 0 : index
    %c0_92 = arith.constant 0 : index
    %339 = vector.load %arg12[%c0_91, %c0_92] : memref<2048x512xbf16, #tpu.memory_space<vmem>>, vector<2048x512xbf16>
    %cst_93 = arith.constant dense<0.000000e+00> : vector<16x512xf32>
    %340 = tpu.matmul %338, %339, %cst_93 {dimension_numbers = #tpu.dot_dimension_numbers<[1], [0], [0], [1], [0, 0, 1, 1], [], []>} : vector<16x2048xbf16>, vector<2048x512xbf16>, vector<16x512xf32> -> vector<16x512xf32>
    %c0_94 = arith.constant 0 : index
    %c0_95 = arith.constant 0 : index
    %341 = vector.load %arg13[%c0_94, %c0_95] : memref<1x512xf32, #tpu.memory_space<vmem>>, vector<1x512xf32>
    %342 = vector.broadcast %341 : vector<1x512xf32> to vector<16x512xf32>
    %343 = arith.addf %340, %342 : vector<16x512xf32>
    %344 = arith.addf %305, %343 : vector<16x512xf32>
    %345 = vector.shape_cast %344 : vector<16x512xf32> to vector<2x8x512xf32>
    %c0_96 = arith.constant 0 : index
    %c0_97 = arith.constant 0 : index
    %c0_98 = arith.constant 0 : index
    %346 = vector.load %arg14[%c0_96, %c0_97, %c0_98] : memref<2x8x512xf32, #tpu.memory_space<vmem>>, vector<2x8x512xf32>
    tpu.vector_store %arg14[%c0_96, %c0_97, %c0_98], %345 {strides = array<i32>} : memref<2x8x512xf32, #tpu.memory_space<vmem>>, vector<2x8x512xf32>,
    return
  }
  func.func @transform_0(%arg0: i32) -> (i32, i32, i32) {
    %c0_i32 = arith.constant 0 : i32
    %c0_i32_0 = arith.constant 0 : i32
    %c0_i32_1 = arith.constant 0 : i32
    return %arg0, %c0_i32, %c0_i32_0 : i32, i32, i32
  }
  func.func @transform_1(%arg0: i32) -> (i32, i32) {
    %c0_i32 = arith.constant 0 : i32
    %c0_i32_0 = arith.constant 0 : i32
    %c0_i32_1 = arith.constant 0 : i32
    return %c0_i32, %c0_i32_0 : i32, i32
  }
  func.func @transform_2(%arg0: i32) -> (i32, i32) {
    %c0_i32 = arith.constant 0 : i32
    %c0_i32_0 = arith.constant 0 : i32
    %c0_i32_1 = arith.constant 0 : i32
    return %c0_i32, %c0_i32_0 : i32, i32
  }
  func.func @transform_3(%arg0: i32) -> (i32, i32) {
    %c0_i32 = arith.constant 0 : i32
    %c0_i32_0 = arith.constant 0 : i32
    %c0_i32_1 = arith.constant 0 : i32
    return %c0_i32, %c0_i32_0 : i32, i32
  }
  func.func @transform_4(%arg0: i32) -> (i32, i32) {
    %c0_i32 = arith.constant 0 : i32
    %c0_i32_0 = arith.constant 0 : i32
    %c0_i32_1 = arith.constant 0 : i32
    return %c0_i32, %c0_i32_0 : i32, i32
  }
  func.func @transform_5(%arg0: i32) -> (i32, i32) {
    %c0_i32 = arith.constant 0 : i32
    %c0_i32_0 = arith.constant 0 : i32
    %c0_i32_1 = arith.constant 0 : i32
    return %c0_i32, %c0_i32_0 : i32, i32
  }
  func.func @transform_6(%arg0: i32) -> (i32, i32) {
    %c0_i32 = arith.constant 0 : i32
    %c0_i32_0 = arith.constant 0 : i32
    %c0_i32_1 = arith.constant 0 : i32
    return %c0_i32, %c0_i32_0 : i32, i32
  }
  func.func @transform_7(%arg0: i32) -> (i32, i32) {
    %c0_i32 = arith.constant 0 : i32
    %c0_i32_0 = arith.constant 0 : i32
    %c0_i32_1 = arith.constant 0 : i32
    return %c0_i32, %c0_i32_0 : i32, i32
  }
  func.func @transform_8(%arg0: i32) -> (i32, i32) {
    %c0_i32 = arith.constant 0 : i32
    %c0_i32_0 = arith.constant 0 : i32
    %c0_i32_1 = arith.constant 0 : i32
    return %c0_i32, %c0_i32_0 : i32, i32
  }
  func.func @transform_9(%arg0: i32) -> (i32, i32) {
    %c0_i32 = arith.constant 0 : i32
    %c0_i32_0 = arith.constant 0 : i32
    %c0_i32_1 = arith.constant 0 : i32
    return %c0_i32, %c0_i32_0 : i32, i32
  }
  func.func @transform_10(%arg0: i32) -> (i32, i32) {
    %c0_i32 = arith.constant 0 : i32
    %c0_i32_0 = arith.constant 0 : i32
    %c0_i32_1 = arith.constant 0 : i32
    return %c0_i32, %c0_i32_0 : i32, i32
  }
  func.func @transform_11(%arg0: i32) -> (i32, i32) {
    %c0_i32 = arith.constant 0 : i32
    %c0_i32_0 = arith.constant 0 : i32
    %c0_i32_1 = arith.constant 0 : i32
    return %c0_i32, %c0_i32_0 : i32, i32
  }
  func.func @transform_12(%arg0: i32) -> (i32, i32) {
    %c0_i32 = arith.constant 0 : i32
    %c0_i32_0 = arith.constant 0 : i32
    %c0_i32_1 = arith.constant 0 : i32
    return %c0_i32, %c0_i32_0 : i32, i32
  }
  func.func @transform_13(%arg0: i32) -> (i32, i32, i32) {
    %c0_i32 = arith.constant 0 : i32
    %c0_i32_0 = arith.constant 0 : i32
    %c0_i32_1 = arith.constant 0 : i32
    return %arg0, %c0_i32, %c0_i32_0 : i32, i32, i32
  }
}

</mosaic_0001>

<bundles_post_ra>
// kernel: tpu_custom_call.1
= control target key start
LH: loop header
LB: loop body
LE: loop exit
PB: predicated region body
PF: predicated region fallthrough
CT: control target
= control target key end

     0   :  { %18 = vsyncpa [#allocation3], 0  ;;  %s19611_s0 = inlined_call_operand.hbm [shape: f32[2,8,512], index: 0, kind: input, shape index: {}]   ;;  %s19612_s1 = inlined_call_operand.hbm [shape: bf16[512,1536], index: 1, kind: input, shape index: {}]   ;;  %s19613_s2 = inlined_call_operand.hbm [shape: f32[1,1536], index: 2, kind: input, shape index: {}]   ;;  %s19614_s3 = inlined_call_operand.hbm [shape: bf16[512,512], index: 3, kind: input, shape index: {}]   ;;  %s19615_s4 = inlined_call_operand.hbm [shape: f32[1,512], index: 4, kind: input, shape index: {}]   ;;  %s19616_s5 = inlined_call_operand.hbm [shape: f32[1,512], index: 5, kind: input, shape index: {}]   ;;  %s19617_s6 = inlined_call_operand.hbm [shape: f32[1,512], index: 6, kind: input, shape index: {}]   ;;  %s19618_s7 = inlined_call_operand.hbm [shape: f32[1,512], index: 7, kind: input, shape index: {}]   ;;  %s19619_s8 = inlined_call_operand.hbm [shape: f32[1,512], index: 8, kind: input, shape index: {}]   ;;  %s19620_s9 = inlined_call_operand.hbm [shape: bf16[512,2048], index: 9, kind: input, shape index: {}]   ;;  %s19621_s10 = inlined_call_operand.hbm [shape: f32[1,2048], index: 10, kind: input, shape index: {}]   ;;  %s19622_s11 = inlined_call_operand.hbm [shape: bf16[2048,512], index: 11, kind: input, shape index: {}]   ;;  %s19623_s12 = inlined_call_operand.hbm [shape: f32[1,512], index: 12, kind: input, shape index: {}]   ;;  %s19624_s13 = inlined_call_operand.hbm [shape: f32[2,8,512], index: 13, kind: output, shape index: {}]  }
   0x1   :  { %19 = vsyncpa [#allocation6], 0 }
   0x2   :  { %20 = vsyncpa [#allocation9], 0 }
   0x3   :  { %21 = vsyncpa [#allocation12], 0 }
   0x4   :  { %22 = vsyncpa [#allocation15], 0 }
   0x5   :  { %23 = vsyncpa [#allocation18], 0 }
   0x6   :  { %24 = vsyncpa [#allocation21], 0 }
   0x7   :  { %25 = vsyncpa [#allocation4], 0  ;;  %s18527_s25 = smov [#allocation5]   ;;  %s18203_s29 = scalar_lea.hbm %s19612_s1, 49152 }
   0x8   :  { %s43_s26 = sshll.u32 %s18527_s25, 4  ;;  %p18204_p0 = scmp.ne.s32.totalorder %s19612_s1, %s18203_s29  ;;  %s44_s26 = int_to_ptr.vmem [resolvable:$true] %s43_s26 }
   0x9   :  { %p18207_p1 = scmp.lt.u32.totalorder %s18203_s29, %s19612_s1 }
   0xb   :  { %p18209_p2 = pnand %p18207_p1, %p18204_p0 }
   0xd   :  { %18212 = shalt.err (!%p18209_p2)
}
   0xe   :  { %s18213_s17 = scalar_lea.vmem %s44_s26, 49152  ;;  %p18218_p4 = scmp.lt.s32.totalorder %s44_s26, %s44_s26 }
   0xf   :  { %p18214_p3 = scmp.ne.s32.totalorder %s44_s26, %s18213_s17  ;;  %p18219_p5 = scmp.lt.s32.totalorder %s18213_s17, %s18213_s17 }
  0x11   :  { %p18220_p6 = por %p18219_p5, %p18218_p4 }
  0x13   :  { %p18221_p7 = pnand %p18220_p6, %p18214_p3 }
  0x15   :  { %18224 = shalt.err (!%p18221_p7)
}
  0x16   :  { %s18528_s18 = smov 768   ;;  %s18529_s19 = smov 48  }
  0x17   :  { %49 = dma.hbm_to_vmem [thread:$0]  %s19612_s1, 49152, %s44_s26, [#allocation6], %s18528_s18, %s18528_s18, %s18529_s19  }
  0x18   :  { %s18530_s22 = smov [#allocation8]   ;;  %s18225_s27 = scalar_lea.hbm %s19614_s3, 16384 }
  0x19   :  { %s65_s23 = sshll.u32 %s18530_s22, 4  ;;  %p18226_p8 = scmp.ne.s32.totalorder %s19614_s3, %s18225_s27  ;;  %s66_s23 = int_to_ptr.vmem [resolvable:$true] %s65_s23 }
  0x1a   :  { %p18229_p9 = scmp.lt.u32.totalorder %s18225_s27, %s19614_s3 }
  0x1c   :  { %p18231_p10 = pnand %p18229_p9, %p18226_p8 }
  0x1e   :  { %18234 = shalt.err (!%p18231_p10)
}
  0x1f   :  { %s18235_s15 = scalar_lea.vmem %s66_s23, 16384  ;;  %p18240_p12 = scmp.lt.s32.totalorder %s66_s23, %s66_s23 }
  0x20   :  { %p18236_p11 = scmp.ne.s32.totalorder %s66_s23, %s18235_s15  ;;  %p18241_p13 = scmp.lt.s32.totalorder %s18235_s15, %s18235_s15 }
  0x22   :  { %p18242_p0 = por %p18241_p13, %p18240_p12 }
  0x24   :  { %p18243_p1 = pnand %p18242_p0, %p18236_p11 }
  0x26   :  { %18246 = shalt.err (!%p18243_p1)
}
  0x27   :  { %s18531_s1 = smov 256   ;;  %s18532_s26 = smov 16  }
  0x28   :  { %71 = dma.hbm_to_vmem [thread:$0]  %s19614_s3, 16384, %s66_s23, [#allocation9], %s18531_s1, %s18531_s1, %s18532_s26  }
  0x29   :  { %s18533_s18 = smov [#allocation11]   ;;  %s18534_s20 = smov [#allocation14]  }
  0x2a   :  { %s88_s19 = sshll.u32 %s18533_s18, 4  ;;  %s108_s21 = sshll.u32 %s18534_s20, 4  ;;  %s89_s19 = int_to_ptr.vmem [resolvable:$true] %s88_s19  ;;  %s109_s21 = int_to_ptr.vmem [resolvable:$true] %s108_s21 }
  0x2b   :  { %s18247_s25 = scalar_lea.hbm %s19616_s5, 64 }
  0x2c   :  { %p18248_p2 = scmp.ne.s32.totalorder %s19616_s5, %s18247_s25  ;;  %p18251_p3 = scmp.lt.u32.totalorder %s18247_s25, %s19616_s5 }
  0x2e   :  { %p18253_p4 = pnand %p18251_p3, %p18248_p2 }
  0x30   :  { %18256 = shalt.err (!%p18253_p4)
}
  0x31   :  { %s18257_s3 = scalar_lea.vmem %s89_s19, 64  ;;  %p18262_p6 = scmp.lt.s32.totalorder %s89_s19, %s89_s19 }
  0x32   :  { %p18258_p5 = scmp.ne.s32.totalorder %s89_s19, %s18257_s3  ;;  %p18263_p7 = scmp.lt.s32.totalorder %s18257_s3, %s18257_s3 }
  0x34   :  { %p18264_p8 = por %p18263_p7, %p18262_p6 }
  0x36   :  { %p18265_p9 = pnand %p18264_p8, %p18258_p5 }
  0x38   :  { %18268 = shalt.err (!%p18265_p9)
}
  0x39   :  { %91 = dma.hbm_to_vmem [thread:$0]  %s19616_s5, 64, %s89_s19, [#allocation12]  }
  0x3a   :  { %s18269_s17 = scalar_lea.hbm %s19618_s7, 64 }
  0x3b   :  { %p18270_p10 = scmp.ne.s32.totalorder %s19618_s7, %s18269_s17  ;;  %p18273_p11 = scmp.lt.u32.totalorder %s18269_s17, %s19618_s7 }
  0x3d   :  { %p18275_p12 = pnand %p18273_p11, %p18270_p10 }
  0x3f   :  { %18278 = shalt.err (!%p18275_p12)
}
  0x40   :  { %s18279_s25 = scalar_lea.vmem %s109_s21, 64  ;;  %p18284_p0 = scmp.lt.s32.totalorder %s109_s21, %s109_s21 }
  0x41   :  { %p18280_p13 = scmp.ne.s32.totalorder %s109_s21, %s18279_s25  ;;  %p18285_p1 = scmp.lt.s32.totalorder %s18279_s25, %s18279_s25 }
  0x43   :  { %p18286_p2 = por %p18285_p1, %p18284_p0 }
  0x45   :  { %p18287_p3 = pnand %p18286_p2, %p18280_p13 }
  0x47   :  { %18290 = shalt.err (!%p18287_p3)
}
  0x48   :  { %111 = dma.hbm_to_vmem [thread:$0]  %s19618_s7, 64, %s109_s21, [#allocation15]  }
  0x49   :  { %s18535_s27 = smov [#allocation17]   ;;  %s18291_s3 = scalar_lea.hbm %s19620_s9, 65536 }
  0x4a   :  { %s127_s28 = sshll.u32 %s18535_s27, 4  ;;  %p18292_p4 = scmp.ne.s32.totalorder %s19620_s9, %s18291_s3  ;;  %s128_s28 = int_to_ptr.vmem [resolvable:$true] %s127_s28 }
  0x4b   :  { %p18295_p5 = scmp.lt.u32.totalorder %s18291_s3, %s19620_s9 }
  0x4d   :  { %p18297_p6 = pnand %p18295_p5, %p18292_p4 }
  0x4f   :  { %18300 = shalt.err (!%p18297_p6)
}
  0x50   :  { %s18301_s17 = scalar_lea.vmem %s128_s28, 65536  ;;  %p18306_p8 = scmp.lt.s32.totalorder %s128_s28, %s128_s28 }
  0x51   :  { %p18302_p7 = scmp.ne.s32.totalorder %s128_s28, %s18301_s17  ;;  %p18307_p9 = scmp.lt.s32.totalorder %s18301_s17, %s18301_s17 }
  0x53   :  { %p18308_p10 = por %p18307_p9, %p18306_p8 }
  0x55   :  { %p18309_p11 = pnand %p18308_p10, %p18302_p7 }
  0x57   :  { %18312 = shalt.err (!%p18309_p11)
}
  0x58   :  { %s18536_s7 = smov 1024   ;;  %s18537_s21 = smov 64  }
  0x59   :  { %133 = dma.hbm_to_vmem [thread:$0]  %s19620_s9, 65536, %s128_s28, [#allocation18], %s18536_s7, %s18536_s7, %s18537_s21  }
  0x5a   :  { %s18538_s22 = smov [#allocation20]   ;;  %s18539_s25 = smov [#allocation2]  }
  0x5b   :  { %s149_s24 = sshll.u32 %s18538_s22, 4  ;;  %s31_s5 = sshll.u32 %s18539_s25, 4  ;;  %s150_s24 = int_to_ptr.vmem [resolvable:$true] %s149_s24  ;;  %s32_s5 = int_to_ptr.vmem [resolvable:$true] %s31_s5 }
  0x5c   :  { %s18313_s29 = scalar_lea.hbm %s19622_s11, 65536 }
  0x5d   :  { %p18314_p12 = scmp.ne.s32.totalorder %s19622_s11, %s18313_s29  ;;  %p18317_p13 = scmp.lt.u32.totalorder %s18313_s29, %s19622_s11 }
  0x5f   :  { %p18319_p0 = pnand %p18317_p13, %p18314_p12 }
  0x61   :  { %18322 = shalt.err (!%p18319_p0)
}
  0x62   :  { %s18323_s9 = scalar_lea.vmem %s150_s24, 65536  ;;  %p18328_p2 = scmp.lt.s32.totalorder %s150_s24, %s150_s24 }
  0x63   :  { %p18324_p1 = scmp.ne.s32.totalorder %s150_s24, %s18323_s9  ;;  %p18329_p3 = scmp.lt.s32.totalorder %s18323_s9, %s18323_s9 }
  0x65   :  { %p18330_p4 = por %p18329_p3, %p18328_p2 }
  0x67   :  { %p18331_p5 = pnand %p18330_p4, %p18324_p1 }
  0x69   :  { %18334 = shalt.err (!%p18331_p5)
}
  0x6a   :  { %155 = dma.hbm_to_vmem [thread:$0]  %s19622_s11, 65536, %s150_s24, [#allocation21], %s18531_s1, %s18531_s1, %s18532_s26  }
  0x6b   :  { %s18335_s7 = scalar_lea.hbm %s19611_s0, 1024 }
  0x6c   :  { %p18336_p6 = scmp.ne.s32.totalorder %s19611_s0, %s18335_s7  ;;  %p18339_p7 = scmp.lt.u32.totalorder %s18335_s7, %s19611_s0 }
  0x6e   :  { %p18341_p8 = pnand %p18339_p7, %p18336_p6 }
  0x70   :  { %18344 = shalt.err (!%p18341_p8)
}
  0x71   :  { %s18345_s19 = scalar_lea.vmem %s32_s5, 1024  ;;  %p18350_p10 = scmp.lt.s32.totalorder %s32_s5, %s32_s5 }
  0x72   :  { %p18346_p9 = scmp.ne.s32.totalorder %s32_s5, %s18345_s19  ;;  %p18351_p11 = scmp.lt.s32.totalorder %s18345_s19, %s18345_s19 }
  0x74   :  { %p18352_p12 = por %p18351_p11, %p18350_p10 }
  0x76   :  { %p18353_p13 = pnand %p18352_p12, %p18346_p9 }
  0x78   :  { %18356 = shalt.err (!%p18353_p13)
}
  0x79   :  { %s18540_s11 = smov 512   ;;  %s18541_s1 = smov 32  }
  0x7a   :  { %37 = dma.hbm_to_vmem [thread:$0]  %s19611_s0, 1024, %s32_s5, [#allocation3], %s18540_s11, %s18540_s11, %s18541_s1  }
  0x7b   :  { %s18542_s27 = smov [#allocation7]   ;;  %s18543_s30 = smov [#allocation10]  }
  0x7c   :  { %s56_s29 = sshll.u32 %s18542_s27, 4  ;;  %s78_s3 = sshll.u32 %s18543_s30, 4  ;;  %s57_s29 = int_to_ptr.vmem [resolvable:$true] %s56_s29  ;;  %s79_s3 = int_to_ptr.vmem [resolvable:$true] %s78_s3 }
  0x7d   :  { %s18357_s9 = scalar_lea.hbm %s19613_s2, 192 }
  0x7e   :  { %p18358_p0 = scmp.ne.s32.totalorder %s19613_s2, %s18357_s9  ;;  %p18361_p1 = scmp.lt.u32.totalorder %s18357_s9, %s19613_s2 }
  0x80   :  { %p18363_p2 = pnand %p18361_p1, %p18358_p0 }
  0x82   :  { %18366 = shalt.err (!%p18363_p2)
}
  0x83   :  { %s18367_s0 = scalar_lea.vmem %s57_s29, 192  ;;  %p18372_p4 = scmp.lt.s32.totalorder %s57_s29, %s57_s29 }
  0x84   :  { %p18368_p3 = scmp.ne.s32.totalorder %s57_s29, %s18367_s0  ;;  %p18373_p5 = scmp.lt.s32.totalorder %s18367_s0, %s18367_s0 }
  0x86   :  { %p18374_p6 = por %p18373_p5, %p18372_p4 }
  0x88   :  { %p18375_p7 = pnand %p18374_p6, %p18368_p3 }
  0x8a   :  { %18378 = shalt.err (!%p18375_p7)
}
  0x8b   :  { %59 = dma.hbm_to_vmem [thread:$0]  %s19613_s2, 192, %s57_s29, [#allocation6]  }
  0x8c   :  { %s18379_s22 = scalar_lea.hbm %s19615_s4, 64 }
  0x8d   :  { %p18380_p8 = scmp.ne.s32.totalorder %s19615_s4, %s18379_s22  ;;  %p18383_p9 = scmp.lt.u32.totalorder %s18379_s22, %s19615_s4 }
  0x8f   :  { %p18385_p10 = pnand %p18383_p9, %p18380_p8 }
  0x91   :  { %18388 = shalt.err (!%p18385_p10)
}
  0x92   :  { %s18389_s27 = scalar_lea.vmem %s79_s3, 64  ;;  %p18394_p12 = scmp.lt.s32.totalorder %s79_s3, %s79_s3 }
  0x93   :  { %p18390_p11 = scmp.ne.s32.totalorder %s79_s3, %s18389_s27  ;;  %p18395_p13 = scmp.lt.s32.totalorder %s18389_s27, %s18389_s27 }
  0x95   :  { %p18396_p0 = por %p18395_p13, %p18394_p12 }
  0x97   :  { %p18397_p1 = pnand %p18396_p0, %p18390_p11 }
  0x99   :  { %18400 = shalt.err (!%p18397_p1)
}
  0x9a   :  { %81 = dma.hbm_to_vmem [thread:$0]  %s19615_s4, 64, %s79_s3, [#allocation9]  }
  0x9b   :  { %s18544_s30 = smov [#allocation13]   ;;  %s18545_s14 = smov [#allocation16]  }
  0x9c   :  { %s98_s23 = sshll.u32 %s18544_s30, 4  ;;  %s118_s9 = sshll.u32 %s18545_s14, 4  ;;  %s99_s23 = int_to_ptr.vmem [resolvable:$true] %s98_s23  ;;  %s119_s9 = int_to_ptr.vmem [resolvable:$true] %s118_s9 }
  0x9d   :  { %s18401_s16 = scalar_lea.hbm %s19617_s6, 64 }
  0x9e   :  { %p18402_p2 = scmp.ne.s32.totalorder %s19617_s6, %s18401_s16  ;;  %p18405_p3 = scmp.lt.u32.totalorder %s18401_s16, %s19617_s6 }
  0xa0   :  { %p18407_p4 = pnand %p18405_p3, %p18402_p2 }
  0xa2   :  { %18410 = shalt.err (!%p18407_p4)
}
  0xa3   :  { %s18411_s4 = scalar_lea.vmem %s99_s23, 64  ;;  %p18416_p6 = scmp.lt.s32.totalorder %s99_s23, %s99_s23 }
  0xa4   :  { %p18412_p5 = scmp.ne.s32.totalorder %s99_s23, %s18411_s4  ;;  %p18417_p7 = scmp.lt.s32.totalorder %s18411_s4, %s18411_s4 }
  0xa6   :  { %p18418_p8 = por %p18417_p7, %p18416_p6 }
  0xa8   :  { %p18419_p9 = pnand %p18418_p8, %p18412_p5 }
  0xaa   :  { %18422 = shalt.err (!%p18419_p9)
}
  0xab   :  { %101 = dma.hbm_to_vmem [thread:$0]  %s19617_s6, 64, %s99_s23, [#allocation12]  }
  0xac   :  { %s18423_s25 = scalar_lea.hbm %s19619_s8, 64 }
  0xad   :  { %p18424_p10 = scmp.ne.s32.totalorder %s19619_s8, %s18423_s25  ;;  %p18427_p11 = scmp.lt.u32.totalorder %s18423_s25, %s19619_s8 }
  0xaf   :  { %p18429_p12 = pnand %p18427_p11, %p18424_p10 }
  0xb1   :  { %18432 = shalt.err (!%p18429_p12)
}
  0xb2   :  { %s18433_s2 = scalar_lea.vmem %s119_s9, 64  ;;  %p18438_p0 = scmp.lt.s32.totalorder %s119_s9, %s119_s9 }
  0xb3   :  { %p18434_p13 = scmp.ne.s32.totalorder %s119_s9, %s18433_s2  ;;  %p18439_p1 = scmp.lt.s32.totalorder %s18433_s2, %s18433_s2 }
  0xb5   :  { %p18440_p2 = por %p18439_p1, %p18438_p0 }
  0xb7   :  { %p18441_p3 = pnand %p18440_p2, %p18434_p13 }
  0xb9   :  { %18444 = shalt.err (!%p18441_p3)
}
  0xba   :  { %121 = dma.hbm_to_vmem [thread:$0]  %s19619_s8, 64, %s119_s9, [#allocation15]  }
  0xbb   :  { %s18546_s30 = smov [#allocation19]   ;;  %s18547_s14 = smov [#allocation22]  }
  0xbc   :  { %s140_s23 = sshll.u32 %s18546_s30, 4  ;;  %s162_s28 = sshll.u32 %s18547_s14, 4  ;;  %s141_s23 = int_to_ptr.vmem [resolvable:$true] %s140_s23  ;;  %s163_s28 = int_to_ptr.vmem [resolvable:$true] %s162_s28 }
  0xbd   :  { %s18445_s17 = scalar_lea.hbm %s19621_s10, 256 }
  0xbe   :  { %p18446_p4 = scmp.ne.s32.totalorder %s19621_s10, %s18445_s17  ;;  %p18449_p5 = scmp.lt.u32.totalorder %s18445_s17, %s19621_s10 }
  0xc0   :  { %p18451_p6 = pnand %p18449_p5, %p18446_p4 }
  0xc2   :  { %18454 = shalt.err (!%p18451_p6)
}
  0xc3   :  { %s18455_s8 = scalar_lea.vmem %s141_s23, 256  ;;  %p18460_p8 = scmp.lt.s32.totalorder %s141_s23, %s141_s23 }
  0xc4   :  { %p18456_p7 = scmp.ne.s32.totalorder %s141_s23, %s18455_s8  ;;  %p18461_p9 = scmp.lt.s32.totalorder %s18455_s8, %s18455_s8 }
  0xc6   :  { %p18462_p10 = por %p18461_p9, %p18460_p8 }
  0xc8   :  { %p18463_p11 = pnand %p18462_p10, %p18456_p7 }
  0xca   :  { %18466 = shalt.err (!%p18463_p11)
}
  0xcb   :  { %143 = dma.hbm_to_vmem [thread:$0]  %s19621_s10, 256, %s141_s23, [#allocation18]  }
  0xcc   :  { %s18467_s22 = scalar_lea.hbm %s19623_s12, 64 }
  0xcd   :  { %p18468_p12 = scmp.ne.s32.totalorder %s19623_s12, %s18467_s22  ;;  %p18471_p13 = scmp.lt.u32.totalorder %s18467_s22, %s19623_s12 }
  0xcf   :  { %p18473_p0 = pnand %p18471_p13, %p18468_p12 }
  0xd1   :  { %18476 = shalt.err (!%p18473_p0)
}
  0xd2   :  { %s18477_s27 = scalar_lea.vmem %s163_s28, 64  ;;  %p18482_p2 = scmp.lt.s32.totalorder %s163_s28, %s163_s28 }
  0xd3   :  { %p18478_p1 = scmp.ne.s32.totalorder %s163_s28, %s18477_s27  ;;  %p18483_p3 = scmp.lt.s32.totalorder %s18477_s27, %s18477_s27 }
  0xd5   :  { %p18484_p4 = por %p18483_p3, %p18482_p2 }
  0xd7   :  { %p18485_p5 = pnand %p18484_p4, %p18478_p1 }
  0xd9   :  { %18488 = shalt.err (!%p18485_p5)
}
  0xda   :  { %165 = dma.hbm_to_vmem [thread:$0]  %s19623_s12, 64, %s163_s28, [#allocation21]  }
  0xdb   :  { %18511 = dma.done.wait [#allocation3], 1024  }
  0xdc   :  { %18512 = vsyncadd [#allocation3], 4294966272 }
  0xdd   :  { %18513 = dma.done.wait [#allocation6], 49344  }
  0xde   :  { %18514 = vsyncadd [#allocation6], 4294917952 }
  0xdf   :  { %18515 = dma.done.wait [#allocation9], 16448  }
  0xe0   :  { %18516 = vsyncadd [#allocation9], 4294950848 }
  0xe1   :  { %18517 = dma.done.wait [#allocation12], 128  }
  0xe2   :  { %18518 = vsyncadd [#allocation12], 4294967168 }
  0xe3   :  { %18519 = dma.done.wait [#allocation15], 128  }
  0xe4   :  { %18520 = vsyncadd [#allocation15], 4294967168 }
  0xe5   :  { %18521 = dma.done.wait [#allocation18], 65792  }
  0xe6   :  { %18522 = vsyncadd [#allocation18], 4294901504 }
  0xe7   :  { %18523 = dma.done.wait [#allocation21], 65600  }
  0xe8   :  { %18524 = vsyncadd [#allocation21], 4294901696  ;;  %v18788_v0 = vld [vmem:[#allocation2] sm:$0xff]  ;;  %v18790_v1 = vld [vmem:[#allocation2 + $0x8] sm:$0xff]  ;;  %vm18549_vm0 = vmmov 0   ;;  %vm3368_vm1 = vcmask 523264  }
  0xe9   :  { %v18792_v2 = vld [vmem:[#allocation2 + $0x10] sm:$0xff]  ;;  %v18794_v3 = vld [vmem:[#allocation2 + $0x18] sm:$0xff]  ;;  %v216_v4 = vadd.f32 %v18790_v1, %v18788_v0  ;;  %v210_v5 = vld [vmem:[#allocation2 + $0x20] sm:$0xff]  ;;  %vm3493_vm2 = vcmask 1043456   ;;  %vm3465_vm4 = vcmask 64512   ;;  %s18551_s12 = smov [#allocation23]  }
  0xea   :  { %v211_v6 = vld [vmem:[#allocation2 + $0x28] sm:$0xff]  ;;  %v212_v7 = vld [vmem:[#allocation2 + $0x30] sm:$0xff]  ;;  %v213_v8 = vld [vmem:[#allocation2 + $0x38] sm:$0xff] }
  0xeb   :  { %v221_v9 = vadd.f32 %v211_v6, %v210_v5  ;;  %v217_v10 = vadd.f32 %v216_v4, %v18792_v2  ;;  %v16581_v14 = vld [vmem:[#allocation5 + $0x4] ss:$48 sps:$4 sm:$0xff]   ;;  %v16583_v15 = vld [vmem:[#allocation5 + $0xc] ss:$48 sps:$4 sm:$0xff]   ;;  %v16585_v16 = vld [vmem:[#allocation5] ss:$48 sps:$4 sm:$0xff]  }
  0xec   :  { %v16586_v17 = vld [vmem:[#allocation5 + $0x8] ss:$48 sps:$4 sm:$0xff]   ;;  %v16587_v18 = vld [vmem:[#allocation5 + $0x64] ss:$48 sps:$4 sm:$0xff]   ;;  %v16589_v19 = vld [vmem:[#allocation5 + $0x6c] ss:$48 sps:$4 sm:$0xff]   ;;  %2699 = vmatprep.subr.bf16.mxu0 %v16581_v14  ;;  %2785 = vmatprep.subr.bf16.mxu1 %v16583_v15 }
  0xed   :  { %v222_v11 = vadd.f32 %v221_v9, %v212_v7  ;;  %v218_v12 = vadd.f32 %v217_v10, %v18794_v3  ;;  %2700 = vmatpush1.bf16.msra.mxu0 %v16585_v16  ;;  %2786 = vmatpush1.bf16.msra.mxu1 %v16586_v17  ;;  %v16591_v20 = vld [vmem:[#allocation5 + $0x60] ss:$48 sps:$4 sm:$0xff]   ;;  %v16592_v21 = vld [vmem:[#allocation5 + $0x68] ss:$48 sps:$4 sm:$0xff]   ;;  %v16593_v22 = vld [vmem:[#allocation5 + $0xc4] ss:$48 sps:$4 sm:$0xff]  }
  0xee   :  { %2701 = vmatprep.subr.bf16.mxu0 %v16587_v18  ;;  %2787 = vmatprep.subr.bf16.mxu1 %v16589_v19  ;;  %v16595_v23 = vld [vmem:[#allocation5 + $0xcc] ss:$48 sps:$4 sm:$0xff]   ;;  %v16597_v24 = vld [vmem:[#allocation5 + $0xc0] ss:$48 sps:$4 sm:$0xff]   ;;  %v16598_v25 = vld [vmem:[#allocation5 + $0xc8] ss:$48 sps:$4 sm:$0xff]  }
  0xef   :  { %219 = vadd.xlane.f32.xlu0 %v218_v12  ;;  %v223_v13 = vadd.f32 %v222_v11, %v213_v8  ;;  %v16599_v26 = vld [vmem:[#allocation5 + $0x124] ss:$48 sps:$4 sm:$0xff]   ;;  %v16601_v27 = vld [vmem:[#allocation5 + $0x12c] ss:$48 sps:$4 sm:$0xff]   ;;  %v16603_v28 = vld [vmem:[#allocation5 + $0x120] ss:$48 sps:$4 sm:$0xff]  }
  0xf0   :  { %v16604_v29 = vld [vmem:[#allocation5 + $0x128] ss:$48 sps:$4 sm:$0xff]   ;;  %v16605_v30 = vld [vmem:[#allocation5 + $0x184] ss:$48 sps:$4 sm:$0xff]   ;;  %v16607_v31 = vld [vmem:[#allocation5 + $0x18c] ss:$48 sps:$4 sm:$0xff]  }
  0xf1   :  { %2702 = vmatpush1.bf16.msra.mxu0 %v16591_v20  ;;  %2788 = vmatpush1.bf16.msra.mxu1 %v16592_v21  ;;  %v16609_v32 = vld [vmem:[#allocation5 + $0x180] ss:$48 sps:$4 sm:$0xff]   ;;  %v16610_v33 = vld [vmem:[#allocation5 + $0x188] ss:$48 sps:$4 sm:$0xff]   ;;  %v16611_v34 = vld [vmem:[#allocation5 + $0x1e4] ss:$48 sps:$4 sm:$0xff]  }
  0xf2   :  { %2703 = vmatprep.subr.bf16.mxu0 %v16593_v22  ;;  %2789 = vmatprep.subr.bf16.mxu1 %v16595_v23  ;;  %v16613_v35 = vld [vmem:[#allocation5 + $0x1ec] ss:$48 sps:$4 sm:$0xff]   ;;  %v16615_v36 = vld [vmem:[#allocation5 + $0x1e0] ss:$48 sps:$4 sm:$0xff]   ;;  %v16616_v37 = vld [vmem:[#allocation5 + $0x1e8] ss:$48 sps:$4 sm:$0xff]  }
  0xf3   :  { %224 = vadd.xlane.f32.xlu0 %v223_v13  ;;  %v16617_v38 = vld [vmem:[#allocation5 + $0x244] ss:$48 sps:$4 sm:$0xff]   ;;  %v16619_v39 = vld [vmem:[#allocation5 + $0x24c] ss:$48 sps:$4 sm:$0xff]   ;;  %v16621_v40 = vld [vmem:[#allocation5 + $0x240] ss:$48 sps:$4 sm:$0xff]  }
  0xf4   :  { %v16622_v41 = vld [vmem:[#allocation5 + $0x248] ss:$48 sps:$4 sm:$0xff]   ;;  %v16623_v42 = vld [vmem:[#allocation5 + $0x2a4] ss:$48 sps:$4 sm:$0xff]   ;;  %v16625_v43 = vld [vmem:[#allocation5 + $0x2ac] ss:$48 sps:$4 sm:$0xff]  }
  0xf5   :  { %2704 = vmatpush1.bf16.msra.mxu0 %v16597_v24  ;;  %2790 = vmatpush1.bf16.msra.mxu1 %v16598_v25  ;;  %v16627_v44 = vld [vmem:[#allocation5 + $0x2a0] ss:$48 sps:$4 sm:$0xff]   ;;  %v16628_v45 = vld [vmem:[#allocation5 + $0x2a8] ss:$48 sps:$4 sm:$0xff]   ;;  %v16629_v46 = vld [vmem:[#allocation5 + $0x304] ss:$48 sps:$4 sm:$0xff]  }
  0xf6   :  { %2705 = vmatprep.subr.bf16.mxu0 %v16599_v26  ;;  %2791 = vmatprep.subr.bf16.mxu1 %v16601_v27  ;;  %v16631_v47 = vld [vmem:[#allocation5 + $0x30c] ss:$48 sps:$4 sm:$0xff]   ;;  %v16633_v48 = vld [vmem:[#allocation5 + $0x300] ss:$48 sps:$4 sm:$0xff]   ;;  %v16634_v49 = vld [vmem:[#allocation5 + $0x308] ss:$48 sps:$4 sm:$0xff]  }
  0xf7   :  { %v16635_v50 = vld [vmem:[#allocation5 + $0x364] ss:$48 sps:$4 sm:$0xff]   ;;  %v16637_v51 = vld [vmem:[#allocation5 + $0x36c] ss:$48 sps:$4 sm:$0xff]   ;;  %v16639_v18 = vld [vmem:[#allocation5 + $0x360] ss:$48 sps:$4 sm:$0xff]  }
  0xf8   :  { %v18189_v63 = vld [vmem:[#allocation2 + $0x20] sm:$0xff]  ;;  %v18191_v5 = vld [vmem:[#allocation2 + $0x30] sm:$0xff]  ;;  %v18192_v8 = vld [vmem:[#allocation2 + $0x38] sm:$0xff] }
  0xf9   :  { %2706 = vmatpush1.bf16.msra.mxu0 %v16603_v28  ;;  %2792 = vmatpush1.bf16.msra.mxu1 %v16604_v29  ;;  %v16640_v19 = vld [vmem:[#allocation5 + $0x368] ss:$48 sps:$4 sm:$0xff]   ;;  %v16641_v20 = vld [vmem:[#allocation5 + $0x3c4] ss:$48 sps:$4 sm:$0xff]   ;;  %v16643_v21 = vld [vmem:[#allocation5 + $0x3cc] ss:$48 sps:$4 sm:$0xff]  }
  0xfa   :  { %2707 = vmatprep.subr.bf16.mxu0 %v16605_v30  ;;  %2793 = vmatprep.subr.bf16.mxu1 %v16607_v31  ;;  %v16645_v22 = vld [vmem:[#allocation5 + $0x3c0] ss:$48 sps:$4 sm:$0xff]   ;;  %v16646_v23 = vld [vmem:[#allocation5 + $0x3c8] ss:$48 sps:$4 sm:$0xff]   ;;  %v16647_v24 = vld [vmem:[#allocation5 + $0x424] ss:$48 sps:$4 sm:$0xff]  }
  0xfb   :  { %v16649_v25 = vld [vmem:[#allocation5 + $0x42c] ss:$48 sps:$4 sm:$0xff]   ;;  %v16651_v26 = vld [vmem:[#allocation5 + $0x420] ss:$48 sps:$4 sm:$0xff]   ;;  %v16652_v27 = vld [vmem:[#allocation5 + $0x428] ss:$48 sps:$4 sm:$0xff]  }
  0xfc   :  { %v16653_v28 = vld [vmem:[#allocation5 + $0x484] ss:$48 sps:$4 sm:$0xff]   ;;  %v16655_v29 = vld [vmem:[#allocation5 + $0x48c] ss:$48 sps:$4 sm:$0xff]   ;;  %v16657_v30 = vld [vmem:[#allocation5 + $0x480] ss:$48 sps:$4 sm:$0xff]  }
  0xfd   :  { %2708 = vmatpush1.bf16.msra.mxu0 %v16609_v32  ;;  %2794 = vmatpush1.bf16.msra.mxu1 %v16610_v33  ;;  %v16658_v31 = vld [vmem:[#allocation5 + $0x488] ss:$48 sps:$4 sm:$0xff]   ;;  %v16659_v32 = vld [vmem:[#allocation5 + $0x4e4] ss:$48 sps:$4 sm:$0xff]   ;;  %v16661_v33 = vld [vmem:[#allocation5 + $0x4ec] ss:$48 sps:$4 sm:$0xff]  }
  0xfe   :  { %2709 = vmatprep.subr.bf16.mxu0 %v16611_v34  ;;  %2795 = vmatprep.subr.bf16.mxu1 %v16613_v35  ;;  %v16663_v34 = vld [vmem:[#allocation5 + $0x4e0] ss:$48 sps:$4 sm:$0xff]   ;;  %v16664_v35 = vld [vmem:[#allocation5 + $0x4e8] ss:$48 sps:$4 sm:$0xff]  }
 0x101   :  { %2710 = vmatpush1.bf16.msra.mxu0 %v16615_v36  ;;  %2796 = vmatpush1.bf16.msra.mxu1 %v16616_v37  ;;  %v16665_v36 = vld [vmem:[#allocation5 + $0x544] ss:$48 sps:$4 sm:$0xff]   ;;  %v16667_v37 = vld [vmem:[#allocation5 + $0x54c] ss:$48 sps:$4 sm:$0xff]  }
 0x102   :  { %2711 = vmatprep.subr.bf16.mxu0 %v16617_v38  ;;  %2797 = vmatprep.subr.bf16.mxu1 %v16619_v39  ;;  %v16669_v38 = vld [vmem:[#allocation5 + $0x540] ss:$48 sps:$4 sm:$0xff]   ;;  %v16670_v39 = vld [vmem:[#allocation5 + $0x548] ss:$48 sps:$4 sm:$0xff]  }
 0x105   :  { %2712 = vmatpush1.bf16.msra.mxu0 %v16621_v40  ;;  %2798 = vmatpush1.bf16.msra.mxu1 %v16622_v41  ;;  %v16671_v40 = vld [vmem:[#allocation5 + $0x5a4] ss:$48 sps:$4 sm:$0xff]   ;;  %v16673_v41 = vld [vmem:[#allocation5 + $0x5ac] ss:$48 sps:$4 sm:$0xff]  }
 0x106   :  { %2713 = vmatprep.subr.bf16.mxu0 %v16623_v42  ;;  %2799 = vmatprep.subr.bf16.mxu1 %v16625_v43  ;;  %v16675_v42 = vld [vmem:[#allocation5 + $0x5a0] ss:$48 sps:$4 sm:$0xff]   ;;  %v16676_v43 = vld [vmem:[#allocation5 + $0x5a8] ss:$48 sps:$4 sm:$0xff]  }
 0x109   :  { %2714 = vmatpush1.bf16.msra.mxu0 %v16627_v44  ;;  %2800 = vmatpush1.bf16.msra.mxu1 %v16628_v45  ;;  %v16679_v44 = vld [vmem:[#allocation5 + $0x604] ss:$48 sps:$4 sm:$0xff]   ;;  %v16682_v45 = vld [vmem:[#allocation5 + $0x60c] ss:$48 sps:$4 sm:$0xff]  }
 0x10a   :  { %2715 = vmatprep.subr.bf16.mxu0 %v16629_v46  ;;  %2801 = vmatprep.subr.bf16.mxu1 %v16631_v47 }
 0x10d   :  { %2716 = vmatpush1.bf16.msra.mxu0 %v16633_v48  ;;  %2802 = vmatpush1.bf16.msra.mxu1 %v16634_v49  ;;  %v270_v48 = vlaneseq }
 0x10e   :  { %2717 = vmatprep.subr.bf16.mxu0 %v16635_v50  ;;  %2803 = vmatprep.subr.bf16.mxu1 %v16637_v51 }
 0x111   :  { %2718 = vmatpush1.bf16.msra.mxu0 %v16639_v18  ;;  %2804 = vmatpush1.bf16.msra.mxu1 %v16640_v19 }
 0x112   :  { %2719 = vmatprep.subr.bf16.mxu0 %v16641_v20  ;;  %2805 = vmatprep.subr.bf16.mxu1 %v16643_v21 }
 0x115   :  { %2720 = vmatpush1.bf16.msra.mxu0 %v16645_v22  ;;  %2806 = vmatpush1.bf16.msra.mxu1 %v16646_v23 }
 0x116   :  { %2721 = vmatprep.subr.bf16.mxu0 %v16647_v24  ;;  %2807 = vmatprep.subr.bf16.mxu1 %v16649_v25 }
 0x119   :  { %2722 = vmatpush1.bf16.msra.mxu0 %v16651_v26  ;;  %2808 = vmatpush1.bf16.msra.mxu1 %v16652_v27 }
 0x11a   :  { %2723 = vmatprep.subr.bf16.mxu0 %v16653_v28  ;;  %2809 = vmatprep.subr.bf16.mxu1 %v16655_v29  ;;  %v16677_v29 = vld [vmem:[#allocation5 + $0x600] ss:$48 sps:$4 sm:$0xff]  }
 0x11d   :  { %2724 = vmatpush1.bf16.msra.mxu0 %v16657_v30  ;;  %2810 = vmatpush1.bf16.msra.mxu1 %v16658_v31 }
 0x11e   :  { %2725 = vmatprep.subr.bf16.mxu0 %v16659_v32  ;;  %2811 = vmatprep.subr.bf16.mxu1 %v16661_v33 }
 0x121   :  { %2726 = vmatpush1.bf16.msra.mxu0 %v16663_v34  ;;  %2812 = vmatpush1.bf16.msra.mxu1 %v16664_v35 }
 0x122   :  { %2727 = vmatprep.subr.bf16.mxu0 %v16665_v36  ;;  %2813 = vmatprep.subr.bf16.mxu1 %v16667_v37  ;;  %v16683_v36 = vld [vmem:[#allocation5 + $0x660] ss:$48 sps:$4 sm:$0xff]   ;;  %v16686_v37 = vld [vmem:[#allocation5 + $0x668] ss:$48 sps:$4 sm:$0xff]  }
 0x125   :  { %2728 = vmatpush1.bf16.msra.mxu0 %v16669_v38  ;;  %2814 = vmatpush1.bf16.msra.mxu1 %v16670_v39  ;;  %v16688_v38 = vld [vmem:[#allocation5 + $0x66c] ss:$48 sps:$4 sm:$0xff]  }
 0x126   :  { %2729 = vmatprep.subr.bf16.mxu0 %v16671_v40  ;;  %2815 = vmatprep.subr.bf16.mxu1 %v16673_v41  ;;  %v16691_v40 = vld [vmem:[#allocation5 + $0x6c4] ss:$48 sps:$4 sm:$0xff]   ;;  %v16694_v41 = vld [vmem:[#allocation5 + $0x6cc] ss:$48 sps:$4 sm:$0xff]  }
 0x129   :  { %2730 = vmatpush1.bf16.msra.mxu0 %v16675_v42  ;;  %2816 = vmatpush1.bf16.msra.mxu1 %v16676_v43  ;;  %v16689_v42 = vld [vmem:[#allocation5 + $0x6c0] ss:$48 sps:$4 sm:$0xff]   ;;  %v16692_v43 = vld [vmem:[#allocation5 + $0x6c8] ss:$48 sps:$4 sm:$0xff]  }
 0x12a   :  { %2742 = vmatprep.subr.bf16.mxu0 %v16679_v44  ;;  %2828 = vmatprep.subr.bf16.mxu1 %v16682_v45  ;;  %v16697_v44 = vld [vmem:[#allocation5 + $0x724] ss:$48 sps:$4 sm:$0xff]   ;;  %v16700_v45 = vld [vmem:[#allocation5 + $0x72c] ss:$48 sps:$4 sm:$0xff]  }
 0x17c   :  { %v220_v52 = vpop.xlane.xlu0 %219 }
 0x17d   :  { %v227_v53 = vmul.f32 0.001953125, %v220_v52  ;;  %v18837_v52 = vshrl.u32 %v270_v48, 7 }
 0x17f   :  { %v18801_v54 = vsub.f32 %v18788_v0, %v227_v53  ;;  %v18804_v55 = vsub.f32 %v18790_v1, %v227_v53  ;;  %v18807_v56 = vsub.f32 %v18792_v2, %v227_v53  ;;  %v18810_v58 = vsub.f32 %v18794_v3, %v227_v53  ;;  %v18190_v1 = vld [vmem:[#allocation2 + $0x28] sm:$0xff] }
 0x180   :  { %v225_v57 = vpop.xlane.xlu0 %224 }
 0x181   :  { %v228_v59 = vmul.f32 0.001953125, %v225_v57  ;;  %v237_v60 = vmul.f32 %v18801_v54, %v18801_v54  ;;  %v238_v61 = vmul.f32 %v18804_v55, %v18804_v55  ;;  %v239_v62 = vmul.f32 %v18807_v56, %v18807_v56 }
 0x182   :  { %v240_v6 = vmul.f32 %v18810_v58, %v18810_v58  ;;  %v18840_v57 = vsub.s32 2, %v18837_v52 }
 0x183   :  { %v18818_v0 = vsub.f32 %v18189_v63, %v228_v59  ;;  %v18820_v2 = vsub.f32 %v18190_v1, %v228_v59  ;;  %v245_v4 = vadd.f32 %v238_v61, %v237_v60  ;;  %v18822_v3 = vsub.f32 %v18191_v5, %v228_v59  ;;  %v215_v61 = vld [vmem:[#allocation13] sm:$0xf] }
 0x184   :  { %v18826_v9 = vsub.f32 %v18192_v8, %v228_v59  ;;  %v214_v59 = vld [vmem:[#allocation11] sm:$0xf]  ;;  %v18843_v60 = vsub.s32 1, %v18837_v52  ;;  %v18851_v5 = vsub.s32 3, %v18837_v52 }
 0x185   :  { %v246_v7 = vadd.f32 %v245_v4, %v239_v62  ;;  %v241_v10 = vmul.f32 %v18818_v0, %v18818_v0  ;;  %v242_v11 = vmul.f32 %v18820_v2, %v18820_v2  ;;  %v243_v13 = vmul.f32 %v18822_v3, %v18822_v3 }
 0x186   :  { %v244_v15 = vmul.f32 %v18826_v9, %v18826_v9  ;;  %v18846_v62 = vsub.s32 0, %v18837_v52  ;;  %v281_v63 = vrot.slane %v214_v59, %v18840_v57  ;;  %v277_v4 = vrot.slane %v214_v59, %v18843_v60 }
 0x187   :  { %v247_v12 = vadd.f32 %v246_v7, %v240_v6  ;;  %v250_v14 = vadd.f32 %v242_v11, %v241_v10  ;;  %v310_v11 = vrot.slane %v215_v61, %v18840_v57  ;;  %v314_v26 = vrot.slane %v215_v61, %v18851_v5 }
 0x188   :  { %v273_v8 = vrot.slane %v214_v59, %v18846_v62 }
 0x189   :  { %248 = vadd.xlane.f32.xlu1 %v247_v12  ;;  %v251_v16 = vadd.f32 %v250_v14, %v243_v13  ;;  %v306_v14 = vrot.slane %v215_v61, %v18843_v60 }
 0x18b   :  { %v252_v17 = vadd.f32 %v251_v16, %v244_v15  ;;  %v302_v15 = vrot.slane %v215_v61, %v18846_v62  ;;  %v16712_v61 = vld [vmem:[#allocation5 + $0x7ec] ss:$48 sps:$4 sm:$0xff]  }
 0x18d   :  { %253 = vadd.xlane.f32.xlu1 %v252_v17  ;;  %v285_v17 = vrot.slane %v214_v59, %v18851_v5  ;;  %v16709_v59 = vld [vmem:[#allocation5 + $0x7e4] ss:$48 sps:$4 sm:$0xff]  }
 0x216   :  { %v249_v46 = vpop.xlane.xlu1 %248 }
 0x217   :  { %v255_v47 = vmul.f32 0.001953125, %v249_v46  ;;  %v16695_v46 = vld [vmem:[#allocation5 + $0x720] ss:$48 sps:$4 sm:$0xff]  }
 0x219   :  { %v257_v49 = vadd.f32 1e-05, %v255_v47  ;;  %v16698_v47 = vld [vmem:[#allocation5 + $0x728] ss:$48 sps:$4 sm:$0xff]  }
 0x21a   :  { %v254_v50 = vpop.xlane.xlu1 %253 }
 0x21b   :  { %18117 = vrsqrt.f32 %v257_v49  ;;  %v256_v51 = vmul.f32 0.001953125, %v254_v50  ;;  %v16703_v49 = vld [vmem:[#allocation5 + $0x784] ss:$48 sps:$4 sm:$0xff]   ;;  %v16706_v50 = vld [vmem:[#allocation5 + $0x78c] ss:$48 sps:$4 sm:$0xff]  }
 0x21d   :  { %v258_v53 = vadd.f32 1e-05, %v256_v51  ;;  %v16701_v51 = vld [vmem:[#allocation5 + $0x780] ss:$48 sps:$4 sm:$0xff]  }
 0x21f   :  { %18119 = vrsqrt.f32 %v258_v53  ;;  %v16704_v53 = vld [vmem:[#allocation5 + $0x788] ss:$48 sps:$4 sm:$0xff]  }
 0x225   :  { %v18118_v1 = vpop.eup %18117 }
 0x226   :  { %v262_v6 = vmul.f32 %v18118_v1, %v18804_v55  ;;  %v261_v7 = vmul.f32 %v18118_v1, %v18801_v54  ;;  %v263_v10 = vmul.f32 %v18118_v1, %v18807_v56  ;;  %v264_v16 = vmul.f32 %v18118_v1, %v18810_v58  ;;  %v16710_v1 = vld [vmem:[#allocation5 + $0x7e8] ss:$48 sps:$4 sm:$0xff]  }
 0x228   :  { %v292_v12 = vmul.f32 %v281_v63, %v263_v10  ;;  %v291_v18 = vmul.f32 %v277_v4, %v262_v6  ;;  %v290_v19 = vmul.f32 %v273_v8, %v261_v7  ;;  %v293_v24 = vmul.f32 %v285_v17, %v264_v16  ;;  %v16718_v6 = vld [vmem:[#allocation5 + $0x84c] ss:$48 sps:$4 sm:$0xff]   ;;  %v16713_v7 = vld [vmem:[#allocation5 + $0x840] ss:$48 sps:$4 sm:$0xff]   ;;  %v16721_v10 = vld [vmem:[#allocation5 + $0x8a4] ss:$48 sps:$4 sm:$0xff]  }
 0x229   :  { %v18120_v13 = vpop.eup %18119  ;;  %v16725_v16 = vld [vmem:[#allocation5 + $0x900] ss:$48 sps:$4 sm:$0xff]  }
 0x22a   :  { %v266_v55 = vmul.f32 %v18120_v13, %v18820_v2  ;;  %v265_v54 = vmul.f32 %v18120_v13, %v18818_v0  ;;  %v268_v56 = vmul.f32 %v18120_v13, %v18826_v9  ;;  %v267_v20 = vmul.f32 %v18120_v13, %v18822_v3  ;;  %v16680_v2 = vld [vmem:[#allocation5 + $0x608] ss:$48 sps:$4 sm:$0xff]   ;;  %v16685_v3 = vld [vmem:[#allocation5 + $0x664] ss:$48 sps:$4 sm:$0xff]  }
 0x22b   :  { %v321_v21 = vadd.f32 %v310_v11, %v292_v12  ;;  %v320_v27 = vadd.f32 %v306_v14, %v291_v18  ;;  %v319_v30 = vadd.f32 %v302_v15, %v290_v19  ;;  %v322_v34 = vadd.f32 %v314_v26, %v293_v24  ;;  %v16719_v12 = vld [vmem:[#allocation5 + $0x8a0] ss:$48 sps:$4 sm:$0xff]   ;;  %v16722_v13 = vld [vmem:[#allocation5 + $0x8a8] ss:$48 sps:$4 sm:$0xff]   ;;  %v16736_v18 = vld [vmem:[#allocation5 + $0x96c] ss:$48 sps:$4 sm:$0xff]  }
 0x22c   :  { %v295_v22 = vmul.f32 %v277_v4, %v266_v55  ;;  %v294_v23 = vmul.f32 %v273_v8, %v265_v54  ;;  %v297_v25 = vmul.f32 %v285_v17, %v268_v56  ;;  %v296_v58 = vmul.f32 %v281_v63, %v267_v20  ;;  %v16707_v63 = vld [vmem:[#allocation5 + $0x7e0] ss:$48 sps:$4 sm:$0xff]   ;;  %v16715_v4 = vld [vmem:[#allocation5 + $0x844] ss:$48 sps:$4 sm:$0xff]   ;;  %v16716_v8 = vld [vmem:[#allocation5 + $0x848] ss:$48 sps:$4 sm:$0xff]  }
 0x22d   :  { %v16728_v17 = vld [vmem:[#allocation5 + $0x908] ss:$48 sps:$4 sm:$0xff]   ;;  %v16733_v55 = vld [vmem:[#allocation5 + $0x964] ss:$48 sps:$4 sm:$0xff]   ;;  %v16731_v54 = vld [vmem:[#allocation5 + $0x960] ss:$48 sps:$4 sm:$0xff]  }
 0x22e   :  { %v324_v28 = vadd.f32 %v306_v14, %v295_v22  ;;  %v323_v31 = vadd.f32 %v302_v15, %v294_v23  ;;  %v326_v0 = vadd.f32 %v314_v26, %v297_v25  ;;  %v325_v32 = vadd.f32 %v310_v11, %v296_v58  ;;  %v16724_v11 = vld [vmem:[#allocation5 + $0x8ac] ss:$48 sps:$4 sm:$0xff]   ;;  %v16727_v14 = vld [vmem:[#allocation5 + $0x904] ss:$48 sps:$4 sm:$0xff]   ;;  %v16734_v19 = vld [vmem:[#allocation5 + $0x968] ss:$48 sps:$4 sm:$0xff]  }
 0x22f   :  { %v16730_v15 = vld [vmem:[#allocation5 + $0x90c] ss:$48 sps:$4 sm:$0xff]   ;;  %v16739_v56 = vld [vmem:[#allocation5 + $0x9c4] ss:$48 sps:$4 sm:$0xff]   ;;  %v16740_v22 = vld [vmem:[#allocation5 + $0x9c8] ss:$48 sps:$4 sm:$0xff]  }
 0x230   :  { %v18867_v33 = vpack.c.bf16 %v324_v28, %v320_v27  ;;  %v18869_v9 = vpack.c.bf16 %v323_v31, %v319_v30  ;;  %v18871_v35 = vpack.c.bf16 %v325_v32, %v321_v21  ;;  %v18877_v39 = vpack.c.bf16 %v326_v0, %v322_v34  ;;  %v16742_v20 = vld [vmem:[#allocation5 + $0x9cc] ss:$48 sps:$4 sm:$0xff]   ;;  %v16737_v21 = vld [vmem:[#allocation5 + $0x9c0] ss:$48 sps:$4 sm:$0xff]   ;;  %v16745_v23 = vld [vmem:[#allocation5 + $0xa24] ss:$48 sps:$4 sm:$0xff]  }
 0x231   :  { %v16748_v24 = vld [vmem:[#allocation5 + $0xa2c] ss:$48 sps:$4 sm:$0xff]   ;;  %v16743_v25 = vld [vmem:[#allocation5 + $0xa20] ss:$48 sps:$4 sm:$0xff]   ;;  %v16746_v26 = vld [vmem:[#allocation5 + $0xa28] ss:$48 sps:$4 sm:$0xff]  }
 0x232   :  { %2731 = vmatprep.mubr.bf16.mxu0 %v18867_v33  ;;  %2817 = vmatprep.mubr.bf16.mxu1 %v18867_v33  ;;  %v16751_v58 = vld [vmem:[#allocation5 + $0xa84] ss:$48 sps:$4 sm:$0xff]   ;;  %v16754_v27 = vld [vmem:[#allocation5 + $0xa8c] ss:$48 sps:$4 sm:$0xff]   ;;  %v16749_v28 = vld [vmem:[#allocation5 + $0xa80] ss:$48 sps:$4 sm:$0xff]  }
 0x233   :  { %2732 = vmatmul.mubr.bf16.vlgmr.msra.gmra.mrb[0].mxu0 %v18869_v9  ;;  %2818 = vmatmul.mubr.bf16.vlgmr.msra.gmra.mrb[0].mxu1 %v18869_v9  ;;  %v16760_v30 = vld [vmem:[#allocation5 + $0xaec] ss:$48 sps:$4 sm:$0xff]   ;;  %v16755_v31 = vld [vmem:[#allocation5 + $0xae0] ss:$48 sps:$4 sm:$0xff]   ;;  %v16758_v0 = vld [vmem:[#allocation5 + $0xae8] ss:$48 sps:$4 sm:$0xff]  }
 0x234   :  { %2743 = vmatpush1.bf16.msra.mxu0 %v16677_v29  ;;  %2829 = vmatpush1.bf16.msra.mxu1 %v16680_v2  ;;  %v16752_v29 = vld [vmem:[#allocation5 + $0xa88] ss:$48 sps:$4 sm:$0xff]   ;;  %v16757_v2 = vld [vmem:[#allocation5 + $0xae4] ss:$48 sps:$4 sm:$0xff]   ;;  %v16761_v34 = vld [vmem:[#allocation5 + $0xb40] ss:$48 sps:$4 sm:$0xff]  }
 0x235   :  { %2774 = vmatprep.mubr.bf16.mxu0 %v18877_v39  ;;  %2860 = vmatprep.mubr.bf16.mxu1 %v18877_v39  ;;  %v16763_v32 = vld [vmem:[#allocation5 + $0xb44] ss:$48 sps:$4 sm:$0xff]  }
 0x236   :  { %2744 = vmatprep.subr.bf16.mxu0 %v16685_v3  ;;  %2830 = vmatprep.subr.bf16.mxu1 %v16688_v38  ;;  %v16766_v3 = vld [vmem:[#allocation5 + $0xb4c] ss:$48 sps:$4 sm:$0xff]  }
 0x237   :  { %v16772_v38 = vld [vmem:[#allocation5 + $0xbac] ss:$48 sps:$4 sm:$0xff]  }
 0x238   :  { %2745 = vmatpush1.bf16.msra.mxu0 %v16683_v36  ;;  %2831 = vmatpush1.bf16.msra.mxu1 %v16686_v37  ;;  %v16764_v36 = vld [vmem:[#allocation5 + $0xb48] ss:$48 sps:$4 sm:$0xff]   ;;  %v16769_v37 = vld [vmem:[#allocation5 + $0xba4] ss:$48 sps:$4 sm:$0xff]  }
 0x239   :  { %2746 = vmatprep.subr.bf16.mxu0 %v16691_v40  ;;  %2832 = vmatprep.subr.bf16.mxu1 %v16694_v41  ;;  %v16767_v40 = vld [vmem:[#allocation5 + $0xba0] ss:$48 sps:$4 sm:$0xff]   ;;  %v16770_v41 = vld [vmem:[#allocation5 + $0xba8] ss:$48 sps:$4 sm:$0xff]  }
 0x23c   :  { %2747 = vmatpush1.bf16.msra.mxu0 %v16689_v42  ;;  %2833 = vmatpush1.bf16.msra.mxu1 %v16692_v43  ;;  %v16775_v42 = vld [vmem:[#allocation5 + $0x14] ss:$48 sps:$4 sm:$0xff]   ;;  %v16778_v43 = vld [vmem:[#allocation5 + $0x1c] ss:$48 sps:$4 sm:$0xff]  }
 0x23d   :  { %2748 = vmatprep.subr.bf16.mxu0 %v16697_v44  ;;  %2834 = vmatprep.subr.bf16.mxu1 %v16700_v45  ;;  %v16773_v44 = vld [vmem:[#allocation5 + $0x10] ss:$48 sps:$4 sm:$0xff]   ;;  %v16776_v45 = vld [vmem:[#allocation5 + $0x18] ss:$48 sps:$4 sm:$0xff]  }
 0x240   :  { %2749 = vmatpush1.bf16.msra.mxu0 %v16695_v46  ;;  %2835 = vmatpush1.bf16.msra.mxu1 %v16698_v47  ;;  %v16781_v46 = vld [vmem:[#allocation5 + $0x74] ss:$48 sps:$4 sm:$0xff]   ;;  %v16784_v47 = vld [vmem:[#allocation5 + $0x7c] ss:$48 sps:$4 sm:$0xff]  }
 0x241   :  { %2750 = vmatprep.subr.bf16.mxu0 %v16703_v49  ;;  %2836 = vmatprep.subr.bf16.mxu1 %v16706_v50  ;;  %v16779_v49 = vld [vmem:[#allocation5 + $0x70] ss:$48 sps:$4 sm:$0xff]   ;;  %v16782_v50 = vld [vmem:[#allocation5 + $0x78] ss:$48 sps:$4 sm:$0xff]  }
 0x244   :  { %2751 = vmatpush1.bf16.msra.mxu0 %v16701_v51  ;;  %2837 = vmatpush1.bf16.msra.mxu1 %v16704_v53  ;;  %v16787_v51 = vld [vmem:[#allocation5 + $0xd4] ss:$48 sps:$4 sm:$0xff]   ;;  %v16790_v53 = vld [vmem:[#allocation5 + $0xdc] ss:$48 sps:$4 sm:$0xff]  }
 0x245   :  { %2752 = vmatprep.subr.bf16.mxu0 %v16709_v59  ;;  %2838 = vmatprep.subr.bf16.mxu1 %v16712_v61  ;;  %v16785_v59 = vld [vmem:[#allocation5 + $0xd0] ss:$48 sps:$4 sm:$0xff]   ;;  %v16788_v61 = vld [vmem:[#allocation5 + $0xd8] ss:$48 sps:$4 sm:$0xff]  }
 0x248   :  { %2753 = vmatpush1.bf16.msra.mxu0 %v16707_v63  ;;  %2839 = vmatpush1.bf16.msra.mxu1 %v16710_v1  ;;  %v16793_v63 = vld [vmem:[#allocation5 + $0x134] ss:$48 sps:$4 sm:$0xff]   ;;  %v16791_v1 = vld [vmem:[#allocation5 + $0x130] ss:$48 sps:$4 sm:$0xff]  }
 0x249   :  { %2754 = vmatprep.subr.bf16.mxu0 %v16715_v4  ;;  %2840 = vmatprep.subr.bf16.mxu1 %v16718_v6  ;;  %v16796_v4 = vld [vmem:[#allocation5 + $0x13c] ss:$48 sps:$4 sm:$0xff]   ;;  %v16794_v6 = vld [vmem:[#allocation5 + $0x138] ss:$48 sps:$4 sm:$0xff]  }
 0x24c   :  { %2755 = vmatpush1.bf16.msra.mxu0 %v16713_v7  ;;  %2841 = vmatpush1.bf16.msra.mxu1 %v16716_v8  ;;  %v16799_v7 = vld [vmem:[#allocation5 + $0x194] ss:$48 sps:$4 sm:$0xff]   ;;  %v16797_v8 = vld [vmem:[#allocation5 + $0x190] ss:$48 sps:$4 sm:$0xff]  }
 0x24d   :  { %2756 = vmatprep.subr.bf16.mxu0 %v16721_v10  ;;  %2842 = vmatprep.subr.bf16.mxu1 %v16724_v11  ;;  %v16802_v10 = vld [vmem:[#allocation5 + $0x19c] ss:$48 sps:$4 sm:$0xff]   ;;  %v16800_v11 = vld [vmem:[#allocation5 + $0x198] ss:$48 sps:$4 sm:$0xff]  }
 0x250   :  { %2757 = vmatpush1.bf16.msra.mxu0 %v16719_v12  ;;  %2843 = vmatpush1.bf16.msra.mxu1 %v16722_v13  ;;  %v16805_v12 = vld [vmem:[#allocation5 + $0x1f4] ss:$48 sps:$4 sm:$0xff]   ;;  %v16803_v13 = vld [vmem:[#allocation5 + $0x1f0] ss:$48 sps:$4 sm:$0xff]  }
 0x251   :  { %2758 = vmatprep.subr.bf16.mxu0 %v16727_v14  ;;  %2844 = vmatprep.subr.bf16.mxu1 %v16730_v15  ;;  %v16808_v14 = vld [vmem:[#allocation5 + $0x1fc] ss:$48 sps:$4 sm:$0xff]   ;;  %v16806_v15 = vld [vmem:[#allocation5 + $0x1f8] ss:$48 sps:$4 sm:$0xff]  }
 0x254   :  { %2759 = vmatpush1.bf16.msra.mxu0 %v16725_v16  ;;  %2845 = vmatpush1.bf16.msra.mxu1 %v16728_v17  ;;  %v16811_v16 = vld [vmem:[#allocation5 + $0x254] ss:$48 sps:$4 sm:$0xff]   ;;  %v16809_v17 = vld [vmem:[#allocation5 + $0x250] ss:$48 sps:$4 sm:$0xff]  }
 0x255   :  { %2760 = vmatprep.subr.bf16.mxu0 %v16733_v55  ;;  %2846 = vmatprep.subr.bf16.mxu1 %v16736_v18  ;;  %v16814_v55 = vld [vmem:[#allocation5 + $0x25c] ss:$48 sps:$4 sm:$0xff]   ;;  %v16812_v18 = vld [vmem:[#allocation5 + $0x258] ss:$48 sps:$4 sm:$0xff]  }
 0x258   :  { %2761 = vmatpush1.bf16.msra.mxu0 %v16731_v54  ;;  %2847 = vmatpush1.bf16.msra.mxu1 %v16734_v19  ;;  %v16817_v54 = vld [vmem:[#allocation5 + $0x2b4] ss:$48 sps:$4 sm:$0xff]   ;;  %v16815_v19 = vld [vmem:[#allocation5 + $0x2b0] ss:$48 sps:$4 sm:$0xff]  }
 0x259   :  { %2762 = vmatprep.subr.bf16.mxu0 %v16739_v56  ;;  %2848 = vmatprep.subr.bf16.mxu1 %v16742_v20  ;;  %v16820_v56 = vld [vmem:[#allocation5 + $0x2bc] ss:$48 sps:$4 sm:$0xff]   ;;  %v16818_v20 = vld [vmem:[#allocation5 + $0x2b8] ss:$48 sps:$4 sm:$0xff]  }
 0x25c   :  { %2763 = vmatpush1.bf16.msra.mxu0 %v16737_v21  ;;  %2849 = vmatpush1.bf16.msra.mxu1 %v16740_v22  ;;  %v16823_v21 = vld [vmem:[#allocation5 + $0x314] ss:$48 sps:$4 sm:$0xff]   ;;  %v16821_v22 = vld [vmem:[#allocation5 + $0x310] ss:$48 sps:$4 sm:$0xff]  }
 0x25d   :  { %2764 = vmatprep.subr.bf16.mxu0 %v16745_v23  ;;  %2850 = vmatprep.subr.bf16.mxu1 %v16748_v24  ;;  %v16826_v23 = vld [vmem:[#allocation5 + $0x31c] ss:$48 sps:$4 sm:$0xff]   ;;  %v16824_v24 = vld [vmem:[#allocation5 + $0x318] ss:$48 sps:$4 sm:$0xff]  }
 0x260   :  { %2765 = vmatpush1.bf16.msra.mxu0 %v16743_v25  ;;  %2851 = vmatpush1.bf16.msra.mxu1 %v16746_v26  ;;  %v16829_v25 = vld [vmem:[#allocation5 + $0x374] ss:$48 sps:$4 sm:$0xff]   ;;  %v16827_v26 = vld [vmem:[#allocation5 + $0x370] ss:$48 sps:$4 sm:$0xff]  }
 0x261   :  { %2766 = vmatprep.subr.bf16.mxu0 %v16751_v58  ;;  %2852 = vmatprep.subr.bf16.mxu1 %v16754_v27  ;;  %v16832_v58 = vld [vmem:[#allocation5 + $0x37c] ss:$48 sps:$4 sm:$0xff]   ;;  %v16830_v27 = vld [vmem:[#allocation5 + $0x378] ss:$48 sps:$4 sm:$0xff]  }
 0x264   :  { %2767 = vmatpush1.bf16.msra.mxu0 %v16749_v28  ;;  %2853 = vmatpush1.bf16.msra.mxu1 %v16752_v29  ;;  %v16835_v28 = vld [vmem:[#allocation5 + $0x3d4] ss:$48 sps:$4 sm:$0xff]   ;;  %v16833_v29 = vld [vmem:[#allocation5 + $0x3d0] ss:$48 sps:$4 sm:$0xff]  }
 0x265   :  { %2768 = vmatprep.subr.bf16.mxu0 %v16757_v2  ;;  %2854 = vmatprep.subr.bf16.mxu1 %v16760_v30  ;;  %v16838_v2 = vld [vmem:[#allocation5 + $0x3dc] ss:$48 sps:$4 sm:$0xff]   ;;  %v16836_v30 = vld [vmem:[#allocation5 + $0x3d8] ss:$48 sps:$4 sm:$0xff]  }
 0x268   :  { %2769 = vmatpush1.bf16.msra.mxu0 %v16755_v31  ;;  %2855 = vmatpush1.bf16.msra.mxu1 %v16758_v0  ;;  %v16841_v31 = vld [vmem:[#allocation5 + $0x434] ss:$48 sps:$4 sm:$0xff]   ;;  %v16839_v0 = vld [vmem:[#allocation5 + $0x430] ss:$48 sps:$4 sm:$0xff]  }
 0x269   :  { %2770 = vmatprep.subr.bf16.mxu0 %v16763_v32  ;;  %2856 = vmatprep.subr.bf16.mxu1 %v16766_v3  ;;  %v16844_v32 = vld [vmem:[#allocation5 + $0x43c] ss:$48 sps:$4 sm:$0xff]   ;;  %v16842_v3 = vld [vmem:[#allocation5 + $0x438] ss:$48 sps:$4 sm:$0xff]  }
 0x26c   :  { %2771 = vmatpush1.bf16.msra.mxu0 %v16761_v34  ;;  %2857 = vmatpush1.bf16.msra.mxu1 %v16764_v36  ;;  %v16847_v34 = vld [vmem:[#allocation5 + $0x494] ss:$48 sps:$4 sm:$0xff]   ;;  %v16845_v36 = vld [vmem:[#allocation5 + $0x490] ss:$48 sps:$4 sm:$0xff]  }
 0x26d   :  { %2772 = vmatprep.subr.bf16.mxu0 %v16769_v37  ;;  %2858 = vmatprep.subr.bf16.mxu1 %v16772_v38  ;;  %v16850_v37 = vld [vmem:[#allocation5 + $0x49c] ss:$48 sps:$4 sm:$0xff]   ;;  %v16848_v38 = vld [vmem:[#allocation5 + $0x498] ss:$48 sps:$4 sm:$0xff]  }
 0x270   :  { %2773 = vmatpush1.bf16.msra.mxu0 %v16767_v40  ;;  %2859 = vmatpush1.bf16.msra.mxu1 %v16770_v41  ;;  %v16853_v40 = vld [vmem:[#allocation5 + $0x4f4] ss:$48 sps:$4 sm:$0xff]   ;;  %v16851_v41 = vld [vmem:[#allocation5 + $0x4f0] ss:$48 sps:$4 sm:$0xff]  }
 0x271   :  { %2871 = vmatprep.subr.bf16.mxu0 %v16775_v42  ;;  %2957 = vmatprep.subr.bf16.mxu1 %v16778_v43  ;;  %v16856_v42 = vld [vmem:[#allocation5 + $0x4fc] ss:$48 sps:$4 sm:$0xff]   ;;  %v16854_v43 = vld [vmem:[#allocation5 + $0x4f8] ss:$48 sps:$4 sm:$0xff]  }
 0x273   :  { %2775 = vmatmul.mubr.bf16.vlgmr.msra.gmra.mrb[0].mxu0 %v18871_v35  ;;  %2861 = vmatmul.mubr.bf16.vlgmr.msra.gmra.mrb[0].mxu1 %v18871_v35 }
 0x274   :  { %2872 = vmatpush1.bf16.msra.mxu0 %v16773_v44  ;;  %2903 = vmatprep.mubr.bf16.mxu0 %v18867_v33  ;;  %v16859_v44 = vld [vmem:[#allocation5 + $0x554] ss:$48 sps:$4 sm:$0xff]  }
 0x275   :  { %2958 = vmatpush1.bf16.msra.mxu1 %v16776_v45  ;;  %2989 = vmatprep.mubr.bf16.mxu1 %v18867_v33  ;;  %v16857_v45 = vld [vmem:[#allocation5 + $0x550] ss:$48 sps:$4 sm:$0xff]  }
 0x276   :  { %2873 = vmatprep.subr.bf16.mxu0 %v16781_v46  ;;  %2959 = vmatprep.subr.bf16.mxu1 %v16784_v47  ;;  %v16862_v46 = vld [vmem:[#allocation5 + $0x55c] ss:$48 sps:$4 sm:$0xff]   ;;  %v16860_v47 = vld [vmem:[#allocation5 + $0x558] ss:$48 sps:$4 sm:$0xff]  }
 0x278   :  { %2874 = vmatpush1.bf16.msra.mxu0 %v16779_v49  ;;  %v16865_v49 = vld [vmem:[#allocation5 + $0x5b4] ss:$48 sps:$4 sm:$0xff]  }
 0x279   :  { %2960 = vmatpush1.bf16.msra.mxu1 %v16782_v50  ;;  %2875 = vmatprep.subr.bf16.mxu0 %v16787_v51  ;;  %v16868_v50 = vld [vmem:[#allocation5 + $0x5bc] ss:$48 sps:$4 sm:$0xff]   ;;  %v16863_v51 = vld [vmem:[#allocation5 + $0x5b0] ss:$48 sps:$4 sm:$0xff]  }
 0x27a   :  { %2961 = vmatprep.subr.bf16.mxu1 %v16790_v53  ;;  %v16866_v53 = vld [vmem:[#allocation5 + $0x5b8] ss:$48 sps:$4 sm:$0xff]  }
 0x27c   :  { %2876 = vmatpush1.bf16.msra.mxu0 %v16785_v59  ;;  %v16871_v59 = vld [vmem:[#allocation5 + $0x614] ss:$48 sps:$4 sm:$0xff]  }
 0x27d   :  { %2962 = vmatpush1.bf16.msra.mxu1 %v16788_v61  ;;  %2877 = vmatprep.subr.bf16.mxu0 %v16793_v63  ;;  %v16874_v61 = vld [vmem:[#allocation5 + $0x61c] ss:$48 sps:$4 sm:$0xff]   ;;  %v16869_v63 = vld [vmem:[#allocation5 + $0x610] ss:$48 sps:$4 sm:$0xff]  }
 0x27e   :  { %2963 = vmatprep.subr.bf16.mxu1 %v16796_v4  ;;  %v16877_v4 = vld [vmem:[#allocation5 + $0x674] ss:$48 sps:$4 sm:$0xff]  }
 0x280   :  { %2878 = vmatpush1.bf16.msra.mxu0 %v16791_v1  ;;  %v16872_v1 = vld [vmem:[#allocation5 + $0x618] ss:$48 sps:$4 sm:$0xff]  }
 0x281   :  { %2964 = vmatpush1.bf16.msra.mxu1 %v16794_v6  ;;  %2879 = vmatprep.subr.bf16.mxu0 %v16799_v7  ;;  %v16880_v6 = vld [vmem:[#allocation5 + $0x67c] ss:$48 sps:$4 sm:$0xff]   ;;  %v16875_v7 = vld [vmem:[#allocation5 + $0x670] ss:$48 sps:$4 sm:$0xff]  }
 0x282   :  { %2965 = vmatprep.subr.bf16.mxu1 %v16802_v10  ;;  %v16883_v10 = vld [vmem:[#allocation5 + $0x6d4] ss:$48 sps:$4 sm:$0xff]  }
 0x284   :  { %2880 = vmatpush1.bf16.msra.mxu0 %v16797_v8  ;;  %v16878_v8 = vld [vmem:[#allocation5 + $0x678] ss:$48 sps:$4 sm:$0xff]  }
 0x285   :  { %2966 = vmatpush1.bf16.msra.mxu1 %v16800_v11  ;;  %2881 = vmatprep.subr.bf16.mxu0 %v16805_v12  ;;  %v16886_v11 = vld [vmem:[#allocation5 + $0x6dc] ss:$48 sps:$4 sm:$0xff]   ;;  %v16881_v12 = vld [vmem:[#allocation5 + $0x6d0] ss:$48 sps:$4 sm:$0xff]  }
 0x286   :  { %2967 = vmatprep.subr.bf16.mxu1 %v16808_v14  ;;  %v16889_v14 = vld [vmem:[#allocation5 + $0x734] ss:$48 sps:$4 sm:$0xff]  }
 0x288   :  { %2882 = vmatpush1.bf16.msra.mxu0 %v16803_v13  ;;  %v16884_v13 = vld [vmem:[#allocation5 + $0x6d8] ss:$48 sps:$4 sm:$0xff]  }
 0x289   :  { %2968 = vmatpush1.bf16.msra.mxu1 %v16806_v15  ;;  %2883 = vmatprep.subr.bf16.mxu0 %v16811_v16  ;;  %v16892_v15 = vld [vmem:[#allocation5 + $0x73c] ss:$48 sps:$4 sm:$0xff]   ;;  %v16887_v16 = vld [vmem:[#allocation5 + $0x730] ss:$48 sps:$4 sm:$0xff]  }
 0x28a   :  { %2969 = vmatprep.subr.bf16.mxu1 %v16814_v55  ;;  %v16895_v55 = vld [vmem:[#allocation5 + $0x794] ss:$48 sps:$4 sm:$0xff]  }
 0x28c   :  { %2884 = vmatpush1.bf16.msra.mxu0 %v16809_v17  ;;  %v16890_v17 = vld [vmem:[#allocation5 + $0x738] ss:$48 sps:$4 sm:$0xff]  }
 0x28d   :  { %2970 = vmatpush1.bf16.msra.mxu1 %v16812_v18  ;;  %2885 = vmatprep.subr.bf16.mxu0 %v16817_v54  ;;  %v16898_v18 = vld [vmem:[#allocation5 + $0x79c] ss:$48 sps:$4 sm:$0xff]   ;;  %v16893_v54 = vld [vmem:[#allocation5 + $0x790] ss:$48 sps:$4 sm:$0xff]  }
 0x28e   :  { %2971 = vmatprep.subr.bf16.mxu1 %v16820_v56  ;;  %v16901_v56 = vld [vmem:[#allocation5 + $0x7f4] ss:$48 sps:$4 sm:$0xff]  }
 0x290   :  { %2886 = vmatpush1.bf16.msra.mxu0 %v16815_v19  ;;  %v16896_v19 = vld [vmem:[#allocation5 + $0x798] ss:$48 sps:$4 sm:$0xff]  }
 0x291   :  { %2972 = vmatpush1.bf16.msra.mxu1 %v16818_v20  ;;  %2887 = vmatprep.subr.bf16.mxu0 %v16823_v21  ;;  %v16904_v20 = vld [vmem:[#allocation5 + $0x7fc] ss:$48 sps:$4 sm:$0xff]   ;;  %v16899_v21 = vld [vmem:[#allocation5 + $0x7f0] ss:$48 sps:$4 sm:$0xff]  }
 0x292   :  { %2973 = vmatprep.subr.bf16.mxu1 %v16826_v23  ;;  %v16907_v23 = vld [vmem:[#allocation5 + $0x854] ss:$48 sps:$4 sm:$0xff]  }
 0x294   :  { %2888 = vmatpush1.bf16.msra.mxu0 %v16821_v22  ;;  %v16902_v22 = vld [vmem:[#allocation5 + $0x7f8] ss:$48 sps:$4 sm:$0xff]  }
 0x295   :  { %2974 = vmatpush1.bf16.msra.mxu1 %v16824_v24  ;;  %2889 = vmatprep.subr.bf16.mxu0 %v16829_v25  ;;  %v16910_v24 = vld [vmem:[#allocation5 + $0x85c] ss:$48 sps:$4 sm:$0xff]   ;;  %v16905_v25 = vld [vmem:[#allocation5 + $0x850] ss:$48 sps:$4 sm:$0xff]  }
 0x296   :  { %2975 = vmatprep.subr.bf16.mxu1 %v16832_v58  ;;  %v16913_v58 = vld [vmem:[#allocation5 + $0x8b4] ss:$48 sps:$4 sm:$0xff]  }
 0x298   :  { %2890 = vmatpush1.bf16.msra.mxu0 %v16827_v26  ;;  %v16908_v26 = vld [vmem:[#allocation5 + $0x858] ss:$48 sps:$4 sm:$0xff]  }
 0x299   :  { %2976 = vmatpush1.bf16.msra.mxu1 %v16830_v27  ;;  %2891 = vmatprep.subr.bf16.mxu0 %v16835_v28  ;;  %v16916_v27 = vld [vmem:[#allocation5 + $0x8bc] ss:$48 sps:$4 sm:$0xff]   ;;  %v16911_v28 = vld [vmem:[#allocation5 + $0x8b0] ss:$48 sps:$4 sm:$0xff]  }
 0x29a   :  { %2977 = vmatprep.subr.bf16.mxu1 %v16838_v2  ;;  %v16919_v2 = vld [vmem:[#allocation5 + $0x914] ss:$48 sps:$4 sm:$0xff]  }
 0x29c   :  { %2892 = vmatpush1.bf16.msra.mxu0 %v16833_v29  ;;  %v16914_v29 = vld [vmem:[#allocation5 + $0x8b8] ss:$48 sps:$4 sm:$0xff]  }
 0x29d   :  { %2978 = vmatpush1.bf16.msra.mxu1 %v16836_v30  ;;  %2893 = vmatprep.subr.bf16.mxu0 %v16841_v31  ;;  %v16922_v30 = vld [vmem:[#allocation5 + $0x91c] ss:$48 sps:$4 sm:$0xff]   ;;  %v16917_v31 = vld [vmem:[#allocation5 + $0x910] ss:$48 sps:$4 sm:$0xff]  }
 0x29e   :  { %2979 = vmatprep.subr.bf16.mxu1 %v16844_v32  ;;  %v16925_v32 = vld [vmem:[#allocation5 + $0x974] ss:$48 sps:$4 sm:$0xff]  }
 0x2a0   :  { %2894 = vmatpush1.bf16.msra.mxu0 %v16839_v0  ;;  %v16920_v0 = vld [vmem:[#allocation5 + $0x918] ss:$48 sps:$4 sm:$0xff]  }
 0x2a1   :  { %2980 = vmatpush1.bf16.msra.mxu1 %v16842_v3  ;;  %2895 = vmatprep.subr.bf16.mxu0 %v16847_v34  ;;  %v16928_v3 = vld [vmem:[#allocation5 + $0x97c] ss:$48 sps:$4 sm:$0xff]   ;;  %v16923_v34 = vld [vmem:[#allocation5 + $0x970] ss:$48 sps:$4 sm:$0xff]  }
 0x2a2   :  { %2981 = vmatprep.subr.bf16.mxu1 %v16850_v37  ;;  %v16931_v37 = vld [vmem:[#allocation5 + $0x9d4] ss:$48 sps:$4 sm:$0xff]  }
 0x2a4   :  { %2896 = vmatpush1.bf16.msra.mxu0 %v16845_v36  ;;  %v16926_v36 = vld [vmem:[#allocation5 + $0x978] ss:$48 sps:$4 sm:$0xff]  }
 0x2a5   :  { %2982 = vmatpush1.bf16.msra.mxu1 %v16848_v38  ;;  %2897 = vmatprep.subr.bf16.mxu0 %v16853_v40  ;;  %v16934_v38 = vld [vmem:[#allocation5 + $0x9dc] ss:$48 sps:$4 sm:$0xff]   ;;  %v16929_v40 = vld [vmem:[#allocation5 + $0x9d0] ss:$48 sps:$4 sm:$0xff]  }
 0x2a6   :  { %2983 = vmatprep.subr.bf16.mxu1 %v16856_v42  ;;  %v16937_v42 = vld [vmem:[#allocation5 + $0xa34] ss:$48 sps:$4 sm:$0xff]  }
 0x2a8   :  { %2898 = vmatpush1.bf16.msra.mxu0 %v16851_v41  ;;  %v16932_v41 = vld [vmem:[#allocation5 + $0x9d8] ss:$48 sps:$4 sm:$0xff]  }
 0x2a9   :  { %2984 = vmatpush1.bf16.msra.mxu1 %v16854_v43  ;;  %2899 = vmatprep.subr.bf16.mxu0 %v16859_v44  ;;  %v16940_v43 = vld [vmem:[#allocation5 + $0xa3c] ss:$48 sps:$4 sm:$0xff]   ;;  %v16935_v44 = vld [vmem:[#allocation5 + $0xa30] ss:$48 sps:$4 sm:$0xff]  }
 0x2aa   :  { %2985 = vmatprep.subr.bf16.mxu1 %v16862_v46  ;;  %v16943_v46 = vld [vmem:[#allocation5 + $0xa94] ss:$48 sps:$4 sm:$0xff]  }
 0x2ac   :  { %2900 = vmatpush1.bf16.msra.mxu0 %v16857_v45  ;;  %v16938_v45 = vld [vmem:[#allocation5 + $0xa38] ss:$48 sps:$4 sm:$0xff]  }
 0x2ad   :  { %2986 = vmatpush1.bf16.msra.mxu1 %v16860_v47  ;;  %2901 = vmatprep.subr.bf16.mxu0 %v16865_v49  ;;  %v16946_v47 = vld [vmem:[#allocation5 + $0xa9c] ss:$48 sps:$4 sm:$0xff]   ;;  %v16941_v49 = vld [vmem:[#allocation5 + $0xa90] ss:$48 sps:$4 sm:$0xff]  }
 0x2ae   :  { %2987 = vmatprep.subr.bf16.mxu1 %v16868_v50  ;;  %v16944_v50 = vld [vmem:[#allocation5 + $0xa98] ss:$48 sps:$4 sm:$0xff]  }
 0x2b0   :  { %2902 = vmatpush1.bf16.msra.mxu0 %v16863_v51  ;;  %v16949_v51 = vld [vmem:[#allocation5 + $0xaf4] ss:$48 sps:$4 sm:$0xff]  }
 0x2b1   :  { %2988 = vmatpush1.bf16.msra.mxu1 %v16866_v53  ;;  %2914 = vmatprep.subr.bf16.mxu0 %v16871_v59  ;;  %v16952_v53 = vld [vmem:[#allocation5 + $0xafc] ss:$48 sps:$4 sm:$0xff]   ;;  %v16947_v59 = vld [vmem:[#allocation5 + $0xaf0] ss:$48 sps:$4 sm:$0xff]  }
 0x2b2   :  { %3000 = vmatprep.subr.bf16.mxu1 %v16874_v61  ;;  %v16950_v61 = vld [vmem:[#allocation5 + $0xaf8] ss:$48 sps:$4 sm:$0xff]  }
 0x2b3   :  { %2904 = vmatmul.mubr.bf16.vlgmr.msra.gmra.mrb[4].mxu0 %v18869_v9 }
 0x2b4   :  { %2990 = vmatmul.mubr.bf16.vlgmr.msra.gmra.mrb[4].mxu1 %v18869_v9  ;;  %2915 = vmatpush1.bf16.msra.mxu0 %v16869_v63  ;;  %v16955_v63 = vld [vmem:[#allocation5 + $0xb54] ss:$48 sps:$4 sm:$0xff]  }
 0x2b5   :  { %2946 = vmatprep.mubr.bf16.mxu0 %v18877_v39  ;;  %3001 = vmatpush1.bf16.msra.mxu1 %v16872_v1  ;;  %v16958_v1 = vld [vmem:[#allocation5 + $0xb5c] ss:$48 sps:$4 sm:$0xff]  }
 0x2b6   :  { %3032 = vmatprep.mubr.bf16.mxu1 %v18877_v39  ;;  %2916 = vmatprep.subr.bf16.mxu0 %v16877_v4  ;;  %v16953_v4 = vld [vmem:[#allocation5 + $0xb50] ss:$48 sps:$4 sm:$0xff]  }
 0x2b7   :  { %3002 = vmatprep.subr.bf16.mxu1 %v16880_v6  ;;  %v16956_v6 = vld [vmem:[#allocation5 + $0xb58] ss:$48 sps:$4 sm:$0xff]  }
 0x2b8   :  { %2917 = vmatpush1.bf16.msra.mxu0 %v16875_v7  ;;  %v16961_v7 = vld [vmem:[#allocation5 + $0xbb4] ss:$48 sps:$4 sm:$0xff]  }
 0x2b9   :  { %3003 = vmatpush1.bf16.msra.mxu1 %v16878_v8  ;;  %2918 = vmatprep.subr.bf16.mxu0 %v16883_v10  ;;  %v16964_v8 = vld [vmem:[#allocation5 + $0xbbc] ss:$48 sps:$4 sm:$0xff]   ;;  %v16959_v10 = vld [vmem:[#allocation5 + $0xbb0] ss:$48 sps:$4 sm:$0xff]  }
 0x2ba   :  { %3004 = vmatprep.subr.bf16.mxu1 %v16886_v11  ;;  %v16962_v11 = vld [vmem:[#allocation5 + $0xbb8] ss:$48 sps:$4 sm:$0xff]  }
 0x2bc   :  { %2919 = vmatpush1.bf16.msra.mxu0 %v16881_v12  ;;  %v16967_v12 = vld [vmem:[#allocation5 + $0x24] ss:$48 sps:$4 sm:$0xff]  }
 0x2bd   :  { %3005 = vmatpush1.bf16.msra.mxu1 %v16884_v13  ;;  %2920 = vmatprep.subr.bf16.mxu0 %v16889_v14  ;;  %v16970_v13 = vld [vmem:[#allocation5 + $0x2c] ss:$48 sps:$4 sm:$0xff]   ;;  %v16965_v14 = vld [vmem:[#allocation5 + $0x20] ss:$48 sps:$4 sm:$0xff]  }
 0x2be   :  { %3006 = vmatprep.subr.bf16.mxu1 %v16892_v15  ;;  %v16968_v15 = vld [vmem:[#allocation5 + $0x28] ss:$48 sps:$4 sm:$0xff]  }
 0x2c0   :  { %2921 = vmatpush1.bf16.msra.mxu0 %v16887_v16  ;;  %v16973_v16 = vld [vmem:[#allocation5 + $0x84] ss:$48 sps:$4 sm:$0xff]  }
 0x2c1   :  { %3007 = vmatpush1.bf16.msra.mxu1 %v16890_v17  ;;  %2922 = vmatprep.subr.bf16.mxu0 %v16895_v55  ;;  %v16976_v17 = vld [vmem:[#allocation5 + $0x8c] ss:$48 sps:$4 sm:$0xff]   ;;  %v16971_v55 = vld [vmem:[#allocation5 + $0x80] ss:$48 sps:$4 sm:$0xff]  }
 0x2c2   :  { %3008 = vmatprep.subr.bf16.mxu1 %v16898_v18  ;;  %v16974_v18 = vld [vmem:[#allocation5 + $0x88] ss:$48 sps:$4 sm:$0xff]  }
 0x2c4   :  { %2923 = vmatpush1.bf16.msra.mxu0 %v16893_v54  ;;  %v16979_v54 = vld [vmem:[#allocation5 + $0xe4] ss:$48 sps:$4 sm:$0xff]  }
 0x2c5   :  { %3009 = vmatpush1.bf16.msra.mxu1 %v16896_v19  ;;  %2924 = vmatprep.subr.bf16.mxu0 %v16901_v56  ;;  %v16982_v19 = vld [vmem:[#allocation5 + $0xec] ss:$48 sps:$4 sm:$0xff]   ;;  %v16977_v56 = vld [vmem:[#allocation5 + $0xe0] ss:$48 sps:$4 sm:$0xff]  }
 0x2c6   :  { %3010 = vmatprep.subr.bf16.mxu1 %v16904_v20  ;;  %v16980_v20 = vld [vmem:[#allocation5 + $0xe8] ss:$48 sps:$4 sm:$0xff]  }
 0x2c8   :  { %2925 = vmatpush1.bf16.msra.mxu0 %v16899_v21  ;;  %v16985_v21 = vld [vmem:[#allocation5 + $0x144] ss:$48 sps:$4 sm:$0xff]  }
 0x2c9   :  { %3011 = vmatpush1.bf16.msra.mxu1 %v16902_v22  ;;  %2926 = vmatprep.subr.bf16.mxu0 %v16907_v23  ;;  %v16988_v22 = vld [vmem:[#allocation5 + $0x14c] ss:$48 sps:$4 sm:$0xff]   ;;  %v16983_v23 = vld [vmem:[#allocation5 + $0x140] ss:$48 sps:$4 sm:$0xff]  }
 0x2ca   :  { %3012 = vmatprep.subr.bf16.mxu1 %v16910_v24  ;;  %v16986_v24 = vld [vmem:[#allocation5 + $0x148] ss:$48 sps:$4 sm:$0xff]  }
 0x2cc   :  { %2927 = vmatpush1.bf16.msra.mxu0 %v16905_v25  ;;  %v16991_v25 = vld [vmem:[#allocation5 + $0x1a4] ss:$48 sps:$4 sm:$0xff]  }
 0x2cd   :  { %3013 = vmatpush1.bf16.msra.mxu1 %v16908_v26  ;;  %2928 = vmatprep.subr.bf16.mxu0 %v16913_v58  ;;  %v16994_v26 = vld [vmem:[#allocation5 + $0x1ac] ss:$48 sps:$4 sm:$0xff]   ;;  %v16992_v58 = vld [vmem:[#allocation5 + $0x1a8] ss:$48 sps:$4 sm:$0xff]  }
 0x2ce   :  { %3014 = vmatprep.subr.bf16.mxu1 %v16916_v27  ;;  %v16997_v27 = vld [vmem:[#allocation5 + $0x204] ss:$48 sps:$4 sm:$0xff]  }
 0x2d0   :  { %2929 = vmatpush1.bf16.msra.mxu0 %v16911_v28  ;;  %v17000_v28 = vld [vmem:[#allocation5 + $0x20c] ss:$48 sps:$4 sm:$0xff]  }
 0x2d1   :  { %3015 = vmatpush1.bf16.msra.mxu1 %v16914_v29  ;;  %2930 = vmatprep.subr.bf16.mxu0 %v16919_v2  ;;  %v16995_v29 = vld [vmem:[#allocation5 + $0x200] ss:$48 sps:$4 sm:$0xff]   ;;  %v16998_v2 = vld [vmem:[#allocation5 + $0x208] ss:$48 sps:$4 sm:$0xff]  }
 0x2d2   :  { %3016 = vmatprep.subr.bf16.mxu1 %v16922_v30  ;;  %v17003_v30 = vld [vmem:[#allocation5 + $0x264] ss:$48 sps:$4 sm:$0xff]  }
 0x2d4   :  { %2931 = vmatpush1.bf16.msra.mxu0 %v16917_v31  ;;  %v17006_v31 = vld [vmem:[#allocation5 + $0x26c] ss:$48 sps:$4 sm:$0xff]  }
 0x2d5   :  { %3017 = vmatpush1.bf16.msra.mxu1 %v16920_v0  ;;  %2932 = vmatprep.subr.bf16.mxu0 %v16925_v32  ;;  %v17001_v0 = vld [vmem:[#allocation5 + $0x260] ss:$48 sps:$4 sm:$0xff]   ;;  %v17004_v32 = vld [vmem:[#allocation5 + $0x268] ss:$48 sps:$4 sm:$0xff]  }
 0x2d6   :  { %3018 = vmatprep.subr.bf16.mxu1 %v16928_v3  ;;  %v17009_v3 = vld [vmem:[#allocation5 + $0x2c4] ss:$48 sps:$4 sm:$0xff]  }
 0x2d8   :  { %2933 = vmatpush1.bf16.msra.mxu0 %v16923_v34  ;;  %v17012_v34 = vld [vmem:[#allocation5 + $0x2cc] ss:$48 sps:$4 sm:$0xff]  }
 0x2d9   :  { %3019 = vmatpush1.bf16.msra.mxu1 %v16926_v36  ;;  %2934 = vmatprep.subr.bf16.mxu0 %v16931_v37  ;;  %v17007_v36 = vld [vmem:[#allocation5 + $0x2c0] ss:$48 sps:$4 sm:$0xff]   ;;  %v17010_v37 = vld [vmem:[#allocation5 + $0x2c8] ss:$48 sps:$4 sm:$0xff]  }
 0x2da   :  { %3020 = vmatprep.subr.bf16.mxu1 %v16934_v38  ;;  %v17015_v38 = vld [vmem:[#allocation5 + $0x324] ss:$48 sps:$4 sm:$0xff]  }
 0x2dc   :  { %2935 = vmatpush1.bf16.msra.mxu0 %v16929_v40  ;;  %v17018_v40 = vld [vmem:[#allocation5 + $0x32c] ss:$48 sps:$4 sm:$0xff]  }
 0x2dd   :  { %3021 = vmatpush1.bf16.msra.mxu1 %v16932_v41  ;;  %2936 = vmatprep.subr.bf16.mxu0 %v16937_v42  ;;  %v17013_v41 = vld [vmem:[#allocation5 + $0x320] ss:$48 sps:$4 sm:$0xff]   ;;  %v17016_v42 = vld [vmem:[#allocation5 + $0x328] ss:$48 sps:$4 sm:$0xff]  }
 0x2de   :  { %3022 = vmatprep.subr.bf16.mxu1 %v16940_v43  ;;  %v17021_v43 = vld [vmem:[#allocation5 + $0x384] ss:$48 sps:$4 sm:$0xff]  }
 0x2e0   :  { %2937 = vmatpush1.bf16.msra.mxu0 %v16935_v44  ;;  %v17024_v44 = vld [vmem:[#allocation5 + $0x38c] ss:$48 sps:$4 sm:$0xff]  }
 0x2e1   :  { %3023 = vmatpush1.bf16.msra.mxu1 %v16938_v45  ;;  %2938 = vmatprep.subr.bf16.mxu0 %v16943_v46  ;;  %v17019_v45 = vld [vmem:[#allocation5 + $0x380] ss:$48 sps:$4 sm:$0xff]   ;;  %v17022_v46 = vld [vmem:[#allocation5 + $0x388] ss:$48 sps:$4 sm:$0xff]  }
 0x2e2   :  { %3024 = vmatprep.subr.bf16.mxu1 %v16946_v47  ;;  %v17027_v47 = vld [vmem:[#allocation5 + $0x3e4] ss:$48 sps:$4 sm:$0xff]  }
 0x2e4   :  { %2939 = vmatpush1.bf16.msra.mxu0 %v16941_v49  ;;  %v17030_v49 = vld [vmem:[#allocation5 + $0x3ec] ss:$48 sps:$4 sm:$0xff]  }
 0x2e5   :  { %3025 = vmatpush1.bf16.msra.mxu1 %v16944_v50  ;;  %2940 = vmatprep.subr.bf16.mxu0 %v16949_v51  ;;  %v17025_v50 = vld [vmem:[#allocation5 + $0x3e0] ss:$48 sps:$4 sm:$0xff]   ;;  %v17028_v51 = vld [vmem:[#allocation5 + $0x3e8] ss:$48 sps:$4 sm:$0xff]  }
 0x2e6   :  { %3026 = vmatprep.subr.bf16.mxu1 %v16952_v53  ;;  %v17033_v53 = vld [vmem:[#allocation5 + $0x444] ss:$48 sps:$4 sm:$0xff]  }
 0x2e8   :  { %2941 = vmatpush1.bf16.msra.mxu0 %v16947_v59  ;;  %v17036_v59 = vld [vmem:[#allocation5 + $0x44c] ss:$48 sps:$4 sm:$0xff]  }
 0x2e9   :  { %3027 = vmatpush1.bf16.msra.mxu1 %v16950_v61  ;;  %2942 = vmatprep.subr.bf16.mxu0 %v16955_v63  ;;  %v17031_v61 = vld [vmem:[#allocation5 + $0x440] ss:$48 sps:$4 sm:$0xff]   ;;  %v17034_v63 = vld [vmem:[#allocation5 + $0x448] ss:$48 sps:$4 sm:$0xff]  }
 0x2ea   :  { %3028 = vmatprep.subr.bf16.mxu1 %v16958_v1  ;;  %v17039_v1 = vld [vmem:[#allocation5 + $0x4a4] ss:$48 sps:$4 sm:$0xff]  }
 0x2ec   :  { %2943 = vmatpush1.bf16.msra.mxu0 %v16953_v4  ;;  %v17042_v4 = vld [vmem:[#allocation5 + $0x4ac] ss:$48 sps:$4 sm:$0xff]  }
 0x2ed   :  { %3029 = vmatpush1.bf16.msra.mxu1 %v16956_v6  ;;  %2944 = vmatprep.subr.bf16.mxu0 %v16961_v7  ;;  %v17037_v6 = vld [vmem:[#allocation5 + $0x4a0] ss:$48 sps:$4 sm:$0xff]   ;;  %v17040_v7 = vld [vmem:[#allocation5 + $0x4a8] ss:$48 sps:$4 sm:$0xff]  }
 0x2ee   :  { %3030 = vmatprep.subr.bf16.mxu1 %v16964_v8  ;;  %v17045_v8 = vld [vmem:[#allocation5 + $0x504] ss:$48 sps:$4 sm:$0xff]  }
 0x2f0   :  { %2945 = vmatpush1.bf16.msra.mxu0 %v16959_v10  ;;  %v17048_v10 = vld [vmem:[#allocation5 + $0x50c] ss:$48 sps:$4 sm:$0xff]  }
 0x2f1   :  { %3031 = vmatpush1.bf16.msra.mxu1 %v16962_v11  ;;  %3043 = vmatprep.subr.bf16.mxu0 %v16967_v12  ;;  %v17043_v11 = vld [vmem:[#allocation5 + $0x500] ss:$48 sps:$4 sm:$0xff]   ;;  %v17046_v12 = vld [vmem:[#allocation5 + $0x508] ss:$48 sps:$4 sm:$0xff]  }
 0x2f2   :  { %3129 = vmatprep.subr.bf16.mxu1 %v16970_v13  ;;  %v17051_v13 = vld [vmem:[#allocation5 + $0x564] ss:$48 sps:$4 sm:$0xff]  }
 0x2f3   :  { %2947 = vmatmul.mubr.bf16.vlgmr.msra.gmra.mrb[4].mxu0 %v18871_v35 }
 0x2f4   :  { %3033 = vmatmul.mubr.bf16.vlgmr.msra.gmra.mrb[4].mxu1 %v18871_v35  ;;  %3044 = vmatpush1.bf16.msra.mxu0 %v16965_v14  ;;  %v17054_v14 = vld [vmem:[#allocation5 + $0x56c] ss:$48 sps:$4 sm:$0xff]  }
 0x2f5   :  { %3075 = vmatprep.mubr.bf16.mxu0 %v18867_v33  ;;  %3130 = vmatpush1.bf16.msra.mxu1 %v16968_v15  ;;  %v17049_v15 = vld [vmem:[#allocation5 + $0x560] ss:$48 sps:$4 sm:$0xff]  }
 0x2f6   :  { %3161 = vmatprep.mubr.bf16.mxu1 %v18867_v33  ;;  %3045 = vmatprep.subr.bf16.mxu0 %v16973_v16  ;;  %v16989_v33 = vld [vmem:[#allocation5 + $0x1a0] ss:$48 sps:$4 sm:$0xff]   ;;  %v17052_v16 = vld [vmem:[#allocation5 + $0x568] ss:$48 sps:$4 sm:$0xff]  }
 0x2f7   :  { %3131 = vmatprep.subr.bf16.mxu1 %v16976_v17  ;;  %v17057_v17 = vld [vmem:[#allocation5 + $0x5c4] ss:$48 sps:$4 sm:$0xff]  }
 0x2f8   :  { %3046 = vmatpush1.bf16.msra.mxu0 %v16971_v55  ;;  %v17060_v55 = vld [vmem:[#allocation5 + $0x5cc] ss:$48 sps:$4 sm:$0xff]  }
 0x2f9   :  { %3132 = vmatpush1.bf16.msra.mxu1 %v16974_v18  ;;  %3047 = vmatprep.subr.bf16.mxu0 %v16979_v54  ;;  %v17055_v18 = vld [vmem:[#allocation5 + $0x5c0] ss:$48 sps:$4 sm:$0xff]   ;;  %v17058_v54 = vld [vmem:[#allocation5 + $0x5c8] ss:$48 sps:$4 sm:$0xff]  }
 0x2fa   :  { %3133 = vmatprep.subr.bf16.mxu1 %v16982_v19  ;;  %v17063_v19 = vld [vmem:[#allocation5 + $0x624] ss:$48 sps:$4 sm:$0xff]  }
 0x2fc   :  { %3048 = vmatpush1.bf16.msra.mxu0 %v16977_v56  ;;  %v17066_v56 = vld [vmem:[#allocation5 + $0x62c] ss:$48 sps:$4 sm:$0xff]  }
 0x2fd   :  { %3134 = vmatpush1.bf16.msra.mxu1 %v16980_v20  ;;  %3049 = vmatprep.subr.bf16.mxu0 %v16985_v21  ;;  %v17061_v20 = vld [vmem:[#allocation5 + $0x620] ss:$48 sps:$4 sm:$0xff]   ;;  %v17064_v21 = vld [vmem:[#allocation5 + $0x628] ss:$48 sps:$4 sm:$0xff]  }
 0x2fe   :  { %3135 = vmatprep.subr.bf16.mxu1 %v16988_v22  ;;  %v17069_v22 = vld [vmem:[#allocation5 + $0x684] ss:$48 sps:$4 sm:$0xff]  }
 0x300   :  { %3050 = vmatpush1.bf16.msra.mxu0 %v16983_v23  ;;  %v17072_v23 = vld [vmem:[#allocation5 + $0x68c] ss:$48 sps:$4 sm:$0xff]  }
 0x301   :  { %3136 = vmatpush1.bf16.msra.mxu1 %v16986_v24  ;;  %3051 = vmatprep.subr.bf16.mxu0 %v16991_v25  ;;  %v17067_v24 = vld [vmem:[#allocation5 + $0x680] ss:$48 sps:$4 sm:$0xff]   ;;  %v17070_v25 = vld [vmem:[#allocation5 + $0x688] ss:$48 sps:$4 sm:$0xff]  }
 0x302   :  { %3137 = vmatprep.subr.bf16.mxu1 %v16994_v26  ;;  %v17075_v26 = vld [vmem:[#allocation5 + $0x6e4] ss:$48 sps:$4 sm:$0xff]  }
 0x304   :  { %3052 = vmatpush1.bf16.msra.mxu0 %v16989_v33  ;;  %v17078_v33 = vld [vmem:[#allocation5 + $0x6ec] ss:$48 sps:$4 sm:$0xff]  }
 0x305   :  { %3138 = vmatpush1.bf16.msra.mxu1 %v16992_v58  ;;  %3053 = vmatprep.subr.bf16.mxu0 %v16997_v27  ;;  %v17073_v58 = vld [vmem:[#allocation5 + $0x6e0] ss:$48 sps:$4 sm:$0xff]   ;;  %v17076_v27 = vld [vmem:[#allocation5 + $0x6e8] ss:$48 sps:$4 sm:$0xff]  }
 0x306   :  { %3139 = vmatprep.subr.bf16.mxu1 %v17000_v28  ;;  %v17081_v28 = vld [vmem:[#allocation5 + $0x744] ss:$48 sps:$4 sm:$0xff]  }
 0x308   :  { %3054 = vmatpush1.bf16.msra.mxu0 %v16995_v29  ;;  %v17079_v29 = vld [vmem:[#allocation5 + $0x740] ss:$48 sps:$4 sm:$0xff]  }
 0x309   :  { %3140 = vmatpush1.bf16.msra.mxu1 %v16998_v2  ;;  %3055 = vmatprep.subr.bf16.mxu0 %v17003_v30  ;;  %v17082_v2 = vld [vmem:[#allocation5 + $0x748] ss:$48 sps:$4 sm:$0xff]   ;;  %v17087_v30 = vld [vmem:[#allocation5 + $0x7a4] ss:$48 sps:$4 sm:$0xff]  }
 0x30a   :  { %3141 = vmatprep.subr.bf16.mxu1 %v17006_v31  ;;  %v17090_v31 = vld [vmem:[#allocation5 + $0x7ac] ss:$48 sps:$4 sm:$0xff]  }
 0x30c   :  { %3056 = vmatpush1.bf16.msra.mxu0 %v17001_v0  ;;  %v17088_v0 = vld [vmem:[#allocation5 + $0x7a8] ss:$48 sps:$4 sm:$0xff]  }
 0x30d   :  { %3142 = vmatpush1.bf16.msra.mxu1 %v17004_v32  ;;  %3057 = vmatprep.subr.bf16.mxu0 %v17009_v3  ;;  %v17093_v32 = vld [vmem:[#allocation5 + $0x804] ss:$48 sps:$4 sm:$0xff]   ;;  %v17096_v3 = vld [vmem:[#allocation5 + $0x80c] ss:$48 sps:$4 sm:$0xff]  }
 0x30e   :  { %3143 = vmatprep.subr.bf16.mxu1 %v17012_v34  ;;  %v17091_v34 = vld [vmem:[#allocation5 + $0x800] ss:$48 sps:$4 sm:$0xff]  }
 0x310   :  { %3058 = vmatpush1.bf16.msra.mxu0 %v17007_v36  ;;  %v17094_v36 = vld [vmem:[#allocation5 + $0x808] ss:$48 sps:$4 sm:$0xff]  }
 0x311   :  { %3144 = vmatpush1.bf16.msra.mxu1 %v17010_v37  ;;  %3059 = vmatprep.subr.bf16.mxu0 %v17015_v38  ;;  %v17099_v37 = vld [vmem:[#allocation5 + $0x864] ss:$48 sps:$4 sm:$0xff]  }
 0x312   :  { %3145 = vmatprep.subr.bf16.mxu1 %v17018_v40 }
 0x314   :  { %3060 = vmatpush1.bf16.msra.mxu0 %v17013_v41  ;;  %v17102_v41 = vld [vmem:[#allocation5 + $0x86c] ss:$48 sps:$4 sm:$0xff]  }
 0x315   :  { %3146 = vmatpush1.bf16.msra.mxu1 %v17016_v42  ;;  %3061 = vmatprep.subr.bf16.mxu0 %v17021_v43 }
 0x316   :  { %3147 = vmatprep.subr.bf16.mxu1 %v17024_v44 }
 0x318   :  { %3062 = vmatpush1.bf16.msra.mxu0 %v17019_v45 }
 0x319   :  { %3148 = vmatpush1.bf16.msra.mxu1 %v17022_v46  ;;  %3063 = vmatprep.subr.bf16.mxu0 %v17027_v47  ;;  %v17097_v46 = vld [vmem:[#allocation5 + $0x860] ss:$48 sps:$4 sm:$0xff]  }
 0x31a   :  { %3149 = vmatprep.subr.bf16.mxu1 %v17030_v49 }
 0x31c   :  { %3064 = vmatpush1.bf16.msra.mxu0 %v17025_v50  ;;  %v17100_v50 = vld [vmem:[#allocation5 + $0x868] ss:$48 sps:$4 sm:$0xff]  }
 0x31d   :  { %3150 = vmatpush1.bf16.msra.mxu1 %v17028_v51  ;;  %3065 = vmatprep.subr.bf16.mxu0 %v17033_v53  ;;  %v17105_v51 = vld [vmem:[#allocation5 + $0x8c4] ss:$48 sps:$4 sm:$0xff]   ;;  %v17108_v53 = vld [vmem:[#allocation5 + $0x8cc] ss:$48 sps:$4 sm:$0xff]  }
 0x31e   :  { %3151 = vmatprep.subr.bf16.mxu1 %v17036_v59  ;;  %v17103_v59 = vld [vmem:[#allocation5 + $0x8c0] ss:$48 sps:$4 sm:$0xff]  }
 0x320   :  { %3066 = vmatpush1.bf16.msra.mxu0 %v17031_v61  ;;  %v17106_v61 = vld [vmem:[#allocation5 + $0x8c8] ss:$48 sps:$4 sm:$0xff]  }
 0x321   :  { %3152 = vmatpush1.bf16.msra.mxu1 %v17034_v63  ;;  %3067 = vmatprep.subr.bf16.mxu0 %v17039_v1  ;;  %v17111_v63 = vld [vmem:[#allocation5 + $0x924] ss:$48 sps:$4 sm:$0xff]   ;;  %v17114_v1 = vld [vmem:[#allocation5 + $0x92c] ss:$48 sps:$4 sm:$0xff]  }
 0x322   :  { %3153 = vmatprep.subr.bf16.mxu1 %v17042_v4  ;;  %v17109_v4 = vld [vmem:[#allocation5 + $0x920] ss:$48 sps:$4 sm:$0xff]  }
 0x324   :  { %3068 = vmatpush1.bf16.msra.mxu0 %v17037_v6  ;;  %v17112_v6 = vld [vmem:[#allocation5 + $0x928] ss:$48 sps:$4 sm:$0xff]  }
 0x325   :  { %3154 = vmatpush1.bf16.msra.mxu1 %v17040_v7  ;;  %3069 = vmatprep.subr.bf16.mxu0 %v17045_v8  ;;  %v17117_v7 = vld [vmem:[#allocation5 + $0x984] ss:$48 sps:$4 sm:$0xff]   ;;  %v17120_v8 = vld [vmem:[#allocation5 + $0x98c] ss:$48 sps:$4 sm:$0xff]  }
 0x326   :  { %3155 = vmatprep.subr.bf16.mxu1 %v17048_v10  ;;  %v17115_v10 = vld [vmem:[#allocation5 + $0x980] ss:$48 sps:$4 sm:$0xff]  }
 0x328   :  { %3070 = vmatpush1.bf16.msra.mxu0 %v17043_v11  ;;  %v17118_v11 = vld [vmem:[#allocation5 + $0x988] ss:$48 sps:$4 sm:$0xff]  }
 0x329   :  { %3156 = vmatpush1.bf16.msra.mxu1 %v17046_v12  ;;  %3071 = vmatprep.subr.bf16.mxu0 %v17051_v13  ;;  %v17123_v12 = vld [vmem:[#allocation5 + $0x9e4] ss:$48 sps:$4 sm:$0xff]   ;;  %v17126_v13 = vld [vmem:[#allocation5 + $0x9ec] ss:$48 sps:$4 sm:$0xff]  }
 0x32a   :  { %3157 = vmatprep.subr.bf16.mxu1 %v17054_v14  ;;  %v17121_v14 = vld [vmem:[#allocation5 + $0x9e0] ss:$48 sps:$4 sm:$0xff]  }
 0x32c   :  { %3072 = vmatpush1.bf16.msra.mxu0 %v17049_v15  ;;  %v17124_v15 = vld [vmem:[#allocation5 + $0x9e8] ss:$48 sps:$4 sm:$0xff]  }
 0x32d   :  { %3158 = vmatpush1.bf16.msra.mxu1 %v17052_v16  ;;  %3073 = vmatprep.subr.bf16.mxu0 %v17057_v17  ;;  %v17129_v16 = vld [vmem:[#allocation5 + $0xa44] ss:$48 sps:$4 sm:$0xff]   ;;  %v17132_v17 = vld [vmem:[#allocation5 + $0xa4c] ss:$48 sps:$4 sm:$0xff]  }
 0x32e   :  { %3159 = vmatprep.subr.bf16.mxu1 %v17060_v55  ;;  %v17127_v55 = vld [vmem:[#allocation5 + $0xa40] ss:$48 sps:$4 sm:$0xff]  }
 0x330   :  { %3074 = vmatpush1.bf16.msra.mxu0 %v17055_v18  ;;  %v17130_v18 = vld [vmem:[#allocation5 + $0xa48] ss:$48 sps:$4 sm:$0xff]  }
 0x331   :  { %3160 = vmatpush1.bf16.msra.mxu1 %v17058_v54  ;;  %3086 = vmatprep.subr.bf16.mxu0 %v17063_v19  ;;  %v17135_v54 = vld [vmem:[#allocation5 + $0xaa4] ss:$48 sps:$4 sm:$0xff]   ;;  %v17138_v19 = vld [vmem:[#allocation5 + $0xaac] ss:$48 sps:$4 sm:$0xff]  }
 0x332   :  { %3172 = vmatprep.subr.bf16.mxu1 %v17066_v56  ;;  %v17133_v56 = vld [vmem:[#allocation5 + $0xaa0] ss:$48 sps:$4 sm:$0xff]  }
 0x333   :  { %3076 = vmatmul.mubr.bf16.vlgmr.msra.gmra.mrb[8].mxu0 %v18869_v9 }
 0x334   :  { %3162 = vmatmul.mubr.bf16.vlgmr.msra.gmra.mrb[8].mxu1 %v18869_v9  ;;  %3087 = vmatpush1.bf16.msra.mxu0 %v17061_v20  ;;  %v17084_v9 = vld [vmem:[#allocation5 + $0x74c] ss:$48 sps:$4 sm:$0xff]   ;;  %v17136_v20 = vld [vmem:[#allocation5 + $0xaa8] ss:$48 sps:$4 sm:$0xff]  }
 0x335   :  { %3118 = vmatprep.mubr.bf16.mxu0 %v18877_v39  ;;  %3173 = vmatpush1.bf16.msra.mxu1 %v17064_v21  ;;  %v17141_v21 = vld [vmem:[#allocation5 + $0xb04] ss:$48 sps:$4 sm:$0xff]  }
 0x336   :  { %3204 = vmatprep.mubr.bf16.mxu1 %v18877_v39  ;;  %3088 = vmatprep.subr.bf16.mxu0 %v17069_v22  ;;  %v17085_v39 = vld [vmem:[#allocation5 + $0x7a0] ss:$48 sps:$4 sm:$0xff]   ;;  %v17144_v22 = vld [vmem:[#allocation5 + $0xb0c] ss:$48 sps:$4 sm:$0xff]  }
 0x337   :  { %3174 = vmatprep.subr.bf16.mxu1 %v17072_v23  ;;  %v17139_v23 = vld [vmem:[#allocation5 + $0xb00] ss:$48 sps:$4 sm:$0xff]  }
 0x338   :  { %3089 = vmatpush1.bf16.msra.mxu0 %v17067_v24  ;;  %v17142_v24 = vld [vmem:[#allocation5 + $0xb08] ss:$48 sps:$4 sm:$0xff]  }
 0x339   :  { %3175 = vmatpush1.bf16.msra.mxu1 %v17070_v25  ;;  %3090 = vmatprep.subr.bf16.mxu0 %v17075_v26  ;;  %v17147_v25 = vld [vmem:[#allocation5 + $0xb64] ss:$48 sps:$4 sm:$0xff]   ;;  %v17150_v26 = vld [vmem:[#allocation5 + $0xb6c] ss:$48 sps:$4 sm:$0xff]  }
 0x33a   :  { %3176 = vmatprep.subr.bf16.mxu1 %v17078_v33  ;;  %v17145_v33 = vld [vmem:[#allocation5 + $0xb60] ss:$48 sps:$4 sm:$0xff]  }
 0x33c   :  { %3091 = vmatpush1.bf16.msra.mxu0 %v17073_v58  ;;  %v17148_v58 = vld [vmem:[#allocation5 + $0xb68] ss:$48 sps:$4 sm:$0xff]  }
 0x33d   :  { %3177 = vmatpush1.bf16.msra.mxu1 %v17076_v27  ;;  %3092 = vmatprep.subr.bf16.mxu0 %v17081_v28  ;;  %v17153_v27 = vld [vmem:[#allocation5 + $0xbc4] ss:$48 sps:$4 sm:$0xff]   ;;  %v17156_v28 = vld [vmem:[#allocation5 + $0xbcc] ss:$48 sps:$4 sm:$0xff]  }
 0x33e   :  { %3178 = vmatprep.subr.bf16.mxu1 %v17084_v9  ;;  %v17151_v9 = vld [vmem:[#allocation5 + $0xbc0] ss:$48 sps:$4 sm:$0xff]  }
 0x340   :  { %3093 = vmatpush1.bf16.msra.mxu0 %v17079_v29  ;;  %v17154_v29 = vld [vmem:[#allocation5 + $0xbc8] ss:$48 sps:$4 sm:$0xff]  }
 0x341   :  { %3179 = vmatpush1.bf16.msra.mxu1 %v17082_v2  ;;  %3094 = vmatprep.subr.bf16.mxu0 %v17087_v30  ;;  %v18548_v2 = vmov 0.0   ;;  %v18922_v30 = vsub.s32 4, %v18837_v52 }
 0x342   :  { %3180 = vmatprep.subr.bf16.mxu1 %v17090_v31  ;;  %v18924_v31 = vld [vmem:[#allocation7] sm:$0xff] }
 0x344   :  { %3095 = vmatpush1.bf16.msra.mxu0 %v17085_v39  ;;  %v738_v39 = vrot.slane %v18924_v31, %v18922_v30 }
 0x345   :  { %3181 = vmatpush1.bf16.msra.mxu1 %v17088_v0  ;;  %3096 = vmatprep.subr.bf16.mxu0 %v17093_v32  ;;  %v722_v0 = vrot.slane %v18924_v31, %v18846_v62 }
 0x346   :  { %v18897_v38 = vpop.f32.mrb[0].mxu0  ;;  %v18899_v40 = vpop.f32.mrb[0].mxu1  ;;  %3182 = vmatprep.subr.bf16.mxu1 %v17096_v3 }
 0x347   :  { %v18901_v42 = vpop.f32.mrb[1].mxu0  ;;  %v18903_v43 = vpop.f32.mrb[1].mxu1 }
 0x348   :  { %v18905_v44 = vpop.f32.mrb[2].mxu0  ;;  %v18907_v45 = vpop.f32.mrb[2].mxu1  ;;  %3097 = vmatpush1.bf16.msra.mxu0 %v17091_v34 }
 0x349   :  { %3183 = vmatpush1.bf16.msra.mxu1 %v17094_v36  ;;  %v18909_v47 = vpop.f32.mrb[3].mxu0  ;;  %v18911_v49 = vpop.f32.mrb[3].mxu1  ;;  %3098 = vmatprep.subr.bf16.mxu0 %v17099_v37 }
 0x34a   :  { %3184 = vmatprep.subr.bf16.mxu1 %v17102_v41  ;;  %v16324_v41 = vadd.f32 %v18897_v38, %v722_v0 }
 0x34c   :  { %3099 = vmatpush1.bf16.msra.mxu0 %v17097_v46 }
 0x34d   :  { %3185 = vmatpush1.bf16.msra.mxu1 %v17100_v50  ;;  %3100 = vmatprep.subr.bf16.mxu0 %v17105_v51 }
 0x34e   :  { %3186 = vmatprep.subr.bf16.mxu1 %v17108_v53 }
 0x350   :  { %3101 = vmatpush1.bf16.msra.mxu0 %v17103_v59 }
 0x351   :  { %3187 = vmatpush1.bf16.msra.mxu1 %v17106_v61  ;;  %3102 = vmatprep.subr.bf16.mxu0 %v17111_v63  ;;  %v16326_v61 = vadd.f32 %v18905_v44, %v722_v0  ;;  %v18957_v44 = vld [vmem:[#allocation7 + $0x8] sm:$0xf] }
 0x352   :  { %3188 = vmatprep.subr.bf16.mxu1 %v17114_v1 }
 0x353   :  { %v3349_v38 = vmul.f32 0.125, %v16326_v61 }
 0x354   :  { %3103 = vmatpush1.bf16.msra.mxu0 %v17109_v4  ;;  %v3348_v4 = vmul.f32 0.125, %v16324_v41 }
 0x355   :  { %3189 = vmatpush1.bf16.msra.mxu1 %v17112_v6  ;;  %3104 = vmatprep.subr.bf16.mxu0 %v17117_v7 }
 0x356   :  { %3190 = vmatprep.subr.bf16.mxu1 %v17120_v8  ;;  %v16044_v7 = vpack.c.bf16 %v3348_v4, %v3348_v4  ;;  %v16045_v8 = vpack.c.bf16 %v3349_v38, %v3349_v38 }
 0x358   :  { %3105 = vmatpush1.bf16.msra.mxu0 %v17115_v10  ;;  %v754_v10 = vrot.slane %v18957_v44, %v18846_v62 }
 0x359   :  { %3191 = vmatpush1.bf16.msra.mxu1 %v17118_v11  ;;  %3106 = vmatprep.subr.bf16.mxu0 %v17123_v12 }
 0x35a   :  { %3192 = vmatprep.subr.bf16.mxu1 %v17126_v13 }
 0x35c   :  { %3107 = vmatpush1.bf16.msra.mxu0 %v17121_v14 }
 0x35d   :  { %3193 = vmatpush1.bf16.msra.mxu1 %v17124_v15  ;;  %3108 = vmatprep.subr.bf16.mxu0 %v17129_v16 }
 0x35e   :  { %3194 = vmatprep.subr.bf16.mxu1 %v17132_v17 }
 0x360   :  { %3109 = vmatpush1.bf16.msra.mxu0 %v17127_v55 }
 0x361   :  { %3195 = vmatpush1.bf16.msra.mxu1 %v17130_v18  ;;  %3110 = vmatprep.subr.bf16.mxu0 %v17135_v54 }
 0x362   :  { %3196 = vmatprep.subr.bf16.mxu1 %v17138_v19 }
 0x364   :  { %3111 = vmatpush1.bf16.msra.mxu0 %v17133_v56 }
 0x365   :  { %3197 = vmatpush1.bf16.msra.mxu1 %v17136_v20  ;;  %3112 = vmatprep.subr.bf16.mxu0 %v17141_v21 }
 0x366   :  { %3198 = vmatprep.subr.bf16.mxu1 %v17144_v22  ;;  %v3218_v22 = vand.u32 127, %v270_v48 }
 0x368   :  { %3113 = vmatpush1.bf16.msra.mxu0 %v17139_v23  ;;  %vm18985_vm3 = vcmp.ge.s32.totalorder %v18837_v52, %v3218_v22 }
 0x369   :  { %3199 = vmatpush1.bf16.msra.mxu1 %v17142_v24  ;;  %3114 = vmatprep.subr.bf16.mxu0 %v17147_v25 }
 0x36a   :  { %3200 = vmatprep.subr.bf16.mxu1 %v17150_v26 }
 0x36c   :  { %3115 = vmatpush1.bf16.msra.mxu0 %v17145_v33 }
 0x36d   :  { %3201 = vmatpush1.bf16.msra.mxu1 %v17148_v58  ;;  %3116 = vmatprep.subr.bf16.mxu0 %v17153_v27 }
 0x36e   :  { %3202 = vmatprep.subr.bf16.mxu1 %v17156_v28 }
 0x370   :  { %3117 = vmatpush1.bf16.msra.mxu0 %v17151_v9 }
 0x371   :  { %3203 = vmatpush1.bf16.msra.mxu1 %v17154_v29  ;;  %16132 = vmatprep.subr.bf16.mxu0 %v18548_v2 }
 0x372   :  { %16138 = vmatprep.subr.bf16.mxu1 %v18548_v2 }
 0x373   :  { %3119 = vmatmul.mubr.bf16.vlgmr.msra.gmra.mrb[8].mxu0 %v18871_v35 }
 0x374   :  { %3205 = vmatmul.mubr.bf16.vlgmr.msra.gmra.mrb[8].mxu1 %v18871_v35  ;;  %16134 = vmatprep.mubr.msk.bf16.mxu0 %vm18549_vm0, %v18548_v2 }
 0x375   :  { %16140 = vmatprep.mubr.msk.bf16.mxu1 %vm18549_vm0, %v18548_v2 }
 0x3c6   :  { %v2948_v32 = vpop.f32.mrb[4].mxu0 }
 0x3c7   :  { %v16332_v35 = vadd.f32 %v2948_v32, %v738_v39  ;;  %v18930_v3 = vpop.f32.mrb[4].mxu1  ;;  %v18932_v34 = vpop.f32.mrb[5].mxu0 }
 0x3c8   :  { %v18934_v36 = vpop.f32.mrb[5].mxu1  ;;  %v2952_v37 = vpop.f32.mrb[6].mxu0 }
 0x3c9   :  { %v18937_v46 = vpack.c.bf16 %v16332_v35, %v16332_v35  ;;  %v16334_v50 = vadd.f32 %v2952_v37, %v738_v39  ;;  %v18939_v51 = vpop.f32.mrb[6].mxu1  ;;  %v18941_v53 = vpop.f32.mrb[7].mxu0 }
 0x3ca   :  { %v18943_v59 = vpop.f32.mrb[7].mxu1 }
 0x3cb   :  { %v3373_v63 = vsel %vm3368_vm1, %v18937_v46, 0  ;;  %v16047_v1 = vpack.c.bf16 %v16334_v50, %v16334_v50 }
 0x3cc   :  { %16133 = vmatpush3.bf16.xpose.msra.mxu0 %v3373_v63 }
 0x3cd   :  { %v3419_v6 = vsel %vm3368_vm1, %v16047_v1, 0  ;;  %16144 = vmatprep.subr.bf16.mxu0 %v18548_v2 }
 0x3ce   :  { %16139 = vmatpush3.bf16.xpose.msra.mxu1 %v3419_v6 }
 0x3cf   :  { %16150 = vmatprep.subr.bf16.mxu1 %v18548_v2 }
 0x3d3   :  { %16135 = vmatmul.mubr.msk.bf16.vlgmr.msra.gmra.mrb[12].mxu0 %vm3368_vm1, %v16044_v7 }
 0x3d4   :  { %16146 = vmatprep.mubr.msk.bf16.mxu0 %vm18549_vm0, %v18548_v2 }
 0x3d5   :  { %16141 = vmatmul.mubr.msk.bf16.vlgmr.msra.gmra.mrb[12].mxu1 %vm3368_vm1, %v16045_v8 }
 0x3d6   :  { %16152 = vmatprep.mubr.msk.bf16.mxu1 %vm18549_vm0, %v18548_v2 }
 0x446   :  { %v3120_v11 = vpop.f32.mrb[8].mxu0 }
 0x447   :  { %v16340_v12 = vadd.f32 %v3120_v11, %v754_v10  ;;  %v18961_v13 = vpop.f32.mrb[8].mxu1  ;;  %v18963_v14 = vpop.f32.mrb[9].mxu0 }
 0x448   :  { %v18965_v15 = vpop.f32.mrb[9].mxu1  ;;  %v3124_v16 = vpop.f32.mrb[10].mxu0 }
 0x449   :  { %v18967_v17 = vpack.c.bf16 %v16340_v12, %v16340_v12  ;;  %v16342_v55 = vadd.f32 %v3124_v16, %v754_v10  ;;  %v18969_v18 = vpop.f32.mrb[10].mxu1  ;;  %v18971_v54 = vpop.f32.mrb[11].mxu0 }
 0x44a   :  { %v18973_v19 = vpop.f32.mrb[11].mxu1 }
 0x44b   :  { %v3495_v56 = vsel %vm3493_vm2, %v18967_v17, 0  ;;  %v18977_v20 = vpack.c.bf16 %v16342_v55, %v16342_v55 }
 0x44c   :  { %16145 = vmatpush3.bf16.msra.mxu0 %v3495_v56 }
 0x44d   :  { %v3541_v21 = vsel %vm3493_vm2, %v18977_v20, 0  ;;  %16156 = vmatprep.subr.bf16.mxu0 %v18548_v2 }
 0x44e   :  { %16151 = vmatpush3.bf16.msra.mxu1 %v3541_v21 }
 0x44f   :  { %16162 = vmatprep.subr.bf16.mxu1 %v18548_v2 }
 0x4a6   :  { %v3409_v24 = vpop.f32.mrb[12].mxu0 }
 0x4a7   :  { %v3463_v25 = vsel %vm18985_vm3, %v3409_v24, -inf  ;;  %v16136_v26 = vpop.f32.mrb[13].mxu0 }
 0x4a8   :  { %v3412_v33 = vpop.f32.mrb[14].mxu0  ;;  %v3455_v58 = vpop.f32.mrb[12].mxu1  ;;  %v3466_v27 = vsel %vm3465_vm4, %v3463_v25, -inf }
 0x4a9   :  { %v3464_v28 = vsel %vm18985_vm3, %v3455_v58, -inf  ;;  %v16142_v9 = vpop.f32.mrb[13].mxu1  ;;  %3467 = vmax.xlane.f32.xlu0 %v3466_v27  ;;  %v16137_v48 = vpop.f32.mrb[15].mxu0 }
 0x4aa   :  { %v3458_v29 = vpop.f32.mrb[14].mxu1  ;;  %v3469_v39 = vsel %vm3465_vm4, %v3464_v28, -inf }
 0x4ab   :  { %3470 = vmax.xlane.f32.xlu1 %v3469_v39  ;;  %v16143_v0 = vpop.f32.mrb[15].mxu1 }
 0x4bc   :  { %3636 = vrot.lane.b32.xlu1 %v16047_v1, %s18537_s21 }
 0x536   :  { %v3468_v32 = vpop.xlane.xlu0 %3467 }
 0x537   :  { %v3472_v35 = vsub.f32 %v3463_v25, %v3468_v32 }
 0x538   :  { %v3471_v37 = vpop.xlane.xlu1 %3470 }
 0x539   :  { %v3474_v41 = vmul.f32 1.442695, %v3472_v35  ;;  %v3473_v50 = vsub.f32 %v3464_v28, %v3471_v37 }
 0x53b   :  { %18121 = vpow2.f32 %v3474_v41  ;;  %v3476_v61 = vmul.f32 1.442695, %v3473_v50 }
 0x53c   :  { %v3637_v1 = vpop.permute.xlu1 %3636 }
 0x53d   :  { %18123 = vpow2.f32 %v3476_v61 }
 0x545   :  { %v18122_v63 = vpop.eup %18121 }
 0x546   :  { %v3478_v4 = vsel %vm3465_vm4, %v18122_v63, 0.0 }
 0x547   :  { %v18124_v6 = vpop.eup %18123  ;;  %3479 = vadd.xlane.f32.xlu0 %v3478_v4 }
 0x548   :  { %v3481_v38 = vsel %vm3465_vm4, %v18124_v6, 0.0 }
 0x549   :  { %3482 = vadd.xlane.f32.xlu1 %v3481_v38 }
 0x55a   :  { %3584 = vrot.lane.b32.xlu1 %v16044_v7, %s18537_s21 }
 0x55d   :  { %3586 = vrot.lane.b32.xlu0 %v18937_v46, %s18537_s21  ;;  %v3642_v46 = vsel %vm3368_vm1, %v3637_v1, 0 }
 0x55e   :  { %3634 = vrot.lane.b32.xlu1 %v16045_v8, %s18537_s21 }
 0x5d4   :  { %v3480_v10 = vpop.xlane.xlu0 %3479 }
 0x5d5   :  { %18125 = vrcp.f32 %v3480_v10 }
 0x5d6   :  { %v3483_v11 = vpop.xlane.xlu1 %3482 }
 0x5d7   :  { %18127 = vrcp.f32 %v3483_v11 }
 0x5d8   :  { %v3587_v56 = vpop.permute.xlu0 %3586 }
 0x5d9   :  { %v3592_v24 = vsel %vm3368_vm1, %v3587_v56, 0 }
 0x5da   :  { %v3585_v8 = vpop.permute.xlu1 %3584 }
 0x5de   :  { %v3635_v25 = vpop.permute.xlu1 %3634 }
 0x5df   :  { %v18126_v12 = vpop.eup %18125 }
 0x5e0   :  { %v3486_v16 = vmul.f32 %v18126_v12, %v18122_v63 }
 0x5e1   :  { %v18128_v55 = vpop.eup %18127 }
 0x5e2   :  { %v3487_v21 = vmul.f32 %v18128_v55, %v18124_v6  ;;  %v3488_v22 = vpack.c.bf16 %v3486_v16, %v3486_v16 }
 0x5e4   :  { %16147 = vmatmul.mubr.msk.bf16.vlgmr.msra.gmra.mrb[16].mxu0 %vm3465_vm4, %v3488_v22  ;;  %v3489_v7 = vpack.c.bf16 %v3487_v21, %v3487_v21 }
 0x5e5   :  { %16157 = vmatpush3.bf16.xpose.msra.mxu0 %v3592_v24  ;;  %16158 = vmatprep.mubr.msk.bf16.mxu0 %vm18549_vm0, %v18548_v2 }
 0x5e6   :  { %16153 = vmatmul.mubr.msk.bf16.vlgmr.msra.gmra.mrb[16].mxu1 %vm3465_vm4, %v3489_v7  ;;  %16168 = vmatprep.subr.bf16.mxu0 %v18548_v2 }
 0x5e7   :  { %16163 = vmatpush3.bf16.xpose.msra.mxu1 %v3642_v46  ;;  %16164 = vmatprep.mubr.msk.bf16.mxu1 %vm18549_vm0, %v18548_v2 }
 0x5e8   :  { %16174 = vmatprep.subr.bf16.mxu1 %v18548_v2 }
 0x5ec   :  { %16159 = vmatmul.mubr.msk.bf16.vlgmr.msra.gmra.mrb[20].mxu0 %vm3368_vm1, %v3585_v8 }
 0x5ed   :  { %16170 = vmatprep.mubr.msk.bf16.mxu0 %vm18549_vm0, %v18548_v2 }
 0x5ee   :  { %16165 = vmatmul.mubr.msk.bf16.vlgmr.msra.gmra.mrb[20].mxu1 %vm3368_vm1, %v3635_v25 }
 0x5ef   :  { %16176 = vmatprep.mubr.msk.bf16.mxu1 %vm18549_vm0, %v18548_v2 }
 0x6b7   :  { %v3531_v26 = vpop.f32.mrb[16].mxu0 }
 0x6b8   :  { %v16148_v33 = vpop.f32.mrb[17].mxu0 }
 0x6b9   :  { %v3534_v58 = vpop.f32.mrb[18].mxu0  ;;  %v3577_v27 = vpop.f32.mrb[16].mxu1  ;;  %v17159_v33 = vld [vmem:[#allocation8 + $0x84] ss:$16 sps:$4 sm:$0xff]  }
 0x6ba   :  { %v19018_v28 = vpack.c.bf16 %v3577_v27, %v3531_v26  ;;  %v16149_v9 = vpop.f32.mrb[19].mxu0  ;;  %v16154_v48 = vpop.f32.mrb[17].mxu1 }
 0x6bb   :  { %v3580_v29 = vpop.f32.mrb[18].mxu1 }
 0x6bc   :  { %v16155_v39 = vpop.f32.mrb[19].mxu1  ;;  %v17157_v29 = vld [vmem:[#allocation8 + $0x80] ss:$16 sps:$4 sm:$0xff]  }
 0x6bf   :  { %v3628_v0 = vpop.f32.mrb[20].mxu0 }
 0x6c0   :  { %v3684_v32 = vsel %vm18985_vm3, %v3628_v0, -inf  ;;  %v16160_v35 = vpop.f32.mrb[21].mxu0  ;;  %v17165_v0 = vld [vmem:[#allocation8 + $0xa4] ss:$16 sps:$4 sm:$0xff]  }
 0x6c1   :  { %v3631_v37 = vpop.f32.mrb[22].mxu0  ;;  %v3678_v41 = vpop.f32.mrb[20].mxu1  ;;  %v3686_v50 = vsel %vm3465_vm4, %v3684_v32, -inf }
 0x6c2   :  { %v3685_v61 = vsel %vm18985_vm3, %v3678_v41, -inf  ;;  %v16166_v63 = vpop.f32.mrb[21].mxu1  ;;  %3687 = vmax.xlane.f32.xlu0 %v3686_v50  ;;  %v16161_v4 = vpop.f32.mrb[23].mxu0  ;;  %v17163_v37 = vld [vmem:[#allocation8 + $0xa0] ss:$16 sps:$4 sm:$0xff]  }
 0x6c3   :  { %v3681_v6 = vpop.f32.mrb[22].mxu1  ;;  %v3689_v38 = vsel %vm3465_vm4, %v3685_v61, -inf  ;;  %v17168_v50 = vld [vmem:[#allocation8 + $0xac] ss:$16 sps:$4 sm:$0xff]   ;;  %v17166_v63 = vld [vmem:[#allocation8 + $0xa8] ss:$16 sps:$4 sm:$0xff]  }
 0x6c4   :  { %3690 = vmax.xlane.f32.xlu1 %v3689_v38  ;;  %v16167_v1 = vpop.f32.mrb[23].mxu1  ;;  %v17169_v4 = vld [vmem:[#allocation8 + $0xc0] ss:$16 sps:$4 sm:$0xff]   ;;  %v17174_v6 = vld [vmem:[#allocation8 + $0xcc] ss:$16 sps:$4 sm:$0xff]  }
 0x6c5   :  { %v17172_v38 = vld [vmem:[#allocation8 + $0xc8] ss:$16 sps:$4 sm:$0xff]   ;;  %v17175_v1 = vld [vmem:[#allocation8 + $0xe0] ss:$16 sps:$4 sm:$0xff]  }
 0x6d5   :  { %3758 = vrot.lane.b32.xlu1 %v18977_v20, %s18537_s21  ;;  %v17162_v20 = vld [vmem:[#allocation8 + $0x8c] ss:$16 sps:$4 sm:$0xff]  }
 0x74f   :  { %v3688_v10 = vpop.xlane.xlu0 %3687 }
 0x750   :  { %v3692_v11 = vsub.f32 %v3684_v32, %v3688_v10  ;;  %v17177_v10 = vld [vmem:[#allocation8 + $0xe4] ss:$16 sps:$4 sm:$0xff]  }
 0x751   :  { %v3691_v12 = vpop.xlane.xlu1 %3690 }
 0x752   :  { %v3694_v16 = vmul.f32 1.442695, %v3692_v11  ;;  %v3693_v55 = vsub.f32 %v3685_v61, %v3691_v12  ;;  %v17171_v61 = vld [vmem:[#allocation8 + $0xc4] ss:$16 sps:$4 sm:$0xff]   ;;  %v17178_v11 = vld [vmem:[#allocation8 + $0xe8] ss:$16 sps:$4 sm:$0xff]  }
 0x753   :  { %v17180_v12 = vld [vmem:[#allocation8 + $0xec] ss:$16 sps:$4 sm:$0xff]  }
 0x754   :  { %18129 = vpow2.f32 %v3694_v16  ;;  %v3696_v56 = vmul.f32 1.442695, %v3693_v55  ;;  %v17183_v16 = vld [vmem:[#allocation8 + $0x4] ss:$16 sps:$4 sm:$0xff]   ;;  %v18550_v55 = vmov 0  }
 0x755   :  { %v3759_v21 = vpop.permute.xlu1 %3758 }
 0x756   :  { %18131 = vpow2.f32 %v3696_v56  ;;  %v3764_v22 = vsel %vm3493_vm2, %v3759_v21, 0  ;;  %v17186_v56 = vld [vmem:[#allocation8 + $0xc] ss:$16 sps:$4 sm:$0xff]  }
 0x757   :  { %16175 = vmatpush3.bf16.msra.mxu1 %v3764_v22 }
 0x758   :  { %3933 = vmatprep.subr.bf16.mxu1 %v17162_v20  ;;  %v17184_v20 = vld [vmem:[#allocation8 + $0x8] ss:$16 sps:$4 sm:$0xff]  }
 0x75e   :  { %v18130_v24 = vpop.eup %18129 }
 0x75f   :  { %v3698_v7 = vsel %vm3465_vm4, %v18130_v24, 0.0 }
 0x760   :  { %v18132_v46 = vpop.eup %18131  ;;  %3699 = vadd.xlane.f32.xlu0 %v3698_v7 }
 0x761   :  { %v3701_v8 = vsel %vm3465_vm4, %v18132_v46, 0.0 }
 0x764   :  { %3702 = vadd.xlane.f32.xlu0 %v3701_v8  ;;  %v17181_v8 = vld [vmem:[#allocation8] ss:$16 sps:$4 sm:$0xff]  }
 0x77a   :  { %3710 = vrot.lane.b32.xlu0 %v18967_v17, %s18537_s21  ;;  %v17160_v17 = vld [vmem:[#allocation8 + $0x88] ss:$16 sps:$4 sm:$0xff]  }
 0x7ed   :  { %v3700_v25 = vpop.xlane.xlu0 %3699 }
 0x7ee   :  { %18133 = vrcp.f32 %v3700_v25 }
 0x7f1   :  { %v3703_v26 = vpop.xlane.xlu0 %3702 }
 0x7f2   :  { %18135 = vrcp.f32 %v3703_v26 }
 0x7f5   :  { %v3711_v58 = vpop.permute.xlu0 %3710 }
 0x7f6   :  { %v3716_v27 = vsel %vm3493_vm2, %v3711_v58, 0  ;;  %v17192_v58 = vld [vmem:[#allocation8 + $0x2c] ss:$16 sps:$4 sm:$0xff]  }
 0x7f7   :  { %16169 = vmatpush3.bf16.msra.mxu0 %v3716_v27 }
 0x7f8   :  { %v18134_v9 = vpop.eup %18133  ;;  %3890 = vmatprep.subr.bf16.mxu0 %v17159_v33  ;;  %v17189_v33 = vld [vmem:[#allocation8 + $0x24] ss:$16 sps:$4 sm:$0xff]  }
 0x7f9   :  { %v3706_v48 = vmul.f32 %v18134_v9, %v18130_v24 }
 0x7fb   :  { %v3708_v39 = vpack.c.bf16 %v3706_v48, %v3706_v48  ;;  %v17187_v48 = vld [vmem:[#allocation8 + $0x20] ss:$16 sps:$4 sm:$0xff]  }
 0x7fc   :  { %v18136_v32 = vpop.eup %18135 }
 0x7fd   :  { %v3707_v35 = vmul.f32 %v18136_v32, %v18132_v46  ;;  %16171 = vmatmul.mubr.msk.bf16.vlgmr.msra.gmra.mrb[24].mxu0 %vm3465_vm4, %v3708_v39  ;;  %v17195_v39 = vld [vmem:[#allocation8 + $0x44] ss:$16 sps:$4 sm:$0xff]   ;;  %v19043_v32 = vsub.s32 5, %v18837_v52 }
 0x7fe   :  { %3891 = vmatpush1.bf16.msra.mxu0 %v17157_v29  ;;  %3922 = vmatprep.mubr.bf16.mxu0 %v18550_v55  ;;  %v17190_v29 = vld [vmem:[#allocation8 + $0x28] ss:$16 sps:$4 sm:$0xff]  }
 0x7ff   :  { %v3709_v41 = vpack.c.bf16 %v3707_v35, %v3707_v35  ;;  %3892 = vmatprep.subr.bf16.mxu0 %v17165_v0  ;;  %v17198_v0 = vld [vmem:[#allocation8 + $0x4c] ss:$16 sps:$4 sm:$0xff]   ;;  %v17193_v35 = vld [vmem:[#allocation8 + $0x40] ss:$16 sps:$4 sm:$0xff]  }
 0x801   :  { %16177 = vmatmul.mubr.msk.bf16.vlgmr.msra.gmra.mrb[24].mxu1 %vm3465_vm4, %v3709_v41  ;;  %v17204_v41 = vld [vmem:[#allocation8 + $0x6c] ss:$16 sps:$4 sm:$0xff]  }
 0x802   :  { %3934 = vmatpush1.bf16.msra.mxu1 %v17160_v17  ;;  %3893 = vmatpush1.bf16.msra.mxu0 %v17163_v37  ;;  %v17196_v17 = vld [vmem:[#allocation8 + $0x48] ss:$16 sps:$4 sm:$0xff]   ;;  %v17201_v37 = vld [vmem:[#allocation8 + $0x64] ss:$16 sps:$4 sm:$0xff]  }
 0x803   :  { %3935 = vmatprep.subr.bf16.mxu1 %v17168_v50  ;;  %3894 = vmatprep.subr.bf16.mxu0 %v17171_v61  ;;  %v742_v50 = vrot.slane %v18924_v31, %v19043_v32  ;;  %v17199_v61 = vld [vmem:[#allocation8 + $0x60] ss:$16 sps:$4 sm:$0xff]  }
 0x804   :  { %3965 = vmatprep.mubr.bf16.mxu1 %v18550_v55 }
 0x806   :  { %3936 = vmatpush1.bf16.msra.mxu1 %v17166_v63  ;;  %3895 = vmatpush1.bf16.msra.mxu0 %v17169_v4  ;;  %v17202_v63 = vld [vmem:[#allocation8 + $0x68] ss:$16 sps:$4 sm:$0xff]   ;;  %v16333_v4 = vadd.f32 %v18932_v34, %v742_v50  ;;  %v758_v34 = vrot.slane %v18957_v44, %v18843_v60 }
 0x807   :  { %3937 = vmatprep.subr.bf16.mxu1 %v17174_v6  ;;  %3896 = vmatprep.subr.bf16.mxu0 %v17177_v10  ;;  %v16335_v6 = vadd.f32 %v18941_v53, %v742_v50 }
 0x809   :  { %v16053_v10 = vpack.c.bf16 %v16335_v6, %v16335_v6 }
 0x80a   :  { %3938 = vmatpush1.bf16.msra.mxu1 %v17172_v38  ;;  %3897 = vmatpush1.bf16.msra.mxu0 %v17175_v1  ;;  %v726_v38 = vrot.slane %v18924_v31, %v18843_v60  ;;  %v16052_v1 = vpack.c.bf16 %v16333_v4, %v16333_v4 }
 0x80b   :  { %3939 = vmatprep.subr.bf16.mxu1 %v17180_v12  ;;  %4059 = vmatprep.subr.bf16.mxu0 %v17183_v16  ;;  %v4215_v16 = vsel %vm3368_vm1, %v16053_v10, 0 }
 0x80c   :  { %v16325_v53 = vadd.f32 %v18901_v42, %v726_v38  ;;  %v4169_v12 = vsel %vm3368_vm1, %v16052_v1, 0 }
 0x80e   :  { %3940 = vmatpush1.bf16.msra.mxu1 %v17178_v11  ;;  %v16327_v11 = vadd.f32 %v18909_v47, %v726_v38  ;;  %v17207_v38 = vld [vmem:[#allocation8 + $0x104] ss:$16 sps:$4 sm:$0xff]  }
 0x80f   :  { %4102 = vmatprep.subr.bf16.mxu1 %v17186_v56  ;;  %v16343_v56 = vadd.f32 %v18971_v54, %v758_v34 }
 0x811   :  { %v19073_v42 = vpack.c.bf16 %v16343_v56, %v16343_v56 }
 0x8d0   :  { %v3752_v21 = vpop.f32.mrb[24].mxu0 }
 0x8d1   :  { %v16172_v22 = vpop.f32.mrb[25].mxu0 }
 0x8d2   :  { %v3755_v24 = vpop.f32.mrb[26].mxu0  ;;  %v4146_v22 = vmul.f32 0.125, %v16327_v11 }
 0x8d3   :  { %v16173_v7 = vpop.f32.mrb[27].mxu0 }
 0x8d4   :  { %v3800_v46 = vpop.f32.mrb[24].mxu1  ;;  %v16051_v7 = vpack.c.bf16 %v4146_v22, %v4146_v22  ;;  %v17205_v22 = vld [vmem:[#allocation8 + $0x100] ss:$16 sps:$4 sm:$0xff]  }
 0x8d5   :  { %v3806_v25 = vpack.c.bf16 %v3800_v46, %v3752_v21  ;;  %v16178_v26 = vpop.f32.mrb[25].mxu1  ;;  %v4145_v21 = vmul.f32 0.125, %v16325_v53 }
 0x8d6   :  { %v3803_v27 = vpop.f32.mrb[26].mxu1 }
 0x8d7   :  { %v16179_v9 = vpop.f32.mrb[27].mxu1  ;;  %14850 = vmatmul.mubr.msk.bf16.vlgmr.msra.gmra.mrb[28].mxu0 %vm3368_vm1, %v3806_v25  ;;  %14851 = vmatmul.mubr.msk.bf16.vlgmr.msra.gmra.mrb[28].mxu1 %vm3368_vm1, %v3806_v25  ;;  %v16050_v47 = vpack.c.bf16 %v4145_v21, %v4145_v21  ;;  %v17208_v21 = vld [vmem:[#allocation8 + $0x108] ss:$16 sps:$4 sm:$0xff]  }
 0x8d8   :  { %4060 = vmatpush1.bf16.msra.mxu0 %v17181_v8  ;;  %4103 = vmatpush1.bf16.msra.mxu1 %v17184_v20 }
 0x8d9   :  { %4061 = vmatprep.subr.bf16.mxu0 %v17189_v33  ;;  %4104 = vmatprep.subr.bf16.mxu1 %v17192_v58 }
 0x8da   :  { %4091 = vmatprep.mubr.bf16.mxu0 %v18550_v55  ;;  %4134 = vmatprep.mubr.bf16.mxu1 %v18550_v55 }
 0x8dc   :  { %4062 = vmatpush1.bf16.msra.mxu0 %v17187_v48  ;;  %4105 = vmatpush1.bf16.msra.mxu1 %v17190_v29 }
 0x8dd   :  { %4063 = vmatprep.subr.bf16.mxu0 %v17195_v39  ;;  %4106 = vmatprep.subr.bf16.mxu1 %v17198_v0 }
 0x8e0   :  { %4064 = vmatpush1.bf16.msra.mxu0 %v17193_v35  ;;  %4107 = vmatpush1.bf16.msra.mxu1 %v17196_v17 }
 0x8e1   :  { %4065 = vmatprep.subr.bf16.mxu0 %v17201_v37  ;;  %4108 = vmatprep.subr.bf16.mxu1 %v17204_v41 }
 0x8e4   :  { %4066 = vmatpush1.bf16.msra.mxu0 %v17199_v61  ;;  %4109 = vmatpush1.bf16.msra.mxu1 %v17202_v63 }
 0x8e5   :  { %16180 = vmatprep.subr.bf16.mxu0 %v18548_v2  ;;  %16186 = vmatprep.subr.bf16.mxu1 %v18548_v2 }
 0x8e7   :  { %14868 = vmatmul.mubr.msk.bf16.vlgmr.msra.gmra.mrb[28].mxu0 %vm3368_vm1, %v19018_v28  ;;  %14869 = vmatmul.mubr.msk.bf16.vlgmr.msra.gmra.mrb[28].mxu1 %vm3368_vm1, %v19018_v28  ;;  %v16341_v28 = vadd.f32 %v18963_v14, %v758_v34  ;;  %v4333_v14 = vsel %vm3493_vm2, %v19073_v42, 0  ;;  %v17210_v34 = vld [vmem:[#allocation8 + $0x10c] ss:$16 sps:$4 sm:$0xff]  }
 0x8e8   :  { %16182 = vmatprep.mubr.msk.bf16.mxu0 %vm18549_vm0, %v18548_v2  ;;  %16188 = vmatprep.mubr.msk.bf16.mxu1 %vm18549_vm0, %v18548_v2 }
 0x8e9   :  { %v19071_v24 = vpack.c.bf16 %v16341_v28, %v16341_v28 }
 0x8eb   :  { %v4287_v46 = vsel %vm3493_vm2, %v19071_v24, 0 }
 0x8ed   :  { %16181 = vmatpush3.bf16.xpose.msra.mxu0 %v4169_v12  ;;  %16187 = vmatpush3.bf16.xpose.msra.mxu1 %v4215_v16 }
 0x8ee   :  { %16192 = vmatprep.subr.bf16.mxu0 %v18548_v2  ;;  %16198 = vmatprep.subr.bf16.mxu1 %v18548_v2 }
 0x8f4   :  { %16183 = vmatmul.mubr.msk.bf16.vlgmr.msra.gmra.mrb[32].mxu0 %vm3368_vm1, %v16050_v47  ;;  %16189 = vmatmul.mubr.msk.bf16.vlgmr.msra.gmra.mrb[32].mxu1 %vm3368_vm1, %v16051_v7 }
 0x8f5   :  { %16193 = vmatpush3.bf16.msra.mxu0 %v4287_v46  ;;  %16199 = vmatpush3.bf16.msra.mxu1 %v4333_v14  ;;  %v17211_v14 = vld [vmem:[#allocation8 + $0x120] ss:$16 sps:$4 sm:$0xff]  }
 0x8f6   :  { %16194 = vmatprep.mubr.msk.bf16.mxu0 %vm18549_vm0, %v18548_v2  ;;  %16200 = vmatprep.mubr.msk.bf16.mxu1 %vm18549_vm0, %v18548_v2 }
 0x8f7   :  { %4459 = vmatprep.subr.bf16.mxu0 %v17207_v38  ;;  %4502 = vmatprep.subr.bf16.mxu1 %v17210_v34 }
 0x9c7   :  { %v4205_v54 = vpop.f32.mrb[32].mxu0  ;;  %v4251_v8 = vpop.f32.mrb[32].mxu1 }
 0x9c8   :  { %v4257_v20 = vsel %vm18985_vm3, %v4205_v54, -inf  ;;  %v4258_v25 = vsel %vm18985_vm3, %v4251_v8, -inf  ;;  %v16184_v26 = vpop.f32.mrb[33].mxu0  ;;  %v16190_v33 = vpop.f32.mrb[33].mxu1  ;;  %v17222_v54 = vld [vmem:[#allocation8 + $0x14c] ss:$16 sps:$4 sm:$0xff]  }
 0x9c9   :  { %v4208_v58 = vpop.f32.mrb[34].mxu0  ;;  %v4254_v27 = vpop.f32.mrb[34].mxu1  ;;  %v4262_v9 = vsel %vm3465_vm4, %v4258_v25, -inf  ;;  %v4259_v48 = vsel %vm3465_vm4, %v4257_v20, -inf  ;;  %v17219_v8 = vld [vmem:[#allocation8 + $0x144] ss:$16 sps:$4 sm:$0xff]  }
 0x9ca   :  { %4263 = vmax.xlane.f32.xlu0 %v4262_v9  ;;  %v16191_v29 = vpop.f32.mrb[35].mxu1  ;;  %4260 = vmax.xlane.f32.xlu1 %v4259_v48  ;;  %v16185_v39 = vpop.f32.mrb[35].mxu0  ;;  %v17228_v26 = vld [vmem:[#allocation8 + $0x16c] ss:$16 sps:$4 sm:$0xff]   ;;  %v17225_v33 = vld [vmem:[#allocation8 + $0x164] ss:$16 sps:$4 sm:$0xff]  }
 0x9cb   :  { %v17226_v58 = vld [vmem:[#allocation8 + $0x168] ss:$16 sps:$4 sm:$0xff]   ;;  %v17223_v27 = vld [vmem:[#allocation8 + $0x160] ss:$16 sps:$4 sm:$0xff]  }
 0xa57   :  { %v4264_v0 = vpop.xlane.xlu0 %4263  ;;  %v4261_v35 = vpop.xlane.xlu1 %4260 }
 0xa58   :  { %v4266_v17 = vsub.f32 %v4258_v25, %v4264_v0  ;;  %v4265_v37 = vsub.f32 %v4257_v20, %v4261_v35  ;;  %v17220_v20 = vld [vmem:[#allocation8 + $0x148] ss:$16 sps:$4 sm:$0xff]   ;;  %v17217_v25 = vld [vmem:[#allocation8 + $0x140] ss:$16 sps:$4 sm:$0xff]  }
 0xa5a   :  { %v4269_v41 = vmul.f32 1.442695, %v4266_v17  ;;  %v4267_v50 = vmul.f32 1.442695, %v4265_v37 }
 0xa5c   :  { %18137 = vpow2.f32 %v4269_v41 }
 0xa5d   :  { %18139 = vpow2.f32 %v4267_v50 }
 0xa66   :  { %v18138_v61 = vpop.eup %18137 }
 0xa67   :  { %v18140_v63 = vpop.eup %18139  ;;  %v4274_v4 = vsel %vm3465_vm4, %v18138_v61, 0.0 }
 0xa68   :  { %4275 = vadd.xlane.f32.xlu1 %v4274_v4  ;;  %v4271_v6 = vsel %vm3465_vm4, %v18140_v63, 0.0 }
 0xa69   :  { %4272 = vadd.xlane.f32.xlu0 %v4271_v6 }
 0xa79   :  { %4605 = vrot.lane.b32.xlu1 %v16053_v10, %s18537_s21 }
 0xa7d   :  { %4553 = vrot.lane.b32.xlu1 %v16050_v47, %s18537_s21  ;;  %v17216_v47 = vld [vmem:[#allocation8 + $0x12c] ss:$16 sps:$4 sm:$0xff]  }
 0xa7f   :  { %4555 = vrot.lane.b32.xlu0 %v16052_v1, %s18537_s21  ;;  %v17213_v1 = vld [vmem:[#allocation8 + $0x124] ss:$16 sps:$4 sm:$0xff]  }
 0xa81   :  { %4603 = vrot.lane.b32.xlu1 %v16051_v7, %s18537_s21  ;;  %v17214_v7 = vld [vmem:[#allocation8 + $0x128] ss:$16 sps:$4 sm:$0xff]  }
 0xaf5   :  { %v4276_v53 = vpop.xlane.xlu1 %4275 }
 0xaf6   :  { %v4273_v11 = vpop.xlane.xlu0 %4272  ;;  %18141 = vrcp.f32 %v4276_v53 }
 0xaf7   :  { %18143 = vrcp.f32 %v4273_v11 }
 0xaf9   :  { %v4606_v9 = vpop.permute.xlu1 %4605 }
 0xafa   :  { %v4556_v48 = vpop.permute.xlu0 %4555 }
 0xafd   :  { %v4554_v6 = vpop.permute.xlu1 %4553 }
 0xb00   :  { %v18142_v12 = vpop.eup %18141 }
 0xb01   :  { %v18144_v16 = vpop.eup %18143  ;;  %v4280_v28 = vmul.f32 %v18142_v12, %v18138_v61  ;;  %v4561_v61 = vsel %vm3368_vm1, %v4556_v48, 0  ;;  %v4604_v38 = vpop.permute.xlu1 %4603 }
 0xb02   :  { %v4279_v56 = vmul.f32 %v18144_v16, %v18140_v63  ;;  %v4611_v63 = vsel %vm3368_vm1, %v4606_v9, 0 }
 0xb03   :  { %v4282_v10 = vpack.c.bf16 %v4280_v28, %v4280_v28 }
 0xb04   :  { %v4281_v46 = vpack.c.bf16 %v4279_v56, %v4279_v56 }
 0xb05   :  { %16201 = vmatmul.mubr.msk.bf16.vlgmr.msra.gmra.mrb[36].mxu1 %vm3465_vm4, %v4282_v10 }
 0xb06   :  { %16195 = vmatmul.mubr.msk.bf16.vlgmr.msra.gmra.mrb[36].mxu0 %vm3465_vm4, %v4281_v46  ;;  %4503 = vmatpush1.bf16.msra.mxu1 %v17208_v21 }
 0xb07   :  { %4460 = vmatpush1.bf16.msra.mxu0 %v17205_v22  ;;  %4504 = vmatprep.subr.bf16.mxu1 %v17216_v47 }
 0xb08   :  { %4461 = vmatprep.subr.bf16.mxu0 %v17213_v1  ;;  %4491 = vmatprep.mubr.bf16.mxu0 %v18550_v55 }
 0xb09   :  { %4534 = vmatprep.mubr.bf16.mxu1 %v18550_v55 }
 0xb0a   :  { %4505 = vmatpush1.bf16.msra.mxu1 %v17214_v7 }
 0xb0b   :  { %4462 = vmatpush1.bf16.msra.mxu0 %v17211_v14  ;;  %4506 = vmatprep.subr.bf16.mxu1 %v17222_v54 }
 0xb0c   :  { %4463 = vmatprep.subr.bf16.mxu0 %v17219_v8 }
 0xb0e   :  { %4507 = vmatpush1.bf16.msra.mxu1 %v17220_v20 }
 0xb0f   :  { %4464 = vmatpush1.bf16.msra.mxu0 %v17217_v25  ;;  %4508 = vmatprep.subr.bf16.mxu1 %v17228_v26 }
 0xb10   :  { %4465 = vmatprep.subr.bf16.mxu0 %v17225_v33 }
 0xb12   :  { %4509 = vmatpush1.bf16.msra.mxu1 %v17226_v58 }
 0xb13   :  { %4466 = vmatpush1.bf16.msra.mxu0 %v17223_v27  ;;  %16210 = vmatprep.subr.bf16.mxu1 %v18548_v2 }
 0xb14   :  { %16204 = vmatprep.subr.bf16.mxu0 %v18548_v2 }
 0xbd8   :  { %v4369_v29 = vpop.f32.mrb[36].mxu1 }
 0xbd9   :  { %v4323_v39 = vpop.f32.mrb[36].mxu0  ;;  %v16202_v0 = vpop.f32.mrb[37].mxu1 }
 0xbda   :  { %v4375_v35 = vpack.c.bf16 %v4369_v29, %v4323_v39  ;;  %v16196_v17 = vpop.f32.mrb[37].mxu0  ;;  %v4372_v37 = vpop.f32.mrb[38].mxu1  ;;  %v17231_v39 = vld [vmem:[#allocation8 + $0x184] ss:$16 sps:$4 sm:$0xff]  }
 0xbdb   :  { %v4326_v41 = vpop.f32.mrb[38].mxu0  ;;  %v16203_v50 = vpop.f32.mrb[39].mxu1 }
 0xbdc   :  { %v16197_v4 = vpop.f32.mrb[39].mxu0  ;;  %14896 = vmatmul.mubr.msk.bf16.vlgmr.msra.gmra.mrb[28].mxu0 %vm3368_vm1, %v4375_v35  ;;  %14897 = vmatmul.mubr.msk.bf16.vlgmr.msra.gmra.mrb[28].mxu1 %vm3368_vm1, %v4375_v35  ;;  %v17229_v41 = vld [vmem:[#allocation8 + $0x180] ss:$16 sps:$4 sm:$0xff]  }
 0xbdd   :  { %16205 = vmatpush3.bf16.xpose.msra.mxu0 %v4561_v61  ;;  %16211 = vmatpush3.bf16.xpose.msra.mxu1 %v4611_v63  ;;  %v17237_v61 = vld [vmem:[#allocation8 + $0x1a4] ss:$16 sps:$4 sm:$0xff]  }
 0xbde   :  { %16206 = vmatprep.mubr.msk.bf16.mxu0 %vm18549_vm0, %v18548_v2  ;;  %16212 = vmatprep.mubr.msk.bf16.mxu1 %vm18549_vm0, %v18548_v2 }
 0xbdf   :  { %16222 = vmatprep.subr.bf16.mxu1 %v18548_v2  ;;  %16216 = vmatprep.subr.bf16.mxu0 %v18548_v2 }
 0xbe4   :  { %16207 = vmatmul.mubr.msk.bf16.vlgmr.msra.gmra.mrb[40].mxu0 %vm3368_vm1, %v4554_v6  ;;  %16213 = vmatmul.mubr.msk.bf16.vlgmr.msra.gmra.mrb[40].mxu1 %vm3368_vm1, %v4604_v38  ;;  %v17235_v6 = vld [vmem:[#allocation8 + $0x1a0] ss:$16 sps:$4 sm:$0xff]  }
 0xbe5   :  { %16218 = vmatprep.mubr.msk.bf16.mxu0 %vm18549_vm0, %v18548_v2  ;;  %16224 = vmatprep.mubr.msk.bf16.mxu1 %vm18549_vm0, %v18548_v2 }
 0xcb7   :  { %v4597_v34 = vpop.f32.mrb[40].mxu0  ;;  %v4647_v53 = vpop.f32.mrb[40].mxu1 }
 0xcb8   :  { %v4653_v11 = vsel %vm18985_vm3, %v4597_v34, -inf  ;;  %v4654_v12 = vsel %vm18985_vm3, %v4647_v53, -inf  ;;  %v16208_v16 = vpop.f32.mrb[41].mxu0  ;;  %v16214_v28 = vpop.f32.mrb[41].mxu1  ;;  %v17240_v34 = vld [vmem:[#allocation8 + $0x1ac] ss:$16 sps:$4 sm:$0xff]  }
 0xcb9   :  { %v4600_v56 = vpop.f32.mrb[42].mxu0  ;;  %v4650_v21 = vpop.f32.mrb[42].mxu1  ;;  %v4658_v10 = vsel %vm3465_vm4, %v4654_v12, -inf  ;;  %v4655_v22 = vsel %vm3465_vm4, %v4653_v11, -inf  ;;  %v17243_v53 = vld [vmem:[#allocation8 + $0x1c4] ss:$16 sps:$4 sm:$0xff]  }
 0xcba   :  { %4659 = vmax.xlane.f32.xlu1 %v4658_v10  ;;  %v16215_v47 = vpop.f32.mrb[43].mxu1  ;;  %4656 = vmax.xlane.f32.xlu0 %v4655_v22  ;;  %v16209_v46 = vpop.f32.mrb[43].mxu0  ;;  %v17246_v16 = vld [vmem:[#allocation8 + $0x1cc] ss:$16 sps:$4 sm:$0xff]   ;;  %v17249_v28 = vld [vmem:[#allocation8 + $0x1e4] ss:$16 sps:$4 sm:$0xff]  }
 0xcbb   :  { %v17244_v56 = vld [vmem:[#allocation8 + $0x1c8] ss:$16 sps:$4 sm:$0xff]   ;;  %v17247_v21 = vld [vmem:[#allocation8 + $0x1e0] ss:$16 sps:$4 sm:$0xff]   ;;  %v17252_v10 = vld [vmem:[#allocation8 + $0x1ec] ss:$16 sps:$4 sm:$0xff]  }
 0xcbc   :  { %v17250_v22 = vld [vmem:[#allocation8 + $0x1e8] ss:$16 sps:$4 sm:$0xff]   ;;  %v19140_v47 = vsub.s32 6, %v18837_v52 }
 0xcbe   :  { %v746_v46 = vrot.slane %v18924_v31, %v19140_v47 }
 0xccb   :  { %4727 = vrot.lane.b32.xlu1 %v19073_v42, %s18537_s21  ;;  %v17234_v42 = vld [vmem:[#allocation8 + $0x18c] ss:$16 sps:$4 sm:$0xff]  }
 0xd47   :  { %v4660_v1 = vpop.xlane.xlu1 %4659  ;;  %v4657_v7 = vpop.xlane.xlu0 %4656 }
 0xd48   :  { %v4662_v14 = vsub.f32 %v4654_v12, %v4660_v1  ;;  %v4661_v54 = vsub.f32 %v4653_v11, %v4657_v7  ;;  %v17238_v11 = vld [vmem:[#allocation8 + $0x1a8] ss:$16 sps:$4 sm:$0xff]   ;;  %v17241_v12 = vld [vmem:[#allocation8 + $0x1c0] ss:$16 sps:$4 sm:$0xff]   ;;  %v16336_v1 = vadd.f32 %v18930_v3, %v746_v46  ;;  %v16338_v7 = vadd.f32 %v18939_v51, %v746_v46 }
 0xd4a   :  { %v4663_v8 = vmul.f32 1.442695, %v4661_v54  ;;  %v4665_v20 = vmul.f32 1.442695, %v4662_v14  ;;  %v730_v54 = vrot.slane %v18924_v31, %v18840_v57 }
 0xd4b   :  { %v4728_v25 = vpop.permute.xlu1 %4727 }
 0xd4c   :  { %v4733_v26 = vsel %vm3493_vm2, %v4728_v25, 0  ;;  %18145 = vpow2.f32 %v4663_v8  ;;  %v19148_v25 = vpack.c.bf16 %v16336_v1, %v16336_v1  ;;  %v16330_v3 = vadd.f32 %v18907_v45, %v730_v54 }
 0xd4d   :  { %16223 = vmatpush3.bf16.msra.mxu1 %v4733_v26  ;;  %18147 = vpow2.f32 %v4665_v20  ;;  %v19150_v26 = vpack.c.bf16 %v16338_v7, %v16338_v7 }
 0xd4e   :  { %4902 = vmatprep.subr.bf16.mxu1 %v17234_v42  ;;  %v4977_v31 = vsel %vm3368_vm1, %v19148_v25, 0  ;;  %v4954_v45 = vmul.f32 0.125, %v16330_v3 }
 0xd56   :  { %v18146_v33 = vpop.eup %18145 }
 0xd57   :  { %v4667_v58 = vsel %vm3465_vm4, %v18146_v33, 0.0  ;;  %v18148_v27 = vpop.eup %18147 }
 0xd58   :  { %4668 = vadd.xlane.f32.xlu0 %v4667_v58  ;;  %v4670_v9 = vsel %vm3465_vm4, %v18148_v27, 0.0 }
 0xd5c   :  { %4671 = vadd.xlane.f32.xlu0 %v4670_v9  ;;  %v16328_v9 = vadd.f32 %v18899_v40, %v730_v54 }
 0xd5e   :  { %v4953_v40 = vmul.f32 0.125, %v16328_v9 }
 0xd72   :  { %4679 = vrot.lane.b32.xlu0 %v19071_v24, %s18537_s21  ;;  %v17232_v24 = vld [vmem:[#allocation8 + $0x188] ss:$16 sps:$4 sm:$0xff]  }
 0xde5   :  { %v4669_v48 = vpop.xlane.xlu0 %4668 }
 0xde6   :  { %18149 = vrcp.f32 %v4669_v48 }
 0xde9   :  { %v4672_v29 = vpop.xlane.xlu0 %4671 }
 0xdea   :  { %18151 = vrcp.f32 %v4672_v29  ;;  %v5023_v29 = vsel %vm3368_vm1, %v19150_v26, 0 }
 0xded   :  { %v4680_v0 = vpop.permute.xlu0 %4679 }
 0xdee   :  { %v4685_v35 = vsel %vm3493_vm2, %v4680_v0, 0 }
 0xdef   :  { %16217 = vmatpush3.bf16.msra.mxu0 %v4685_v35  ;;  %v16056_v35 = vpack.c.bf16 %v4953_v40, %v4953_v40  ;;  %v17267_v40 = vld [vmem:[#allocation8 + $0x244] ss:$16 sps:$4 sm:$0xff]  }
 0xdf0   :  { %v18150_v17 = vpop.eup %18149  ;;  %4859 = vmatprep.subr.bf16.mxu0 %v17231_v39 }
 0xdf1   :  { %v4675_v37 = vmul.f32 %v18150_v17, %v18146_v33  ;;  %v762_v33 = vrot.slane %v18957_v44, %v18840_v57  ;;  %v16057_v17 = vpack.c.bf16 %v4954_v45, %v4954_v45  ;;  %v17268_v45 = vld [vmem:[#allocation8 + $0x248] ss:$16 sps:$4 sm:$0xff]  }
 0xdf3   :  { %v4677_v50 = vpack.c.bf16 %v4675_v37, %v4675_v37  ;;  %v16344_v39 = vadd.f32 %v18961_v13, %v762_v33  ;;  %v16346_v0 = vadd.f32 %v18969_v18, %v762_v33 }
 0xdf4   :  { %v18152_v63 = vpop.eup %18151 }
 0xdf5   :  { %v4676_v4 = vmul.f32 %v18152_v63, %v18148_v27  ;;  %16219 = vmatmul.mubr.msk.bf16.vlgmr.msra.gmra.mrb[44].mxu0 %vm3465_vm4, %v4677_v50  ;;  %v19170_v13 = vpack.c.bf16 %v16344_v39, %v16344_v39  ;;  %v19172_v18 = vpack.c.bf16 %v16346_v0, %v16346_v0  ;;  %v17262_v39 = vld [vmem:[#allocation8 + $0x228] ss:$16 sps:$4 sm:$0xff]   ;;  %v17259_v0 = vld [vmem:[#allocation8 + $0x220] ss:$16 sps:$4 sm:$0xff]  }
 0xdf6   :  { %4860 = vmatpush1.bf16.msra.mxu0 %v17229_v41  ;;  %4891 = vmatprep.mubr.bf16.mxu0 %v18550_v55 }
 0xdf7   :  { %v4678_v38 = vpack.c.bf16 %v4676_v4, %v4676_v4  ;;  %4861 = vmatprep.subr.bf16.mxu0 %v17237_v61  ;;  %v5095_v37 = vsel %vm3493_vm2, %v19170_v13, 0  ;;  %v5141_v41 = vsel %vm3493_vm2, %v19172_v18, 0 }
 0xdf9   :  { %16225 = vmatmul.mubr.msk.bf16.vlgmr.msra.gmra.mrb[44].mxu1 %vm3465_vm4, %v4678_v38 }
 0xdfa   :  { %4903 = vmatpush1.bf16.msra.mxu1 %v17232_v24  ;;  %4862 = vmatpush1.bf16.msra.mxu0 %v17235_v6 }
 0xdfb   :  { %4904 = vmatprep.subr.bf16.mxu1 %v17240_v34  ;;  %4863 = vmatprep.subr.bf16.mxu0 %v17243_v53 }
 0xdfc   :  { %4934 = vmatprep.mubr.bf16.mxu1 %v18550_v55 }
 0xdfe   :  { %4905 = vmatpush1.bf16.msra.mxu1 %v17238_v11  ;;  %4864 = vmatpush1.bf16.msra.mxu0 %v17241_v12 }
 0xdff   :  { %4906 = vmatprep.subr.bf16.mxu1 %v17246_v16  ;;  %4865 = vmatprep.subr.bf16.mxu0 %v17249_v28 }
 0xe02   :  { %4907 = vmatpush1.bf16.msra.mxu1 %v17244_v56  ;;  %4866 = vmatpush1.bf16.msra.mxu0 %v17247_v21 }
 0xe03   :  { %4908 = vmatprep.subr.bf16.mxu1 %v17252_v10  ;;  %16228 = vmatprep.subr.bf16.mxu0 %v18548_v2 }
 0xe06   :  { %4909 = vmatpush1.bf16.msra.mxu1 %v17250_v22 }
 0xe07   :  { %16234 = vmatprep.subr.bf16.mxu1 %v18548_v2 }
 0xec8   :  { %v4721_v14 = vpop.f32.mrb[44].mxu0 }
 0xec9   :  { %v16220_v8 = vpop.f32.mrb[45].mxu0 }
 0xeca   :  { %v4724_v20 = vpop.f32.mrb[46].mxu0  ;;  %v17255_v8 = vld [vmem:[#allocation8 + $0x204] ss:$16 sps:$4 sm:$0xff]  }
 0xecb   :  { %v16221_v58 = vpop.f32.mrb[47].mxu0  ;;  %v17258_v20 = vld [vmem:[#allocation8 + $0x20c] ss:$16 sps:$4 sm:$0xff]  }
 0xecc   :  { %v4769_v27 = vpop.f32.mrb[44].mxu1 }
 0xecd   :  { %v4775_v51 = vpack.c.bf16 %v4769_v27, %v4721_v14  ;;  %v16226_v42 = vpop.f32.mrb[45].mxu1 }
 0xece   :  { %v4772_v48 = vpop.f32.mrb[46].mxu1 }
 0xecf   :  { %v16227_v44 = vpop.f32.mrb[47].mxu1  ;;  %14918 = vmatmul.mubr.msk.bf16.vlgmr.msra.gmra.mrb[28].mxu0 %vm3368_vm1, %v4775_v51  ;;  %14919 = vmatmul.mubr.msk.bf16.vlgmr.msra.gmra.mrb[28].mxu1 %vm3368_vm1, %v4775_v51  ;;  %v17253_v48 = vld [vmem:[#allocation8 + $0x200] ss:$16 sps:$4 sm:$0xff]  }
 0xed0   :  { %16229 = vmatpush3.bf16.xpose.msra.mxu0 %v4977_v31  ;;  %16235 = vmatpush3.bf16.xpose.msra.mxu1 %v5023_v29  ;;  %v17264_v31 = vld [vmem:[#allocation8 + $0x22c] ss:$16 sps:$4 sm:$0xff]  }
 0xed1   :  { %16230 = vmatprep.mubr.msk.bf16.mxu0 %vm18549_vm0, %v18548_v2  ;;  %16236 = vmatprep.mubr.msk.bf16.mxu1 %vm18549_vm0, %v18548_v2  ;;  %v17270_v44 = vld [vmem:[#allocation8 + $0x24c] ss:$16 sps:$4 sm:$0xff]  }
 0xed2   :  { %16240 = vmatprep.subr.bf16.mxu0 %v18548_v2  ;;  %16246 = vmatprep.subr.bf16.mxu1 %v18548_v2 }
 0xed7   :  { %16231 = vmatmul.mubr.msk.bf16.vlgmr.msra.gmra.mrb[48].mxu0 %vm3368_vm1, %v16056_v35  ;;  %16237 = vmatmul.mubr.msk.bf16.vlgmr.msra.gmra.mrb[48].mxu1 %vm3368_vm1, %v16057_v17 }
 0xed8   :  { %16241 = vmatpush3.bf16.msra.mxu0 %v5095_v37  ;;  %16247 = vmatpush3.bf16.msra.mxu1 %v5141_v41  ;;  %v17273_v37 = vld [vmem:[#allocation8 + $0x264] ss:$16 sps:$4 sm:$0xff]   ;;  %v17274_v41 = vld [vmem:[#allocation8 + $0x268] ss:$16 sps:$4 sm:$0xff]  }
 0xed9   :  { %16242 = vmatprep.mubr.msk.bf16.mxu0 %vm18549_vm0, %v18548_v2  ;;  %16248 = vmatprep.mubr.msk.bf16.mxu1 %vm18549_vm0, %v18548_v2 }
 0xeda   :  { %5267 = vmatprep.subr.bf16.mxu0 %v17255_v8  ;;  %5310 = vmatprep.subr.bf16.mxu1 %v17258_v20 }
 0xfaa   :  { %v5013_v50 = vpop.f32.mrb[48].mxu0  ;;  %v5059_v61 = vpop.f32.mrb[48].mxu1 }
 0xfab   :  { %v5065_v63 = vsel %vm18985_vm3, %v5013_v50, -inf  ;;  %v5066_v4 = vsel %vm18985_vm3, %v5059_v61, -inf  ;;  %v16232_v24 = vpop.f32.mrb[49].mxu0  ;;  %v16238_v6 = vpop.f32.mrb[49].mxu1  ;;  %v17271_v50 = vld [vmem:[#allocation8 + $0x260] ss:$16 sps:$4 sm:$0xff]  }
 0xfac   :  { %v5016_v38 = vpop.f32.mrb[50].mxu0  ;;  %v5062_v34 = vpop.f32.mrb[50].mxu1  ;;  %v5070_v53 = vsel %vm3465_vm4, %v5066_v4, -inf  ;;  %v5067_v11 = vsel %vm3465_vm4, %v5065_v63, -inf }
 0xfad   :  { %5071 = vmax.xlane.f32.xlu0 %v5070_v53  ;;  %v16239_v12 = vpop.f32.mrb[51].mxu1  ;;  %5068 = vmax.xlane.f32.xlu1 %v5067_v11  ;;  %v16233_v16 = vpop.f32.mrb[51].mxu0 }
0x103a   :  { %v5072_v28 = vpop.xlane.xlu0 %5071  ;;  %v5069_v56 = vpop.xlane.xlu1 %5068 }
0x103b   :  { %v5074_v21 = vsub.f32 %v5066_v4, %v5072_v28  ;;  %v5073_v10 = vsub.f32 %v5065_v63, %v5069_v56 }
0x103d   :  { %v5077_v22 = vmul.f32 1.442695, %v5074_v21  ;;  %v5075_v46 = vmul.f32 1.442695, %v5073_v10 }
0x103f   :  { %18153 = vpow2.f32 %v5077_v22 }
0x1040   :  { %18155 = vpow2.f32 %v5075_v46 }
0x1049   :  { %v18154_v1 = vpop.eup %18153 }
0x104a   :  { %v18156_v7 = vpop.eup %18155  ;;  %v5082_v14 = vsel %vm3465_vm4, %v18154_v1, 0.0 }
0x104b   :  { %5083 = vadd.xlane.f32.xlu1 %v5082_v14  ;;  %v5079_v54 = vsel %vm3465_vm4, %v18156_v7, 0.0 }
0x104c   :  { %5080 = vadd.xlane.f32.xlu0 %v5079_v54 }
0x105c   :  { %5413 = vrot.lane.b32.xlu1 %v19150_v26, %s18537_s21  ;;  %v17256_v26 = vld [vmem:[#allocation8 + $0x208] ss:$16 sps:$4 sm:$0xff]  }
0x1060   :  { %5361 = vrot.lane.b32.xlu1 %v16056_v35, %s18537_s21  ;;  %v17265_v35 = vld [vmem:[#allocation8 + $0x240] ss:$16 sps:$4 sm:$0xff]  }
0x1062   :  { %5363 = vrot.lane.b32.xlu0 %v19148_v25, %s18537_s21  ;;  %v17261_v25 = vld [vmem:[#allocation8 + $0x224] ss:$16 sps:$4 sm:$0xff]  }
0x1064   :  { %5411 = vrot.lane.b32.xlu1 %v16057_v17, %s18537_s21  ;;  %v17276_v17 = vld [vmem:[#allocation8 + $0x26c] ss:$16 sps:$4 sm:$0xff]  }
0x10d8   :  { %v5084_v33 = vpop.xlane.xlu1 %5083 }
0x10d9   :  { %v5081_v58 = vpop.xlane.xlu0 %5080  ;;  %18157 = vrcp.f32 %v5084_v33 }
0x10da   :  { %18159 = vrcp.f32 %v5081_v58 }
0x10dc   :  { %v5414_v61 = vpop.permute.xlu1 %5413 }
0x10dd   :  { %v5364_v63 = vpop.permute.xlu0 %5363  ;;  %v5419_v28 = vsel %vm3368_vm1, %v5414_v61, 0 }
0x10de   :  { %v5369_v16 = vsel %vm3368_vm1, %v5364_v63, 0  ;;  %v17277_v63 = vld [vmem:[#allocation8 + $0x280] ss:$16 sps:$4 sm:$0xff]  }
0x10e0   :  { %v5362_v21 = vpop.permute.xlu1 %5361 }
0x10e3   :  { %v18158_v27 = vpop.eup %18157 }
0x10e4   :  { %v18160_v9 = vpop.eup %18159  ;;  %v5088_v3 = vmul.f32 %v18158_v27, %v18154_v1  ;;  %v5412_v10 = vpop.permute.xlu1 %5411 }
0x10e5   :  { %v5087_v51 = vmul.f32 %v18160_v9, %v18156_v7 }
0x10e6   :  { %v5090_v42 = vpack.c.bf16 %v5088_v3, %v5088_v3 }
0x10e7   :  { %v5089_v29 = vpack.c.bf16 %v5087_v51, %v5087_v51 }
0x10e8   :  { %16249 = vmatmul.mubr.msk.bf16.vlgmr.msra.gmra.mrb[52].mxu1 %vm3465_vm4, %v5090_v42 }
0x10e9   :  { %16243 = vmatmul.mubr.msk.bf16.vlgmr.msra.gmra.mrb[52].mxu0 %vm3465_vm4, %v5089_v29  ;;  %5311 = vmatpush1.bf16.msra.mxu1 %v17256_v26 }
0x10ea   :  { %5268 = vmatpush1.bf16.msra.mxu0 %v17253_v48  ;;  %5312 = vmatprep.subr.bf16.mxu1 %v17264_v31 }
0x10eb   :  { %5269 = vmatprep.subr.bf16.mxu0 %v17261_v25  ;;  %5299 = vmatprep.mubr.bf16.mxu0 %v18550_v55 }
0x10ec   :  { %5342 = vmatprep.mubr.bf16.mxu1 %v18550_v55 }
0x10ed   :  { %5313 = vmatpush1.bf16.msra.mxu1 %v17262_v39 }
0x10ee   :  { %5270 = vmatpush1.bf16.msra.mxu0 %v17259_v0  ;;  %5314 = vmatprep.subr.bf16.mxu1 %v17270_v44 }
0x10ef   :  { %5271 = vmatprep.subr.bf16.mxu0 %v17267_v40 }
0x10f1   :  { %5315 = vmatpush1.bf16.msra.mxu1 %v17268_v45 }
0x10f2   :  { %5272 = vmatpush1.bf16.msra.mxu0 %v17265_v35  ;;  %5316 = vmatprep.subr.bf16.mxu1 %v17276_v17  ;;  %v17279_v17 = vld [vmem:[#allocation8 + $0x284] ss:$16 sps:$4 sm:$0xff]  }
0x10f3   :  { %5273 = vmatprep.subr.bf16.mxu0 %v17273_v37 }
0x10f5   :  { %5317 = vmatpush1.bf16.msra.mxu1 %v17274_v41 }
0x10f6   :  { %5274 = vmatpush1.bf16.msra.mxu0 %v17271_v50  ;;  %16258 = vmatprep.subr.bf16.mxu1 %v18548_v2 }
0x10f7   :  { %16252 = vmatprep.subr.bf16.mxu0 %v18548_v2 }
0x11bb   :  { %v5177_v4 = vpop.f32.mrb[52].mxu1 }
0x11bc   :  { %v5131_v24 = vpop.f32.mrb[52].mxu0  ;;  %v16250_v6 = vpop.f32.mrb[53].mxu1 }
0x11bd   :  { %v5183_v38 = vpack.c.bf16 %v5177_v4, %v5131_v24  ;;  %v16244_v34 = vpop.f32.mrb[53].mxu0  ;;  %v5180_v53 = vpop.f32.mrb[54].mxu1  ;;  %v17285_v24 = vld [vmem:[#allocation8 + $0x2a4] ss:$16 sps:$4 sm:$0xff]  }
0x11be   :  { %v5134_v11 = vpop.f32.mrb[54].mxu0  ;;  %v16251_v12 = vpop.f32.mrb[55].mxu1  ;;  %v17283_v34 = vld [vmem:[#allocation8 + $0x2a0] ss:$16 sps:$4 sm:$0xff]  }
0x11bf   :  { %v16245_v56 = vpop.f32.mrb[55].mxu0  ;;  %14946 = vmatmul.mubr.msk.bf16.vlgmr.msra.gmra.mrb[28].mxu0 %vm3368_vm1, %v5183_v38  ;;  %14947 = vmatmul.mubr.msk.bf16.vlgmr.msra.gmra.mrb[28].mxu1 %vm3368_vm1, %v5183_v38  ;;  %v17288_v11 = vld [vmem:[#allocation8 + $0x2ac] ss:$16 sps:$4 sm:$0xff]   ;;  %v17291_v12 = vld [vmem:[#allocation8 + $0x2c4] ss:$16 sps:$4 sm:$0xff]  }
0x11c0   :  { %16253 = vmatpush3.bf16.xpose.msra.mxu0 %v5369_v16  ;;  %16259 = vmatpush3.bf16.xpose.msra.mxu1 %v5419_v28  ;;  %v17286_v16 = vld [vmem:[#allocation8 + $0x2a8] ss:$16 sps:$4 sm:$0xff]   ;;  %v17289_v28 = vld [vmem:[#allocation8 + $0x2c0] ss:$16 sps:$4 sm:$0xff]   ;;  %v17294_v56 = vld [vmem:[#allocation8 + $0x2cc] ss:$16 sps:$4 sm:$0xff]  }
0x11c1   :  { %16254 = vmatprep.mubr.msk.bf16.mxu0 %vm18549_vm0, %v18548_v2  ;;  %16260 = vmatprep.mubr.msk.bf16.mxu1 %vm18549_vm0, %v18548_v2 }
0x11c2   :  { %16270 = vmatprep.subr.bf16.mxu1 %v18548_v2  ;;  %16264 = vmatprep.subr.bf16.mxu0 %v18548_v2 }
0x11c7   :  { %16255 = vmatmul.mubr.msk.bf16.vlgmr.msra.gmra.mrb[56].mxu0 %vm3368_vm1, %v5362_v21  ;;  %16261 = vmatmul.mubr.msk.bf16.vlgmr.msra.gmra.mrb[56].mxu1 %vm3368_vm1, %v5412_v10  ;;  %v17297_v21 = vld [vmem:[#allocation8 + $0x2e4] ss:$16 sps:$4 sm:$0xff]   ;;  %v17292_v10 = vld [vmem:[#allocation8 + $0x2c8] ss:$16 sps:$4 sm:$0xff]  }
0x11c8   :  { %16266 = vmatprep.mubr.msk.bf16.mxu0 %vm18549_vm0, %v18548_v2  ;;  %16272 = vmatprep.mubr.msk.bf16.mxu1 %vm18549_vm0, %v18548_v2 }
0x129a   :  { %v5405_v22 = vpop.f32.mrb[56].mxu0  ;;  %v5455_v46 = vpop.f32.mrb[56].mxu1 }
0x129b   :  { %v5461_v1 = vsel %vm18985_vm3, %v5405_v22, -inf  ;;  %v5462_v7 = vsel %vm18985_vm3, %v5455_v46, -inf  ;;  %v16256_v14 = vpop.f32.mrb[57].mxu0  ;;  %v16262_v54 = vpop.f32.mrb[57].mxu1  ;;  %v17295_v22 = vld [vmem:[#allocation8 + $0x2e0] ss:$16 sps:$4 sm:$0xff]  }
0x129c   :  { %v5408_v8 = vpop.f32.mrb[58].mxu0  ;;  %v5458_v20 = vpop.f32.mrb[58].mxu1  ;;  %v5466_v33 = vsel %vm3465_vm4, %v5462_v7, -inf  ;;  %v5463_v58 = vsel %vm3465_vm4, %v5461_v1, -inf  ;;  %v17300_v46 = vld [vmem:[#allocation8 + $0x2ec] ss:$16 sps:$4 sm:$0xff]  }
0x129d   :  { %5467 = vmax.xlane.f32.xlu1 %v5466_v33  ;;  %v16263_v27 = vpop.f32.mrb[59].mxu1  ;;  %5464 = vmax.xlane.f32.xlu0 %v5463_v58  ;;  %v16257_v9 = vpop.f32.mrb[59].mxu0  ;;  %v18193_v14 = vld [vmem:[#allocation7] sm:$0xff] }
0x129e   :  { %v734_v58 = vrot.slane %v18193_v14, %v18851_v5 }
0x12ae   :  { %5535 = vrot.lane.b32.xlu1 %v19172_v18, %s18537_s21  ;;  %v17282_v18 = vld [vmem:[#allocation8 + $0x28c] ss:$16 sps:$4 sm:$0xff]  }
0x132a   :  { %v5468_v3 = vpop.xlane.xlu1 %5467  ;;  %v5465_v51 = vpop.xlane.xlu0 %5464 }
0x132b   :  { %v5470_v26 = vsub.f32 %v5462_v7, %v5468_v3  ;;  %v5469_v42 = vsub.f32 %v5461_v1, %v5465_v51  ;;  %v17298_v1 = vld [vmem:[#allocation8 + $0x2e8] ss:$16 sps:$4 sm:$0xff]   ;;  %v19241_v7 = vsub.s32 7, %v18837_v52 }
0x132d   :  { %v5471_v48 = vmul.f32 1.442695, %v5469_v42  ;;  %v5473_v31 = vmul.f32 1.442695, %v5470_v26  ;;  %v750_v54 = vrot.slane %v18193_v14, %v19241_v7  ;;  %v18194_v26 = vld [vmem:[#allocation7 + $0x8] sm:$0xf] }
0x132e   :  { %v5536_v29 = vpop.permute.xlu1 %5535  ;;  %v766_v52 = vrot.slane %v18194_v26, %v18851_v5 }
0x132f   :  { %v5541_v25 = vsel %vm3493_vm2, %v5536_v29, 0  ;;  %18161 = vpow2.f32 %v5471_v48  ;;  %v16337_v8 = vadd.f32 %v18934_v36, %v750_v54  ;;  %v16339_v20 = vadd.f32 %v18943_v59, %v750_v54  ;;  %v17303_v54 = vld [vmem:[#allocation8 + $0x304] ss:$16 sps:$4 sm:$0xff]  }
0x1330   :  { %16271 = vmatpush3.bf16.msra.mxu1 %v5541_v25  ;;  %18163 = vpow2.f32 %v5473_v31  ;;  %v16329_v31 = vadd.f32 %v18903_v43, %v734_v58  ;;  %v16331_v36 = vadd.f32 %v18911_v49, %v734_v58 }
0x1331   :  { %5710 = vmatprep.subr.bf16.mxu1 %v17282_v18  ;;  %v19247_v3 = vpack.c.bf16 %v16337_v8, %v16337_v8  ;;  %v19249_v51 = vpack.c.bf16 %v16339_v20, %v16339_v20  ;;  %v17306_v8 = vld [vmem:[#allocation8 + $0x30c] ss:$16 sps:$4 sm:$0xff]  }
0x1332   :  { %v5761_v43 = vmul.f32 0.125, %v16329_v31  ;;  %v5762_v49 = vmul.f32 0.125, %v16331_v36  ;;  %v17310_v36 = vld [vmem:[#allocation8 + $0x328] ss:$16 sps:$4 sm:$0xff]  }
0x1339   :  { %v18162_v39 = vpop.eup %18161 }
0x133a   :  { %v5475_v0 = vsel %vm3465_vm4, %v18162_v39, 0.0  ;;  %v18164_v44 = vpop.eup %18163 }
0x133b   :  { %5476 = vadd.xlane.f32.xlu0 %v5475_v0  ;;  %v5478_v40 = vsel %vm3465_vm4, %v18164_v44, 0.0  ;;  %v5831_v0 = vsel %vm3368_vm1, %v19249_v51, 0 }
0x133f   :  { %5479 = vadd.xlane.f32.xlu0 %v5478_v40  ;;  %v16347_v40 = vadd.f32 %v18973_v19, %v766_v52 }
0x1341   :  { %v19270_v19 = vpack.c.bf16 %v16347_v40, %v16347_v40  ;;  %v17321_v40 = vld [vmem:[#allocation8 + $0x364] ss:$16 sps:$4 sm:$0xff]  }
0x1355   :  { %5487 = vrot.lane.b32.xlu0 %v19170_v13, %s18537_s21  ;;  %v17280_v13 = vld [vmem:[#allocation8 + $0x288] ss:$16 sps:$4 sm:$0xff]  }
0x13c8   :  { %v5477_v45 = vpop.xlane.xlu0 %5476 }
0x13c9   :  { %18165 = vrcp.f32 %v5477_v45  ;;  %v16062_v45 = vpack.c.bf16 %v5761_v43, %v5761_v43  ;;  %v17319_v43 = vld [vmem:[#allocation8 + $0x360] ss:$16 sps:$4 sm:$0xff]  }
0x13cc   :  { %v5480_v35 = vpop.xlane.xlu0 %5479 }
0x13cd   :  { %18167 = vrcp.f32 %v5480_v35  ;;  %v16063_v35 = vpack.c.bf16 %v5762_v49, %v5762_v49 }
0x13d0   :  { %v5488_v37 = vpop.permute.xlu0 %5487 }
0x13d1   :  { %v5493_v41 = vsel %vm3493_vm2, %v5488_v37, 0  ;;  %v5949_v37 = vsel %vm3493_vm2, %v19270_v19, 0 }
0x13d2   :  { %16265 = vmatpush3.bf16.msra.mxu0 %v5493_v41 }
0x13d3   :  { %v18166_v50 = vpop.eup %18165  ;;  %5667 = vmatprep.subr.bf16.mxu0 %v17279_v17 }
0x13d4   :  { %v5483_v61 = vmul.f32 %v18166_v50, %v18162_v39  ;;  %v5785_v39 = vsel %vm3368_vm1, %v19247_v3, 0 }
0x13d6   :  { %v5485_v4 = vpack.c.bf16 %v5483_v61, %v5483_v61 }
0x13d7   :  { %v18168_v6 = vpop.eup %18167 }
0x13d8   :  { %v5484_v38 = vmul.f32 %v18168_v6, %v18164_v44  ;;  %16267 = vmatmul.mubr.msk.bf16.vlgmr.msra.gmra.mrb[60].mxu0 %vm3465_vm4, %v5485_v4  ;;  %v16345_v44 = vadd.f32 %v18965_v15, %v766_v52 }
0x13d9   :  { %5668 = vmatpush1.bf16.msra.mxu0 %v17277_v63  ;;  %5699 = vmatprep.mubr.bf16.mxu0 %v18550_v55 }
0x13da   :  { %v5486_v53 = vpack.c.bf16 %v5484_v38, %v5484_v38  ;;  %5669 = vmatprep.subr.bf16.mxu0 %v17285_v24  ;;  %v19268_v15 = vpack.c.bf16 %v16345_v44, %v16345_v44  ;;  %v17324_v44 = vld [vmem:[#allocation8 + $0x36c] ss:$16 sps:$4 sm:$0xff]  }
0x13dc   :  { %16273 = vmatmul.mubr.msk.bf16.vlgmr.msra.gmra.mrb[60].mxu1 %vm3465_vm4, %v5486_v53  ;;  %v5903_v17 = vsel %vm3493_vm2, %v19268_v15, 0 }
0x13dd   :  { %5711 = vmatpush1.bf16.msra.mxu1 %v17280_v13  ;;  %5670 = vmatpush1.bf16.msra.mxu0 %v17283_v34 }
0x13de   :  { %5712 = vmatprep.subr.bf16.mxu1 %v17288_v11  ;;  %5671 = vmatprep.subr.bf16.mxu0 %v17291_v12 }
0x13df   :  { %5742 = vmatprep.mubr.bf16.mxu1 %v18550_v55 }
0x13e1   :  { %5713 = vmatpush1.bf16.msra.mxu1 %v17286_v16  ;;  %5672 = vmatpush1.bf16.msra.mxu0 %v17289_v28 }
0x13e2   :  { %5714 = vmatprep.subr.bf16.mxu1 %v17294_v56  ;;  %5673 = vmatprep.subr.bf16.mxu0 %v17297_v21 }
0x13e5   :  { %5715 = vmatpush1.bf16.msra.mxu1 %v17292_v10  ;;  %5674 = vmatpush1.bf16.msra.mxu0 %v17295_v22 }
0x13e6   :  { %5716 = vmatprep.subr.bf16.mxu1 %v17300_v46  ;;  %16276 = vmatprep.subr.bf16.mxu0 %v18548_v2 }
0x13e9   :  { %5717 = vmatpush1.bf16.msra.mxu1 %v17298_v1 }
0x13ea   :  { %16282 = vmatprep.subr.bf16.mxu1 %v18548_v2 }
0x14ab   :  { %v5529_v33 = vpop.f32.mrb[60].mxu0 }
0x14ac   :  { %v16268_v27 = vpop.f32.mrb[61].mxu0 }
0x14ad   :  { %v5532_v9 = vpop.f32.mrb[62].mxu0 }
0x14ae   :  { %v16269_v42 = vpop.f32.mrb[63].mxu0 }
0x14af   :  { %v5577_v48 = vpop.f32.mrb[60].mxu1  ;;  %v17301_v42 = vld [vmem:[#allocation8 + $0x300] ss:$16 sps:$4 sm:$0xff]  }
0x14b0   :  { %v5583_v29 = vpack.c.bf16 %v5577_v48, %v5529_v33  ;;  %v16274_v59 = vpop.f32.mrb[61].mxu1  ;;  %v17312_v48 = vld [vmem:[#allocation8 + $0x32c] ss:$16 sps:$4 sm:$0xff]  }
0x14b1   :  { %v5580_v25 = vpop.f32.mrb[62].mxu1  ;;  %v17318_v59 = vld [vmem:[#allocation8 + $0x34c] ss:$16 sps:$4 sm:$0xff]  }
0x14b2   :  { %v16275_v18 = vpop.f32.mrb[63].mxu1  ;;  %14968 = vmatmul.mubr.msk.bf16.vlgmr.msra.gmra.mrb[28].mxu0 %vm3368_vm1, %v5583_v29  ;;  %14969 = vmatmul.mubr.msk.bf16.vlgmr.msra.gmra.mrb[28].mxu1 %vm3368_vm1, %v5583_v29  ;;  %v17307_v29 = vld [vmem:[#allocation8 + $0x320] ss:$16 sps:$4 sm:$0xff]   ;;  %v17315_v25 = vld [vmem:[#allocation8 + $0x344] ss:$16 sps:$4 sm:$0xff]  }
0x14b3   :  { %16277 = vmatpush3.bf16.xpose.msra.mxu0 %v5785_v39  ;;  %16283 = vmatpush3.bf16.xpose.msra.mxu1 %v5831_v0  ;;  %v17316_v39 = vld [vmem:[#allocation8 + $0x348] ss:$16 sps:$4 sm:$0xff]   ;;  %v17313_v0 = vld [vmem:[#allocation8 + $0x340] ss:$16 sps:$4 sm:$0xff]  }
0x14b4   :  { %16278 = vmatprep.mubr.msk.bf16.mxu0 %vm18549_vm0, %v18548_v2  ;;  %16284 = vmatprep.mubr.msk.bf16.mxu1 %vm18549_vm0, %v18548_v2  ;;  %v17322_v18 = vld [vmem:[#allocation8 + $0x368] ss:$16 sps:$4 sm:$0xff]  }
0x14b5   :  { %16288 = vmatprep.subr.bf16.mxu0 %v18548_v2  ;;  %16294 = vmatprep.subr.bf16.mxu1 %v18548_v2 }
0x14ba   :  { %16279 = vmatmul.mubr.msk.bf16.vlgmr.msra.gmra.mrb[64].mxu0 %vm3368_vm1, %v16062_v45  ;;  %16285 = vmatmul.mubr.msk.bf16.vlgmr.msra.gmra.mrb[64].mxu1 %vm3368_vm1, %v16063_v35 }
0x14bb   :  { %16289 = vmatpush3.bf16.msra.mxu0 %v5903_v17  ;;  %16295 = vmatpush3.bf16.msra.mxu1 %v5949_v37 }
0x14bc   :  { %16290 = vmatprep.mubr.msk.bf16.mxu0 %vm18549_vm0, %v18548_v2  ;;  %16296 = vmatprep.mubr.msk.bf16.mxu1 %vm18549_vm0, %v18548_v2 }
0x14bd   :  { %6075 = vmatprep.subr.bf16.mxu0 %v17303_v54  ;;  %6118 = vmatprep.subr.bf16.mxu1 %v17306_v8 }
0x158d   :  { %v5821_v41 = vpop.f32.mrb[64].mxu0  ;;  %v5867_v50 = vpop.f32.mrb[64].mxu1 }
0x158e   :  { %v5873_v61 = vsel %vm18985_vm3, %v5821_v41, -inf  ;;  %v5874_v63 = vsel %vm18985_vm3, %v5867_v50, -inf  ;;  %v16280_v4 = vpop.f32.mrb[65].mxu0  ;;  %v16286_v24 = vpop.f32.mrb[65].mxu1 }
0x158f   :  { %v5824_v6 = vpop.f32.mrb[66].mxu0  ;;  %v5870_v38 = vpop.f32.mrb[66].mxu1  ;;  %v5878_v13 = vsel %vm3465_vm4, %v5874_v63, -inf  ;;  %v5875_v34 = vsel %vm3465_vm4, %v5873_v61, -inf }
0x1590   :  { %5879 = vmax.xlane.f32.xlu0 %v5878_v13  ;;  %v16287_v53 = vpop.f32.mrb[67].mxu1  ;;  %5876 = vmax.xlane.f32.xlu1 %v5875_v34  ;;  %v16281_v11 = vpop.f32.mrb[67].mxu0 }
0x161d   :  { %v5880_v12 = vpop.xlane.xlu0 %5879  ;;  %v5877_v16 = vpop.xlane.xlu1 %5876 }
0x161e   :  { %v5882_v28 = vsub.f32 %v5874_v63, %v5880_v12  ;;  %v5881_v56 = vsub.f32 %v5873_v61, %v5877_v16 }
0x1620   :  { %v5885_v21 = vmul.f32 1.442695, %v5882_v28  ;;  %v5883_v10 = vmul.f32 1.442695, %v5881_v56 }
0x1622   :  { %18169 = vpow2.f32 %v5885_v21 }
0x1623   :  { %18171 = vpow2.f32 %v5883_v10 }
0x162c   :  { %v18170_v22 = vpop.eup %18169 }
0x162d   :  { %v18172_v46 = vpop.eup %18171  ;;  %v5890_v1 = vsel %vm3465_vm4, %v18170_v22, 0.0 }
0x162e   :  { %5891 = vadd.xlane.f32.xlu1 %v5890_v1  ;;  %v5887_v14 = vsel %vm3465_vm4, %v18172_v46, 0.0 }
0x162f   :  { %5888 = vadd.xlane.f32.xlu0 %v5887_v14 }
0x163f   :  { %6221 = vrot.lane.b32.xlu1 %v19249_v51, %s18537_s21  ;;  %v17304_v51 = vld [vmem:[#allocation8 + $0x308] ss:$16 sps:$4 sm:$0xff]  }
0x1643   :  { %6169 = vrot.lane.b32.xlu1 %v16062_v45, %s18537_s21 }
0x1645   :  { %6171 = vrot.lane.b32.xlu0 %v19247_v3, %s18537_s21  ;;  %v17309_v3 = vld [vmem:[#allocation8 + $0x324] ss:$16 sps:$4 sm:$0xff]  }
0x1647   :  { %6219 = vrot.lane.b32.xlu1 %v16063_v35, %s18537_s21 }
0x16bb   :  { %v5892_v20 = vpop.xlane.xlu1 %5891 }
0x16bc   :  { %v5889_v33 = vpop.xlane.xlu0 %5888  ;;  %18173 = vrcp.f32 %v5892_v20 }
0x16bd   :  { %18175 = vrcp.f32 %v5889_v33 }
0x16bf   :  { %v6222_v49 = vpop.permute.xlu1 %6221 }
0x16c0   :  { %v6172_v45 = vpop.permute.xlu0 %6171  ;;  %v6227_v6 = vsel %vm3368_vm1, %v6222_v49, 0  ;;  %v17336_v49 = vld [vmem:[#allocation8 + $0x3ac] ss:$16 sps:$4 sm:$0xff]  }
0x16c1   :  { %v6177_v24 = vsel %vm3368_vm1, %v6172_v45, 0  ;;  %v17339_v45 = vld [vmem:[#allocation8 + $0x3c4] ss:$16 sps:$4 sm:$0xff]  }
0x16c3   :  { %v6170_v13 = vpop.permute.xlu1 %6169 }
0x16c6   :  { %v18174_v58 = vpop.eup %18173 }
0x16c7   :  { %v18176_v27 = vpop.eup %18175  ;;  %v5896_v9 = vmul.f32 %v18174_v58, %v18170_v22  ;;  %v6220_v34 = vpop.permute.xlu1 %6219 }
0x16c8   :  { %v5895_v26 = vmul.f32 %v18176_v27, %v18172_v46 }
0x16c9   :  { %v5898_v52 = vpack.c.bf16 %v5896_v9, %v5896_v9 }
0x16ca   :  { %v5897_v31 = vpack.c.bf16 %v5895_v26, %v5895_v26 }
0x16cb   :  { %16297 = vmatmul.mubr.msk.bf16.vlgmr.msra.gmra.mrb[68].mxu1 %vm3465_vm4, %v5898_v52 }
0x16cc   :  { %16291 = vmatmul.mubr.msk.bf16.vlgmr.msra.gmra.mrb[68].mxu0 %vm3465_vm4, %v5897_v31  ;;  %6119 = vmatpush1.bf16.msra.mxu1 %v17304_v51  ;;  %v17327_v31 = vld [vmem:[#allocation8 + $0x384] ss:$16 sps:$4 sm:$0xff]  }
0x16cd   :  { %6076 = vmatpush1.bf16.msra.mxu0 %v17301_v42  ;;  %6120 = vmatprep.subr.bf16.mxu1 %v17312_v48 }
0x16ce   :  { %6077 = vmatprep.subr.bf16.mxu0 %v17309_v3  ;;  %6107 = vmatprep.mubr.bf16.mxu0 %v18550_v55 }
0x16cf   :  { %6150 = vmatprep.mubr.bf16.mxu1 %v18550_v55 }
0x16d0   :  { %6121 = vmatpush1.bf16.msra.mxu1 %v17310_v36 }
0x16d1   :  { %6078 = vmatpush1.bf16.msra.mxu0 %v17307_v29  ;;  %6122 = vmatprep.subr.bf16.mxu1 %v17318_v59 }
0x16d2   :  { %6079 = vmatprep.subr.bf16.mxu0 %v17315_v25  ;;  %v17325_v25 = vld [vmem:[#allocation8 + $0x380] ss:$16 sps:$4 sm:$0xff]  }
0x16d4   :  { %6123 = vmatpush1.bf16.msra.mxu1 %v17316_v39 }
0x16d5   :  { %6080 = vmatpush1.bf16.msra.mxu0 %v17313_v0  ;;  %6124 = vmatprep.subr.bf16.mxu1 %v17324_v44  ;;  %v17333_v0 = vld [vmem:[#allocation8 + $0x3a4] ss:$16 sps:$4 sm:$0xff]  }
0x16d6   :  { %6081 = vmatprep.subr.bf16.mxu0 %v17321_v40 }
0x16d8   :  { %6125 = vmatpush1.bf16.msra.mxu1 %v17322_v18  ;;  %v17331_v18 = vld [vmem:[#allocation8 + $0x3a0] ss:$16 sps:$4 sm:$0xff]  }
0x16d9   :  { %6082 = vmatpush1.bf16.msra.mxu0 %v17319_v43  ;;  %16306 = vmatprep.subr.bf16.mxu1 %v18548_v2 }
0x16da   :  { %16300 = vmatprep.subr.bf16.mxu0 %v18548_v2 }
0x179e   :  { %v5985_v35 = vpop.f32.mrb[68].mxu1 }
0x179f   :  { %v5939_v17 = vpop.f32.mrb[68].mxu0  ;;  %v16298_v37 = vpop.f32.mrb[69].mxu1 }
0x17a0   :  { %v5991_v41 = vpack.c.bf16 %v5985_v35, %v5939_v17  ;;  %v16292_v50 = vpop.f32.mrb[69].mxu0  ;;  %v5988_v61 = vpop.f32.mrb[70].mxu1  ;;  %v17334_v35 = vld [vmem:[#allocation8 + $0x3a8] ss:$16 sps:$4 sm:$0xff]   ;;  %v17337_v17 = vld [vmem:[#allocation8 + $0x3c0] ss:$16 sps:$4 sm:$0xff]  }
0x17a1   :  { %v5942_v63 = vpop.f32.mrb[70].mxu0  ;;  %v16299_v4 = vpop.f32.mrb[71].mxu1  ;;  %v17342_v37 = vld [vmem:[#allocation8 + $0x3cc] ss:$16 sps:$4 sm:$0xff]   ;;  %v17345_v50 = vld [vmem:[#allocation8 + $0x3e4] ss:$16 sps:$4 sm:$0xff]  }
0x17a2   :  { %v16293_v38 = vpop.f32.mrb[71].mxu0  ;;  %14996 = vmatmul.mubr.msk.bf16.vlgmr.msra.gmra.mrb[28].mxu0 %vm3368_vm1, %v5991_v41  ;;  %14997 = vmatmul.mubr.msk.bf16.vlgmr.msra.gmra.mrb[28].mxu1 %vm3368_vm1, %v5991_v41  ;;  %v17340_v41 = vld [vmem:[#allocation8 + $0x3c8] ss:$16 sps:$4 sm:$0xff]   ;;  %v17348_v61 = vld [vmem:[#allocation8 + $0x3ec] ss:$16 sps:$4 sm:$0xff]  }
0x17a3   :  { %16301 = vmatpush3.bf16.xpose.msra.mxu0 %v6177_v24  ;;  %16307 = vmatpush3.bf16.xpose.msra.mxu1 %v6227_v6  ;;  %v17343_v63 = vld [vmem:[#allocation8 + $0x3e0] ss:$16 sps:$4 sm:$0xff]   ;;  %v17346_v4 = vld [vmem:[#allocation8 + $0x3e8] ss:$16 sps:$4 sm:$0xff]  }
0x17a4   :  { %16302 = vmatprep.mubr.msk.bf16.mxu0 %vm18549_vm0, %v18548_v2  ;;  %16308 = vmatprep.mubr.msk.bf16.mxu1 %vm18549_vm0, %v18548_v2 }
0x17a5   :  { %16318 = vmatprep.subr.bf16.mxu1 %v18548_v2  ;;  %16312 = vmatprep.subr.bf16.mxu0 %v18548_v2 }
0x17aa   :  { %16303 = vmatmul.mubr.msk.bf16.vlgmr.msra.gmra.mrb[72].mxu0 %vm3368_vm1, %v6170_v13  ;;  %16309 = vmatmul.mubr.msk.bf16.vlgmr.msra.gmra.mrb[72].mxu1 %vm3368_vm1, %v6220_v34 }
0x17ab   :  { %16314 = vmatprep.mubr.msk.bf16.mxu0 %vm18549_vm0, %v18548_v2  ;;  %16320 = vmatprep.mubr.msk.bf16.mxu1 %vm18549_vm0, %v18548_v2 }
0x187d   :  { %v6213_v53 = vpop.f32.mrb[72].mxu0  ;;  %v6263_v11 = vpop.f32.mrb[72].mxu1 }
0x187e   :  { %v6269_v12 = vsel %vm18985_vm3, %v6213_v53, -inf  ;;  %v6270_v16 = vsel %vm18985_vm3, %v6263_v11, -inf  ;;  %v16304_v28 = vpop.f32.mrb[73].mxu0  ;;  %v16310_v56 = vpop.f32.mrb[73].mxu1 }
0x187f   :  { %v6216_v21 = vpop.f32.mrb[74].mxu0  ;;  %v6266_v10 = vpop.f32.mrb[74].mxu1  ;;  %v6274_v22 = vsel %vm3465_vm4, %v6270_v16, -inf  ;;  %v6271_v46 = vsel %vm3465_vm4, %v6269_v12, -inf }
0x1880   :  { %6275 = vmax.xlane.f32.xlu1 %v6274_v22  ;;  %v16311_v1 = vpop.f32.mrb[75].mxu1  ;;  %6272 = vmax.xlane.f32.xlu0 %v6271_v46  ;;  %v16305_v2 = vpop.f32.mrb[75].mxu0 }
0x1891   :  { %6343 = vrot.lane.b32.xlu1 %v19270_v19, %s18537_s21  ;;  %v17330_v19 = vld [vmem:[#allocation8 + $0x38c] ss:$16 sps:$4 sm:$0xff]  }
0x190d   :  { %v6276_v14 = vpop.xlane.xlu1 %6275  ;;  %v6273_v54 = vpop.xlane.xlu0 %6272 }
0x190e   :  { %v6278_v8 = vsub.f32 %v6270_v16, %v6276_v14  ;;  %v6277_v23 = vsub.f32 %v6269_v12, %v6273_v54  ;;  %v6569_v16 = vld [vmem:[#allocation10] sm:$0xf] }
0x190f   :  { %v6574_v28 = vrot.slane %v6569_v16, %v18846_v62  ;;  %v6582_v56 = vrot.slane %v6569_v16, %v18840_v57  ;;  %v6578_v21 = vrot.slane %v6569_v16, %v18843_v60  ;;  %v6586_v46 = vrot.slane %v6569_v16, %v18851_v5  ;;  %v6755_v16 = vld [vmem:[#allocation17 + $0x100] sm:$0xff] }
0x1910   :  { %v6279_v20 = vmul.f32 1.442695, %v6277_v23  ;;  %v6281_v33 = vmul.f32 1.442695, %v6278_v8 }
0x1911   :  { %v6344_v58 = vpop.permute.xlu1 %6343 }
0x1912   :  { %v6349_v27 = vsel %vm3493_vm2, %v6344_v58, 0  ;;  %18177 = vpow2.f32 %v6279_v20 }
0x1913   :  { %16319 = vmatpush3.bf16.msra.mxu1 %v6349_v27  ;;  %18179 = vpow2.f32 %v6281_v33  ;;  %v18195_v33 = vld [vmem:[#allocation2] sm:$0xff] }
0x1914   :  { %6518 = vmatprep.subr.bf16.mxu1 %v17330_v19 }
0x191c   :  { %v18178_v9 = vpop.eup %18177 }
0x191d   :  { %v6283_v26 = vsel %vm3465_vm4, %v18178_v9, 0.0  ;;  %v18180_v51 = vpop.eup %18179 }
0x191e   :  { %6284 = vadd.xlane.f32.xlu0 %v6283_v26  ;;  %v6286_v52 = vsel %vm3465_vm4, %v18180_v51, 0.0 }
0x1922   :  { %6287 = vadd.xlane.f32.xlu0 %v6286_v52 }
0x1938   :  { %6295 = vrot.lane.b32.xlu0 %v19268_v15, %s18537_s21  ;;  %v17328_v15 = vld [vmem:[#allocation8 + $0x388] ss:$16 sps:$4 sm:$0xff]   ;;  %s14418_s21 = sshll.u32 %s18551_s12, 4  ;;  %s14419_s21 = int_to_ptr.vmem [resolvable:$true] %s14418_s21 }
0x1939   :  { %s18489_s6 = scalar_lea.vmem %s14419_s21, 1024  ;;  %p18494_p7 = scmp.lt.s32.totalorder %s14419_s21, %s14419_s21 }
0x193a   :  { %p18490_p6 = scmp.ne.s32.totalorder %s14419_s21, %s18489_s6  ;;  %p18495_p8 = scmp.lt.s32.totalorder %s18489_s6, %s18489_s6 }
0x193c   :  { %p18496_p9 = por %p18495_p8, %p18494_p7 }
0x193e   :  { %p18497_p10 = pnand %p18496_p9, %p18490_p6 }
0x19ab   :  { %v6285_v42 = vpop.xlane.xlu0 %6284 }
0x19ac   :  { %18181 = vrcp.f32 %v6285_v42 }
0x19af   :  { %v6288_v48 = vpop.xlane.xlu0 %6287 }
0x19b0   :  { %18183 = vrcp.f32 %v6288_v48 }
0x19b3   :  { %v6296_v3 = vpop.permute.xlu0 %6295 }
0x19b4   :  { %v6301_v36 = vsel %vm3493_vm2, %v6296_v3, 0 }
0x19b5   :  { %16313 = vmatpush3.bf16.msra.mxu0 %v6301_v36  ;;  %v18198_v36 = vld [vmem:[#allocation2 + $0x10] sm:$0xff] }
0x19b6   :  { %v18182_v29 = vpop.eup %18181  ;;  %6475 = vmatprep.subr.bf16.mxu0 %v17327_v31  ;;  %v18197_v31 = vld [vmem:[#allocation2 + $0x20] sm:$0xff] }
0x19b7   :  { %v6291_v59 = vmul.f32 %v18182_v29, %v18178_v9 }
0x19b9   :  { %v6293_v39 = vpack.c.bf16 %v6291_v59, %v6291_v59  ;;  %v18199_v59 = vld [vmem:[#allocation2 + $0x28] sm:$0xff] }
0x19ba   :  { %v18184_v44 = vpop.eup %18183 }
0x19bb   :  { %v6292_v40 = vmul.f32 %v18184_v44, %v18180_v51  ;;  %16315 = vmatmul.mubr.msk.bf16.vlgmr.msra.gmra.mrb[76].mxu0 %vm3465_vm4, %v6293_v39  ;;  %v18196_v51 = vld [vmem:[#allocation2 + $0x8] sm:$0xff]  ;;  %v18200_v44 = vld [vmem:[#allocation2 + $0x18] sm:$0xff] }
0x19bc   :  { %6476 = vmatpush1.bf16.msra.mxu0 %v17325_v25  ;;  %6507 = vmatprep.mubr.bf16.mxu0 %v18550_v55 }
0x19bd   :  { %v6294_v43 = vpack.c.bf16 %v6292_v40, %v6292_v40  ;;  %6477 = vmatprep.subr.bf16.mxu0 %v17333_v0 }
0x19bf   :  { %16321 = vmatmul.mubr.msk.bf16.vlgmr.msra.gmra.mrb[76].mxu1 %vm3465_vm4, %v6294_v43 }
0x19c0   :  { %6519 = vmatpush1.bf16.msra.mxu1 %v17328_v15  ;;  %6478 = vmatpush1.bf16.msra.mxu0 %v17331_v18  ;;  %v18201_v15 = vld [vmem:[#allocation2 + $0x30] sm:$0xff] }
0x19c1   :  { %6520 = vmatprep.subr.bf16.mxu1 %v17336_v49  ;;  %6479 = vmatprep.subr.bf16.mxu0 %v17339_v45  ;;  %v18202_v45 = vld [vmem:[#allocation2 + $0x38] sm:$0xff] }
0x19c2   :  { %6550 = vmatprep.mubr.bf16.mxu1 %v18550_v55 }
0x19c4   :  { %6521 = vmatpush1.bf16.msra.mxu1 %v17334_v35  ;;  %6480 = vmatpush1.bf16.msra.mxu0 %v17337_v17 }
0x19c5   :  { %6522 = vmatprep.subr.bf16.mxu1 %v17342_v37  ;;  %6481 = vmatprep.subr.bf16.mxu0 %v17345_v50  ;;  %v6723_v50 = vld [vmem:[#allocation17] sm:$0xff] }
0x19c8   :  { %6523 = vmatpush1.bf16.msra.mxu1 %v17340_v41  ;;  %6482 = vmatpush1.bf16.msra.mxu0 %v17343_v63  ;;  %v6724_v63 = vld [vmem:[#allocation17 + $0x8] sm:$0xff] }
0x19c9   :  { %6524 = vmatprep.subr.bf16.mxu1 %v17348_v61  ;;  %v6731_v61 = vld [vmem:[#allocation17 + $0x40] sm:$0xff] }
0x19cc   :  { %6525 = vmatpush1.bf16.msra.mxu1 %v17346_v4  ;;  %v15020_v4 = vcombine.low %v6723_v50, %v6731_v61 }
0x1a8e   :  { %v6337_v24 = vpop.f32.mrb[76].mxu0 }
0x1a8f   :  { %v16316_v6 = vpop.f32.mrb[77].mxu0 }
0x1a90   :  { %v6340_v38 = vpop.f32.mrb[78].mxu0  ;;  %v6732_v6 = vld [vmem:[#allocation17 + $0x48] sm:$0xff] }
0x1a91   :  { %v16317_v13 = vpop.f32.mrb[79].mxu0  ;;  %v6739_v38 = vld [vmem:[#allocation17 + $0x80] sm:$0xff] }
0x1a92   :  { %v6385_v34 = vpop.f32.mrb[76].mxu1  ;;  %v6747_v13 = vld [vmem:[#allocation17 + $0xc0] sm:$0xff] }
0x1a93   :  { %v6391_v53 = vpack.c.bf16 %v6385_v34, %v6337_v24  ;;  %v16322_v55 = vpop.f32.mrb[77].mxu1  ;;  %v15021_v24 = vcombine.high %v6723_v50, %v6731_v61  ;;  %v15022_v34 = vcombine.low %v6724_v63, %v6732_v6  ;;  %v6820_v50 = vld [vmem:[#allocation17 + $0x308] sm:$0xff] }
0x1a94   :  { %v6388_v11 = vpop.f32.mrb[78].mxu1  ;;  %v15037_v55 = vcombine.high %v6739_v38, %v6747_v13  ;;  %v6828_v61 = vld [vmem:[#allocation17 + $0x348] sm:$0xff] }
0x1a95   :  { %v16323_v12 = vpop.f32.mrb[79].mxu1  ;;  %15018 = vmatmul.mubr.msk.bf16.vlgmr.msra.gmra.mrb[28].mxu0 %vm3368_vm1, %v6391_v53  ;;  %15019 = vmatmul.mubr.msk.bf16.vlgmr.msra.gmra.mrb[28].mxu1 %vm3368_vm1, %v6391_v53  ;;  %v15023_v53 = vcombine.high %v6724_v63, %v6732_v6  ;;  %v6740_v11 = vld [vmem:[#allocation17 + $0x88] sm:$0xff]  ;;  %v15119_v6 = vcombine.high %v6820_v50, %v6828_v61 }
0x1a96   :  { %v6748_v12 = vld [vmem:[#allocation17 + $0xc8] sm:$0xff]  ;;  %9879 = vmatprep.subr.bf16.mxu0 %v15021_v24 }
0x1a97   :  { %9965 = vmatprep.subr.bf16.mxu1 %v15023_v53  ;;  %9880 = vmatpush1.bf16.msra.mxu0 %v15020_v4  ;;  %v6844_v53 = vld [vmem:[#allocation17 + $0x3c8] sm:$0xff] }
0x1a98   :  { %9966 = vmatpush1.bf16.msra.mxu1 %v15022_v34  ;;  %9881 = vmatprep.subr.bf16.mxu0 %v15037_v55  ;;  %v6836_v34 = vld [vmem:[#allocation17 + $0x388] sm:$0xff] }
0x1b68   :  { %v6509_v10 = vpop.f32.mrb[28].mxu0  ;;  %v6552_v22 = vpop.f32.mrb[28].mxu1 }
0x1b69   :  { %v6591_v1 = vadd.f32 %v6574_v28, %v6509_v10  ;;  %v6511_v2 = vpop.f32.mrb[29].mxu0  ;;  %v6554_v14 = vpop.f32.mrb[29].mxu1  ;;  %v6593_v54 = vadd.f32 %v6582_v56, %v6552_v22  ;;  %v6764_v10 = vld [vmem:[#allocation17 + $0x148] sm:$0xff]  ;;  %v15036_v22 = vcombine.low %v6739_v38, %v6747_v13  ;;  %v6835_v38 = vld [vmem:[#allocation17 + $0x380] sm:$0xff] }
0x1b6a   :  { %v6592_v8 = vadd.f32 %v6578_v21, %v6511_v2  ;;  %v6513_v23 = vpop.f32.mrb[30].mxu0  ;;  %v6556_v20 = vpop.f32.mrb[30].mxu1  ;;  %v6594_v19 = vadd.f32 %v6586_v46, %v6554_v14  ;;  %v6771_v14 = vld [vmem:[#allocation17 + $0x180] sm:$0xff] }
0x1b6b   :  { %v19342_v58 = vadd.f32 %v18195_v33, %v6591_v1  ;;  %v6595_v27 = vadd.f32 %v6574_v28, %v6513_v23  ;;  %v6515_v9 = vpop.f32.mrb[31].mxu0  ;;  %v6558_v26 = vpop.f32.mrb[31].mxu1  ;;  %v6597_v42 = vadd.f32 %v6582_v56, %v6556_v20  ;;  %v19348_v29 = vadd.f32 %v18198_v36, %v6593_v54  ;;  %v6763_v56 = vld [vmem:[#allocation17 + $0x140] sm:$0xff]  ;;  %v6780_v23 = vld [vmem:[#allocation17 + $0x1c8] sm:$0xff]  ;;  %9882 = vmatpush1.bf16.msra.mxu0 %v15036_v22 }
0x1b6c   :  { %v19344_v52 = vadd.f32 %v18196_v51, %v6592_v8  ;;  %v6596_v48 = vadd.f32 %v6578_v21, %v6515_v9  ;;  %v6598_v39 = vadd.f32 %v6586_v46, %v6558_v26  ;;  %v19354_v40 = vadd.f32 %v18200_v44, %v6594_v19  ;;  %v6756_v21 = vld [vmem:[#allocation17 + $0x108] sm:$0xff]  ;;  %v6779_v54 = vld [vmem:[#allocation17 + $0x1c0] sm:$0xff] }
0x1b6d   :  { %v19346_v3 = vadd.f32 %v18197_v31, %v6595_v27  ;;  %v19356_v18 = vadd.f32 %v18201_v15, %v6597_v42  ;;  %v15039_v28 = vcombine.high %v6740_v11, %v6748_v12  ;;  %v15038_v46 = vcombine.low %v6740_v11, %v6748_v12  ;;  %v6772_v8 = vld [vmem:[#allocation17 + $0x188] sm:$0xff]  ;;  %v6787_v26 = vld [vmem:[#allocation17 + $0x200] sm:$0xff] }
0x1b6e   :  { %v19350_v25 = vadd.f32 %v18199_v59, %v6596_v48  ;;  %v6609_v0 = vadd.f32 %v19344_v52, %v19342_v58  ;;  %v19361_v35 = vadd.f32 %v18202_v45, %v6598_v39  ;;  %v15053_v1 = vcombine.high %v6755_v16, %v6763_v56  ;;  %v6795_v51 = vld [vmem:[#allocation17 + $0x240] sm:$0xff]  ;;  %v6788_v19 = vld [vmem:[#allocation17 + $0x208] sm:$0xff] }
0x1b6f   :  { %9967 = vmatprep.subr.bf16.mxu1 %v15039_v28  ;;  %v15055_v2 = vcombine.high %v6756_v21, %v6764_v10  ;;  %v15052_v20 = vcombine.low %v6755_v16, %v6763_v56  ;;  %v15054_v33 = vcombine.low %v6756_v21, %v6764_v10  ;;  %v15069_v27 = vcombine.high %v6771_v14, %v6779_v54  ;;  %v6796_v42 = vld [vmem:[#allocation17 + $0x248] sm:$0xff]  ;;  %v6803_v39 = vld [vmem:[#allocation17 + $0x280] sm:$0xff] }
0x1b70   :  { %v6610_v43 = vadd.f32 %v6609_v0, %v19348_v29  ;;  %v6614_v49 = vadd.f32 %v19350_v25, %v19346_v3  ;;  %9968 = vmatpush1.bf16.msra.mxu1 %v15038_v46  ;;  %9883 = vmatprep.subr.bf16.mxu0 %v15053_v1  ;;  %v15071_v9 = vcombine.high %v6772_v8, %v6780_v23  ;;  %v6811_v0 = vld [vmem:[#allocation17 + $0x2c0] sm:$0xff]  ;;  %v6804_v44 = vld [vmem:[#allocation17 + $0x288] sm:$0xff] }
0x1b71   :  { %9969 = vmatprep.subr.bf16.mxu1 %v15055_v2  ;;  %9884 = vmatpush1.bf16.msra.mxu0 %v15052_v20  ;;  %v15068_v48 = vcombine.low %v6771_v14, %v6779_v54  ;;  %v15070_v31 = vcombine.low %v6772_v8, %v6780_v23  ;;  %v15085_v36 = vcombine.high %v6787_v26, %v6795_v51  ;;  %v6812_v15 = vld [vmem:[#allocation17 + $0x2c8] sm:$0xff]  ;;  %v6843_v13 = vld [vmem:[#allocation17 + $0x3c0] sm:$0xff] }
0x1b72   :  { %v6611_v17 = vadd.f32 %v6610_v43, %v19354_v40  ;;  %v6615_v37 = vadd.f32 %v6614_v49, %v19356_v18  ;;  %9885 = vmatprep.subr.bf16.mxu0 %v15069_v27  ;;  %v15087_v59 = vcombine.high %v6788_v19, %v6796_v42  ;;  %v15084_v43 = vcombine.low %v6787_v26, %v6795_v51  ;;  %v6851_v28 = vld [vmem:[#allocation17 + $0x400] sm:$0xff]  ;;  %v6852_v21 = vld [vmem:[#allocation17 + $0x408] sm:$0xff] }
0x1b73   :  { %v15086_v49 = vcombine.low %v6788_v19, %v6796_v42  ;;  %v15101_v45 = vcombine.high %v6803_v39, %v6811_v0  ;;  %v15100_v63 = vcombine.low %v6803_v39, %v6811_v0  ;;  %v15102_v4 = vcombine.low %v6804_v44, %v6812_v15  ;;  %v6859_v56 = vld [vmem:[#allocation17 + $0x440] sm:$0xff]  ;;  %v6860_v10 = vld [vmem:[#allocation17 + $0x448] sm:$0xff] }
0x1b74   :  { %6612 = vadd.xlane.f32.xlu1 %v6611_v17  ;;  %v6616_v41 = vadd.f32 %v6615_v37, %v19361_v35  ;;  %9970 = vmatpush1.bf16.msra.mxu1 %v15054_v33  ;;  %v15103_v17 = vcombine.high %v6804_v44, %v6812_v15  ;;  %v6819_v37 = vld [vmem:[#allocation17 + $0x300] sm:$0xff]  ;;  %v15118_v11 = vcombine.low %v6820_v50, %v6828_v61  ;;  %v6868_v8 = vld [vmem:[#allocation17 + $0x488] sm:$0xff] }
0x1b75   :  { %9971 = vmatprep.subr.bf16.mxu1 %v15071_v9  ;;  %9886 = vmatpush1.bf16.msra.mxu0 %v15068_v48  ;;  %v15133_v12 = vcombine.high %v6835_v38, %v6843_v13  ;;  %v15135_v16 = vcombine.high %v6836_v34, %v6844_v53  ;;  %v15132_v22 = vcombine.low %v6835_v38, %v6843_v13  ;;  %v6867_v14 = vld [vmem:[#allocation17 + $0x480] sm:$0xff]  ;;  %v6876_v23 = vld [vmem:[#allocation17 + $0x4c8] sm:$0xff] }
0x1b76   :  { %6617 = vadd.xlane.f32.xlu0 %v6616_v41  ;;  %9887 = vmatprep.subr.bf16.mxu0 %v15085_v36  ;;  %v6827_v41 = vld [vmem:[#allocation17 + $0x340] sm:$0xff]  ;;  %v15134_v46 = vcombine.low %v6836_v34, %v6844_v53  ;;  %v15149_v1 = vcombine.high %v6851_v28, %v6859_v56  ;;  %v15151_v2 = vcombine.high %v6852_v21, %v6860_v10 }
0x1b77   :  { %v15117_v24 = vcombine.high %v6819_v37, %v6827_v41  ;;  %v15116_v55 = vcombine.low %v6819_v37, %v6827_v41  ;;  %v6875_v54 = vld [vmem:[#allocation17 + $0x4c0] sm:$0xff]  ;;  %v15148_v20 = vcombine.low %v6851_v28, %v6859_v56  ;;  %v15150_v33 = vcombine.low %v6852_v21, %v6860_v10  ;;  %v6892_v28 = vld [vmem:[#allocation17 + $0x548] sm:$0xff] }
0x1b78   :  { %9972 = vmatpush1.bf16.msra.mxu1 %v15070_v31  ;;  %v15165_v27 = vcombine.high %v6867_v14, %v6875_v54  ;;  %v15167_v9 = vcombine.high %v6868_v8, %v6876_v23  ;;  %v15164_v26 = vcombine.low %v6867_v14, %v6875_v54  ;;  %v15166_v51 = vcombine.low %v6868_v8, %v6876_v23  ;;  %v6908_v14 = vld [vmem:[#allocation17 + $0x5c8] sm:$0xff] }
0x1b79   :  { %9973 = vmatprep.subr.bf16.mxu1 %v15087_v59  ;;  %9888 = vmatpush1.bf16.msra.mxu0 %v15084_v43 }
0x1b7a   :  { %9889 = vmatprep.subr.bf16.mxu0 %v15101_v45 }
0x1b7c   :  { %9974 = vmatpush1.bf16.msra.mxu1 %v15086_v49 }
0x1b7d   :  { %9975 = vmatprep.subr.bf16.mxu1 %v15103_v17  ;;  %9890 = vmatpush1.bf16.msra.mxu0 %v15100_v63 }
0x1b7e   :  { %9891 = vmatprep.subr.bf16.mxu0 %v15117_v24 }
0x1b80   :  { %9976 = vmatpush1.bf16.msra.mxu1 %v15102_v4 }
0x1b81   :  { %9977 = vmatprep.subr.bf16.mxu1 %v15119_v6  ;;  %9892 = vmatpush1.bf16.msra.mxu0 %v15116_v55  ;;  %v6883_v55 = vld [vmem:[#allocation17 + $0x500] sm:$0xff] }
0x1b82   :  { %9893 = vmatprep.subr.bf16.mxu0 %v15133_v12  ;;  %v6884_v12 = vld [vmem:[#allocation17 + $0x508] sm:$0xff] }
0x1b83   :  { %v15182_v21 = vcombine.low %v6884_v12, %v6892_v28  ;;  %v15183_v10 = vcombine.high %v6884_v12, %v6892_v28 }
0x1b84   :  { %9978 = vmatpush1.bf16.msra.mxu1 %v15118_v11  ;;  %v6891_v11 = vld [vmem:[#allocation17 + $0x540] sm:$0xff] }
0x1b85   :  { %9979 = vmatprep.subr.bf16.mxu1 %v15135_v16  ;;  %9894 = vmatpush1.bf16.msra.mxu0 %v15132_v22  ;;  %v15181_v16 = vcombine.high %v6883_v55, %v6891_v11  ;;  %v15180_v56 = vcombine.low %v6883_v55, %v6891_v11  ;;  %v6899_v22 = vld [vmem:[#allocation17 + $0x580] sm:$0xff]  ;;  %v6964_v55 = vld [vmem:[#allocation17 + $0x788] sm:$0xff] }
0x1b86   :  { %9895 = vmatprep.subr.bf16.mxu0 %v15149_v1  ;;  %v6900_v1 = vld [vmem:[#allocation17 + $0x588] sm:$0xff] }
0x1b87   :  { %v15198_v8 = vcombine.low %v6900_v1, %v6908_v14  ;;  %v15199_v23 = vcombine.high %v6900_v1, %v6908_v14  ;;  %v6972_v11 = vld [vmem:[#allocation17 + $0x7c8] sm:$0xff] }
0x1b88   :  { %9980 = vmatpush1.bf16.msra.mxu1 %v15134_v46  ;;  %v6907_v46 = vld [vmem:[#allocation17 + $0x5c0] sm:$0xff]  ;;  %v19410_v1 = vld [vmem:[#allocation17 + $0x808] sm:$0xff] }
0x1b89   :  { %9981 = vmatprep.subr.bf16.mxu1 %v15151_v2  ;;  %9896 = vmatpush1.bf16.msra.mxu0 %v15148_v20  ;;  %v15197_v2 = vcombine.high %v6899_v22, %v6907_v46  ;;  %v15196_v54 = vcombine.low %v6899_v22, %v6907_v46  ;;  %v6915_v20 = vld [vmem:[#allocation17 + $0x600] sm:$0xff]  ;;  %v19414_v14 = vld [vmem:[#allocation17 + $0x848] sm:$0xff] }
0x1b8a   :  { %9897 = vmatprep.subr.bf16.mxu0 %v15165_v27  ;;  %v6916_v27 = vld [vmem:[#allocation17 + $0x608] sm:$0xff]  ;;  %v19406_v22 = vld [vmem:[#allocation17 + $0x800] sm:$0xff] }
0x1b8b   :  { %v19408_v46 = vld [vmem:[#allocation17 + $0x840] sm:$0xff] }
0x1b8c   :  { %9982 = vmatpush1.bf16.msra.mxu1 %v15150_v33  ;;  %v6923_v33 = vld [vmem:[#allocation17 + $0x640] sm:$0xff] }
0x1b8d   :  { %9983 = vmatprep.subr.bf16.mxu1 %v15167_v9  ;;  %9898 = vmatpush1.bf16.msra.mxu0 %v15164_v26  ;;  %v15212_v9 = vcombine.low %v6915_v20, %v6923_v33  ;;  %v15213_v26 = vcombine.high %v6915_v20, %v6923_v33 }
0x1b8e   :  { %9899 = vmatprep.subr.bf16.mxu0 %v15181_v16 }
0x1b90   :  { %9984 = vmatpush1.bf16.msra.mxu1 %v15166_v51  ;;  %v6924_v51 = vld [vmem:[#allocation17 + $0x648] sm:$0xff] }
0x1b91   :  { %9985 = vmatprep.subr.bf16.mxu1 %v15183_v10  ;;  %9900 = vmatpush1.bf16.msra.mxu0 %v15180_v56  ;;  %v15263_v56 = vcombine.high %v6964_v55, %v6972_v11  ;;  %v15262_v10 = vcombine.low %v6964_v55, %v6972_v11 }
0x1b92   :  { %9901 = vmatprep.subr.bf16.mxu0 %v15197_v2  ;;  %v15277_v2 = vcombine.high %v19406_v22, %v19408_v46 }
0x1b94   :  { %9986 = vmatpush1.bf16.msra.mxu1 %v15182_v21 }
0x1b95   :  { %9987 = vmatprep.subr.bf16.mxu1 %v15199_v23  ;;  %9902 = vmatpush1.bf16.msra.mxu0 %v15196_v54  ;;  %v15276_v54 = vcombine.low %v19406_v22, %v19408_v46  ;;  %v15279_v23 = vcombine.high %v19410_v1, %v19414_v14 }
0x1b96   :  { %9903 = vmatprep.subr.bf16.mxu0 %v15213_v26 }
0x1b98   :  { %9988 = vmatpush1.bf16.msra.mxu1 %v15198_v8  ;;  %v15278_v8 = vcombine.low %v19410_v1, %v19414_v14 }
0x1b99   :  { %9904 = vmatpush1.bf16.msra.mxu0 %v15212_v9 }
0x1c01   :  { %v6613_v19 = vpop.xlane.xlu1 %6612 }
0x1c02   :  { %v6619_v42 = vmul.f32 0.001953125, %v6613_v19  ;;  %v6931_v19 = vld [vmem:[#allocation17 + $0x680] sm:$0xff] }
0x1c03   :  { %v6618_v48 = vpop.xlane.xlu0 %6617 }
0x1c04   :  { %v19367_v31 = vsub.f32 %v19342_v58, %v6619_v42  ;;  %v19370_v36 = vsub.f32 %v19344_v52, %v6619_v42  ;;  %v6620_v59 = vmul.f32 0.001953125, %v6618_v48  ;;  %v19373_v39 = vsub.f32 %v19348_v29, %v6619_v42 }
0x1c05   :  { %v19376_v0 = vsub.f32 %v19354_v40, %v6619_v42  ;;  %v6939_v42 = vld [vmem:[#allocation17 + $0x6c0] sm:$0xff]  ;;  %v15214_v48 = vcombine.low %v6916_v27, %v6924_v51 }
0x1c06   :  { %v19379_v44 = vsub.f32 %v19346_v3, %v6620_v59  ;;  %v19382_v15 = vsub.f32 %v19350_v25, %v6620_v59  ;;  %v6629_v43 = vmul.f32 %v19367_v31, %v19367_v31  ;;  %v6630_v49 = vmul.f32 %v19370_v36, %v19370_v36 }
0x1c07   :  { %v6631_v45 = vmul.f32 %v19373_v39, %v19373_v39  ;;  %v19391_v17 = vsub.f32 %v19356_v18, %v6620_v59  ;;  %v19394_v41 = vsub.f32 %v19361_v35, %v6620_v59  ;;  %v6632_v63 = vmul.f32 %v19376_v0, %v19376_v0 }
0x1c08   :  { %v6637_v37 = vadd.f32 %v6630_v49, %v6629_v43  ;;  %v6633_v50 = vmul.f32 %v19379_v44, %v19379_v44  ;;  %v6634_v61 = vmul.f32 %v19382_v15, %v19382_v15  ;;  %v15215_v59 = vcombine.high %v6916_v27, %v6924_v51  ;;  %v6932_v49 = vld [vmem:[#allocation17 + $0x688] sm:$0xff] }
0x1c09   :  { %v6635_v24 = vmul.f32 %v19391_v17, %v19391_v17  ;;  %v6636_v13 = vmul.f32 %v19394_v41, %v19394_v41  ;;  %v15229_v43 = vcombine.high %v6931_v19, %v6939_v42 }
0x1c0a   :  { %v6638_v4 = vadd.f32 %v6637_v37, %v6631_v45  ;;  %v6642_v6 = vadd.f32 %v6634_v61, %v6633_v50  ;;  %v6940_v45 = vld [vmem:[#allocation17 + $0x6c8] sm:$0xff]  ;;  %v6947_v50 = vld [vmem:[#allocation17 + $0x700] sm:$0xff]  ;;  %9989 = vmatprep.subr.bf16.mxu1 %v15215_v59 }
0x1c0b   :  { %v15231_v37 = vcombine.high %v6932_v49, %v6940_v45  ;;  %v6955_v61 = vld [vmem:[#allocation17 + $0x740] sm:$0xff]  ;;  %9990 = vmatpush1.bf16.msra.mxu1 %v15214_v48  ;;  %9905 = vmatprep.subr.bf16.mxu0 %v15229_v43 }
0x1c0c   :  { %v6639_v38 = vadd.f32 %v6638_v4, %v6632_v63  ;;  %v6643_v34 = vadd.f32 %v6642_v6, %v6635_v24  ;;  %v6948_v63 = vld [vmem:[#allocation17 + $0x708] sm:$0xff]  ;;  %v15228_v24 = vcombine.low %v6931_v19, %v6939_v42  ;;  %v15230_v6 = vcombine.low %v6932_v49, %v6940_v45  ;;  %v6607_v19 = vld [vmem:[#allocation14] sm:$0xf]  ;;  %v6608_v42 = vld [vmem:[#allocation16] sm:$0xf] }
0x1c0d   :  { %v6956_v4 = vld [vmem:[#allocation17 + $0x748] sm:$0xff]  ;;  %9991 = vmatprep.subr.bf16.mxu1 %v15231_v37  ;;  %v15244_v12 = vcombine.low %v6947_v50, %v6955_v61  ;;  %v6669_v48 = vrot.slane %v6607_v19, %v18843_v60  ;;  %v6665_v59 = vrot.slane %v6607_v19, %v18846_v62  ;;  %v6673_v49 = vrot.slane %v6607_v19, %v18840_v57 }
0x1c0e   :  { %6640 = vadd.xlane.f32.xlu0 %v6639_v38  ;;  %v6644_v53 = vadd.f32 %v6643_v34, %v6636_v13  ;;  %v15245_v38 = vcombine.high %v6947_v50, %v6955_v61  ;;  %v15247_v13 = vcombine.high %v6948_v63, %v6956_v4  ;;  %v6963_v34 = vld [vmem:[#allocation17 + $0x780] sm:$0xff]  ;;  %9906 = vmatpush1.bf16.msra.mxu0 %v15228_v24 }
0x1c0f   :  { %9992 = vmatpush1.bf16.msra.mxu1 %v15230_v6  ;;  %v15246_v16 = vcombine.low %v6948_v63, %v6956_v4  ;;  %v6677_v50 = vrot.slane %v6607_v19, %v18851_v5  ;;  %v6698_v4 = vrot.slane %v6608_v42, %v18843_v60  ;;  %v6694_v24 = vrot.slane %v6608_v42, %v18846_v62  ;;  %v7011_v19 = vld [vmem:[#allocation17 + $0x900] sm:$0xff] }
0x1c10   :  { %6645 = vadd.xlane.f32.xlu1 %v6644_v53  ;;  %v6971_v53 = vld [vmem:[#allocation17 + $0x7c0] sm:$0xff]  ;;  %9907 = vmatprep.subr.bf16.mxu0 %v15245_v38  ;;  %v6702_v38 = vrot.slane %v6608_v42, %v18840_v57 }
0x1c11   :  { %v15261_v28 = vcombine.high %v6963_v34, %v6971_v53  ;;  %9993 = vmatprep.subr.bf16.mxu1 %v15247_v13  ;;  %v15260_v21 = vcombine.low %v6963_v34, %v6971_v53 }
0x1c12   :  { %9908 = vmatpush1.bf16.msra.mxu0 %v15244_v12 }
0x1c13   :  { %9994 = vmatpush1.bf16.msra.mxu1 %v15246_v16  ;;  %9909 = vmatprep.subr.bf16.mxu0 %v15261_v28  ;;  %v6706_v16 = vrot.slane %v6608_v42, %v18851_v5 }
0x1c14   :  { %9995 = vmatprep.subr.bf16.mxu1 %v15263_v56 }
0x1c16   :  { %9910 = vmatpush1.bf16.msra.mxu0 %v15260_v21 }
0x1c17   :  { %9996 = vmatpush1.bf16.msra.mxu1 %v15262_v10  ;;  %9922 = vmatprep.subr.bf16.mxu0 %v15277_v2 }
0x1c18   :  { %10008 = vmatprep.subr.bf16.mxu1 %v15279_v23 }
0x1c9b   :  { %v6641_v20 = vpop.xlane.xlu0 %6640 }
0x1c9c   :  { %v6647_v33 = vmul.f32 0.001953125, %v6641_v20  ;;  %v6995_v20 = vld [vmem:[#allocation17 + $0x880] sm:$0xff] }
0x1c9d   :  { %v6646_v27 = vpop.xlane.xlu1 %6645 }
0x1c9e   :  { %v6649_v9 = vadd.f32 1e-05, %v6647_v33  ;;  %v6648_v26 = vmul.f32 0.001953125, %v6646_v27  ;;  %v7003_v33 = vld [vmem:[#allocation17 + $0x8c0] sm:$0xff]  ;;  %v6996_v27 = vld [vmem:[#allocation17 + $0x888] sm:$0xff] }
0x1ca0   :  { %18185 = vrsqrt.f32 %v6649_v9  ;;  %v6650_v51 = vadd.f32 1e-05, %v6648_v26 }
0x1ca2   :  { %18187 = vrsqrt.f32 %v6650_v51 }
0x1caa   :  { %v18186_v43 = vpop.eup %18185 }
0x1cab   :  { %v6654_v45 = vmul.f32 %v18186_v43, %v19370_v36  ;;  %v6653_v37 = vmul.f32 %v18186_v43, %v19367_v31  ;;  %v6655_v61 = vmul.f32 %v18186_v43, %v19373_v39  ;;  %v6656_v6 = vmul.f32 %v18186_v43, %v19376_v0  ;;  %v7019_v43 = vld [vmem:[#allocation17 + $0x940] sm:$0xff] }
0x1cac   :  { %v18188_v63 = vpop.eup %18187  ;;  %v15308_v22 = vcombine.low %v7011_v19, %v7019_v43 }
0x1cad   :  { %v6658_v13 = vmul.f32 %v18188_v63, %v19382_v15  ;;  %v6683_v34 = vmul.f32 %v6669_v48, %v6654_v45  ;;  %v6657_v36 = vmul.f32 %v18188_v63, %v19379_v44  ;;  %v6682_v53 = vmul.f32 %v6665_v59, %v6653_v37  ;;  %v7020_v45 = vld [vmem:[#allocation17 + $0x948] sm:$0xff] }
0x1cae   :  { %v6660_v31 = vmul.f32 %v18188_v63, %v19394_v41  ;;  %v6659_v55 = vmul.f32 %v18188_v63, %v19391_v17  ;;  %v6684_v39 = vmul.f32 %v6673_v49, %v6655_v61  ;;  %v6685_v28 = vmul.f32 %v6677_v50, %v6656_v6  ;;  %v7004_v41 = vld [vmem:[#allocation17 + $0x8c8] sm:$0xff]  ;;  %v7035_v6 = vld [vmem:[#allocation17 + $0x9c0] sm:$0xff] }
0x1caf   :  { %v6687_v11 = vmul.f32 %v6669_v48, %v6658_v13  ;;  %v6686_v12 = vmul.f32 %v6665_v59, %v6657_v36  ;;  %v6712_v10 = vadd.f32 %v6698_v4, %v6683_v34  ;;  %v6711_v15 = vadd.f32 %v6694_v24, %v6682_v53  ;;  %v7036_v13 = vld [vmem:[#allocation17 + $0x9c8] sm:$0xff] }
0x1cb0   :  { %v6689_v56 = vmul.f32 %v6677_v50, %v6660_v31  ;;  %v6688_v0 = vmul.f32 %v6673_v49, %v6659_v55  ;;  %v6713_v21 = vadd.f32 %v6702_v38, %v6684_v39  ;;  %v6714_v51 = vadd.f32 %v6706_v16, %v6685_v28  ;;  %v7012_v49 = vld [vmem:[#allocation17 + $0x908] sm:$0xff] }
0x1cb1   :  { %v6716_v2 = vadd.f32 %v6698_v4, %v6687_v11  ;;  %v6715_v23 = vadd.f32 %v6694_v24, %v6686_v12  ;;  %v15293_v48 = vcombine.high %v6995_v20, %v7003_v33  ;;  %v15295_v59 = vcombine.high %v6996_v27, %v7004_v41  ;;  %v7027_v24 = vld [vmem:[#allocation17 + $0x980] sm:$0xff]  ;;  %v7044_v34 = vld [vmem:[#allocation17 + $0xa08] sm:$0xff] }
0x1cb2   :  { %v6718_v44 = vadd.f32 %v6706_v16, %v6689_v56  ;;  %v6717_v9 = vadd.f32 %v6702_v38, %v6688_v0  ;;  %v15292_v50 = vcombine.low %v6995_v20, %v7003_v33  ;;  %v15294_v61 = vcombine.low %v6996_v27, %v7004_v41  ;;  %v7028_v38 = vld [vmem:[#allocation17 + $0x988] sm:$0xff]  ;;  %v7059_v11 = vld [vmem:[#allocation17 + $0xa80] sm:$0xff] }
0x1cb3   :  { %v19438_v17 = vpack.c.bf16 %v6716_v2, %v6712_v10  ;;  %v19440_v26 = vpack.c.bf16 %v6715_v23, %v6711_v15  ;;  %v15309_v63 = vcombine.high %v7011_v19, %v7019_v43  ;;  %v15311_v4 = vcombine.high %v7012_v49, %v7020_v45  ;;  %v7052_v36 = vld [vmem:[#allocation17 + $0xa48] sm:$0xff]  ;;  %v7067_v12 = vld [vmem:[#allocation17 + $0xac0] sm:$0xff] }
0x1cb4   :  { %v19442_v42 = vpack.c.bf16 %v6717_v9, %v6713_v21  ;;  %v19448_v37 = vpack.c.bf16 %v6718_v44, %v6714_v51  ;;  %v15310_v46 = vcombine.low %v7012_v49, %v7020_v45  ;;  %v15325_v1 = vcombine.high %v7027_v24, %v7035_v6  ;;  %v7060_v16 = vld [vmem:[#allocation17 + $0xa88] sm:$0xff]  ;;  %v7075_v2 = vld [vmem:[#allocation17 + $0xb00] sm:$0xff] }
0x1cb5   :  { %9911 = vmatprep.mubr.bf16.mxu0 %v19438_v17  ;;  %9997 = vmatprep.mubr.bf16.mxu1 %v19438_v17  ;;  %v15327_v14 = vcombine.high %v7028_v38, %v7036_v13  ;;  %v15324_v53 = vcombine.low %v7027_v24, %v7035_v6  ;;  %v15326_v31 = vcombine.low %v7028_v38, %v7036_v13  ;;  %v7068_v28 = vld [vmem:[#allocation17 + $0xac8] sm:$0xff]  ;;  %v7083_v15 = vld [vmem:[#allocation17 + $0xb40] sm:$0xff] }
0x1cb6   :  { %9912 = vmatmul.mubr.bf16.vlgmr.msra.gmra.mrb[80].mxu0 %v19440_v26  ;;  %9998 = vmatmul.mubr.bf16.vlgmr.msra.gmra.mrb[80].mxu1 %v19440_v26  ;;  %v15343_v39 = vcombine.high %v7044_v34, %v7052_v36  ;;  %v15342_v0 = vcombine.low %v7044_v34, %v7052_v36  ;;  %v15357_v21 = vcombine.high %v7059_v11, %v7067_v12  ;;  %v7076_v23 = vld [vmem:[#allocation17 + $0xb08] sm:$0xff]  ;;  %v7091_v9 = vld [vmem:[#allocation17 + $0xb80] sm:$0xff] }
0x1cb7   :  { %9923 = vmatpush1.bf16.msra.mxu0 %v15276_v54  ;;  %10009 = vmatpush1.bf16.msra.mxu1 %v15278_v8  ;;  %v7043_v54 = vld [vmem:[#allocation17 + $0xa00] sm:$0xff]  ;;  %v15359_v10 = vcombine.high %v7060_v16, %v7068_v28  ;;  %v7084_v20 = vld [vmem:[#allocation17 + $0xb48] sm:$0xff]  ;;  %v15356_v44 = vcombine.low %v7059_v11, %v7067_v12  ;;  %v15358_v33 = vcombine.low %v7060_v16, %v7068_v28 }
0x1cb8   :  { %9954 = vmatprep.mubr.bf16.mxu0 %v19448_v37  ;;  %10040 = vmatprep.mubr.bf16.mxu1 %v19448_v37  ;;  %v7051_v8 = vld [vmem:[#allocation17 + $0xa40] sm:$0xff]  ;;  %v15373_v27 = vcombine.high %v7075_v2, %v7083_v15  ;;  %v15375_v41 = vcombine.high %v7076_v23, %v7084_v20  ;;  %v7092_v19 = vld [vmem:[#allocation17 + $0xb88] sm:$0xff]  ;;  %v15374_v43 = vcombine.low %v7076_v23, %v7084_v20 }
0x1cb9   :  { %9924 = vmatprep.subr.bf16.mxu0 %v15293_v48  ;;  %10010 = vmatprep.subr.bf16.mxu1 %v15295_v59  ;;  %v15341_v55 = vcombine.high %v7043_v54, %v7051_v8  ;;  %v15340_v56 = vcombine.low %v7043_v54, %v7051_v8  ;;  %v7099_v51 = vld [vmem:[#allocation17 + $0xbc0] sm:$0xff]  ;;  %v7100_v48 = vld [vmem:[#allocation17 + $0xbc8] sm:$0xff]  ;;  %v15372_v59 = vcombine.low %v7075_v2, %v7083_v15 }
0x1cba   :  { %v15389_v49 = vcombine.high %v7091_v9, %v7099_v51  ;;  %v15391_v45 = vcombine.high %v7092_v19, %v7100_v48  ;;  %v15388_v24 = vcombine.low %v7091_v9, %v7099_v51  ;;  %v15390_v6 = vcombine.low %v7092_v19, %v7100_v48 }
0x1cbb   :  { %9925 = vmatpush1.bf16.msra.mxu0 %v15292_v50  ;;  %10011 = vmatpush1.bf16.msra.mxu1 %v15294_v61  ;;  %v7107_v50 = vld [vmem:[#allocation17 + $0xc00] sm:$0xff] }
0x1cbc   :  { %9926 = vmatprep.subr.bf16.mxu0 %v15309_v63  ;;  %10012 = vmatprep.subr.bf16.mxu1 %v15311_v4  ;;  %v7115_v61 = vld [vmem:[#allocation17 + $0xc40] sm:$0xff]  ;;  %v7108_v63 = vld [vmem:[#allocation17 + $0xc08] sm:$0xff] }
0x1cbd   :  { %v7116_v4 = vld [vmem:[#allocation17 + $0xc48] sm:$0xff]  ;;  %v15405_v38 = vcombine.high %v7107_v50, %v7115_v61  ;;  %v15404_v54 = vcombine.low %v7107_v50, %v7115_v61 }
0x1cbe   :  { %v15407_v13 = vcombine.high %v7108_v63, %v7116_v4  ;;  %v15406_v8 = vcombine.low %v7108_v63, %v7116_v4 }
0x1cbf   :  { %9927 = vmatpush1.bf16.msra.mxu0 %v15308_v22  ;;  %10013 = vmatpush1.bf16.msra.mxu1 %v15310_v46  ;;  %v7123_v22 = vld [vmem:[#allocation17 + $0xc80] sm:$0xff] }
0x1cc0   :  { %9928 = vmatprep.subr.bf16.mxu0 %v15325_v1  ;;  %10014 = vmatprep.subr.bf16.mxu1 %v15327_v14  ;;  %v7131_v46 = vld [vmem:[#allocation17 + $0xcc0] sm:$0xff]  ;;  %v7124_v1 = vld [vmem:[#allocation17 + $0xc88] sm:$0xff] }
0x1cc1   :  { %v7132_v14 = vld [vmem:[#allocation17 + $0xcc8] sm:$0xff]  ;;  %v15421_v34 = vcombine.high %v7123_v22, %v7131_v46  ;;  %v15420_v11 = vcombine.low %v7123_v22, %v7131_v46 }
0x1cc2   :  { %v15423_v36 = vcombine.high %v7124_v1, %v7132_v14  ;;  %v15422_v12 = vcombine.low %v7124_v1, %v7132_v14 }
0x1cc3   :  { %9929 = vmatpush1.bf16.msra.mxu0 %v15324_v53  ;;  %10015 = vmatpush1.bf16.msra.mxu1 %v15326_v31  ;;  %v7139_v53 = vld [vmem:[#allocation17 + $0xd00] sm:$0xff] }
0x1cc4   :  { %9930 = vmatprep.subr.bf16.mxu0 %v15341_v55  ;;  %10016 = vmatprep.subr.bf16.mxu1 %v15343_v39  ;;  %v7147_v31 = vld [vmem:[#allocation17 + $0xd40] sm:$0xff]  ;;  %v7140_v55 = vld [vmem:[#allocation17 + $0xd08] sm:$0xff] }
0x1cc5   :  { %v7148_v39 = vld [vmem:[#allocation17 + $0xd48] sm:$0xff]  ;;  %v15437_v16 = vcombine.high %v7139_v53, %v7147_v31  ;;  %v15436_v2 = vcombine.low %v7139_v53, %v7147_v31 }
0x1cc6   :  { %v15439_v28 = vcombine.high %v7140_v55, %v7148_v39  ;;  %v15438_v15 = vcombine.low %v7140_v55, %v7148_v39 }
0x1cc7   :  { %9931 = vmatpush1.bf16.msra.mxu0 %v15340_v56  ;;  %10017 = vmatpush1.bf16.msra.mxu1 %v15342_v0  ;;  %v7155_v56 = vld [vmem:[#allocation17 + $0xd80] sm:$0xff] }
0x1cc8   :  { %9932 = vmatprep.subr.bf16.mxu0 %v15357_v21  ;;  %10018 = vmatprep.subr.bf16.mxu1 %v15359_v10  ;;  %v7163_v0 = vld [vmem:[#allocation17 + $0xdc0] sm:$0xff]  ;;  %v7156_v21 = vld [vmem:[#allocation17 + $0xd88] sm:$0xff] }
0x1cc9   :  { %v7164_v10 = vld [vmem:[#allocation17 + $0xdc8] sm:$0xff]  ;;  %v15453_v23 = vcombine.high %v7155_v56, %v7163_v0  ;;  %v15452_v9 = vcombine.low %v7155_v56, %v7163_v0 }
0x1cca   :  { %v15455_v20 = vcombine.high %v7156_v21, %v7164_v10  ;;  %v15454_v51 = vcombine.low %v7156_v21, %v7164_v10 }
0x1ccb   :  { %9933 = vmatpush1.bf16.msra.mxu0 %v15356_v44  ;;  %10019 = vmatpush1.bf16.msra.mxu1 %v15358_v33  ;;  %v7171_v44 = vld [vmem:[#allocation17 + $0xe00] sm:$0xff] }
0x1ccc   :  { %9934 = vmatprep.subr.bf16.mxu0 %v15373_v27  ;;  %10020 = vmatprep.subr.bf16.mxu1 %v15375_v41  ;;  %v7179_v33 = vld [vmem:[#allocation17 + $0xe40] sm:$0xff]  ;;  %v7172_v27 = vld [vmem:[#allocation17 + $0xe08] sm:$0xff] }
0x1ccd   :  { %v7180_v41 = vld [vmem:[#allocation17 + $0xe48] sm:$0xff]  ;;  %v15469_v19 = vcombine.high %v7171_v44, %v7179_v33  ;;  %v15468_v50 = vcombine.low %v7171_v44, %v7179_v33 }
0x1cce   :  { %v15471_v48 = vcombine.high %v7172_v27, %v7180_v41  ;;  %v15470_v61 = vcombine.low %v7172_v27, %v7180_v41 }
0x1ccf   :  { %9935 = vmatpush1.bf16.msra.mxu0 %v15372_v59  ;;  %10021 = vmatpush1.bf16.msra.mxu1 %v15374_v43  ;;  %v7187_v59 = vld [vmem:[#allocation17 + $0xe80] sm:$0xff] }
0x1cd0   :  { %9936 = vmatprep.subr.bf16.mxu0 %v15389_v49  ;;  %10022 = vmatprep.subr.bf16.mxu1 %v15391_v45  ;;  %v7195_v43 = vld [vmem:[#allocation17 + $0xec0] sm:$0xff]  ;;  %v7188_v49 = vld [vmem:[#allocation17 + $0xe88] sm:$0xff] }
0x1cd1   :  { %v7196_v45 = vld [vmem:[#allocation17 + $0xec8] sm:$0xff]  ;;  %v15485_v63 = vcombine.high %v7187_v59, %v7195_v43  ;;  %v15484_v22 = vcombine.low %v7187_v59, %v7195_v43 }
0x1cd2   :  { %v15487_v4 = vcombine.high %v7188_v49, %v7196_v45  ;;  %v15486_v46 = vcombine.low %v7188_v49, %v7196_v45 }
0x1cd3   :  { %9937 = vmatpush1.bf16.msra.mxu0 %v15388_v24  ;;  %10023 = vmatpush1.bf16.msra.mxu1 %v15390_v6  ;;  %v7203_v24 = vld [vmem:[#allocation17 + $0xf00] sm:$0xff] }
0x1cd4   :  { %9938 = vmatprep.subr.bf16.mxu0 %v15405_v38  ;;  %10024 = vmatprep.subr.bf16.mxu1 %v15407_v13  ;;  %v7211_v6 = vld [vmem:[#allocation17 + $0xf40] sm:$0xff]  ;;  %v7204_v38 = vld [vmem:[#allocation17 + $0xf08] sm:$0xff] }
0x1cd5   :  { %v7212_v13 = vld [vmem:[#allocation17 + $0xf48] sm:$0xff]  ;;  %v15501_v1 = vcombine.high %v7203_v24, %v7211_v6  ;;  %v15500_v53 = vcombine.low %v7203_v24, %v7211_v6 }
0x1cd6   :  { %v15503_v14 = vcombine.high %v7204_v38, %v7212_v13  ;;  %v15502_v31 = vcombine.low %v7204_v38, %v7212_v13 }
0x1cd7   :  { %9939 = vmatpush1.bf16.msra.mxu0 %v15404_v54  ;;  %10025 = vmatpush1.bf16.msra.mxu1 %v15406_v8  ;;  %v7219_v54 = vld [vmem:[#allocation17 + $0xf80] sm:$0xff] }
0x1cd8   :  { %9940 = vmatprep.subr.bf16.mxu0 %v15421_v34  ;;  %10026 = vmatprep.subr.bf16.mxu1 %v15423_v36  ;;  %v7227_v8 = vld [vmem:[#allocation17 + $0xfc0] sm:$0xff]  ;;  %v7220_v34 = vld [vmem:[#allocation17 + $0xf88] sm:$0xff] }
0x1cd9   :  { %v7228_v36 = vld [vmem:[#allocation17 + $0xfc8] sm:$0xff]  ;;  %v15517_v55 = vcombine.high %v7219_v54, %v7227_v8  ;;  %v15516_v56 = vcombine.low %v7219_v54, %v7227_v8 }
0x1cda   :  { %v15519_v39 = vcombine.high %v7220_v34, %v7228_v36  ;;  %v15518_v0 = vcombine.low %v7220_v34, %v7228_v36 }
0x1cdb   :  { %9941 = vmatpush1.bf16.msra.mxu0 %v15420_v11  ;;  %10027 = vmatpush1.bf16.msra.mxu1 %v15422_v12  ;;  %v6725_v11 = vld [vmem:[#allocation17 + $0x10] sm:$0xff] }
0x1cdc   :  { %9942 = vmatprep.subr.bf16.mxu0 %v15437_v16  ;;  %10028 = vmatprep.subr.bf16.mxu1 %v15439_v28  ;;  %v6733_v12 = vld [vmem:[#allocation17 + $0x50] sm:$0xff]  ;;  %v6726_v16 = vld [vmem:[#allocation17 + $0x18] sm:$0xff] }
0x1cdd   :  { %v6734_v28 = vld [vmem:[#allocation17 + $0x58] sm:$0xff]  ;;  %v15025_v21 = vcombine.high %v6725_v11, %v6733_v12  ;;  %v15024_v44 = vcombine.low %v6725_v11, %v6733_v12 }
0x1cde   :  { %v15027_v10 = vcombine.high %v6726_v16, %v6734_v28  ;;  %v15026_v33 = vcombine.low %v6726_v16, %v6734_v28 }
0x1cdf   :  { %9943 = vmatpush1.bf16.msra.mxu0 %v15436_v2  ;;  %10029 = vmatpush1.bf16.msra.mxu1 %v15438_v15  ;;  %v6741_v2 = vld [vmem:[#allocation17 + $0x90] sm:$0xff] }
0x1ce0   :  { %9944 = vmatprep.subr.bf16.mxu0 %v15453_v23  ;;  %10030 = vmatprep.subr.bf16.mxu1 %v15455_v20  ;;  %v6749_v15 = vld [vmem:[#allocation17 + $0xd0] sm:$0xff]  ;;  %v6742_v23 = vld [vmem:[#allocation17 + $0x98] sm:$0xff] }
0x1ce1   :  { %v6750_v20 = vld [vmem:[#allocation17 + $0xd8] sm:$0xff]  ;;  %v15041_v27 = vcombine.high %v6741_v2, %v6749_v15  ;;  %v15040_v59 = vcombine.low %v6741_v2, %v6749_v15 }
0x1ce2   :  { %v15043_v41 = vcombine.high %v6742_v23, %v6750_v20  ;;  %v15042_v43 = vcombine.low %v6742_v23, %v6750_v20 }
0x1ce3   :  { %9945 = vmatpush1.bf16.msra.mxu0 %v15452_v9  ;;  %10031 = vmatpush1.bf16.msra.mxu1 %v15454_v51  ;;  %v6757_v9 = vld [vmem:[#allocation17 + $0x110] sm:$0xff] }
0x1ce4   :  { %9946 = vmatprep.subr.bf16.mxu0 %v15469_v19  ;;  %10032 = vmatprep.subr.bf16.mxu1 %v15471_v48  ;;  %v6765_v51 = vld [vmem:[#allocation17 + $0x150] sm:$0xff]  ;;  %v6758_v19 = vld [vmem:[#allocation17 + $0x118] sm:$0xff] }
0x1ce5   :  { %v6766_v48 = vld [vmem:[#allocation17 + $0x158] sm:$0xff]  ;;  %v15057_v49 = vcombine.high %v6757_v9, %v6765_v51  ;;  %v15056_v24 = vcombine.low %v6757_v9, %v6765_v51 }
0x1ce6   :  { %v15059_v45 = vcombine.high %v6758_v19, %v6766_v48  ;;  %v15058_v6 = vcombine.low %v6758_v19, %v6766_v48 }
0x1ce7   :  { %9947 = vmatpush1.bf16.msra.mxu0 %v15468_v50  ;;  %10033 = vmatpush1.bf16.msra.mxu1 %v15470_v61  ;;  %v6773_v50 = vld [vmem:[#allocation17 + $0x190] sm:$0xff] }
0x1ce8   :  { %9948 = vmatprep.subr.bf16.mxu0 %v15485_v63  ;;  %10034 = vmatprep.subr.bf16.mxu1 %v15487_v4  ;;  %v6781_v61 = vld [vmem:[#allocation17 + $0x1d0] sm:$0xff]  ;;  %v6774_v63 = vld [vmem:[#allocation17 + $0x198] sm:$0xff] }
0x1ce9   :  { %v6782_v4 = vld [vmem:[#allocation17 + $0x1d8] sm:$0xff]  ;;  %v15073_v38 = vcombine.high %v6773_v50, %v6781_v61  ;;  %v15072_v54 = vcombine.low %v6773_v50, %v6781_v61 }
0x1cea   :  { %v15075_v13 = vcombine.high %v6774_v63, %v6782_v4  ;;  %v15074_v8 = vcombine.low %v6774_v63, %v6782_v4 }
0x1ceb   :  { %9949 = vmatpush1.bf16.msra.mxu0 %v15484_v22  ;;  %10035 = vmatpush1.bf16.msra.mxu1 %v15486_v46  ;;  %v6789_v22 = vld [vmem:[#allocation17 + $0x210] sm:$0xff] }
0x1cec   :  { %9950 = vmatprep.subr.bf16.mxu0 %v15501_v1  ;;  %10036 = vmatprep.subr.bf16.mxu1 %v15503_v14  ;;  %v6797_v46 = vld [vmem:[#allocation17 + $0x250] sm:$0xff]  ;;  %v6790_v1 = vld [vmem:[#allocation17 + $0x218] sm:$0xff] }
0x1ced   :  { %v6798_v14 = vld [vmem:[#allocation17 + $0x258] sm:$0xff]  ;;  %v15089_v34 = vcombine.high %v6789_v22, %v6797_v46  ;;  %v15088_v11 = vcombine.low %v6789_v22, %v6797_v46 }
0x1cee   :  { %v15091_v36 = vcombine.high %v6790_v1, %v6798_v14  ;;  %v15090_v12 = vcombine.low %v6790_v1, %v6798_v14 }
0x1cef   :  { %9951 = vmatpush1.bf16.msra.mxu0 %v15500_v53  ;;  %10037 = vmatpush1.bf16.msra.mxu1 %v15502_v31  ;;  %v6805_v53 = vld [vmem:[#allocation17 + $0x290] sm:$0xff] }
0x1cf0   :  { %9952 = vmatprep.subr.bf16.mxu0 %v15517_v55  ;;  %10038 = vmatprep.subr.bf16.mxu1 %v15519_v39  ;;  %v6813_v31 = vld [vmem:[#allocation17 + $0x2d0] sm:$0xff]  ;;  %v6806_v55 = vld [vmem:[#allocation17 + $0x298] sm:$0xff] }
0x1cf1   :  { %v6814_v39 = vld [vmem:[#allocation17 + $0x2d8] sm:$0xff]  ;;  %v15105_v16 = vcombine.high %v6805_v53, %v6813_v31  ;;  %v15104_v2 = vcombine.low %v6805_v53, %v6813_v31 }
0x1cf2   :  { %v15107_v28 = vcombine.high %v6806_v55, %v6814_v39  ;;  %v15106_v15 = vcombine.low %v6806_v55, %v6814_v39 }
0x1cf3   :  { %9953 = vmatpush1.bf16.msra.mxu0 %v15516_v56  ;;  %10039 = vmatpush1.bf16.msra.mxu1 %v15518_v0  ;;  %v6821_v56 = vld [vmem:[#allocation17 + $0x310] sm:$0xff] }
0x1cf4   :  { %10051 = vmatprep.subr.bf16.mxu0 %v15025_v21  ;;  %10137 = vmatprep.subr.bf16.mxu1 %v15027_v10  ;;  %v6829_v0 = vld [vmem:[#allocation17 + $0x350] sm:$0xff]  ;;  %v6822_v21 = vld [vmem:[#allocation17 + $0x318] sm:$0xff] }
0x1cf5   :  { %v6830_v10 = vld [vmem:[#allocation17 + $0x358] sm:$0xff]  ;;  %v15121_v23 = vcombine.high %v6821_v56, %v6829_v0  ;;  %v15120_v9 = vcombine.low %v6821_v56, %v6829_v0 }
0x1cf6   :  { %9955 = vmatmul.mubr.bf16.vlgmr.msra.gmra.mrb[80].mxu0 %v19442_v42  ;;  %10041 = vmatmul.mubr.bf16.vlgmr.msra.gmra.mrb[80].mxu1 %v19442_v42  ;;  %v15123_v20 = vcombine.high %v6822_v21, %v6830_v10  ;;  %v15122_v51 = vcombine.low %v6822_v21, %v6830_v10 }
0x1cf7   :  { %10052 = vmatpush1.bf16.msra.mxu0 %v15024_v44  ;;  %10083 = vmatprep.mubr.bf16.mxu0 %v19438_v17  ;;  %v6837_v44 = vld [vmem:[#allocation17 + $0x390] sm:$0xff] }
0x1cf8   :  { %10138 = vmatpush1.bf16.msra.mxu1 %v15026_v33  ;;  %10169 = vmatprep.mubr.bf16.mxu1 %v19438_v17  ;;  %v6845_v33 = vld [vmem:[#allocation17 + $0x3d0] sm:$0xff] }
0x1cf9   :  { %10053 = vmatprep.subr.bf16.mxu0 %v15041_v27  ;;  %10139 = vmatprep.subr.bf16.mxu1 %v15043_v41  ;;  %v6838_v27 = vld [vmem:[#allocation17 + $0x398] sm:$0xff]  ;;  %v15137_v19 = vcombine.high %v6837_v44, %v6845_v33  ;;  %v15136_v50 = vcombine.low %v6837_v44, %v6845_v33 }
0x1cfa   :  { %v6846_v41 = vld [vmem:[#allocation17 + $0x3d8] sm:$0xff] }
0x1cfb   :  { %10054 = vmatpush1.bf16.msra.mxu0 %v15040_v59  ;;  %v15139_v48 = vcombine.high %v6838_v27, %v6846_v41  ;;  %v6853_v59 = vld [vmem:[#allocation17 + $0x410] sm:$0xff]  ;;  %v15138_v61 = vcombine.low %v6838_v27, %v6846_v41 }
0x1cfc   :  { %10140 = vmatpush1.bf16.msra.mxu1 %v15042_v43  ;;  %10055 = vmatprep.subr.bf16.mxu0 %v15057_v49  ;;  %v6861_v43 = vld [vmem:[#allocation17 + $0x450] sm:$0xff]  ;;  %v6854_v49 = vld [vmem:[#allocation17 + $0x418] sm:$0xff] }
0x1cfd   :  { %10141 = vmatprep.subr.bf16.mxu1 %v15059_v45  ;;  %v6862_v45 = vld [vmem:[#allocation17 + $0x458] sm:$0xff]  ;;  %v15153_v63 = vcombine.high %v6853_v59, %v6861_v43  ;;  %v15152_v22 = vcombine.low %v6853_v59, %v6861_v43 }
0x1cfe   :  { %v15155_v4 = vcombine.high %v6854_v49, %v6862_v45  ;;  %v15154_v46 = vcombine.low %v6854_v49, %v6862_v45 }
0x1cff   :  { %10056 = vmatpush1.bf16.msra.mxu0 %v15056_v24  ;;  %v6869_v24 = vld [vmem:[#allocation17 + $0x490] sm:$0xff] }
0x1d00   :  { %10142 = vmatpush1.bf16.msra.mxu1 %v15058_v6  ;;  %10057 = vmatprep.subr.bf16.mxu0 %v15073_v38  ;;  %v6877_v6 = vld [vmem:[#allocation17 + $0x4d0] sm:$0xff]  ;;  %v6870_v38 = vld [vmem:[#allocation17 + $0x498] sm:$0xff] }
0x1d01   :  { %10143 = vmatprep.subr.bf16.mxu1 %v15075_v13  ;;  %v6878_v13 = vld [vmem:[#allocation17 + $0x4d8] sm:$0xff]  ;;  %v15169_v1 = vcombine.high %v6869_v24, %v6877_v6  ;;  %v15168_v53 = vcombine.low %v6869_v24, %v6877_v6 }
0x1d02   :  { %v15171_v14 = vcombine.high %v6870_v38, %v6878_v13  ;;  %v15170_v31 = vcombine.low %v6870_v38, %v6878_v13 }
0x1d03   :  { %10058 = vmatpush1.bf16.msra.mxu0 %v15072_v54  ;;  %v6885_v54 = vld [vmem:[#allocation17 + $0x510] sm:$0xff] }
0x1d04   :  { %10144 = vmatpush1.bf16.msra.mxu1 %v15074_v8  ;;  %10059 = vmatprep.subr.bf16.mxu0 %v15089_v34  ;;  %v6893_v8 = vld [vmem:[#allocation17 + $0x550] sm:$0xff]  ;;  %v6886_v34 = vld [vmem:[#allocation17 + $0x518] sm:$0xff] }
0x1d05   :  { %10145 = vmatprep.subr.bf16.mxu1 %v15091_v36  ;;  %v6894_v36 = vld [vmem:[#allocation17 + $0x558] sm:$0xff]  ;;  %v15185_v55 = vcombine.high %v6885_v54, %v6893_v8  ;;  %v15184_v56 = vcombine.low %v6885_v54, %v6893_v8 }
0x1d06   :  { %v15187_v39 = vcombine.high %v6886_v34, %v6894_v36  ;;  %v15186_v0 = vcombine.low %v6886_v34, %v6894_v36 }
0x1d07   :  { %10060 = vmatpush1.bf16.msra.mxu0 %v15088_v11  ;;  %v6901_v11 = vld [vmem:[#allocation17 + $0x590] sm:$0xff] }
0x1d08   :  { %10146 = vmatpush1.bf16.msra.mxu1 %v15090_v12  ;;  %10061 = vmatprep.subr.bf16.mxu0 %v15105_v16  ;;  %v6909_v12 = vld [vmem:[#allocation17 + $0x5d0] sm:$0xff]  ;;  %v6902_v16 = vld [vmem:[#allocation17 + $0x598] sm:$0xff] }
0x1d09   :  { %10147 = vmatprep.subr.bf16.mxu1 %v15107_v28  ;;  %v6910_v28 = vld [vmem:[#allocation17 + $0x5d8] sm:$0xff]  ;;  %v15201_v21 = vcombine.high %v6901_v11, %v6909_v12  ;;  %v15200_v44 = vcombine.low %v6901_v11, %v6909_v12 }
0x1d0a   :  { %v15203_v10 = vcombine.high %v6902_v16, %v6910_v28  ;;  %v15202_v33 = vcombine.low %v6902_v16, %v6910_v28 }
0x1d0b   :  { %10062 = vmatpush1.bf16.msra.mxu0 %v15104_v2  ;;  %v6917_v2 = vld [vmem:[#allocation17 + $0x610] sm:$0xff] }
0x1d0c   :  { %10148 = vmatpush1.bf16.msra.mxu1 %v15106_v15  ;;  %10063 = vmatprep.subr.bf16.mxu0 %v15121_v23  ;;  %v6925_v15 = vld [vmem:[#allocation17 + $0x650] sm:$0xff]  ;;  %v6918_v23 = vld [vmem:[#allocation17 + $0x618] sm:$0xff] }
0x1d0d   :  { %10149 = vmatprep.subr.bf16.mxu1 %v15123_v20  ;;  %v6926_v20 = vld [vmem:[#allocation17 + $0x658] sm:$0xff]  ;;  %v15217_v27 = vcombine.high %v6917_v2, %v6925_v15  ;;  %v15216_v59 = vcombine.low %v6917_v2, %v6925_v15 }
0x1d0e   :  { %v15219_v41 = vcombine.high %v6918_v23, %v6926_v20  ;;  %v15218_v43 = vcombine.low %v6918_v23, %v6926_v20  ;;  %v7006_v2 = vld [vmem:[#allocation17 + $0x8d8] sm:$0xff]  ;;  %v7013_v20 = vld [vmem:[#allocation17 + $0x910] sm:$0xff] }
0x1d0f   :  { %10064 = vmatpush1.bf16.msra.mxu0 %v15120_v9  ;;  %v6933_v9 = vld [vmem:[#allocation17 + $0x690] sm:$0xff] }
0x1d10   :  { %10150 = vmatpush1.bf16.msra.mxu1 %v15122_v51  ;;  %10065 = vmatprep.subr.bf16.mxu0 %v15137_v19  ;;  %v6941_v51 = vld [vmem:[#allocation17 + $0x6d0] sm:$0xff]  ;;  %v6934_v19 = vld [vmem:[#allocation17 + $0x698] sm:$0xff] }
0x1d11   :  { %10151 = vmatprep.subr.bf16.mxu1 %v15139_v48  ;;  %v6942_v48 = vld [vmem:[#allocation17 + $0x6d8] sm:$0xff]  ;;  %v15233_v49 = vcombine.high %v6933_v9, %v6941_v51  ;;  %v15232_v24 = vcombine.low %v6933_v9, %v6941_v51 }
0x1d12   :  { %v15235_v45 = vcombine.high %v6934_v19, %v6942_v48  ;;  %v15234_v6 = vcombine.low %v6934_v19, %v6942_v48 }
0x1d13   :  { %10066 = vmatpush1.bf16.msra.mxu0 %v15136_v50  ;;  %v6949_v50 = vld [vmem:[#allocation17 + $0x710] sm:$0xff] }
0x1d14   :  { %10152 = vmatpush1.bf16.msra.mxu1 %v15138_v61  ;;  %10067 = vmatprep.subr.bf16.mxu0 %v15153_v63  ;;  %v6957_v61 = vld [vmem:[#allocation17 + $0x750] sm:$0xff]  ;;  %v6950_v63 = vld [vmem:[#allocation17 + $0x718] sm:$0xff] }
0x1d15   :  { %10153 = vmatprep.subr.bf16.mxu1 %v15155_v4  ;;  %v6958_v4 = vld [vmem:[#allocation17 + $0x758] sm:$0xff]  ;;  %v15249_v38 = vcombine.high %v6949_v50, %v6957_v61  ;;  %v15248_v54 = vcombine.low %v6949_v50, %v6957_v61 }
0x1d16   :  { %v15251_v13 = vcombine.high %v6950_v63, %v6958_v4  ;;  %v15250_v8 = vcombine.low %v6950_v63, %v6958_v4 }
0x1d17   :  { %10068 = vmatpush1.bf16.msra.mxu0 %v15152_v22  ;;  %v6965_v22 = vld [vmem:[#allocation17 + $0x790] sm:$0xff] }
0x1d18   :  { %10154 = vmatpush1.bf16.msra.mxu1 %v15154_v46  ;;  %10069 = vmatprep.subr.bf16.mxu0 %v15169_v1  ;;  %v6973_v46 = vld [vmem:[#allocation17 + $0x7d0] sm:$0xff]  ;;  %v6966_v1 = vld [vmem:[#allocation17 + $0x798] sm:$0xff] }
0x1d19   :  { %10155 = vmatprep.subr.bf16.mxu1 %v15171_v14  ;;  %v6974_v14 = vld [vmem:[#allocation17 + $0x7d8] sm:$0xff]  ;;  %v15265_v34 = vcombine.high %v6965_v22, %v6973_v46  ;;  %v15264_v11 = vcombine.low %v6965_v22, %v6973_v46 }
0x1d1a   :  { %v15267_v36 = vcombine.high %v6966_v1, %v6974_v14  ;;  %v15266_v12 = vcombine.low %v6966_v1, %v6974_v14 }
0x1d1b   :  { %10070 = vmatpush1.bf16.msra.mxu0 %v15168_v53  ;;  %v6981_v53 = vld [vmem:[#allocation17 + $0x810] sm:$0xff] }
0x1d1c   :  { %10156 = vmatpush1.bf16.msra.mxu1 %v15170_v31  ;;  %10071 = vmatprep.subr.bf16.mxu0 %v15185_v55  ;;  %v6989_v31 = vld [vmem:[#allocation17 + $0x850] sm:$0xff]  ;;  %v6982_v55 = vld [vmem:[#allocation17 + $0x818] sm:$0xff] }
0x1d1d   :  { %10157 = vmatprep.subr.bf16.mxu1 %v15187_v39  ;;  %v6990_v39 = vld [vmem:[#allocation17 + $0x858] sm:$0xff]  ;;  %v15281_v16 = vcombine.high %v6981_v53, %v6989_v31 }
0x1d1e   :  { %v15283_v28 = vcombine.high %v6982_v55, %v6990_v39  ;;  %v15282_v15 = vcombine.low %v6982_v55, %v6990_v39 }
0x1d1f   :  { %10072 = vmatpush1.bf16.msra.mxu0 %v15184_v56  ;;  %v6997_v56 = vld [vmem:[#allocation17 + $0x890] sm:$0xff] }
0x1d20   :  { %10158 = vmatpush1.bf16.msra.mxu1 %v15186_v0  ;;  %10073 = vmatprep.subr.bf16.mxu0 %v15201_v21  ;;  %v7005_v0 = vld [vmem:[#allocation17 + $0x8d0] sm:$0xff]  ;;  %v15280_v21 = vcombine.low %v6981_v53, %v6989_v31 }
0x1d21   :  { %10159 = vmatprep.subr.bf16.mxu1 %v15203_v10  ;;  %v6998_v10 = vld [vmem:[#allocation17 + $0x898] sm:$0xff]  ;;  %v15297_v23 = vcombine.high %v6997_v56, %v7005_v0  ;;  %v15296_v9 = vcombine.low %v6997_v56, %v7005_v0 }
0x1d22   :  { %v15298_v51 = vcombine.low %v6998_v10, %v7006_v2 }
0x1d23   :  { %10074 = vmatpush1.bf16.msra.mxu0 %v15200_v44  ;;  %v7021_v44 = vld [vmem:[#allocation17 + $0x950] sm:$0xff] }
0x1d24   :  { %10160 = vmatpush1.bf16.msra.mxu1 %v15202_v33  ;;  %10075 = vmatprep.subr.bf16.mxu0 %v15217_v27  ;;  %v15299_v33 = vcombine.high %v6998_v10, %v7006_v2  ;;  %v7014_v27 = vld [vmem:[#allocation17 + $0x918] sm:$0xff]  ;;  %v15313_v19 = vcombine.high %v7013_v20, %v7021_v44  ;;  %v15312_v50 = vcombine.low %v7013_v20, %v7021_v44  ;;  %v7093_v2 = vld [vmem:[#allocation17 + $0xb90] sm:$0xff] }
0x1d25   :  { %10161 = vmatprep.subr.bf16.mxu1 %v15219_v41  ;;  %v7022_v41 = vld [vmem:[#allocation17 + $0x958] sm:$0xff] }
0x1d26   :  { %v15315_v48 = vcombine.high %v7014_v27, %v7022_v41  ;;  %v15314_v61 = vcombine.low %v7014_v27, %v7022_v41  ;;  %v7102_v20 = vld [vmem:[#allocation17 + $0xbd8] sm:$0xff] }
0x1d27   :  { %10076 = vmatpush1.bf16.msra.mxu0 %v15216_v59  ;;  %v7029_v59 = vld [vmem:[#allocation17 + $0x990] sm:$0xff] }
0x1d28   :  { %10162 = vmatpush1.bf16.msra.mxu1 %v15218_v43  ;;  %10077 = vmatprep.subr.bf16.mxu0 %v15233_v49  ;;  %v7037_v43 = vld [vmem:[#allocation17 + $0x9d0] sm:$0xff]  ;;  %v7030_v49 = vld [vmem:[#allocation17 + $0x998] sm:$0xff] }
0x1d29   :  { %10163 = vmatprep.subr.bf16.mxu1 %v15235_v45  ;;  %v7038_v45 = vld [vmem:[#allocation17 + $0x9d8] sm:$0xff]  ;;  %v15329_v63 = vcombine.high %v7029_v59, %v7037_v43  ;;  %v15328_v22 = vcombine.low %v7029_v59, %v7037_v43 }
0x1d2a   :  { %v15331_v4 = vcombine.high %v7030_v49, %v7038_v45  ;;  %v15330_v46 = vcombine.low %v7030_v49, %v7038_v45 }
0x1d2b   :  { %10078 = vmatpush1.bf16.msra.mxu0 %v15232_v24  ;;  %v7045_v24 = vld [vmem:[#allocation17 + $0xa10] sm:$0xff] }
0x1d2c   :  { %10164 = vmatpush1.bf16.msra.mxu1 %v15234_v6  ;;  %10079 = vmatprep.subr.bf16.mxu0 %v15249_v38  ;;  %v7053_v6 = vld [vmem:[#allocation17 + $0xa50] sm:$0xff]  ;;  %v7046_v38 = vld [vmem:[#allocation17 + $0xa18] sm:$0xff] }
0x1d2d   :  { %10165 = vmatprep.subr.bf16.mxu1 %v15251_v13  ;;  %v7054_v13 = vld [vmem:[#allocation17 + $0xa58] sm:$0xff]  ;;  %v15345_v1 = vcombine.high %v7045_v24, %v7053_v6  ;;  %v15344_v53 = vcombine.low %v7045_v24, %v7053_v6 }
0x1d2e   :  { %v15347_v14 = vcombine.high %v7046_v38, %v7054_v13  ;;  %v15346_v31 = vcombine.low %v7046_v38, %v7054_v13 }
0x1d2f   :  { %10080 = vmatpush1.bf16.msra.mxu0 %v15248_v54  ;;  %v7061_v54 = vld [vmem:[#allocation17 + $0xa90] sm:$0xff] }
0x1d30   :  { %10166 = vmatpush1.bf16.msra.mxu1 %v15250_v8  ;;  %10081 = vmatprep.subr.bf16.mxu0 %v15265_v34  ;;  %v7069_v8 = vld [vmem:[#allocation17 + $0xad0] sm:$0xff]  ;;  %v7062_v34 = vld [vmem:[#allocation17 + $0xa98] sm:$0xff] }
0x1d31   :  { %10167 = vmatprep.subr.bf16.mxu1 %v15267_v36  ;;  %v7070_v36 = vld [vmem:[#allocation17 + $0xad8] sm:$0xff]  ;;  %v15361_v55 = vcombine.high %v7061_v54, %v7069_v8  ;;  %v15360_v56 = vcombine.low %v7061_v54, %v7069_v8 }
0x1d32   :  { %v15363_v39 = vcombine.high %v7062_v34, %v7070_v36  ;;  %v15362_v0 = vcombine.low %v7062_v34, %v7070_v36 }
0x1d33   :  { %10082 = vmatpush1.bf16.msra.mxu0 %v15264_v11  ;;  %v7077_v11 = vld [vmem:[#allocation17 + $0xb10] sm:$0xff] }
0x1d34   :  { %10168 = vmatpush1.bf16.msra.mxu1 %v15266_v12  ;;  %10094 = vmatprep.subr.bf16.mxu0 %v15281_v16  ;;  %v7085_v12 = vld [vmem:[#allocation17 + $0xb50] sm:$0xff]  ;;  %v7078_v16 = vld [vmem:[#allocation17 + $0xb18] sm:$0xff] }
0x1d35   :  { %10180 = vmatprep.subr.bf16.mxu1 %v15283_v28  ;;  %v7086_v28 = vld [vmem:[#allocation17 + $0xb58] sm:$0xff]  ;;  %v15376_v44 = vcombine.low %v7077_v11, %v7085_v12 }
0x1d36   :  { %10084 = vmatmul.mubr.bf16.vlgmr.msra.gmra.mrb[84].mxu0 %v19440_v26  ;;  %v15379_v10 = vcombine.high %v7078_v16, %v7086_v28 }
0x1d37   :  { %10170 = vmatmul.mubr.bf16.vlgmr.msra.gmra.mrb[84].mxu1 %v19440_v26  ;;  %10095 = vmatpush1.bf16.msra.mxu0 %v15280_v21  ;;  %v15377_v21 = vcombine.high %v7077_v11, %v7085_v12 }
0x1d38   :  { %10126 = vmatprep.mubr.bf16.mxu0 %v19448_v37  ;;  %10181 = vmatpush1.bf16.msra.mxu1 %v15282_v15  ;;  %v7101_v15 = vld [vmem:[#allocation17 + $0xbd0] sm:$0xff] }
0x1d39   :  { %10212 = vmatprep.mubr.bf16.mxu1 %v19448_v37  ;;  %10096 = vmatprep.subr.bf16.mxu0 %v15297_v23  ;;  %v7094_v23 = vld [vmem:[#allocation17 + $0xb98] sm:$0xff]  ;;  %v15393_v27 = vcombine.high %v7093_v2, %v7101_v15  ;;  %v15392_v59 = vcombine.low %v7093_v2, %v7101_v15 }
0x1d3a   :  { %10182 = vmatprep.subr.bf16.mxu1 %v15299_v33  ;;  %v15378_v33 = vcombine.low %v7078_v16, %v7086_v28  ;;  %v15395_v41 = vcombine.high %v7094_v23, %v7102_v20  ;;  %v15394_v43 = vcombine.low %v7094_v23, %v7102_v20 }
0x1d3b   :  { %10097 = vmatpush1.bf16.msra.mxu0 %v15296_v9  ;;  %v7109_v9 = vld [vmem:[#allocation17 + $0xc10] sm:$0xff] }
0x1d3c   :  { %10183 = vmatpush1.bf16.msra.mxu1 %v15298_v51  ;;  %10098 = vmatprep.subr.bf16.mxu0 %v15313_v19  ;;  %v7117_v51 = vld [vmem:[#allocation17 + $0xc50] sm:$0xff]  ;;  %v7110_v19 = vld [vmem:[#allocation17 + $0xc18] sm:$0xff] }
0x1d3d   :  { %10184 = vmatprep.subr.bf16.mxu1 %v15315_v48  ;;  %v7118_v48 = vld [vmem:[#allocation17 + $0xc58] sm:$0xff]  ;;  %v15409_v49 = vcombine.high %v7109_v9, %v7117_v51  ;;  %v15408_v24 = vcombine.low %v7109_v9, %v7117_v51 }
0x1d3e   :  { %v15411_v45 = vcombine.high %v7110_v19, %v7118_v48  ;;  %v15410_v6 = vcombine.low %v7110_v19, %v7118_v48 }
0x1d3f   :  { %10099 = vmatpush1.bf16.msra.mxu0 %v15312_v50  ;;  %v7125_v50 = vld [vmem:[#allocation17 + $0xc90] sm:$0xff] }
0x1d40   :  { %10185 = vmatpush1.bf16.msra.mxu1 %v15314_v61  ;;  %10100 = vmatprep.subr.bf16.mxu0 %v15329_v63  ;;  %v7133_v61 = vld [vmem:[#allocation17 + $0xcd0] sm:$0xff]  ;;  %v7126_v63 = vld [vmem:[#allocation17 + $0xc98] sm:$0xff] }
0x1d41   :  { %10186 = vmatprep.subr.bf16.mxu1 %v15331_v4  ;;  %v7134_v4 = vld [vmem:[#allocation17 + $0xcd8] sm:$0xff]  ;;  %v15425_v38 = vcombine.high %v7125_v50, %v7133_v61  ;;  %v15424_v54 = vcombine.low %v7125_v50, %v7133_v61 }
0x1d42   :  { %v15427_v13 = vcombine.high %v7126_v63, %v7134_v4  ;;  %v15426_v8 = vcombine.low %v7126_v63, %v7134_v4 }
0x1d43   :  { %10101 = vmatpush1.bf16.msra.mxu0 %v15328_v22  ;;  %v7141_v22 = vld [vmem:[#allocation17 + $0xd10] sm:$0xff] }
0x1d44   :  { %10187 = vmatpush1.bf16.msra.mxu1 %v15330_v46  ;;  %10102 = vmatprep.subr.bf16.mxu0 %v15345_v1  ;;  %v7149_v46 = vld [vmem:[#allocation17 + $0xd50] sm:$0xff]  ;;  %v7142_v1 = vld [vmem:[#allocation17 + $0xd18] sm:$0xff] }
0x1d45   :  { %10188 = vmatprep.subr.bf16.mxu1 %v15347_v14  ;;  %v7150_v14 = vld [vmem:[#allocation17 + $0xd58] sm:$0xff]  ;;  %v15441_v34 = vcombine.high %v7141_v22, %v7149_v46  ;;  %v15440_v11 = vcombine.low %v7141_v22, %v7149_v46 }
0x1d46   :  { %v15443_v36 = vcombine.high %v7142_v1, %v7150_v14  ;;  %v15442_v12 = vcombine.low %v7142_v1, %v7150_v14 }
0x1d47   :  { %10103 = vmatpush1.bf16.msra.mxu0 %v15344_v53  ;;  %v7157_v53 = vld [vmem:[#allocation17 + $0xd90] sm:$0xff] }
0x1d48   :  { %10189 = vmatpush1.bf16.msra.mxu1 %v15346_v31  ;;  %10104 = vmatprep.subr.bf16.mxu0 %v15361_v55  ;;  %v7165_v31 = vld [vmem:[#allocation17 + $0xdd0] sm:$0xff]  ;;  %v7158_v55 = vld [vmem:[#allocation17 + $0xd98] sm:$0xff] }
0x1d49   :  { %10190 = vmatprep.subr.bf16.mxu1 %v15363_v39  ;;  %v7166_v39 = vld [vmem:[#allocation17 + $0xdd8] sm:$0xff]  ;;  %v15457_v16 = vcombine.high %v7157_v53, %v7165_v31  ;;  %v15456_v2 = vcombine.low %v7157_v53, %v7165_v31 }
0x1d4a   :  { %v15459_v28 = vcombine.high %v7158_v55, %v7166_v39  ;;  %v15458_v15 = vcombine.low %v7158_v55, %v7166_v39 }
0x1d4b   :  { %10105 = vmatpush1.bf16.msra.mxu0 %v15360_v56  ;;  %v7173_v56 = vld [vmem:[#allocation17 + $0xe10] sm:$0xff] }
0x1d4c   :  { %10191 = vmatpush1.bf16.msra.mxu1 %v15362_v0  ;;  %10106 = vmatprep.subr.bf16.mxu0 %v15377_v21  ;;  %v7181_v0 = vld [vmem:[#allocation17 + $0xe50] sm:$0xff]  ;;  %v7174_v21 = vld [vmem:[#allocation17 + $0xe18] sm:$0xff] }
0x1d4d   :  { %10192 = vmatprep.subr.bf16.mxu1 %v15379_v10  ;;  %v7182_v10 = vld [vmem:[#allocation17 + $0xe58] sm:$0xff]  ;;  %v15473_v23 = vcombine.high %v7173_v56, %v7181_v0  ;;  %v15472_v9 = vcombine.low %v7173_v56, %v7181_v0  ;;  %v6752_v56 = vld [vmem:[#allocation17 + $0xe8] sm:$0xff] }
0x1d4e   :  { %v15475_v20 = vcombine.high %v7174_v21, %v7182_v10  ;;  %v15474_v51 = vcombine.low %v7174_v21, %v7182_v10  ;;  %v6759_v10 = vld [vmem:[#allocation17 + $0x120] sm:$0xff] }
0x1d4f   :  { %10107 = vmatpush1.bf16.msra.mxu0 %v15376_v44  ;;  %v7189_v44 = vld [vmem:[#allocation17 + $0xe90] sm:$0xff] }
0x1d50   :  { %10193 = vmatpush1.bf16.msra.mxu1 %v15378_v33  ;;  %10108 = vmatprep.subr.bf16.mxu0 %v15393_v27  ;;  %v7197_v33 = vld [vmem:[#allocation17 + $0xed0] sm:$0xff]  ;;  %v7190_v27 = vld [vmem:[#allocation17 + $0xe98] sm:$0xff] }
0x1d51   :  { %10194 = vmatprep.subr.bf16.mxu1 %v15395_v41  ;;  %v7198_v41 = vld [vmem:[#allocation17 + $0xed8] sm:$0xff]  ;;  %v15489_v19 = vcombine.high %v7189_v44, %v7197_v33  ;;  %v15488_v50 = vcombine.low %v7189_v44, %v7197_v33 }
0x1d52   :  { %v15491_v48 = vcombine.high %v7190_v27, %v7198_v41  ;;  %v15490_v61 = vcombine.low %v7190_v27, %v7198_v41 }
0x1d53   :  { %10109 = vmatpush1.bf16.msra.mxu0 %v15392_v59  ;;  %v7205_v59 = vld [vmem:[#allocation17 + $0xf10] sm:$0xff] }
0x1d54   :  { %10195 = vmatpush1.bf16.msra.mxu1 %v15394_v43  ;;  %10110 = vmatprep.subr.bf16.mxu0 %v15409_v49  ;;  %v7213_v43 = vld [vmem:[#allocation17 + $0xf50] sm:$0xff]  ;;  %v7206_v49 = vld [vmem:[#allocation17 + $0xf18] sm:$0xff] }
0x1d55   :  { %10196 = vmatprep.subr.bf16.mxu1 %v15411_v45  ;;  %v7214_v45 = vld [vmem:[#allocation17 + $0xf58] sm:$0xff]  ;;  %v15505_v63 = vcombine.high %v7205_v59, %v7213_v43  ;;  %v15504_v22 = vcombine.low %v7205_v59, %v7213_v43 }
0x1d56   :  { %v15507_v4 = vcombine.high %v7206_v49, %v7214_v45  ;;  %v15506_v46 = vcombine.low %v7206_v49, %v7214_v45 }
0x1d57   :  { %10111 = vmatpush1.bf16.msra.mxu0 %v15408_v24  ;;  %v7221_v24 = vld [vmem:[#allocation17 + $0xf90] sm:$0xff] }
0x1d58   :  { %10197 = vmatpush1.bf16.msra.mxu1 %v15410_v6  ;;  %10112 = vmatprep.subr.bf16.mxu0 %v15425_v38  ;;  %v7229_v6 = vld [vmem:[#allocation17 + $0xfd0] sm:$0xff]  ;;  %v7222_v38 = vld [vmem:[#allocation17 + $0xf98] sm:$0xff] }
0x1d59   :  { %10198 = vmatprep.subr.bf16.mxu1 %v15427_v13  ;;  %v7230_v13 = vld [vmem:[#allocation17 + $0xfd8] sm:$0xff]  ;;  %v15521_v1 = vcombine.high %v7221_v24, %v7229_v6  ;;  %v15520_v53 = vcombine.low %v7221_v24, %v7229_v6 }
0x1d5a   :  { %v15523_v14 = vcombine.high %v7222_v38, %v7230_v13  ;;  %v15522_v31 = vcombine.low %v7222_v38, %v7230_v13 }
0x1d5b   :  { %10113 = vmatpush1.bf16.msra.mxu0 %v15424_v54  ;;  %v6727_v54 = vld [vmem:[#allocation17 + $0x20] sm:$0xff] }
0x1d5c   :  { %10199 = vmatpush1.bf16.msra.mxu1 %v15426_v8  ;;  %10114 = vmatprep.subr.bf16.mxu0 %v15441_v34  ;;  %v6735_v8 = vld [vmem:[#allocation17 + $0x60] sm:$0xff]  ;;  %v6728_v34 = vld [vmem:[#allocation17 + $0x28] sm:$0xff] }
0x1d5d   :  { %10200 = vmatprep.subr.bf16.mxu1 %v15443_v36  ;;  %v6736_v36 = vld [vmem:[#allocation17 + $0x68] sm:$0xff]  ;;  %v15029_v55 = vcombine.high %v6727_v54, %v6735_v8 }
0x1d5e   :  { %v15031_v39 = vcombine.high %v6728_v34, %v6736_v36  ;;  %v15030_v0 = vcombine.low %v6728_v34, %v6736_v36 }
0x1d5f   :  { %10115 = vmatpush1.bf16.msra.mxu0 %v15440_v11  ;;  %v6743_v11 = vld [vmem:[#allocation17 + $0xa0] sm:$0xff] }
0x1d60   :  { %10201 = vmatpush1.bf16.msra.mxu1 %v15442_v12  ;;  %10116 = vmatprep.subr.bf16.mxu0 %v15457_v16  ;;  %v6751_v12 = vld [vmem:[#allocation17 + $0xe0] sm:$0xff]  ;;  %v15028_v16 = vcombine.low %v6727_v54, %v6735_v8 }
0x1d61   :  { %10202 = vmatprep.subr.bf16.mxu1 %v15459_v28  ;;  %v6744_v28 = vld [vmem:[#allocation17 + $0xa8] sm:$0xff]  ;;  %v15045_v21 = vcombine.high %v6743_v11, %v6751_v12  ;;  %v15044_v44 = vcombine.low %v6743_v11, %v6751_v12 }
0x1d62   :  { %v15046_v33 = vcombine.low %v6744_v28, %v6752_v56 }
0x1d63   :  { %10117 = vmatpush1.bf16.msra.mxu0 %v15456_v2  ;;  %v6767_v2 = vld [vmem:[#allocation17 + $0x160] sm:$0xff] }
0x1d64   :  { %10203 = vmatpush1.bf16.msra.mxu1 %v15458_v15  ;;  %10118 = vmatprep.subr.bf16.mxu0 %v15473_v23  ;;  %v15047_v15 = vcombine.high %v6744_v28, %v6752_v56  ;;  %v6760_v23 = vld [vmem:[#allocation17 + $0x128] sm:$0xff]  ;;  %v15061_v27 = vcombine.high %v6759_v10, %v6767_v2  ;;  %v15060_v59 = vcombine.low %v6759_v10, %v6767_v2  ;;  %v6839_v56 = vld [vmem:[#allocation17 + $0x3a0] sm:$0xff] }
0x1d65   :  { %10204 = vmatprep.subr.bf16.mxu1 %v15475_v20  ;;  %v6768_v20 = vld [vmem:[#allocation17 + $0x168] sm:$0xff] }
0x1d66   :  { %v15063_v41 = vcombine.high %v6760_v23, %v6768_v20  ;;  %v15062_v43 = vcombine.low %v6760_v23, %v6768_v20  ;;  %v6848_v10 = vld [vmem:[#allocation17 + $0x3e8] sm:$0xff] }
0x1d67   :  { %10119 = vmatpush1.bf16.msra.mxu0 %v15472_v9  ;;  %v6775_v9 = vld [vmem:[#allocation17 + $0x1a0] sm:$0xff] }
0x1d68   :  { %10205 = vmatpush1.bf16.msra.mxu1 %v15474_v51  ;;  %10120 = vmatprep.subr.bf16.mxu0 %v15489_v19  ;;  %v6783_v51 = vld [vmem:[#allocation17 + $0x1e0] sm:$0xff]  ;;  %v6776_v19 = vld [vmem:[#allocation17 + $0x1a8] sm:$0xff] }
0x1d69   :  { %10206 = vmatprep.subr.bf16.mxu1 %v15491_v48  ;;  %v6784_v48 = vld [vmem:[#allocation17 + $0x1e8] sm:$0xff]  ;;  %v15077_v49 = vcombine.high %v6775_v9, %v6783_v51  ;;  %v15076_v24 = vcombine.low %v6775_v9, %v6783_v51 }
0x1d6a   :  { %v15079_v45 = vcombine.high %v6776_v19, %v6784_v48  ;;  %v15078_v6 = vcombine.low %v6776_v19, %v6784_v48 }
0x1d6b   :  { %10121 = vmatpush1.bf16.msra.mxu0 %v15488_v50  ;;  %v6791_v50 = vld [vmem:[#allocation17 + $0x220] sm:$0xff] }
0x1d6c   :  { %10207 = vmatpush1.bf16.msra.mxu1 %v15490_v61  ;;  %10122 = vmatprep.subr.bf16.mxu0 %v15505_v63  ;;  %v6799_v61 = vld [vmem:[#allocation17 + $0x260] sm:$0xff]  ;;  %v6792_v63 = vld [vmem:[#allocation17 + $0x228] sm:$0xff] }
0x1d6d   :  { %10208 = vmatprep.subr.bf16.mxu1 %v15507_v4  ;;  %v6800_v4 = vld [vmem:[#allocation17 + $0x268] sm:$0xff]  ;;  %v15093_v38 = vcombine.high %v6791_v50, %v6799_v61  ;;  %v15092_v54 = vcombine.low %v6791_v50, %v6799_v61 }
0x1d6e   :  { %v15095_v13 = vcombine.high %v6792_v63, %v6800_v4  ;;  %v15094_v8 = vcombine.low %v6792_v63, %v6800_v4 }
0x1d6f   :  { %10123 = vmatpush1.bf16.msra.mxu0 %v15504_v22  ;;  %v6807_v22 = vld [vmem:[#allocation17 + $0x2a0] sm:$0xff] }
0x1d70   :  { %10209 = vmatpush1.bf16.msra.mxu1 %v15506_v46  ;;  %10124 = vmatprep.subr.bf16.mxu0 %v15521_v1  ;;  %v6815_v46 = vld [vmem:[#allocation17 + $0x2e0] sm:$0xff]  ;;  %v6808_v1 = vld [vmem:[#allocation17 + $0x2a8] sm:$0xff] }
0x1d71   :  { %10210 = vmatprep.subr.bf16.mxu1 %v15523_v14  ;;  %v6816_v14 = vld [vmem:[#allocation17 + $0x2e8] sm:$0xff]  ;;  %v15109_v34 = vcombine.high %v6807_v22, %v6815_v46  ;;  %v15108_v11 = vcombine.low %v6807_v22, %v6815_v46 }
0x1d72   :  { %v15111_v36 = vcombine.high %v6808_v1, %v6816_v14  ;;  %v15110_v12 = vcombine.low %v6808_v1, %v6816_v14 }
0x1d73   :  { %10125 = vmatpush1.bf16.msra.mxu0 %v15520_v53  ;;  %v6823_v53 = vld [vmem:[#allocation17 + $0x320] sm:$0xff] }
0x1d74   :  { %10211 = vmatpush1.bf16.msra.mxu1 %v15522_v31  ;;  %10223 = vmatprep.subr.bf16.mxu0 %v15029_v55  ;;  %v6831_v31 = vld [vmem:[#allocation17 + $0x360] sm:$0xff]  ;;  %v6824_v55 = vld [vmem:[#allocation17 + $0x328] sm:$0xff] }
0x1d75   :  { %10309 = vmatprep.subr.bf16.mxu1 %v15031_v39  ;;  %v6832_v39 = vld [vmem:[#allocation17 + $0x368] sm:$0xff]  ;;  %v15124_v2 = vcombine.low %v6823_v53, %v6831_v31 }
0x1d76   :  { %10127 = vmatmul.mubr.bf16.vlgmr.msra.gmra.mrb[84].mxu0 %v19442_v42  ;;  %v15127_v28 = vcombine.high %v6824_v55, %v6832_v39 }
0x1d77   :  { %10213 = vmatmul.mubr.bf16.vlgmr.msra.gmra.mrb[84].mxu1 %v19442_v42  ;;  %10224 = vmatpush1.bf16.msra.mxu0 %v15028_v16  ;;  %v15125_v16 = vcombine.high %v6823_v53, %v6831_v31 }
0x1d78   :  { %10255 = vmatprep.mubr.bf16.mxu0 %v19438_v17  ;;  %10310 = vmatpush1.bf16.msra.mxu1 %v15030_v0  ;;  %v6847_v0 = vld [vmem:[#allocation17 + $0x3e0] sm:$0xff] }
0x1d79   :  { %10341 = vmatprep.mubr.bf16.mxu1 %v19438_v17  ;;  %10225 = vmatprep.subr.bf16.mxu0 %v15045_v21  ;;  %v6840_v21 = vld [vmem:[#allocation17 + $0x3a8] sm:$0xff]  ;;  %v15141_v23 = vcombine.high %v6839_v56, %v6847_v0  ;;  %v15140_v9 = vcombine.low %v6839_v56, %v6847_v0 }
0x1d7a   :  { %10311 = vmatprep.subr.bf16.mxu1 %v15047_v15  ;;  %v15126_v15 = vcombine.low %v6824_v55, %v6832_v39  ;;  %v15143_v20 = vcombine.high %v6840_v21, %v6848_v10  ;;  %v15142_v51 = vcombine.low %v6840_v21, %v6848_v10 }
0x1d7b   :  { %10226 = vmatpush1.bf16.msra.mxu0 %v15044_v44  ;;  %v6855_v44 = vld [vmem:[#allocation17 + $0x420] sm:$0xff] }
0x1d7c   :  { %10312 = vmatpush1.bf16.msra.mxu1 %v15046_v33  ;;  %10227 = vmatprep.subr.bf16.mxu0 %v15061_v27  ;;  %v6863_v33 = vld [vmem:[#allocation17 + $0x460] sm:$0xff]  ;;  %v6856_v27 = vld [vmem:[#allocation17 + $0x428] sm:$0xff] }
0x1d7d   :  { %10313 = vmatprep.subr.bf16.mxu1 %v15063_v41  ;;  %v6864_v41 = vld [vmem:[#allocation17 + $0x468] sm:$0xff]  ;;  %v15157_v19 = vcombine.high %v6855_v44, %v6863_v33  ;;  %v15156_v50 = vcombine.low %v6855_v44, %v6863_v33 }
0x1d7e   :  { %v15159_v48 = vcombine.high %v6856_v27, %v6864_v41  ;;  %v15158_v61 = vcombine.low %v6856_v27, %v6864_v41 }
0x1d7f   :  { %10228 = vmatpush1.bf16.msra.mxu0 %v15060_v59  ;;  %v6871_v59 = vld [vmem:[#allocation17 + $0x4a0] sm:$0xff] }
0x1d80   :  { %10314 = vmatpush1.bf16.msra.mxu1 %v15062_v43  ;;  %10229 = vmatprep.subr.bf16.mxu0 %v15077_v49  ;;  %v6879_v43 = vld [vmem:[#allocation17 + $0x4e0] sm:$0xff]  ;;  %v6872_v49 = vld [vmem:[#allocation17 + $0x4a8] sm:$0xff] }
0x1d81   :  { %10315 = vmatprep.subr.bf16.mxu1 %v15079_v45  ;;  %v6880_v45 = vld [vmem:[#allocation17 + $0x4e8] sm:$0xff]  ;;  %v15173_v63 = vcombine.high %v6871_v59, %v6879_v43  ;;  %v15172_v22 = vcombine.low %v6871_v59, %v6879_v43 }
0x1d82   :  { %v15175_v4 = vcombine.high %v6872_v49, %v6880_v45  ;;  %v15174_v46 = vcombine.low %v6872_v49, %v6880_v45 }
0x1d83   :  { %10230 = vmatpush1.bf16.msra.mxu0 %v15076_v24  ;;  %v6887_v24 = vld [vmem:[#allocation17 + $0x520] sm:$0xff] }
0x1d84   :  { %10316 = vmatpush1.bf16.msra.mxu1 %v15078_v6  ;;  %10231 = vmatprep.subr.bf16.mxu0 %v15093_v38  ;;  %v6895_v6 = vld [vmem:[#allocation17 + $0x560] sm:$0xff]  ;;  %v6888_v38 = vld [vmem:[#allocation17 + $0x528] sm:$0xff] }
0x1d85   :  { %10317 = vmatprep.subr.bf16.mxu1 %v15095_v13  ;;  %v6896_v13 = vld [vmem:[#allocation17 + $0x568] sm:$0xff]  ;;  %v15189_v1 = vcombine.high %v6887_v24, %v6895_v6  ;;  %v15188_v53 = vcombine.low %v6887_v24, %v6895_v6 }
0x1d86   :  { %v15191_v14 = vcombine.high %v6888_v38, %v6896_v13  ;;  %v15190_v31 = vcombine.low %v6888_v38, %v6896_v13 }
0x1d87   :  { %10232 = vmatpush1.bf16.msra.mxu0 %v15092_v54  ;;  %v6903_v54 = vld [vmem:[#allocation17 + $0x5a0] sm:$0xff] }
0x1d88   :  { %10318 = vmatpush1.bf16.msra.mxu1 %v15094_v8  ;;  %10233 = vmatprep.subr.bf16.mxu0 %v15109_v34  ;;  %v6911_v8 = vld [vmem:[#allocation17 + $0x5e0] sm:$0xff]  ;;  %v6904_v34 = vld [vmem:[#allocation17 + $0x5a8] sm:$0xff] }
0x1d89   :  { %10319 = vmatprep.subr.bf16.mxu1 %v15111_v36  ;;  %v6912_v36 = vld [vmem:[#allocation17 + $0x5e8] sm:$0xff]  ;;  %v15205_v55 = vcombine.high %v6903_v54, %v6911_v8  ;;  %v15204_v56 = vcombine.low %v6903_v54, %v6911_v8 }
0x1d8a   :  { %v15207_v39 = vcombine.high %v6904_v34, %v6912_v36  ;;  %v15206_v0 = vcombine.low %v6904_v34, %v6912_v36 }
0x1d8b   :  { %10234 = vmatpush1.bf16.msra.mxu0 %v15108_v11  ;;  %v6919_v11 = vld [vmem:[#allocation17 + $0x620] sm:$0xff] }
0x1d8c   :  { %10320 = vmatpush1.bf16.msra.mxu1 %v15110_v12  ;;  %10235 = vmatprep.subr.bf16.mxu0 %v15125_v16  ;;  %v6927_v12 = vld [vmem:[#allocation17 + $0x660] sm:$0xff]  ;;  %v6920_v16 = vld [vmem:[#allocation17 + $0x628] sm:$0xff] }
0x1d8d   :  { %10321 = vmatprep.subr.bf16.mxu1 %v15127_v28  ;;  %v6928_v28 = vld [vmem:[#allocation17 + $0x668] sm:$0xff]  ;;  %v15221_v21 = vcombine.high %v6919_v11, %v6927_v12  ;;  %v15220_v44 = vcombine.low %v6919_v11, %v6927_v12 }
0x1d8e   :  { %v15223_v10 = vcombine.high %v6920_v16, %v6928_v28  ;;  %v15222_v33 = vcombine.low %v6920_v16, %v6928_v28  ;;  %v7008_v11 = vld [vmem:[#allocation17 + $0x8e8] sm:$0xff]  ;;  %v7015_v28 = vld [vmem:[#allocation17 + $0x920] sm:$0xff] }
0x1d8f   :  { %10236 = vmatpush1.bf16.msra.mxu0 %v15124_v2  ;;  %v6935_v2 = vld [vmem:[#allocation17 + $0x6a0] sm:$0xff] }
0x1d90   :  { %10322 = vmatpush1.bf16.msra.mxu1 %v15126_v15  ;;  %10237 = vmatprep.subr.bf16.mxu0 %v15141_v23  ;;  %v6943_v15 = vld [vmem:[#allocation17 + $0x6e0] sm:$0xff]  ;;  %v6936_v23 = vld [vmem:[#allocation17 + $0x6a8] sm:$0xff] }
0x1d91   :  { %10323 = vmatprep.subr.bf16.mxu1 %v15143_v20  ;;  %v6944_v20 = vld [vmem:[#allocation17 + $0x6e8] sm:$0xff]  ;;  %v15237_v27 = vcombine.high %v6935_v2, %v6943_v15  ;;  %v15236_v59 = vcombine.low %v6935_v2, %v6943_v15 }
0x1d92   :  { %v15239_v41 = vcombine.high %v6936_v23, %v6944_v20  ;;  %v15238_v43 = vcombine.low %v6936_v23, %v6944_v20 }
0x1d93   :  { %10238 = vmatpush1.bf16.msra.mxu0 %v15140_v9  ;;  %v6951_v9 = vld [vmem:[#allocation17 + $0x720] sm:$0xff] }
0x1d94   :  { %10324 = vmatpush1.bf16.msra.mxu1 %v15142_v51  ;;  %10239 = vmatprep.subr.bf16.mxu0 %v15157_v19  ;;  %v6959_v51 = vld [vmem:[#allocation17 + $0x760] sm:$0xff]  ;;  %v6952_v19 = vld [vmem:[#allocation17 + $0x728] sm:$0xff] }
0x1d95   :  { %10325 = vmatprep.subr.bf16.mxu1 %v15159_v48  ;;  %v6960_v48 = vld [vmem:[#allocation17 + $0x768] sm:$0xff]  ;;  %v15253_v49 = vcombine.high %v6951_v9, %v6959_v51  ;;  %v15252_v24 = vcombine.low %v6951_v9, %v6959_v51 }
0x1d96   :  { %v15255_v45 = vcombine.high %v6952_v19, %v6960_v48  ;;  %v15254_v6 = vcombine.low %v6952_v19, %v6960_v48 }
0x1d97   :  { %10240 = vmatpush1.bf16.msra.mxu0 %v15156_v50  ;;  %v6967_v50 = vld [vmem:[#allocation17 + $0x7a0] sm:$0xff] }
0x1d98   :  { %10326 = vmatpush1.bf16.msra.mxu1 %v15158_v61  ;;  %10241 = vmatprep.subr.bf16.mxu0 %v15173_v63  ;;  %v6975_v61 = vld [vmem:[#allocation17 + $0x7e0] sm:$0xff]  ;;  %v6968_v63 = vld [vmem:[#allocation17 + $0x7a8] sm:$0xff] }
0x1d99   :  { %10327 = vmatprep.subr.bf16.mxu1 %v15175_v4  ;;  %v6976_v4 = vld [vmem:[#allocation17 + $0x7e8] sm:$0xff]  ;;  %v15269_v38 = vcombine.high %v6967_v50, %v6975_v61  ;;  %v15268_v54 = vcombine.low %v6967_v50, %v6975_v61 }
0x1d9a   :  { %v15271_v13 = vcombine.high %v6968_v63, %v6976_v4  ;;  %v15270_v8 = vcombine.low %v6968_v63, %v6976_v4 }
0x1d9b   :  { %10242 = vmatpush1.bf16.msra.mxu0 %v15172_v22  ;;  %v6983_v22 = vld [vmem:[#allocation17 + $0x820] sm:$0xff] }
0x1d9c   :  { %10328 = vmatpush1.bf16.msra.mxu1 %v15174_v46  ;;  %10243 = vmatprep.subr.bf16.mxu0 %v15189_v1  ;;  %v6991_v46 = vld [vmem:[#allocation17 + $0x860] sm:$0xff]  ;;  %v6984_v1 = vld [vmem:[#allocation17 + $0x828] sm:$0xff] }
0x1d9d   :  { %10329 = vmatprep.subr.bf16.mxu1 %v15191_v14  ;;  %v6992_v14 = vld [vmem:[#allocation17 + $0x868] sm:$0xff]  ;;  %v15285_v34 = vcombine.high %v6983_v22, %v6991_v46 }
0x1d9e   :  { %v15287_v36 = vcombine.high %v6984_v1, %v6992_v14  ;;  %v15286_v12 = vcombine.low %v6984_v1, %v6992_v14 }
0x1d9f   :  { %10244 = vmatpush1.bf16.msra.mxu0 %v15188_v53  ;;  %v6999_v53 = vld [vmem:[#allocation17 + $0x8a0] sm:$0xff] }
0x1da0   :  { %10330 = vmatpush1.bf16.msra.mxu1 %v15190_v31  ;;  %10245 = vmatprep.subr.bf16.mxu0 %v15205_v55  ;;  %v7007_v31 = vld [vmem:[#allocation17 + $0x8e0] sm:$0xff]  ;;  %v15284_v55 = vcombine.low %v6983_v22, %v6991_v46 }
0x1da1   :  { %10331 = vmatprep.subr.bf16.mxu1 %v15207_v39  ;;  %v7000_v39 = vld [vmem:[#allocation17 + $0x8a8] sm:$0xff]  ;;  %v15301_v16 = vcombine.high %v6999_v53, %v7007_v31  ;;  %v15300_v2 = vcombine.low %v6999_v53, %v7007_v31  ;;  %v19474_v46 = vld [vmem:[#allocation19] sm:$0xff] }
0x1da2   :  { %v15302_v15 = vcombine.low %v7000_v39, %v7008_v11  ;;  %v7250_v53 = vrot.slane %v19474_v46, %v18840_v57  ;;  %v7080_v31 = vld [vmem:[#allocation17 + $0xb28] sm:$0xff] }
0x1da3   :  { %10246 = vmatpush1.bf16.msra.mxu0 %v15204_v56  ;;  %v7023_v56 = vld [vmem:[#allocation17 + $0x960] sm:$0xff] }
0x1da4   :  { %10332 = vmatpush1.bf16.msra.mxu1 %v15206_v0  ;;  %10247 = vmatprep.subr.bf16.mxu0 %v15221_v21  ;;  %v15303_v0 = vcombine.high %v7000_v39, %v7008_v11  ;;  %v7016_v21 = vld [vmem:[#allocation17 + $0x928] sm:$0xff]  ;;  %v15317_v23 = vcombine.high %v7015_v28, %v7023_v56  ;;  %v15316_v9 = vcombine.low %v7015_v28, %v7023_v56  ;;  %v7095_v56 = vld [vmem:[#allocation17 + $0xba0] sm:$0xff] }
0x1da5   :  { %10333 = vmatprep.subr.bf16.mxu1 %v15223_v10  ;;  %v7024_v10 = vld [vmem:[#allocation17 + $0x968] sm:$0xff]  ;;  %v7246_v39 = vrot.slane %v19474_v46, %v18843_v60  ;;  %v7254_v11 = vrot.slane %v19474_v46, %v18851_v5 }
0x1da6   :  { %v15319_v20 = vcombine.high %v7016_v21, %v7024_v10  ;;  %v15318_v51 = vcombine.low %v7016_v21, %v7024_v10 }
0x1da7   :  { %10248 = vmatpush1.bf16.msra.mxu0 %v15220_v44  ;;  %v7031_v44 = vld [vmem:[#allocation17 + $0x9a0] sm:$0xff] }
0x1da8   :  { %10334 = vmatpush1.bf16.msra.mxu1 %v15222_v33  ;;  %10249 = vmatprep.subr.bf16.mxu0 %v15237_v27  ;;  %v7039_v33 = vld [vmem:[#allocation17 + $0x9e0] sm:$0xff]  ;;  %v7032_v27 = vld [vmem:[#allocation17 + $0x9a8] sm:$0xff] }
0x1da9   :  { %10335 = vmatprep.subr.bf16.mxu1 %v15239_v41  ;;  %v7040_v41 = vld [vmem:[#allocation17 + $0x9e8] sm:$0xff]  ;;  %v15333_v19 = vcombine.high %v7031_v44, %v7039_v33  ;;  %v15332_v50 = vcombine.low %v7031_v44, %v7039_v33 }
0x1daa   :  { %v15335_v48 = vcombine.high %v7032_v27, %v7040_v41  ;;  %v15334_v61 = vcombine.low %v7032_v27, %v7040_v41  ;;  %v7096_v27 = vld [vmem:[#allocation17 + $0xba8] sm:$0xff] }
0x1dab   :  { %10250 = vmatpush1.bf16.msra.mxu0 %v15236_v59  ;;  %v7047_v59 = vld [vmem:[#allocation17 + $0xa20] sm:$0xff]  ;;  %v7104_v41 = vld [vmem:[#allocation17 + $0xbe8] sm:$0xff] }
0x1dac   :  { %10336 = vmatpush1.bf16.msra.mxu1 %v15238_v43  ;;  %10251 = vmatprep.subr.bf16.mxu0 %v15253_v49  ;;  %v7055_v43 = vld [vmem:[#allocation17 + $0xa60] sm:$0xff]  ;;  %v7048_v49 = vld [vmem:[#allocation17 + $0xa28] sm:$0xff] }
0x1dad   :  { %10337 = vmatprep.subr.bf16.mxu1 %v15255_v45  ;;  %v7056_v45 = vld [vmem:[#allocation17 + $0xa68] sm:$0xff]  ;;  %v15349_v63 = vcombine.high %v7047_v59, %v7055_v43  ;;  %v15348_v22 = vcombine.low %v7047_v59, %v7055_v43 }
0x1dae   :  { %v15351_v4 = vcombine.high %v7048_v49, %v7056_v45  ;;  %v15350_v1 = vcombine.low %v7048_v49, %v7056_v45 }
0x1daf   :  { %10252 = vmatpush1.bf16.msra.mxu0 %v15252_v24  ;;  %v7063_v24 = vld [vmem:[#allocation17 + $0xaa0] sm:$0xff] }
0x1db0   :  { %10338 = vmatpush1.bf16.msra.mxu1 %v15254_v6  ;;  %10253 = vmatprep.subr.bf16.mxu0 %v15269_v38  ;;  %v7071_v6 = vld [vmem:[#allocation17 + $0xae0] sm:$0xff]  ;;  %v7064_v38 = vld [vmem:[#allocation17 + $0xaa8] sm:$0xff] }
0x1db1   :  { %10339 = vmatprep.subr.bf16.mxu1 %v15271_v13  ;;  %v7072_v13 = vld [vmem:[#allocation17 + $0xae8] sm:$0xff]  ;;  %v15365_v14 = vcombine.high %v7063_v24, %v7071_v6 }
0x1db3   :  { %10254 = vmatpush1.bf16.msra.mxu0 %v15268_v54  ;;  %v15367_v54 = vcombine.high %v7064_v38, %v7072_v13 }
0x1db4   :  { %10340 = vmatpush1.bf16.msra.mxu1 %v15270_v8  ;;  %10266 = vmatprep.subr.bf16.mxu0 %v15285_v34  ;;  %v7079_v8 = vld [vmem:[#allocation17 + $0xb20] sm:$0xff] }
0x1db5   :  { %10352 = vmatprep.subr.bf16.mxu1 %v15287_v36  ;;  %v7087_v34 = vld [vmem:[#allocation17 + $0xb60] sm:$0xff]  ;;  %v7242_v36 = vrot.slane %v19474_v46, %v18846_v62 }
0x1db6   :  { %10256 = vmatmul.mubr.bf16.vlgmr.msra.gmra.mrb[88].mxu0 %v19440_v26  ;;  %v15381_v28 = vcombine.high %v7079_v8, %v7087_v34  ;;  %v15380_v33 = vcombine.low %v7079_v8, %v7087_v34  ;;  %v7112_v34 = vld [vmem:[#allocation17 + $0xc28] sm:$0xff] }
0x1db7   :  { %10342 = vmatmul.mubr.bf16.vlgmr.msra.gmra.mrb[88].mxu1 %v19440_v26  ;;  %10267 = vmatpush1.bf16.msra.mxu0 %v15284_v55  ;;  %v7088_v55 = vld [vmem:[#allocation17 + $0xb68] sm:$0xff] }
0x1db8   :  { %10298 = vmatprep.mubr.bf16.mxu0 %v19448_v37  ;;  %10353 = vmatpush1.bf16.msra.mxu1 %v15286_v12  ;;  %v15364_v12 = vcombine.low %v7063_v24, %v7071_v6  ;;  %v15382_v59 = vcombine.low %v7080_v31, %v7088_v55  ;;  %v15398_v6 = vcombine.low %v7096_v27, %v7104_v41 }
0x1db9   :  { %10384 = vmatprep.mubr.bf16.mxu1 %v19448_v37  ;;  %10268 = vmatprep.subr.bf16.mxu0 %v15301_v16  ;;  %v15366_v16 = vcombine.low %v7064_v38, %v7072_v13  ;;  %v15399_v38 = vcombine.high %v7096_v27, %v7104_v41  ;;  %v7111_v13 = vld [vmem:[#allocation17 + $0xc20] sm:$0xff] }
0x1dba   :  { %10354 = vmatprep.subr.bf16.mxu1 %v15303_v0  ;;  %v7103_v0 = vld [vmem:[#allocation17 + $0xbe0] sm:$0xff] }
0x1dbb   :  { %10269 = vmatpush1.bf16.msra.mxu0 %v15300_v2  ;;  %v15383_v2 = vcombine.high %v7080_v31, %v7088_v55  ;;  %v15396_v43 = vcombine.low %v7095_v56, %v7103_v0  ;;  %v7120_v31 = vld [vmem:[#allocation17 + $0xc68] sm:$0xff]  ;;  %v7143_v27 = vld [vmem:[#allocation17 + $0xd20] sm:$0xff] }
0x1dbc   :  { %10355 = vmatpush1.bf16.msra.mxu1 %v15302_v15  ;;  %10270 = vmatprep.subr.bf16.mxu0 %v15317_v23  ;;  %v7151_v41 = vld [vmem:[#allocation17 + $0xd60] sm:$0xff] }
0x1dbd   :  { %10356 = vmatprep.subr.bf16.mxu1 %v15319_v20 }
0x1dbf   :  { %10271 = vmatpush1.bf16.msra.mxu0 %v15316_v9 }
0x1dc0   :  { %10357 = vmatpush1.bf16.msra.mxu1 %v15318_v51  ;;  %10272 = vmatprep.subr.bf16.mxu0 %v15333_v19 }
0x1dc1   :  { %10358 = vmatprep.subr.bf16.mxu1 %v15335_v48 }
0x1dc3   :  { %10273 = vmatpush1.bf16.msra.mxu0 %v15332_v50 }
0x1dc4   :  { %10359 = vmatpush1.bf16.msra.mxu1 %v15334_v61  ;;  %10274 = vmatprep.subr.bf16.mxu0 %v15349_v63  ;;  %v15397_v63 = vcombine.high %v7095_v56, %v7103_v0  ;;  %v15415_v0 = vcombine.high %v7112_v34, %v7120_v31 }
0x1dc5   :  { %10360 = vmatprep.subr.bf16.mxu1 %v15351_v4 }
0x1dc7   :  { %10275 = vmatpush1.bf16.msra.mxu0 %v15348_v22  ;;  %v7119_v22 = vld [vmem:[#allocation17 + $0xc60] sm:$0xff] }
0x1dc8   :  { %10361 = vmatpush1.bf16.msra.mxu1 %v15350_v1  ;;  %10276 = vmatprep.subr.bf16.mxu0 %v15365_v14 }
0x1dc9   :  { %v9956_v21 = vpop.f32.mrb[80].mxu0  ;;  %v10042_v10 = vpop.f32.mrb[80].mxu1  ;;  %10362 = vmatprep.subr.bf16.mxu1 %v15367_v54 }
0x1dca   :  { %v16348_v15 = vadd.f32 %v9956_v21, %v7242_v36  ;;  %v16352_v23 = vadd.f32 %v10042_v10, %v7250_v53  ;;  %v9958_v20 = vpop.f32.mrb[81].mxu0  ;;  %v10044_v44 = vpop.f32.mrb[81].mxu1  ;;  %v7127_v21 = vld [vmem:[#allocation17 + $0xca0] sm:$0xff] }
0x1dcb   :  { %v16349_v9 = vadd.f32 %v9958_v20, %v7246_v39  ;;  %v16353_v51 = vadd.f32 %v10044_v44, %v7254_v11  ;;  %v9960_v19 = vpop.f32.mrb[82].mxu0  ;;  %v10046_v48 = vpop.f32.mrb[82].mxu1  ;;  %10277 = vmatpush1.bf16.msra.mxu0 %v15364_v12  ;;  %v7135_v10 = vld [vmem:[#allocation17 + $0xce0] sm:$0xff]  ;;  %v15414_v20 = vcombine.low %v7112_v34, %v7120_v31 }
0x1dcc   :  { %v16350_v49 = vadd.f32 %v9960_v19, %v7242_v36  ;;  %v16354_v45 = vadd.f32 %v10046_v48, %v7250_v53  ;;  %10363 = vmatpush1.bf16.msra.mxu1 %v15366_v16  ;;  %v9962_v50 = vpop.f32.mrb[83].mxu0  ;;  %v10048_v61 = vpop.f32.mrb[83].mxu1  ;;  %10278 = vmatprep.subr.bf16.mxu0 %v15381_v28  ;;  %v10567_v1 = vmax.f32 %v16348_v15, 0.0  ;;  %v10569_v14 = vmax.f32 %v16352_v23, 0.0  ;;  %v7136_v15 = vld [vmem:[#allocation17 + $0xce8] sm:$0xff]  ;;  %v7191_v31 = vld [vmem:[#allocation17 + $0xea0] sm:$0xff] }
0x1dcd   :  { %v16351_v4 = vadd.f32 %v9962_v50, %v7246_v39  ;;  %v16355_v24 = vadd.f32 %v10048_v61, %v7254_v11  ;;  %10364 = vmatprep.subr.bf16.mxu1 %v15383_v2  ;;  %v10568_v36 = vmax.f32 %v16349_v9, 0.0  ;;  %v10570_v53 = vmax.f32 %v16353_v51, 0.0  ;;  %v7128_v2 = vld [vmem:[#allocation17 + $0xca8] sm:$0xff] }
0x1dce   :  { %v10583_v54 = vmax.f32 %v16350_v49, 0.0  ;;  %v10585_v8 = vmax.f32 %v16354_v45, 0.0  ;;  %v15413_v11 = vcombine.high %v7111_v13, %v7119_v22  ;;  %v15412_v23 = vcombine.low %v7111_v13, %v7119_v22  ;;  %v7144_v9 = vld [vmem:[#allocation17 + $0xd28] sm:$0xff]  ;;  %v7167_v45 = vld [vmem:[#allocation17 + $0xde0] sm:$0xff] }
0x1dcf   :  { %v10584_v55 = vmax.f32 %v16351_v4, 0.0  ;;  %v10586_v12 = vmax.f32 %v16355_v24, 0.0  ;;  %10279 = vmatpush1.bf16.msra.mxu0 %v15380_v33  ;;  %v15429_v44 = vcombine.high %v7127_v21, %v7135_v10  ;;  %v15431_v33 = vcombine.high %v7128_v2, %v7136_v15  ;;  %v7152_v51 = vld [vmem:[#allocation17 + $0xd68] sm:$0xff]  ;;  %v7183_v13 = vld [vmem:[#allocation17 + $0xe60] sm:$0xff] }
0x1dd0   :  { %v19484_v16 = vpack.c.bf16 %v10583_v54, %v10567_v1  ;;  %v19486_v39 = vpack.c.bf16 %v10585_v8, %v10569_v14  ;;  %10365 = vmatpush1.bf16.msra.mxu1 %v15382_v59  ;;  %10280 = vmatprep.subr.bf16.mxu0 %v15397_v63  ;;  %v15428_v19 = vcombine.low %v7127_v21, %v7135_v10  ;;  %v7160_v50 = vld [vmem:[#allocation17 + $0xda8] sm:$0xff]  ;;  %v7207_v10 = vld [vmem:[#allocation17 + $0xf20] sm:$0xff] }
0x1dd1   :  { %v19488_v28 = vpack.c.bf16 %v10584_v55, %v10568_v36  ;;  %v19490_v56 = vpack.c.bf16 %v10586_v12, %v10570_v53  ;;  %10366 = vmatprep.subr.bf16.mxu1 %v15399_v38  ;;  %v15430_v48 = vcombine.low %v7128_v2, %v7136_v15  ;;  %v15445_v59 = vcombine.high %v7143_v27, %v7151_v41  ;;  %v7168_v61 = vld [vmem:[#allocation17 + $0xde8] sm:$0xff]  ;;  %v7175_v38 = vld [vmem:[#allocation17 + $0xe20] sm:$0xff] }
0x1dd2   :  { %v15447_v49 = vcombine.high %v7144_v9, %v7152_v51  ;;  %v15444_v63 = vcombine.low %v7143_v27, %v7151_v41  ;;  %v15446_v4 = vcombine.low %v7144_v9, %v7152_v51  ;;  %v7176_v22 = vld [vmem:[#allocation17 + $0xe28] sm:$0xff]  ;;  %v15462_v54 = vcombine.low %v7160_v50, %v7168_v61  ;;  %v7199_v36 = vld [vmem:[#allocation17 + $0xee0] sm:$0xff] }
0x1dd3   :  { %10281 = vmatpush1.bf16.msra.mxu0 %v15396_v43  ;;  %v7159_v43 = vld [vmem:[#allocation17 + $0xda0] sm:$0xff]  ;;  %v7184_v1 = vld [vmem:[#allocation17 + $0xe68] sm:$0xff]  ;;  %v15477_v8 = vcombine.high %v7175_v38, %v7183_v13  ;;  %v15476_v12 = vcombine.low %v7175_v38, %v7183_v13  ;;  %v6745_v13 = vld [vmem:[#allocation17 + $0xb0] sm:$0xff] }
0x1dd4   :  { %10367 = vmatpush1.bf16.msra.mxu1 %v15398_v6  ;;  %10282 = vmatprep.subr.bf16.mxu0 %v15413_v11  ;;  %v15461_v24 = vcombine.high %v7159_v43, %v7167_v45  ;;  %v15463_v6 = vcombine.high %v7160_v50, %v7168_v61  ;;  %v15460_v14 = vcombine.low %v7159_v43, %v7167_v45  ;;  %v7192_v53 = vld [vmem:[#allocation17 + $0xea8] sm:$0xff]  ;;  %v7215_v2 = vld [vmem:[#allocation17 + $0xf60] sm:$0xff]  ;;  %v6729_v45 = vld [vmem:[#allocation17 + $0x30] sm:$0xff] }
0x1dd5   :  { %10368 = vmatprep.subr.bf16.mxu1 %v15415_v0  ;;  %v15479_v34 = vcombine.high %v7176_v22, %v7184_v1  ;;  %v7200_v55 = vld [vmem:[#allocation17 + $0xee8] sm:$0xff]  ;;  %v15478_v11 = vcombine.low %v7176_v22, %v7184_v1  ;;  %v15493_v0 = vcombine.high %v7191_v31, %v7199_v36  ;;  %v7223_v41 = vld [vmem:[#allocation17 + $0xfa0] sm:$0xff]  ;;  %v6737_v50 = vld [vmem:[#allocation17 + $0x70] sm:$0xff] }
0x1dd6   :  { %v15495_v21 = vcombine.high %v7192_v53, %v7200_v55  ;;  %v7208_v15 = vld [vmem:[#allocation17 + $0xf28] sm:$0xff]  ;;  %v7231_v9 = vld [vmem:[#allocation17 + $0xfe0] sm:$0xff]  ;;  %v6730_v61 = vld [vmem:[#allocation17 + $0x38] sm:$0xff]  ;;  %v15032_v1 = vcombine.low %v6729_v45, %v6737_v50 }
0x1dd7   :  { %10283 = vmatpush1.bf16.msra.mxu0 %v15412_v23  ;;  %v7216_v23 = vld [vmem:[#allocation17 + $0xf68] sm:$0xff]  ;;  %v6753_v22 = vld [vmem:[#allocation17 + $0xf0] sm:$0xff] }
0x1dd8   :  { %10369 = vmatpush1.bf16.msra.mxu1 %v15414_v20  ;;  %10284 = vmatprep.subr.bf16.mxu0 %v15429_v44  ;;  %v15492_v20 = vcombine.low %v7191_v31, %v7199_v36  ;;  %v15494_v44 = vcombine.low %v7192_v53, %v7200_v55  ;;  %v15511_v27 = vcombine.high %v7208_v15, %v7216_v23  ;;  %v7224_v51 = vld [vmem:[#allocation17 + $0xfa8] sm:$0xff]  ;;  %v6761_v31 = vld [vmem:[#allocation17 + $0x130] sm:$0xff]  ;;  %v6762_v55 = vld [vmem:[#allocation17 + $0x138] sm:$0xff] }
0x1dd9   :  { %10370 = vmatprep.subr.bf16.mxu1 %v15431_v33  ;;  %v15509_v33 = vcombine.high %v7207_v10, %v7215_v2  ;;  %v6769_v36 = vld [vmem:[#allocation17 + $0x170] sm:$0xff] }
0x1ddb   :  { %10285 = vmatpush1.bf16.msra.mxu0 %v15428_v19  ;;  %v7232_v19 = vld [vmem:[#allocation17 + $0xfe8] sm:$0xff] }
0x1ddc   :  { %10371 = vmatpush1.bf16.msra.mxu1 %v15430_v48  ;;  %10286 = vmatprep.subr.bf16.mxu0 %v15445_v59  ;;  %v15508_v48 = vcombine.low %v7207_v10, %v7215_v2  ;;  %v15510_v59 = vcombine.low %v7208_v15, %v7216_v23  ;;  %v15527_v43 = vcombine.high %v7224_v51, %v7232_v19  ;;  %v6777_v2 = vld [vmem:[#allocation17 + $0x1b0] sm:$0xff]  ;;  %v6778_v23 = vld [vmem:[#allocation17 + $0x1b8] sm:$0xff] }
0x1ddd   :  { %10372 = vmatprep.subr.bf16.mxu1 %v15447_v49  ;;  %v15525_v49 = vcombine.high %v7223_v41, %v7231_v9  ;;  %v6785_v15 = vld [vmem:[#allocation17 + $0x1f0] sm:$0xff] }
0x1ddf   :  { %10287 = vmatpush1.bf16.msra.mxu0 %v15444_v63  ;;  %v6738_v63 = vld [vmem:[#allocation17 + $0x78] sm:$0xff] }
0x1de0   :  { %10373 = vmatpush1.bf16.msra.mxu1 %v15446_v4  ;;  %10288 = vmatprep.subr.bf16.mxu0 %v15461_v24  ;;  %v15524_v4 = vcombine.low %v7223_v41, %v7231_v9  ;;  %v15526_v24 = vcombine.low %v7224_v51, %v7232_v19  ;;  %v15035_v38 = vcombine.high %v6730_v61, %v6738_v63  ;;  %v6793_v9 = vld [vmem:[#allocation17 + $0x230] sm:$0xff]  ;;  %v6794_v19 = vld [vmem:[#allocation17 + $0x238] sm:$0xff] }
0x1de1   :  { %10374 = vmatprep.subr.bf16.mxu1 %v15463_v6  ;;  %v15033_v6 = vcombine.high %v6729_v45, %v6737_v50  ;;  %v6801_v51 = vld [vmem:[#allocation17 + $0x270] sm:$0xff] }
0x1de2   :  { %v6809_v45 = vld [vmem:[#allocation17 + $0x2b0] sm:$0xff] }
0x1de3   :  { %10289 = vmatpush1.bf16.msra.mxu0 %v15460_v14  ;;  %v6746_v14 = vld [vmem:[#allocation17 + $0xb8] sm:$0xff]  ;;  %v6817_v50 = vld [vmem:[#allocation17 + $0x2f0] sm:$0xff] }
0x1de4   :  { %10375 = vmatpush1.bf16.msra.mxu1 %v15462_v54  ;;  %10290 = vmatprep.subr.bf16.mxu0 %v15477_v8  ;;  %v6754_v54 = vld [vmem:[#allocation17 + $0xf8] sm:$0xff]  ;;  %v15034_v8 = vcombine.low %v6730_v61, %v6738_v63 }
0x1de5   :  { %10376 = vmatprep.subr.bf16.mxu1 %v15479_v34  ;;  %v15049_v34 = vcombine.high %v6745_v13, %v6753_v22  ;;  %v15051_v53 = vcombine.high %v6746_v14, %v6754_v54  ;;  %v6810_v61 = vld [vmem:[#allocation17 + $0x2b8] sm:$0xff] }
0x1de6   :  { %v6818_v63 = vld [vmem:[#allocation17 + $0x2f8] sm:$0xff] }
0x1de7   :  { %10291 = vmatpush1.bf16.msra.mxu0 %v15476_v12  ;;  %v6770_v12 = vld [vmem:[#allocation17 + $0x178] sm:$0xff] }
0x1de8   :  { %10377 = vmatpush1.bf16.msra.mxu1 %v15478_v11  ;;  %10292 = vmatprep.subr.bf16.mxu0 %v15493_v0  ;;  %v15048_v11 = vcombine.low %v6745_v13, %v6753_v22  ;;  %v15050_v0 = vcombine.low %v6746_v14, %v6754_v54  ;;  %v15067_v10 = vcombine.high %v6762_v55, %v6770_v12  ;;  %v6825_v13 = vld [vmem:[#allocation17 + $0x330] sm:$0xff]  ;;  %v6834_v14 = vld [vmem:[#allocation17 + $0x378] sm:$0xff] }
0x1de9   :  { %10378 = vmatprep.subr.bf16.mxu1 %v15495_v21  ;;  %v15065_v21 = vcombine.high %v6761_v31, %v6769_v36  ;;  %v6833_v22 = vld [vmem:[#allocation17 + $0x370] sm:$0xff]  ;;  %v15112_v54 = vcombine.low %v6809_v45, %v6817_v50 }
0x1deb   :  { %10293 = vmatpush1.bf16.msra.mxu0 %v15492_v20  ;;  %v6786_v20 = vld [vmem:[#allocation17 + $0x1f8] sm:$0xff] }
0x1dec   :  { %10379 = vmatpush1.bf16.msra.mxu1 %v15494_v44  ;;  %10294 = vmatprep.subr.bf16.mxu0 %v15509_v33  ;;  %v15064_v44 = vcombine.low %v6761_v31, %v6769_v36  ;;  %v15066_v33 = vcombine.low %v6762_v55, %v6770_v12  ;;  %v15083_v41 = vcombine.high %v6778_v23, %v6786_v20  ;;  %v6841_v36 = vld [vmem:[#allocation17 + $0x3b0] sm:$0xff]  ;;  %v6842_v55 = vld [vmem:[#allocation17 + $0x3b8] sm:$0xff] }
0x1ded   :  { %10380 = vmatprep.subr.bf16.mxu1 %v15511_v27  ;;  %v15081_v27 = vcombine.high %v6777_v2, %v6785_v15  ;;  %v6850_v12 = vld [vmem:[#allocation17 + $0x3f8] sm:$0xff] }
0x1def   :  { %10295 = vmatpush1.bf16.msra.mxu0 %v15508_v48  ;;  %v6802_v48 = vld [vmem:[#allocation17 + $0x278] sm:$0xff] }
0x1df0   :  { %10381 = vmatpush1.bf16.msra.mxu1 %v15510_v59  ;;  %10296 = vmatprep.subr.bf16.mxu0 %v15525_v49  ;;  %v15082_v59 = vcombine.low %v6778_v23, %v6786_v20  ;;  %v15097_v49 = vcombine.high %v6793_v9, %v6801_v51  ;;  %v6858_v23 = vld [vmem:[#allocation17 + $0x438] sm:$0xff] }
0x1df1   :  { %10382 = vmatprep.subr.bf16.mxu1 %v15527_v43  ;;  %v15099_v43 = vcombine.high %v6794_v19, %v6802_v48  ;;  %v6866_v20 = vld [vmem:[#allocation17 + $0x478] sm:$0xff] }
0x1df3   :  { %10297 = vmatpush1.bf16.msra.mxu0 %v15524_v4  ;;  %v15096_v4 = vcombine.low %v6793_v9, %v6801_v51  ;;  %v6873_v9 = vld [vmem:[#allocation17 + $0x4b0] sm:$0xff] }
0x1df4   :  { %10383 = vmatpush1.bf16.msra.mxu1 %v15526_v24  ;;  %10395 = vmatprep.subr.bf16.mxu0 %v15033_v6  ;;  %v15098_v24 = vcombine.low %v6794_v19, %v6802_v48  ;;  %v15113_v6 = vcombine.high %v6809_v45, %v6817_v50  ;;  %v6881_v51 = vld [vmem:[#allocation17 + $0x4f0] sm:$0xff]  ;;  %v6874_v19 = vld [vmem:[#allocation17 + $0x4b8] sm:$0xff] }
0x1df5   :  { %10481 = vmatprep.subr.bf16.mxu1 %v15035_v38  ;;  %v15115_v38 = vcombine.high %v6810_v61, %v6818_v63  ;;  %v6882_v48 = vld [vmem:[#allocation17 + $0x4f8] sm:$0xff]  ;;  %v6889_v45 = vld [vmem:[#allocation17 + $0x530] sm:$0xff] }
0x1df6   :  { %10299 = vmatmul.mubr.bf16.vlgmr.msra.gmra.mrb[88].mxu0 %v19442_v42  ;;  %v6897_v50 = vld [vmem:[#allocation17 + $0x570] sm:$0xff] }
0x1df7   :  { %10385 = vmatmul.mubr.bf16.vlgmr.msra.gmra.mrb[88].mxu1 %v19442_v42  ;;  %10396 = vmatpush1.bf16.msra.mxu0 %v15032_v1  ;;  %v6826_v1 = vld [vmem:[#allocation17 + $0x338] sm:$0xff] }
0x1df8   :  { %10427 = vmatprep.mubr.bf16.mxu0 %v19438_v17  ;;  %10482 = vmatpush1.bf16.msra.mxu1 %v15034_v8  ;;  %v15114_v8 = vcombine.low %v6810_v61, %v6818_v63  ;;  %v15131_v31 = vcombine.high %v6826_v1, %v6834_v14  ;;  %v6890_v61 = vld [vmem:[#allocation17 + $0x538] sm:$0xff] }
0x1df9   :  { %10513 = vmatprep.mubr.bf16.mxu1 %v19438_v17  ;;  %10397 = vmatprep.subr.bf16.mxu0 %v15049_v34  ;;  %v15080_v17 = vcombine.low %v6777_v2, %v6785_v15  ;;  %v15129_v34 = vcombine.high %v6825_v13, %v6833_v22  ;;  %v6857_v2 = vld [vmem:[#allocation17 + $0x430] sm:$0xff]  ;;  %v6898_v63 = vld [vmem:[#allocation17 + $0x578] sm:$0xff] }
0x1dfa   :  { %10483 = vmatprep.subr.bf16.mxu1 %v15051_v53  ;;  %v6849_v53 = vld [vmem:[#allocation17 + $0x3f0] sm:$0xff] }
0x1dfb   :  { %10398 = vmatpush1.bf16.msra.mxu0 %v15048_v11  ;;  %v15128_v11 = vcombine.low %v6825_v13, %v6833_v22  ;;  %v6865_v15 = vld [vmem:[#allocation17 + $0x470] sm:$0xff] }
0x1dfc   :  { %10484 = vmatpush1.bf16.msra.mxu1 %v15050_v0  ;;  %10399 = vmatprep.subr.bf16.mxu0 %v15065_v21  ;;  %v15130_v0 = vcombine.low %v6826_v1, %v6834_v14  ;;  %v15145_v21 = vcombine.high %v6841_v36, %v6849_v53  ;;  %v6905_v13 = vld [vmem:[#allocation17 + $0x5b0] sm:$0xff]  ;;  %v6906_v1 = vld [vmem:[#allocation17 + $0x5b8] sm:$0xff] }
0x1dfd   :  { %10485 = vmatprep.subr.bf16.mxu1 %v15067_v10  ;;  %v15147_v10 = vcombine.high %v6842_v55, %v6850_v12  ;;  %v6913_v22 = vld [vmem:[#allocation17 + $0x5f0] sm:$0xff]  ;;  %v6914_v14 = vld [vmem:[#allocation17 + $0x5f8] sm:$0xff] }
0x1dff   :  { %10400 = vmatpush1.bf16.msra.mxu0 %v15064_v44  ;;  %v15144_v44 = vcombine.low %v6841_v36, %v6849_v53  ;;  %v6921_v36 = vld [vmem:[#allocation17 + $0x630] sm:$0xff] }
0x1e00   :  { %10486 = vmatpush1.bf16.msra.mxu1 %v15066_v33  ;;  %10401 = vmatprep.subr.bf16.mxu0 %v15081_v27  ;;  %v15146_v33 = vcombine.low %v6842_v55, %v6850_v12  ;;  %v15161_v27 = vcombine.high %v6857_v2, %v6865_v15  ;;  %v6929_v53 = vld [vmem:[#allocation17 + $0x670] sm:$0xff]  ;;  %v6922_v55 = vld [vmem:[#allocation17 + $0x638] sm:$0xff] }
0x1e01   :  { %10487 = vmatprep.subr.bf16.mxu1 %v15083_v41  ;;  %v15163_v41 = vcombine.high %v6858_v23, %v6866_v20  ;;  %v6930_v12 = vld [vmem:[#allocation17 + $0x678] sm:$0xff] }
0x1e03   :  { %10402 = vmatpush1.bf16.msra.mxu0 %v15080_v17  ;;  %v15160_v17 = vcombine.low %v6857_v2, %v6865_v15  ;;  %v6937_v2 = vld [vmem:[#allocation17 + $0x6b0] sm:$0xff] }
0x1e04   :  { %10488 = vmatpush1.bf16.msra.mxu1 %v15082_v59  ;;  %10403 = vmatprep.subr.bf16.mxu0 %v15097_v49  ;;  %v15162_v59 = vcombine.low %v6858_v23, %v6866_v20  ;;  %v15177_v49 = vcombine.high %v6873_v9, %v6881_v51  ;;  %v6945_v15 = vld [vmem:[#allocation17 + $0x6f0] sm:$0xff]  ;;  %v6938_v23 = vld [vmem:[#allocation17 + $0x6b8] sm:$0xff] }
0x1e05   :  { %10489 = vmatprep.subr.bf16.mxu1 %v15099_v43  ;;  %v15179_v43 = vcombine.high %v6874_v19, %v6882_v48  ;;  %v6946_v20 = vld [vmem:[#allocation17 + $0x6f8] sm:$0xff] }
0x1e07   :  { %10404 = vmatpush1.bf16.msra.mxu0 %v15096_v4  ;;  %v15176_v4 = vcombine.low %v6873_v9, %v6881_v51  ;;  %v6953_v9 = vld [vmem:[#allocation17 + $0x730] sm:$0xff] }
0x1e08   :  { %10490 = vmatpush1.bf16.msra.mxu1 %v15098_v24  ;;  %10405 = vmatprep.subr.bf16.mxu0 %v15113_v6  ;;  %v15178_v24 = vcombine.low %v6874_v19, %v6882_v48  ;;  %v15193_v6 = vcombine.high %v6889_v45, %v6897_v50  ;;  %v6961_v51 = vld [vmem:[#allocation17 + $0x770] sm:$0xff]  ;;  %v6954_v19 = vld [vmem:[#allocation17 + $0x738] sm:$0xff] }
0x1e09   :  { %10491 = vmatprep.subr.bf16.mxu1 %v15115_v38  ;;  %v15195_v38 = vcombine.high %v6890_v61, %v6898_v63  ;;  %v6962_v48 = vld [vmem:[#allocation17 + $0x778] sm:$0xff] }
0x1e0b   :  { %10406 = vmatpush1.bf16.msra.mxu0 %v15112_v54  ;;  %v15192_v54 = vcombine.low %v6889_v45, %v6897_v50  ;;  %v6969_v45 = vld [vmem:[#allocation17 + $0x7b0] sm:$0xff] }
0x1e0c   :  { %10492 = vmatpush1.bf16.msra.mxu1 %v15114_v8  ;;  %10407 = vmatprep.subr.bf16.mxu0 %v15129_v34  ;;  %v15194_v8 = vcombine.low %v6890_v61, %v6898_v63  ;;  %v15209_v34 = vcombine.high %v6905_v13, %v6913_v22  ;;  %v6977_v50 = vld [vmem:[#allocation17 + $0x7f0] sm:$0xff]  ;;  %v6970_v61 = vld [vmem:[#allocation17 + $0x7b8] sm:$0xff] }
0x1e0d   :  { %10493 = vmatprep.subr.bf16.mxu1 %v15131_v31  ;;  %v15211_v31 = vcombine.high %v6906_v1, %v6914_v14  ;;  %v6978_v63 = vld [vmem:[#allocation17 + $0x7f8] sm:$0xff] }
0x1e0f   :  { %10408 = vmatpush1.bf16.msra.mxu0 %v15128_v11  ;;  %v15208_v11 = vcombine.low %v6905_v13, %v6913_v22  ;;  %v6985_v13 = vld [vmem:[#allocation17 + $0x830] sm:$0xff] }
0x1e10   :  { %10494 = vmatpush1.bf16.msra.mxu1 %v15130_v0  ;;  %10409 = vmatprep.subr.bf16.mxu0 %v15145_v21  ;;  %v15210_v0 = vcombine.low %v6906_v1, %v6914_v14  ;;  %v15225_v21 = vcombine.high %v6921_v36, %v6929_v53  ;;  %v6993_v22 = vld [vmem:[#allocation17 + $0x870] sm:$0xff]  ;;  %v6986_v1 = vld [vmem:[#allocation17 + $0x838] sm:$0xff] }
0x1e11   :  { %10495 = vmatprep.subr.bf16.mxu1 %v15147_v10  ;;  %v15227_v10 = vcombine.high %v6922_v55, %v6930_v12  ;;  %v6994_v14 = vld [vmem:[#allocation17 + $0x878] sm:$0xff] }
0x1e13   :  { %10410 = vmatpush1.bf16.msra.mxu0 %v15144_v44  ;;  %v15224_v44 = vcombine.low %v6921_v36, %v6929_v53  ;;  %v7001_v36 = vld [vmem:[#allocation17 + $0x8b0] sm:$0xff] }
0x1e14   :  { %10496 = vmatpush1.bf16.msra.mxu1 %v15146_v33  ;;  %10411 = vmatprep.subr.bf16.mxu0 %v15161_v27  ;;  %v15226_v33 = vcombine.low %v6922_v55, %v6930_v12  ;;  %v15241_v27 = vcombine.high %v6937_v2, %v6945_v15  ;;  %v7009_v53 = vld [vmem:[#allocation17 + $0x8f0] sm:$0xff]  ;;  %v15288_v55 = vcombine.low %v6985_v13, %v6993_v22  ;;  %v7002_v12 = vld [vmem:[#allocation17 + $0x8b8] sm:$0xff] }
0x1e15   :  { %10497 = vmatprep.subr.bf16.mxu1 %v15163_v41  ;;  %v15243_v41 = vcombine.high %v6938_v23, %v6946_v20 }
0x1e17   :  { %10412 = vmatpush1.bf16.msra.mxu0 %v15160_v17  ;;  %v15240_v17 = vcombine.low %v6937_v2, %v6945_v15  ;;  %v7025_v2 = vld [vmem:[#allocation17 + $0x970] sm:$0xff] }
0x1e18   :  { %10498 = vmatpush1.bf16.msra.mxu1 %v15162_v59  ;;  %10413 = vmatprep.subr.bf16.mxu0 %v15177_v49  ;;  %v15242_v59 = vcombine.low %v6938_v23, %v6946_v20  ;;  %v15257_v49 = vcombine.high %v6953_v9, %v6961_v51  ;;  %v7018_v23 = vld [vmem:[#allocation17 + $0x938] sm:$0xff] }
0x1e19   :  { %10499 = vmatprep.subr.bf16.mxu1 %v15179_v43  ;;  %v15259_v43 = vcombine.high %v6954_v19, %v6962_v48  ;;  %v7026_v20 = vld [vmem:[#allocation17 + $0x978] sm:$0xff] }
0x1e1b   :  { %10414 = vmatpush1.bf16.msra.mxu0 %v15176_v4  ;;  %v15256_v4 = vcombine.low %v6953_v9, %v6961_v51  ;;  %v7033_v9 = vld [vmem:[#allocation17 + $0x9b0] sm:$0xff] }
0x1e1c   :  { %10500 = vmatpush1.bf16.msra.mxu1 %v15178_v24  ;;  %10415 = vmatprep.subr.bf16.mxu0 %v15193_v6  ;;  %v15258_v24 = vcombine.low %v6954_v19, %v6962_v48  ;;  %v15273_v6 = vcombine.high %v6969_v45, %v6977_v50  ;;  %v7041_v51 = vld [vmem:[#allocation17 + $0x9f0] sm:$0xff]  ;;  %v7034_v19 = vld [vmem:[#allocation17 + $0x9b8] sm:$0xff] }
0x1e1d   :  { %10501 = vmatprep.subr.bf16.mxu1 %v15195_v38  ;;  %v15275_v38 = vcombine.high %v6970_v61, %v6978_v63  ;;  %v7042_v48 = vld [vmem:[#allocation17 + $0x9f8] sm:$0xff] }
0x1e1f   :  { %10416 = vmatpush1.bf16.msra.mxu0 %v15192_v54  ;;  %v15272_v54 = vcombine.low %v6969_v45, %v6977_v50  ;;  %v7057_v45 = vld [vmem:[#allocation17 + $0xa70] sm:$0xff]  ;;  %v7050_v50 = vld [vmem:[#allocation17 + $0xa38] sm:$0xff] }
0x1e20   :  { %10502 = vmatpush1.bf16.msra.mxu1 %v15194_v8  ;;  %10417 = vmatprep.subr.bf16.mxu0 %v15209_v34  ;;  %v15274_v8 = vcombine.low %v6970_v61, %v6978_v63  ;;  %v15289_v34 = vcombine.high %v6985_v13, %v6993_v22  ;;  %v7058_v61 = vld [vmem:[#allocation17 + $0xa78] sm:$0xff]  ;;  %v15338_v63 = vcombine.low %v7034_v19, %v7042_v48 }
0x1e21   :  { %10503 = vmatprep.subr.bf16.mxu1 %v15211_v31  ;;  %v15291_v31 = vcombine.high %v6986_v1, %v6994_v14  ;;  %v7066_v13 = vld [vmem:[#allocation17 + $0xab8] sm:$0xff] }
0x1e22   :  { %v7074_v22 = vld [vmem:[#allocation17 + $0xaf8] sm:$0xff] }
0x1e23   :  { %10418 = vmatpush1.bf16.msra.mxu0 %v15208_v11  ;;  %v7010_v11 = vld [vmem:[#allocation17 + $0x8f8] sm:$0xff] }
0x1e24   :  { %10504 = vmatpush1.bf16.msra.mxu1 %v15210_v0  ;;  %10419 = vmatprep.subr.bf16.mxu0 %v15225_v21  ;;  %v15290_v0 = vcombine.low %v6986_v1, %v6994_v14  ;;  %v15305_v21 = vcombine.high %v7001_v36, %v7009_v53  ;;  %v15307_v15 = vcombine.high %v7002_v12, %v7010_v11 }
0x1e25   :  { %10505 = vmatprep.subr.bf16.mxu1 %v15227_v10  ;;  %v7017_v10 = vld [vmem:[#allocation17 + $0x930] sm:$0xff]  ;;  %v15354_v14 = vcombine.low %v7050_v50, %v7058_v61 }
0x1e27   :  { %10420 = vmatpush1.bf16.msra.mxu0 %v15224_v44  ;;  %v15304_v44 = vcombine.low %v7001_v36, %v7009_v53  ;;  %v7258_v36 = vrot.slane %v19474_v46, %v18922_v30  ;;  %v7082_v53 = vld [vmem:[#allocation17 + $0xb38] sm:$0xff] }
0x1e28   :  { %10506 = vmatpush1.bf16.msra.mxu1 %v15226_v33  ;;  %10421 = vmatprep.subr.bf16.mxu0 %v15241_v27  ;;  %v15306_v33 = vcombine.low %v7002_v12, %v7010_v11  ;;  %v15321_v27 = vcombine.high %v7017_v10, %v7025_v2  ;;  %v7266_v12 = vrot.slane %v19474_v46, %v19140_v47 }
0x1e29   :  { %10507 = vmatprep.subr.bf16.mxu1 %v15243_v41  ;;  %v15323_v41 = vcombine.high %v7018_v23, %v7026_v20  ;;  %v7262_v11 = vrot.slane %v19474_v46, %v19043_v32 }
0x1e2b   :  { %10422 = vmatpush1.bf16.msra.mxu0 %v15240_v17  ;;  %v15320_v17 = vcombine.low %v7017_v10, %v7025_v2  ;;  %v15370_v10 = vcombine.low %v7066_v13, %v7074_v22 }
0x1e2c   :  { %10508 = vmatpush1.bf16.msra.mxu1 %v15242_v59  ;;  %10423 = vmatprep.subr.bf16.mxu0 %v15257_v49  ;;  %v15337_v59 = vcombine.high %v7033_v9, %v7041_v51  ;;  %v15339_v49 = vcombine.high %v7034_v19, %v7042_v48 }
0x1e2d   :  { %10509 = vmatprep.subr.bf16.mxu1 %v15259_v43  ;;  %v7049_v43 = vld [vmem:[#allocation17 + $0xa30] sm:$0xff] }
0x1e2e   :  { %v15352_v1 = vcombine.low %v7049_v43, %v7057_v45 }
0x1e2f   :  { %10424 = vmatpush1.bf16.msra.mxu0 %v15256_v4  ;;  %v15353_v4 = vcombine.high %v7049_v43, %v7057_v45 }
0x1e30   :  { %10510 = vmatpush1.bf16.msra.mxu1 %v15258_v24  ;;  %10425 = vmatprep.subr.bf16.mxu0 %v15273_v6  ;;  %v15355_v24 = vcombine.high %v7050_v50, %v7058_v61  ;;  %v7065_v6 = vld [vmem:[#allocation17 + $0xab0] sm:$0xff] }
0x1e31   :  { %10511 = vmatprep.subr.bf16.mxu1 %v15275_v38  ;;  %v7073_v38 = vld [vmem:[#allocation17 + $0xaf0] sm:$0xff] }
0x1e33   :  { %10426 = vmatpush1.bf16.msra.mxu0 %v15272_v54  ;;  %v15369_v54 = vcombine.high %v7065_v6, %v7073_v38 }
0x1e34   :  { %10512 = vmatpush1.bf16.msra.mxu1 %v15274_v8  ;;  %10438 = vmatprep.subr.bf16.mxu0 %v15289_v34  ;;  %v15371_v8 = vcombine.high %v7066_v13, %v7074_v22  ;;  %v7081_v34 = vld [vmem:[#allocation17 + $0xb30] sm:$0xff] }
0x1e35   :  { %10524 = vmatprep.subr.bf16.mxu1 %v15291_v31  ;;  %v7089_v31 = vld [vmem:[#allocation17 + $0xb70] sm:$0xff] }
0x1e36   :  { %10428 = vmatmul.mubr.bf16.vlgmr.msra.gmra.mrb[92].mxu0 %v19440_v26  ;;  %v15385_v2 = vcombine.high %v7081_v34, %v7089_v31  ;;  %v7121_v13 = vld [vmem:[#allocation17 + $0xc70] sm:$0xff] }
0x1e37   :  { %10514 = vmatmul.mubr.bf16.vlgmr.msra.gmra.mrb[92].mxu1 %v19440_v26  ;;  %10439 = vmatpush1.bf16.msra.mxu0 %v15288_v55  ;;  %v15322_v26 = vcombine.low %v7018_v23, %v7026_v20  ;;  %v7090_v55 = vld [vmem:[#allocation17 + $0xb78] sm:$0xff]  ;;  %v7097_v20 = vld [vmem:[#allocation17 + $0xbb0] sm:$0xff] }
0x1e38   :  { %10470 = vmatprep.mubr.bf16.mxu0 %v19448_v37  ;;  %10525 = vmatpush1.bf16.msra.mxu1 %v15290_v0  ;;  %v15368_v0 = vcombine.low %v7065_v6, %v7073_v38  ;;  %v15387_v23 = vcombine.high %v7082_v53, %v7090_v55  ;;  %v7113_v38 = vld [vmem:[#allocation17 + $0xc30] sm:$0xff] }
0x1e39   :  { %10556 = vmatprep.mubr.bf16.mxu1 %v19448_v37  ;;  %10440 = vmatprep.subr.bf16.mxu0 %v15305_v21  ;;  %v15336_v37 = vcombine.low %v7033_v9, %v7041_v51  ;;  %v7270_v21 = vrot.slane %v19474_v46, %v19241_v7  ;;  %v7098_v9 = vld [vmem:[#allocation17 + $0xbb8] sm:$0xff]  ;;  %v15386_v46 = vcombine.low %v7082_v53, %v7090_v55 }
0x1e3a   :  { %10526 = vmatprep.subr.bf16.mxu1 %v15307_v15  ;;  %v7106_v51 = vld [vmem:[#allocation17 + $0xbf8] sm:$0xff] }
0x1e3b   :  { %10441 = vmatpush1.bf16.msra.mxu0 %v15304_v44  ;;  %v7105_v44 = vld [vmem:[#allocation17 + $0xbf0] sm:$0xff]  ;;  %v15403_v6 = vcombine.high %v7098_v9, %v7106_v51 }
0x1e3c   :  { %10527 = vmatpush1.bf16.msra.mxu1 %v15306_v33  ;;  %10442 = vmatprep.subr.bf16.mxu0 %v15321_v27  ;;  %v15401_v61 = vcombine.high %v7097_v20, %v7105_v44 }
0x1e3d   :  { %10528 = vmatprep.subr.bf16.mxu1 %v15323_v41 }
0x1e3f   :  { %10443 = vmatpush1.bf16.msra.mxu0 %v15320_v17 }
0x1e40   :  { %10529 = vmatpush1.bf16.msra.mxu1 %v15322_v26  ;;  %10444 = vmatprep.subr.bf16.mxu0 %v15337_v59  ;;  %v15384_v59 = vcombine.low %v7081_v34, %v7089_v31  ;;  %v7122_v34 = vld [vmem:[#allocation17 + $0xc78] sm:$0xff] }
0x1e41   :  { %10530 = vmatprep.subr.bf16.mxu1 %v15339_v49 }
0x1e43   :  { %10445 = vmatpush1.bf16.msra.mxu0 %v15336_v37 }
0x1e44   :  { %10531 = vmatpush1.bf16.msra.mxu1 %v15338_v63  ;;  %10446 = vmatprep.subr.bf16.mxu0 %v15353_v4 }
0x1e45   :  { %10532 = vmatprep.subr.bf16.mxu1 %v15355_v24  ;;  %v15400_v24 = vcombine.low %v7097_v20, %v7105_v44  ;;  %v7137_v20 = vld [vmem:[#allocation17 + $0xcf0] sm:$0xff] }
0x1e47   :  { %10447 = vmatpush1.bf16.msra.mxu0 %v15352_v1 }
0x1e48   :  { %10533 = vmatpush1.bf16.msra.mxu1 %v15354_v14  ;;  %10448 = vmatprep.subr.bf16.mxu0 %v15369_v54  ;;  %v15402_v54 = vcombine.low %v7098_v9, %v7106_v51 }
0x1e49   :  { %v10128_v15 = vpop.f32.mrb[84].mxu0  ;;  %10534 = vmatprep.subr.bf16.mxu1 %v15371_v8  ;;  %v7114_v8 = vld [vmem:[#allocation17 + $0xc38] sm:$0xff] }
0x1e4a   :  { %v16356_v33 = vadd.f32 %v10128_v15, %v7258_v36  ;;  %v10214_v27 = vpop.f32.mrb[84].mxu1  ;;  %v10130_v41 = vpop.f32.mrb[85].mxu0  ;;  %v15418_v9 = vcombine.low %v7114_v8, %v7122_v34 }
0x1e4b   :  { %v16360_v19 = vadd.f32 %v10214_v27, %v7266_v12  ;;  %v16357_v48 = vadd.f32 %v10130_v41, %v7262_v11  ;;  %v10216_v17 = vpop.f32.mrb[85].mxu1  ;;  %v10132_v26 = vpop.f32.mrb[86].mxu0  ;;  %10449 = vmatpush1.bf16.msra.mxu0 %v15368_v0  ;;  %v7138_v27 = vld [vmem:[#allocation17 + $0xcf8] sm:$0xff]  ;;  %v15416_v41 = vcombine.low %v7113_v38, %v7121_v13 }
0x1e4c   :  { %v16361_v49 = vadd.f32 %v10216_v17, %v7270_v21  ;;  %v16358_v43 = vadd.f32 %v10132_v26, %v7258_v36  ;;  %v10218_v45 = vpop.f32.mrb[86].mxu1  ;;  %10535 = vmatpush1.bf16.msra.mxu1 %v15370_v10  ;;  %v10134_v50 = vpop.f32.mrb[87].mxu0  ;;  %10450 = vmatprep.subr.bf16.mxu0 %v15385_v2  ;;  %v10571_v22 = vmax.f32 %v16356_v33, 0.0  ;;  %v15417_v10 = vcombine.high %v7113_v38, %v7121_v13  ;;  %v7130_v33 = vld [vmem:[#allocation17 + $0xcb8] sm:$0xff]  ;;  %v7153_v17 = vld [vmem:[#allocation17 + $0xd70] sm:$0xff] }
0x1e4d   :  { %v16362_v37 = vadd.f32 %v10218_v45, %v7266_v12  ;;  %v16359_v63 = vadd.f32 %v10134_v50, %v7262_v11  ;;  %v10220_v4 = vpop.f32.mrb[87].mxu1  ;;  %10536 = vmatprep.subr.bf16.mxu1 %v15387_v23  ;;  %v10573_v31 = vmax.f32 %v16360_v19, 0.0  ;;  %v10572_v36 = vmax.f32 %v16357_v48, 0.0  ;;  %v7129_v23 = vld [vmem:[#allocation17 + $0xcb0] sm:$0xff]  ;;  %v7146_v26 = vld [vmem:[#allocation17 + $0xd38] sm:$0xff] }
0x1e4e   :  { %v10587_v1 = vmax.f32 %v16358_v43, 0.0  ;;  %v16363_v14 = vadd.f32 %v10220_v4, %v7270_v21  ;;  %v10574_v0 = vmax.f32 %v16361_v49, 0.0  ;;  %v15419_v21 = vcombine.high %v7114_v8, %v7122_v34  ;;  %v7145_v48 = vld [vmem:[#allocation17 + $0xd30] sm:$0xff] }
0x1e4f   :  { %v10589_v53 = vmax.f32 %v16362_v37, 0.0  ;;  %v10588_v55 = vmax.f32 %v16359_v63, 0.0  ;;  %10451 = vmatpush1.bf16.msra.mxu0 %v15384_v59  ;;  %v15433_v51 = vcombine.high %v7129_v23, %v7137_v20  ;;  %v15435_v19 = vcombine.high %v7130_v33, %v7138_v27  ;;  %v7154_v59 = vld [vmem:[#allocation17 + $0xd78] sm:$0xff]  ;;  %v7161_v50 = vld [vmem:[#allocation17 + $0xdb0] sm:$0xff] }
0x1e50   :  { %v19508_v12 = vpack.c.bf16 %v10587_v1, %v10571_v22  ;;  %v10590_v11 = vmax.f32 %v16363_v14, 0.0  ;;  %10537 = vmatpush1.bf16.msra.mxu1 %v15386_v46  ;;  %10452 = vmatprep.subr.bf16.mxu0 %v15401_v61  ;;  %v15432_v46 = vcombine.low %v7129_v23, %v7137_v20  ;;  %v15434_v49 = vcombine.low %v7130_v33, %v7138_v27  ;;  %v7169_v61 = vld [vmem:[#allocation17 + $0xdf0] sm:$0xff]  ;;  %v7162_v37 = vld [vmem:[#allocation17 + $0xdb8] sm:$0xff] }
0x1e51   :  { %v19510_v2 = vpack.c.bf16 %v10589_v53, %v10573_v31  ;;  %v19512_v15 = vpack.c.bf16 %v10588_v55, %v10572_v36  ;;  %10538 = vmatprep.subr.bf16.mxu1 %v15403_v6  ;;  %v15449_v43 = vcombine.high %v7145_v48, %v7153_v17  ;;  %v15451_v45 = vcombine.high %v7146_v26, %v7154_v59  ;;  %v7170_v63 = vld [vmem:[#allocation17 + $0xdf8] sm:$0xff]  ;;  %v7177_v13 = vld [vmem:[#allocation17 + $0xe30] sm:$0xff] }
0x1e52   :  { %v19514_v44 = vpack.c.bf16 %v10590_v11, %v10574_v0  ;;  %v15448_v4 = vcombine.low %v7145_v48, %v7153_v17  ;;  %v15465_v6 = vcombine.high %v7161_v50, %v7169_v61  ;;  %v15467_v38 = vcombine.high %v7162_v37, %v7170_v63  ;;  %v7185_v22 = vld [vmem:[#allocation17 + $0xe70] sm:$0xff]  ;;  %v7178_v1 = vld [vmem:[#allocation17 + $0xe38] sm:$0xff] }
0x1e53   :  { %10453 = vmatpush1.bf16.msra.mxu0 %v15400_v24  ;;  %v15450_v24 = vcombine.low %v7146_v26, %v7154_v59  ;;  %v7186_v14 = vld [vmem:[#allocation17 + $0xe78] sm:$0xff]  ;;  %v15466_v8 = vcombine.low %v7162_v37, %v7170_v63  ;;  %v15481_v34 = vcombine.high %v7177_v13, %v7185_v22  ;;  %v7193_v36 = vld [vmem:[#allocation17 + $0xeb0] sm:$0xff]  ;;  %v15480_v11 = vcombine.low %v7177_v13, %v7185_v22 }
0x1e54   :  { %10539 = vmatpush1.bf16.msra.mxu1 %v15402_v54  ;;  %10454 = vmatprep.subr.bf16.mxu0 %v15417_v10  ;;  %v15464_v54 = vcombine.low %v7161_v50, %v7169_v61  ;;  %v15483_v31 = vcombine.high %v7178_v1, %v7186_v14  ;;  %v7201_v53 = vld [vmem:[#allocation17 + $0xef0] sm:$0xff]  ;;  %v7194_v55 = vld [vmem:[#allocation17 + $0xeb8] sm:$0xff]  ;;  %v15482_v10 = vcombine.low %v7178_v1, %v7186_v14 }
0x1e55   :  { %10540 = vmatprep.subr.bf16.mxu1 %v15419_v21  ;;  %v7202_v0 = vld [vmem:[#allocation17 + $0xef8] sm:$0xff]  ;;  %v15497_v21 = vcombine.high %v7193_v36, %v7201_v53  ;;  %v7209_v20 = vld [vmem:[#allocation17 + $0xf30] sm:$0xff] }
0x1e56   :  { %v15499_v23 = vcombine.high %v7194_v55, %v7202_v0  ;;  %v7217_v33 = vld [vmem:[#allocation17 + $0xf70] sm:$0xff]  ;;  %v7210_v27 = vld [vmem:[#allocation17 + $0xf38] sm:$0xff] }
0x1e57   :  { %10455 = vmatpush1.bf16.msra.mxu0 %v15416_v41  ;;  %v7218_v41 = vld [vmem:[#allocation17 + $0xf78] sm:$0xff]  ;;  %v7225_v17 = vld [vmem:[#allocation17 + $0xfb0] sm:$0xff] }
0x1e58   :  { %10541 = vmatpush1.bf16.msra.mxu1 %v15418_v9  ;;  %10456 = vmatprep.subr.bf16.mxu0 %v15433_v51  ;;  %v15496_v9 = vcombine.low %v7193_v36, %v7201_v53  ;;  %v15498_v51 = vcombine.low %v7194_v55, %v7202_v0  ;;  %v15515_v48 = vcombine.high %v7210_v27, %v7218_v41  ;;  %v7233_v26 = vld [vmem:[#allocation17 + $0xff0] sm:$0xff]  ;;  %v7226_v59 = vld [vmem:[#allocation17 + $0xfb8] sm:$0xff] }
0x1e59   :  { %10542 = vmatprep.subr.bf16.mxu1 %v15435_v19  ;;  %v15513_v19 = vcombine.high %v7209_v20, %v7217_v33  ;;  %v15528_v61 = vcombine.low %v7225_v17, %v7233_v26  ;;  %v17351_v63 = vld [vmem:[#allocation20 + $0x4] ss:$16 sps:$4 sm:$0xff]   ;;  %v17360_v13 = vld [vmem:[#allocation20 + $0x2c] ss:$16 sps:$4 sm:$0xff]   ;;  %v17355_v22 = vld [vmem:[#allocation20 + $0x20] ss:$16 sps:$4 sm:$0xff]  }
0x1e5a   :  { %v17358_v1 = vld [vmem:[#allocation20 + $0x28] ss:$16 sps:$4 sm:$0xff]   ;;  %v17363_v14 = vld [vmem:[#allocation20 + $0x44] ss:$16 sps:$4 sm:$0xff]   ;;  %v17367_v36 = vld [vmem:[#allocation20 + $0x60] ss:$16 sps:$4 sm:$0xff]  }
0x1e5b   :  { %10457 = vmatpush1.bf16.msra.mxu0 %v15432_v46  ;;  %v7234_v46 = vld [vmem:[#allocation17 + $0xff8] sm:$0xff]  ;;  %v17375_v55 = vld [vmem:[#allocation20 + $0x84] ss:$16 sps:$4 sm:$0xff]  }
0x1e5c   :  { %10543 = vmatpush1.bf16.msra.mxu1 %v15434_v49  ;;  %10458 = vmatprep.subr.bf16.mxu0 %v15449_v43  ;;  %v15512_v49 = vcombine.low %v7209_v20, %v7217_v33  ;;  %v15514_v43 = vcombine.low %v7210_v27, %v7218_v41  ;;  %v15531_v50 = vcombine.high %v7226_v59, %v7234_v46  ;;  %v17370_v53 = vld [vmem:[#allocation20 + $0x68] ss:$16 sps:$4 sm:$0xff]   ;;  %v17378_v0 = vld [vmem:[#allocation20 + $0x8c] ss:$16 sps:$4 sm:$0xff]   ;;  %v17387_v33 = vld [vmem:[#allocation20 + $0xc4] ss:$16 sps:$4 sm:$0xff]  }
0x1e5d   :  { %10544 = vmatprep.subr.bf16.mxu1 %v15451_v45  ;;  %v15529_v45 = vcombine.high %v7225_v17, %v7233_v26  ;;  %v15530_v37 = vcombine.low %v7226_v59, %v7234_v46  ;;  %v17382_v20 = vld [vmem:[#allocation20 + $0xa8] ss:$16 sps:$4 sm:$0xff]   ;;  %v17390_v27 = vld [vmem:[#allocation20 + $0xcc] ss:$16 sps:$4 sm:$0xff]   ;;  %v17385_v41 = vld [vmem:[#allocation20 + $0xc0] ss:$16 sps:$4 sm:$0xff]  }
0x1e5e   :  { %v17394_v17 = vld [vmem:[#allocation20 + $0xe8] ss:$16 sps:$4 sm:$0xff]   ;;  %v17399_v26 = vld [vmem:[#allocation20 + $0x104] ss:$16 sps:$4 sm:$0xff]   ;;  %v17402_v59 = vld [vmem:[#allocation20 + $0x10c] ss:$16 sps:$4 sm:$0xff]  }
0x1e5f   :  { %10459 = vmatpush1.bf16.msra.mxu0 %v15448_v4  ;;  %v17354_v4 = vld [vmem:[#allocation20 + $0xc] ss:$16 sps:$4 sm:$0xff]   ;;  %v17397_v46 = vld [vmem:[#allocation20 + $0x100] ss:$16 sps:$4 sm:$0xff]  }
0x1e60   :  { %10545 = vmatpush1.bf16.msra.mxu1 %v15450_v24  ;;  %10460 = vmatprep.subr.bf16.mxu0 %v15465_v6  ;;  %v17349_v24 = vld [vmem:[#allocation20] ss:$16 sps:$4 sm:$0xff]   ;;  %v17352_v6 = vld [vmem:[#allocation20 + $0x8] ss:$16 sps:$4 sm:$0xff]  }
0x1e61   :  { %10546 = vmatprep.subr.bf16.mxu1 %v15467_v38  ;;  %v17357_v38 = vld [vmem:[#allocation20 + $0x24] ss:$16 sps:$4 sm:$0xff]  }
0x1e63   :  { %10461 = vmatpush1.bf16.msra.mxu0 %v15464_v54  ;;  %v17366_v54 = vld [vmem:[#allocation20 + $0x4c] ss:$16 sps:$4 sm:$0xff]  }
0x1e64   :  { %10547 = vmatpush1.bf16.msra.mxu1 %v15466_v8  ;;  %10462 = vmatprep.subr.bf16.mxu0 %v15481_v34  ;;  %v17361_v8 = vld [vmem:[#allocation20 + $0x40] ss:$16 sps:$4 sm:$0xff]   ;;  %v17364_v34 = vld [vmem:[#allocation20 + $0x48] ss:$16 sps:$4 sm:$0xff]  }
0x1e65   :  { %10548 = vmatprep.subr.bf16.mxu1 %v15483_v31  ;;  %v17369_v31 = vld [vmem:[#allocation20 + $0x64] ss:$16 sps:$4 sm:$0xff]  }
0x1e67   :  { %10463 = vmatpush1.bf16.msra.mxu0 %v15480_v11  ;;  %v17376_v11 = vld [vmem:[#allocation20 + $0x88] ss:$16 sps:$4 sm:$0xff]  }
0x1e68   :  { %10549 = vmatpush1.bf16.msra.mxu1 %v15482_v10  ;;  %10464 = vmatprep.subr.bf16.mxu0 %v15497_v21  ;;  %v17381_v10 = vld [vmem:[#allocation20 + $0xa4] ss:$16 sps:$4 sm:$0xff]   ;;  %v17384_v21 = vld [vmem:[#allocation20 + $0xac] ss:$16 sps:$4 sm:$0xff]  }
0x1e69   :  { %10550 = vmatprep.subr.bf16.mxu1 %v15499_v23  ;;  %v17379_v23 = vld [vmem:[#allocation20 + $0xa0] ss:$16 sps:$4 sm:$0xff]  }
0x1e6b   :  { %10465 = vmatpush1.bf16.msra.mxu0 %v15496_v9  ;;  %v17388_v9 = vld [vmem:[#allocation20 + $0xc8] ss:$16 sps:$4 sm:$0xff]  }
0x1e6c   :  { %10551 = vmatpush1.bf16.msra.mxu1 %v15498_v51  ;;  %10466 = vmatprep.subr.bf16.mxu0 %v15513_v19  ;;  %v17393_v51 = vld [vmem:[#allocation20 + $0xe4] ss:$16 sps:$4 sm:$0xff]   ;;  %v17396_v19 = vld [vmem:[#allocation20 + $0xec] ss:$16 sps:$4 sm:$0xff]  }
0x1e6d   :  { %10552 = vmatprep.subr.bf16.mxu1 %v15515_v48  ;;  %v17391_v48 = vld [vmem:[#allocation20 + $0xe0] ss:$16 sps:$4 sm:$0xff]  }
0x1e6f   :  { %10467 = vmatpush1.bf16.msra.mxu0 %v15512_v49  ;;  %v17400_v49 = vld [vmem:[#allocation20 + $0x108] ss:$16 sps:$4 sm:$0xff]  }
0x1e70   :  { %10553 = vmatpush1.bf16.msra.mxu1 %v15514_v43  ;;  %10468 = vmatprep.subr.bf16.mxu0 %v15529_v45  ;;  %v17405_v43 = vld [vmem:[#allocation20 + $0x124] ss:$16 sps:$4 sm:$0xff]   ;;  %v17408_v45 = vld [vmem:[#allocation20 + $0x12c] ss:$16 sps:$4 sm:$0xff]  }
0x1e71   :  { %10554 = vmatprep.subr.bf16.mxu1 %v15531_v50  ;;  %v17403_v50 = vld [vmem:[#allocation20 + $0x120] ss:$16 sps:$4 sm:$0xff]  }
0x1e73   :  { %10469 = vmatpush1.bf16.msra.mxu0 %v15528_v61  ;;  %v17406_v61 = vld [vmem:[#allocation20 + $0x128] ss:$16 sps:$4 sm:$0xff]  }
0x1e74   :  { %10555 = vmatpush1.bf16.msra.mxu1 %v15530_v37  ;;  %13709 = vmatprep.subr.bf16.mxu0 %v17351_v63  ;;  %v17411_v37 = vld [vmem:[#allocation20 + $0x144] ss:$16 sps:$4 sm:$0xff]   ;;  %v17414_v63 = vld [vmem:[#allocation20 + $0x14c] ss:$16 sps:$4 sm:$0xff]  }
0x1e75   :  { %14053 = vmatprep.subr.bf16.mxu1 %v17354_v4  ;;  %v17409_v4 = vld [vmem:[#allocation20 + $0x140] ss:$16 sps:$4 sm:$0xff]  }
0x1e76   :  { %10471 = vmatmul.mubr.bf16.vlgmr.msra.gmra.mrb[92].mxu0 %v19442_v42 }
0x1e77   :  { %10557 = vmatmul.mubr.bf16.vlgmr.msra.gmra.mrb[92].mxu1 %v19442_v42  ;;  %13710 = vmatpush1.bf16.msra.mxu0 %v17349_v24  ;;  %v17372_v42 = vld [vmem:[#allocation20 + $0x6c] ss:$16 sps:$4 sm:$0xff]   ;;  %v17412_v24 = vld [vmem:[#allocation20 + $0x148] ss:$16 sps:$4 sm:$0xff]  }
0x1e78   :  { %13741 = vmatprep.mubr.bf16.mxu0 %v19488_v28  ;;  %14054 = vmatpush1.bf16.msra.mxu1 %v17352_v6  ;;  %v17417_v6 = vld [vmem:[#allocation20 + $0x164] ss:$16 sps:$4 sm:$0xff]  }
0x1e79   :  { %14085 = vmatprep.mubr.bf16.mxu1 %v19488_v28  ;;  %13711 = vmatprep.subr.bf16.mxu0 %v17357_v38  ;;  %v17373_v28 = vld [vmem:[#allocation20 + $0x80] ss:$16 sps:$4 sm:$0xff]   ;;  %v17420_v38 = vld [vmem:[#allocation20 + $0x16c] ss:$16 sps:$4 sm:$0xff]  }
0x1e7a   :  { %14055 = vmatprep.subr.bf16.mxu1 %v17360_v13  ;;  %v17415_v13 = vld [vmem:[#allocation20 + $0x160] ss:$16 sps:$4 sm:$0xff]  }
0x1e7b   :  { %13712 = vmatpush1.bf16.msra.mxu0 %v17355_v22  ;;  %v17418_v22 = vld [vmem:[#allocation20 + $0x168] ss:$16 sps:$4 sm:$0xff]  }
0x1e7c   :  { %14056 = vmatpush1.bf16.msra.mxu1 %v17358_v1  ;;  %13713 = vmatprep.subr.bf16.mxu0 %v17363_v14  ;;  %v17423_v1 = vld [vmem:[#allocation20 + $0x184] ss:$16 sps:$4 sm:$0xff]   ;;  %v17426_v14 = vld [vmem:[#allocation20 + $0x18c] ss:$16 sps:$4 sm:$0xff]  }
0x1e7d   :  { %14057 = vmatprep.subr.bf16.mxu1 %v17366_v54  ;;  %v17421_v54 = vld [vmem:[#allocation20 + $0x180] ss:$16 sps:$4 sm:$0xff]  }
0x1e7f   :  { %13714 = vmatpush1.bf16.msra.mxu0 %v17361_v8  ;;  %v17424_v8 = vld [vmem:[#allocation20 + $0x188] ss:$16 sps:$4 sm:$0xff]  }
0x1e80   :  { %14058 = vmatpush1.bf16.msra.mxu1 %v17364_v34  ;;  %13715 = vmatprep.subr.bf16.mxu0 %v17369_v31  ;;  %v17429_v34 = vld [vmem:[#allocation20 + $0x1a4] ss:$16 sps:$4 sm:$0xff]   ;;  %v17432_v31 = vld [vmem:[#allocation20 + $0x1ac] ss:$16 sps:$4 sm:$0xff]  }
0x1e81   :  { %14059 = vmatprep.subr.bf16.mxu1 %v17372_v42  ;;  %v17427_v42 = vld [vmem:[#allocation20 + $0x1a0] ss:$16 sps:$4 sm:$0xff]  }
0x1e83   :  { %13716 = vmatpush1.bf16.msra.mxu0 %v17367_v36  ;;  %v17430_v36 = vld [vmem:[#allocation20 + $0x1a8] ss:$16 sps:$4 sm:$0xff]  }
0x1e84   :  { %14060 = vmatpush1.bf16.msra.mxu1 %v17370_v53  ;;  %13717 = vmatprep.subr.bf16.mxu0 %v17375_v55  ;;  %v17435_v53 = vld [vmem:[#allocation20 + $0x1c4] ss:$16 sps:$4 sm:$0xff]   ;;  %v17438_v55 = vld [vmem:[#allocation20 + $0x1cc] ss:$16 sps:$4 sm:$0xff]  }
0x1e85   :  { %14061 = vmatprep.subr.bf16.mxu1 %v17378_v0  ;;  %v17433_v0 = vld [vmem:[#allocation20 + $0x1c0] ss:$16 sps:$4 sm:$0xff]  }
0x1e87   :  { %13718 = vmatpush1.bf16.msra.mxu0 %v17373_v28  ;;  %v17436_v28 = vld [vmem:[#allocation20 + $0x1c8] ss:$16 sps:$4 sm:$0xff]  }
0x1e88   :  { %14062 = vmatpush1.bf16.msra.mxu1 %v17376_v11  ;;  %13719 = vmatprep.subr.bf16.mxu0 %v17381_v10  ;;  %v17441_v11 = vld [vmem:[#allocation20 + $0x1e4] ss:$16 sps:$4 sm:$0xff]   ;;  %v17444_v10 = vld [vmem:[#allocation20 + $0x1ec] ss:$16 sps:$4 sm:$0xff]  }
0x1e89   :  { %14063 = vmatprep.subr.bf16.mxu1 %v17384_v21  ;;  %v17439_v21 = vld [vmem:[#allocation20 + $0x1e0] ss:$16 sps:$4 sm:$0xff]  }
0x1e8b   :  { %13720 = vmatpush1.bf16.msra.mxu0 %v17379_v23  ;;  %v17442_v23 = vld [vmem:[#allocation20 + $0x1e8] ss:$16 sps:$4 sm:$0xff]  }
0x1e8c   :  { %14064 = vmatpush1.bf16.msra.mxu1 %v17382_v20  ;;  %13721 = vmatprep.subr.bf16.mxu0 %v17387_v33  ;;  %v17447_v20 = vld [vmem:[#allocation20 + $0x204] ss:$16 sps:$4 sm:$0xff]   ;;  %v17450_v33 = vld [vmem:[#allocation20 + $0x20c] ss:$16 sps:$4 sm:$0xff]  }
0x1e8d   :  { %14065 = vmatprep.subr.bf16.mxu1 %v17390_v27  ;;  %v17445_v27 = vld [vmem:[#allocation20 + $0x200] ss:$16 sps:$4 sm:$0xff]  }
0x1e8f   :  { %13722 = vmatpush1.bf16.msra.mxu0 %v17385_v41  ;;  %v17448_v41 = vld [vmem:[#allocation20 + $0x208] ss:$16 sps:$4 sm:$0xff]  }
0x1e90   :  { %14066 = vmatpush1.bf16.msra.mxu1 %v17388_v9  ;;  %13723 = vmatprep.subr.bf16.mxu0 %v17393_v51  ;;  %v17453_v9 = vld [vmem:[#allocation20 + $0x224] ss:$16 sps:$4 sm:$0xff]   ;;  %v17456_v51 = vld [vmem:[#allocation20 + $0x22c] ss:$16 sps:$4 sm:$0xff]  }
0x1e91   :  { %14067 = vmatprep.subr.bf16.mxu1 %v17396_v19  ;;  %v17451_v19 = vld [vmem:[#allocation20 + $0x220] ss:$16 sps:$4 sm:$0xff]  }
0x1e93   :  { %13724 = vmatpush1.bf16.msra.mxu0 %v17391_v48  ;;  %v17454_v48 = vld [vmem:[#allocation20 + $0x228] ss:$16 sps:$4 sm:$0xff]  }
0x1e94   :  { %14068 = vmatpush1.bf16.msra.mxu1 %v17394_v17  ;;  %13725 = vmatprep.subr.bf16.mxu0 %v17399_v26  ;;  %v17459_v17 = vld [vmem:[#allocation20 + $0x244] ss:$16 sps:$4 sm:$0xff]   ;;  %v17462_v26 = vld [vmem:[#allocation20 + $0x24c] ss:$16 sps:$4 sm:$0xff]  }
0x1e95   :  { %14069 = vmatprep.subr.bf16.mxu1 %v17402_v59  ;;  %v17457_v59 = vld [vmem:[#allocation20 + $0x240] ss:$16 sps:$4 sm:$0xff]  }
0x1e97   :  { %13726 = vmatpush1.bf16.msra.mxu0 %v17397_v46  ;;  %v17460_v46 = vld [vmem:[#allocation20 + $0x248] ss:$16 sps:$4 sm:$0xff]  }
0x1e98   :  { %14070 = vmatpush1.bf16.msra.mxu1 %v17400_v49  ;;  %13727 = vmatprep.subr.bf16.mxu0 %v17405_v43  ;;  %v17465_v49 = vld [vmem:[#allocation20 + $0x264] ss:$16 sps:$4 sm:$0xff]   ;;  %v17463_v43 = vld [vmem:[#allocation20 + $0x260] ss:$16 sps:$4 sm:$0xff]  }
0x1e99   :  { %14071 = vmatprep.subr.bf16.mxu1 %v17408_v45  ;;  %v17466_v45 = vld [vmem:[#allocation20 + $0x268] ss:$16 sps:$4 sm:$0xff]  }
0x1e9b   :  { %13728 = vmatpush1.bf16.msra.mxu0 %v17403_v50  ;;  %v17471_v50 = vld [vmem:[#allocation20 + $0x284] ss:$16 sps:$4 sm:$0xff]  }
0x1e9c   :  { %14072 = vmatpush1.bf16.msra.mxu1 %v17406_v61  ;;  %13729 = vmatprep.subr.bf16.mxu0 %v17411_v37  ;;  %v17474_v61 = vld [vmem:[#allocation20 + $0x28c] ss:$16 sps:$4 sm:$0xff]  }
0x1e9d   :  { %14073 = vmatprep.subr.bf16.mxu1 %v17414_v63  ;;  %v19524_v37 = vld [vmem:[#allocation19 + $0x8] sm:$0xff] }
0x1e9e   :  { %v17472_v63 = vld [vmem:[#allocation20 + $0x288] ss:$16 sps:$4 sm:$0xff]  }
0x1e9f   :  { %13730 = vmatpush1.bf16.msra.mxu0 %v17409_v4  ;;  %v17477_v4 = vld [vmem:[#allocation20 + $0x2a4] ss:$16 sps:$4 sm:$0xff]  }
0x1ea0   :  { %14074 = vmatpush1.bf16.msra.mxu1 %v17412_v24  ;;  %13731 = vmatprep.subr.bf16.mxu0 %v17417_v6  ;;  %v17480_v24 = vld [vmem:[#allocation20 + $0x2ac] ss:$16 sps:$4 sm:$0xff]   ;;  %v7274_v6 = vrot.slane %v19524_v37, %v18846_v62 }
0x1ea1   :  { %14075 = vmatprep.subr.bf16.mxu1 %v17420_v38  ;;  %v7282_v38 = vrot.slane %v19524_v37, %v18840_v57 }
0x1ea3   :  { %13732 = vmatpush1.bf16.msra.mxu0 %v17415_v13  ;;  %v7278_v13 = vrot.slane %v19524_v37, %v18843_v60 }
0x1ea4   :  { %14076 = vmatpush1.bf16.msra.mxu1 %v17418_v22  ;;  %13733 = vmatprep.subr.bf16.mxu0 %v17423_v1  ;;  %v17475_v22 = vld [vmem:[#allocation20 + $0x2a0] ss:$16 sps:$4 sm:$0xff]   ;;  %v7286_v1 = vrot.slane %v19524_v37, %v18851_v5 }
0x1ea5   :  { %14077 = vmatprep.subr.bf16.mxu1 %v17426_v14  ;;  %v17478_v14 = vld [vmem:[#allocation20 + $0x2a8] ss:$16 sps:$4 sm:$0xff]  }
0x1ea7   :  { %13734 = vmatpush1.bf16.msra.mxu0 %v17421_v54  ;;  %v17483_v54 = vld [vmem:[#allocation20 + $0x2c4] ss:$16 sps:$4 sm:$0xff]  }
0x1ea8   :  { %14078 = vmatpush1.bf16.msra.mxu1 %v17424_v8  ;;  %13735 = vmatprep.subr.bf16.mxu0 %v17429_v34  ;;  %v17486_v34 = vld [vmem:[#allocation20 + $0x2cc] ss:$16 sps:$4 sm:$0xff]  }
0x1ea9   :  { %14079 = vmatprep.subr.bf16.mxu1 %v17432_v31 }
0x1eab   :  { %13736 = vmatpush1.bf16.msra.mxu0 %v17427_v42 }
0x1eac   :  { %14080 = vmatpush1.bf16.msra.mxu1 %v17430_v36  ;;  %13737 = vmatprep.subr.bf16.mxu0 %v17435_v53 }
0x1ead   :  { %14081 = vmatprep.subr.bf16.mxu1 %v17438_v55 }
0x1eaf   :  { %13738 = vmatpush1.bf16.msra.mxu0 %v17433_v0 }
0x1eb0   :  { %14082 = vmatpush1.bf16.msra.mxu1 %v17436_v28  ;;  %13739 = vmatprep.subr.bf16.mxu0 %v17441_v11  ;;  %v17481_v11 = vld [vmem:[#allocation20 + $0x2c0] ss:$16 sps:$4 sm:$0xff]  }
0x1eb1   :  { %14083 = vmatprep.subr.bf16.mxu1 %v17444_v10 }
0x1eb3   :  { %13740 = vmatpush1.bf16.msra.mxu0 %v17439_v21 }
0x1eb4   :  { %14084 = vmatpush1.bf16.msra.mxu1 %v17442_v23  ;;  %13752 = vmatprep.subr.bf16.mxu0 %v17447_v20 }
0x1eb5   :  { %14096 = vmatprep.subr.bf16.mxu1 %v17450_v33  ;;  %v17484_v33 = vld [vmem:[#allocation20 + $0x2c8] ss:$16 sps:$4 sm:$0xff]  }
0x1eb6   :  { %13742 = vmatmul.mubr.bf16.vlgmr.msra.gmra.mrb[96].mxu0 %v19484_v16 }
0x1eb7   :  { %14086 = vmatmul.mubr.bf16.vlgmr.msra.gmra.mrb[96].mxu1 %v19484_v16  ;;  %13753 = vmatpush1.bf16.msra.mxu0 %v17445_v27  ;;  %v17468_v16 = vld [vmem:[#allocation20 + $0x26c] ss:$16 sps:$4 sm:$0xff]   ;;  %v17489_v27 = vld [vmem:[#allocation20 + $0x2e4] ss:$16 sps:$4 sm:$0xff]  }
0x1eb8   :  { %13784 = vmatprep.mubr.bf16.mxu0 %v19490_v56  ;;  %14097 = vmatpush1.bf16.msra.mxu1 %v17448_v41 }
0x1eb9   :  { %14128 = vmatprep.mubr.bf16.mxu1 %v19490_v56  ;;  %13754 = vmatprep.subr.bf16.mxu0 %v17453_v9  ;;  %v17469_v56 = vld [vmem:[#allocation20 + $0x280] ss:$16 sps:$4 sm:$0xff]  }
0x1eba   :  { %14098 = vmatprep.subr.bf16.mxu1 %v17456_v51 }
0x1ebb   :  { %13755 = vmatpush1.bf16.msra.mxu0 %v17451_v19  ;;  %v17492_v19 = vld [vmem:[#allocation20 + $0x2ec] ss:$16 sps:$4 sm:$0xff]  }
0x1ebc   :  { %14099 = vmatpush1.bf16.msra.mxu1 %v17454_v48  ;;  %13756 = vmatprep.subr.bf16.mxu0 %v17459_v17 }
0x1ebd   :  { %14100 = vmatprep.subr.bf16.mxu1 %v17462_v26 }
0x1ebf   :  { %13757 = vmatpush1.bf16.msra.mxu0 %v17457_v59 }
0x1ec0   :  { %14101 = vmatpush1.bf16.msra.mxu1 %v17460_v46  ;;  %13758 = vmatprep.subr.bf16.mxu0 %v17465_v49 }
0x1ec1   :  { %14102 = vmatprep.subr.bf16.mxu1 %v17468_v16 }
0x1ec3   :  { %13759 = vmatpush1.bf16.msra.mxu0 %v17463_v43  ;;  %v17487_v43 = vld [vmem:[#allocation20 + $0x2e0] ss:$16 sps:$4 sm:$0xff]  }
0x1ec4   :  { %14103 = vmatpush1.bf16.msra.mxu1 %v17466_v45  ;;  %13760 = vmatprep.subr.bf16.mxu0 %v17471_v50 }
0x1ec5   :  { %14104 = vmatprep.subr.bf16.mxu1 %v17474_v61 }
0x1ec7   :  { %13761 = vmatpush1.bf16.msra.mxu0 %v17469_v56  ;;  %v17490_v56 = vld [vmem:[#allocation20 + $0x2e8] ss:$16 sps:$4 sm:$0xff]  }
0x1ec8   :  { %14105 = vmatpush1.bf16.msra.mxu1 %v17472_v63  ;;  %13762 = vmatprep.subr.bf16.mxu0 %v17477_v4  ;;  %v17495_v63 = vld [vmem:[#allocation20 + $0x304] ss:$16 sps:$4 sm:$0xff]  }
0x1ec9   :  { %v10300_v8 = vpop.f32.mrb[88].mxu0  ;;  %14106 = vmatprep.subr.bf16.mxu1 %v17480_v24 }
0x1eca   :  { %v16364_v31 = vadd.f32 %v10300_v8, %v7274_v6  ;;  %v10386_v42 = vpop.f32.mrb[88].mxu1  ;;  %v10302_v36 = vpop.f32.mrb[89].mxu0  ;;  %v17502_v8 = vld [vmem:[#allocation20 + $0x328] ss:$16 sps:$4 sm:$0xff]  }
0x1ecb   :  { %v16368_v53 = vadd.f32 %v10386_v42, %v7282_v38  ;;  %v16365_v55 = vadd.f32 %v10302_v36, %v7278_v13  ;;  %v10388_v0 = vpop.f32.mrb[89].mxu1  ;;  %v10304_v28 = vpop.f32.mrb[90].mxu0  ;;  %13763 = vmatpush1.bf16.msra.mxu0 %v17475_v22  ;;  %v17496_v22 = vld [vmem:[#allocation20 + $0x308] ss:$16 sps:$4 sm:$0xff]   ;;  %v17505_v42 = vld [vmem:[#allocation20 + $0x340] ss:$16 sps:$4 sm:$0xff]  }
0x1ecc   :  { %v16369_v10 = vadd.f32 %v10388_v0, %v7286_v1  ;;  %v16366_v21 = vadd.f32 %v10304_v28, %v7274_v6  ;;  %v10390_v23 = vpop.f32.mrb[90].mxu1  ;;  %14107 = vmatpush1.bf16.msra.mxu1 %v17478_v14  ;;  %v10306_v20 = vpop.f32.mrb[91].mxu0  ;;  %13764 = vmatprep.subr.bf16.mxu0 %v17483_v54  ;;  %v10575_v48 = vmax.f32 %v16364_v31, 0.0  ;;  %v17498_v6 = vld [vmem:[#allocation20 + $0x30c] ss:$16 sps:$4 sm:$0xff]  }
0x1ecd   :  { %v16370_v41 = vadd.f32 %v10390_v23, %v7282_v38  ;;  %v16367_v9 = vadd.f32 %v10306_v20, %v7278_v13  ;;  %v10392_v51 = vpop.f32.mrb[91].mxu1  ;;  %14108 = vmatprep.subr.bf16.mxu1 %v17486_v34  ;;  %v10577_v59 = vmax.f32 %v16368_v53, 0.0  ;;  %v10576_v46 = vmax.f32 %v16365_v55, 0.0  ;;  %v17493_v13 = vld [vmem:[#allocation20 + $0x300] ss:$16 sps:$4 sm:$0xff]  }
0x1ece   :  { %v10591_v17 = vmax.f32 %v16366_v21, 0.0  ;;  %v16371_v26 = vadd.f32 %v10392_v51, %v7286_v1  ;;  %v10578_v45 = vmax.f32 %v16369_v10, 0.0  ;;  %v17501_v1 = vld [vmem:[#allocation20 + $0x324] ss:$16 sps:$4 sm:$0xff]   ;;  %v17504_v14 = vld [vmem:[#allocation20 + $0x32c] ss:$16 sps:$4 sm:$0xff]  }
0x1ecf   :  { %v10593_v49 = vmax.f32 %v16370_v41, 0.0  ;;  %v10592_v16 = vmax.f32 %v16367_v9, 0.0  ;;  %13765 = vmatpush1.bf16.msra.mxu0 %v17481_v11  ;;  %v17499_v54 = vld [vmem:[#allocation20 + $0x320] ss:$16 sps:$4 sm:$0xff]   ;;  %v17507_v34 = vld [vmem:[#allocation20 + $0x344] ss:$16 sps:$4 sm:$0xff]  }
0x1ed0   :  { %v19534_v50 = vpack.c.bf16 %v10591_v17, %v10575_v48  ;;  %v10594_v61 = vmax.f32 %v16371_v26, 0.0  ;;  %14109 = vmatpush1.bf16.msra.mxu1 %v17484_v33  ;;  %13766 = vmatprep.subr.bf16.mxu0 %v17489_v27  ;;  %v17510_v31 = vld [vmem:[#allocation20 + $0x34c] ss:$16 sps:$4 sm:$0xff]   ;;  %v17508_v36 = vld [vmem:[#allocation20 + $0x348] ss:$16 sps:$4 sm:$0xff]  }
0x1ed1   :  { %v19536_v4 = vpack.c.bf16 %v10593_v49, %v10577_v59  ;;  %v19538_v24 = vpack.c.bf16 %v10592_v16, %v10576_v46  ;;  %14110 = vmatprep.subr.bf16.mxu1 %v17492_v19  ;;  %v17513_v53 = vld [vmem:[#allocation20 + $0x364] ss:$16 sps:$4 sm:$0xff]   ;;  %v17516_v55 = vld [vmem:[#allocation20 + $0x36c] ss:$16 sps:$4 sm:$0xff]   ;;  %v17511_v0 = vld [vmem:[#allocation20 + $0x360] ss:$16 sps:$4 sm:$0xff]  }
0x1ed2   :  { %v19540_v38 = vpack.c.bf16 %v10594_v61, %v10578_v45  ;;  %v17514_v28 = vld [vmem:[#allocation20 + $0x368] ss:$16 sps:$4 sm:$0xff]   ;;  %v17519_v11 = vld [vmem:[#allocation20 + $0x384] ss:$16 sps:$4 sm:$0xff]   ;;  %v17522_v10 = vld [vmem:[#allocation20 + $0x38c] ss:$16 sps:$4 sm:$0xff]  }
0x1ed3   :  { %13767 = vmatpush1.bf16.msra.mxu0 %v17487_v43  ;;  %v17517_v21 = vld [vmem:[#allocation20 + $0x380] ss:$16 sps:$4 sm:$0xff]   ;;  %v17520_v23 = vld [vmem:[#allocation20 + $0x388] ss:$16 sps:$4 sm:$0xff]   ;;  %v17525_v20 = vld [vmem:[#allocation20 + $0x3a4] ss:$16 sps:$4 sm:$0xff]  }
0x1ed4   :  { %14111 = vmatpush1.bf16.msra.mxu1 %v17490_v56  ;;  %13768 = vmatprep.subr.bf16.mxu0 %v17495_v63  ;;  %v17528_v33 = vld [vmem:[#allocation20 + $0x3ac] ss:$16 sps:$4 sm:$0xff]   ;;  %v17523_v27 = vld [vmem:[#allocation20 + $0x3a0] ss:$16 sps:$4 sm:$0xff]   ;;  %v17526_v41 = vld [vmem:[#allocation20 + $0x3a8] ss:$16 sps:$4 sm:$0xff]  }
0x1ed5   :  { %14112 = vmatprep.subr.bf16.mxu1 %v17498_v6  ;;  %v17531_v9 = vld [vmem:[#allocation20 + $0x3c4] ss:$16 sps:$4 sm:$0xff]   ;;  %v17534_v51 = vld [vmem:[#allocation20 + $0x3cc] ss:$16 sps:$4 sm:$0xff]   ;;  %v17529_v19 = vld [vmem:[#allocation20 + $0x3c0] ss:$16 sps:$4 sm:$0xff]  }
0x1ed6   :  { %v17532_v48 = vld [vmem:[#allocation20 + $0x3c8] ss:$16 sps:$4 sm:$0xff]   ;;  %v17537_v17 = vld [vmem:[#allocation20 + $0x3e4] ss:$16 sps:$4 sm:$0xff]   ;;  %v17540_v26 = vld [vmem:[#allocation20 + $0x3ec] ss:$16 sps:$4 sm:$0xff]  }
0x1ed7   :  { %13769 = vmatpush1.bf16.msra.mxu0 %v17493_v13  ;;  %v17535_v59 = vld [vmem:[#allocation20 + $0x3e0] ss:$16 sps:$4 sm:$0xff]   ;;  %v17538_v46 = vld [vmem:[#allocation20 + $0x3e8] ss:$16 sps:$4 sm:$0xff]   ;;  %v17543_v49 = vld [vmem:[#allocation20 + $0x404] ss:$16 sps:$4 sm:$0xff]  }
0x1ed8   :  { %14113 = vmatpush1.bf16.msra.mxu1 %v17496_v22  ;;  %13770 = vmatprep.subr.bf16.mxu0 %v17501_v1  ;;  %v17546_v16 = vld [vmem:[#allocation20 + $0x40c] ss:$16 sps:$4 sm:$0xff]   ;;  %v17541_v43 = vld [vmem:[#allocation20 + $0x400] ss:$16 sps:$4 sm:$0xff]   ;;  %v17544_v45 = vld [vmem:[#allocation20 + $0x408] ss:$16 sps:$4 sm:$0xff]  }
0x1ed9   :  { %14114 = vmatprep.subr.bf16.mxu1 %v17504_v14  ;;  %v17549_v61 = vld [vmem:[#allocation20 + $0x424] ss:$16 sps:$4 sm:$0xff]   ;;  %v17552_v56 = vld [vmem:[#allocation20 + $0x42c] ss:$16 sps:$4 sm:$0xff]   ;;  %v17547_v63 = vld [vmem:[#allocation20 + $0x420] ss:$16 sps:$4 sm:$0xff]  }
0x1eda   :  { %v17550_v6 = vld [vmem:[#allocation20 + $0x428] ss:$16 sps:$4 sm:$0xff]   ;;  %v17555_v13 = vld [vmem:[#allocation20 + $0x444] ss:$16 sps:$4 sm:$0xff]   ;;  %v17558_v22 = vld [vmem:[#allocation20 + $0x44c] ss:$16 sps:$4 sm:$0xff]  }
0x1edb   :  { %13771 = vmatpush1.bf16.msra.mxu0 %v17499_v54  ;;  %v17553_v1 = vld [vmem:[#allocation20 + $0x440] ss:$16 sps:$4 sm:$0xff]   ;;  %v17556_v14 = vld [vmem:[#allocation20 + $0x448] ss:$16 sps:$4 sm:$0xff]   ;;  %v17561_v54 = vld [vmem:[#allocation20 + $0x464] ss:$16 sps:$4 sm:$0xff]  }
0x1edc   :  { %14115 = vmatpush1.bf16.msra.mxu1 %v17502_v8  ;;  %13772 = vmatprep.subr.bf16.mxu0 %v17507_v34  ;;  %v17559_v8 = vld [vmem:[#allocation20 + $0x460] ss:$16 sps:$4 sm:$0xff]   ;;  %v17562_v34 = vld [vmem:[#allocation20 + $0x468] ss:$16 sps:$4 sm:$0xff]  }
0x1edd   :  { %14116 = vmatprep.subr.bf16.mxu1 %v17510_v31  ;;  %v17567_v31 = vld [vmem:[#allocation20 + $0x484] ss:$16 sps:$4 sm:$0xff]  }
0x1edf   :  { %13773 = vmatpush1.bf16.msra.mxu0 %v17505_v42  ;;  %v17570_v42 = vld [vmem:[#allocation20 + $0x48c] ss:$16 sps:$4 sm:$0xff]  }
0x1ee0   :  { %14117 = vmatpush1.bf16.msra.mxu1 %v17508_v36  ;;  %13774 = vmatprep.subr.bf16.mxu0 %v17513_v53  ;;  %v17568_v36 = vld [vmem:[#allocation20 + $0x488] ss:$16 sps:$4 sm:$0xff]   ;;  %v17573_v53 = vld [vmem:[#allocation20 + $0x4a4] ss:$16 sps:$4 sm:$0xff]  }
0x1ee1   :  { %14118 = vmatprep.subr.bf16.mxu1 %v17516_v55  ;;  %v17576_v55 = vld [vmem:[#allocation20 + $0x4ac] ss:$16 sps:$4 sm:$0xff]  }
0x1ee3   :  { %13775 = vmatpush1.bf16.msra.mxu0 %v17511_v0  ;;  %v17571_v0 = vld [vmem:[#allocation20 + $0x4a0] ss:$16 sps:$4 sm:$0xff]  }
0x1ee4   :  { %14119 = vmatpush1.bf16.msra.mxu1 %v17514_v28  ;;  %13776 = vmatprep.subr.bf16.mxu0 %v17519_v11  ;;  %v17574_v28 = vld [vmem:[#allocation20 + $0x4a8] ss:$16 sps:$4 sm:$0xff]   ;;  %v17579_v11 = vld [vmem:[#allocation20 + $0x4c4] ss:$16 sps:$4 sm:$0xff]  }
0x1ee5   :  { %14120 = vmatprep.subr.bf16.mxu1 %v17522_v10  ;;  %v17582_v10 = vld [vmem:[#allocation20 + $0x4cc] ss:$16 sps:$4 sm:$0xff]  }
0x1ee7   :  { %13777 = vmatpush1.bf16.msra.mxu0 %v17517_v21  ;;  %v17577_v21 = vld [vmem:[#allocation20 + $0x4c0] ss:$16 sps:$4 sm:$0xff]  }
0x1ee8   :  { %14121 = vmatpush1.bf16.msra.mxu1 %v17520_v23  ;;  %13778 = vmatprep.subr.bf16.mxu0 %v17525_v20  ;;  %v17580_v23 = vld [vmem:[#allocation20 + $0x4c8] ss:$16 sps:$4 sm:$0xff]   ;;  %v17585_v20 = vld [vmem:[#allocation20 + $0x4e4] ss:$16 sps:$4 sm:$0xff]  }
0x1ee9   :  { %14122 = vmatprep.subr.bf16.mxu1 %v17528_v33  ;;  %v17588_v33 = vld [vmem:[#allocation20 + $0x4ec] ss:$16 sps:$4 sm:$0xff]  }
0x1eeb   :  { %13779 = vmatpush1.bf16.msra.mxu0 %v17523_v27  ;;  %v17583_v27 = vld [vmem:[#allocation20 + $0x4e0] ss:$16 sps:$4 sm:$0xff]  }
0x1eec   :  { %14123 = vmatpush1.bf16.msra.mxu1 %v17526_v41  ;;  %13780 = vmatprep.subr.bf16.mxu0 %v17531_v9  ;;  %v17586_v41 = vld [vmem:[#allocation20 + $0x4e8] ss:$16 sps:$4 sm:$0xff]   ;;  %v17591_v9 = vld [vmem:[#allocation20 + $0x504] ss:$16 sps:$4 sm:$0xff]  }
0x1eed   :  { %14124 = vmatprep.subr.bf16.mxu1 %v17534_v51  ;;  %v17594_v51 = vld [vmem:[#allocation20 + $0x50c] ss:$16 sps:$4 sm:$0xff]  }
0x1eef   :  { %13781 = vmatpush1.bf16.msra.mxu0 %v17529_v19  ;;  %v17589_v19 = vld [vmem:[#allocation20 + $0x500] ss:$16 sps:$4 sm:$0xff]  }
0x1ef0   :  { %14125 = vmatpush1.bf16.msra.mxu1 %v17532_v48  ;;  %13782 = vmatprep.subr.bf16.mxu0 %v17537_v17  ;;  %v17592_v48 = vld [vmem:[#allocation20 + $0x508] ss:$16 sps:$4 sm:$0xff]   ;;  %v17597_v17 = vld [vmem:[#allocation20 + $0x524] ss:$16 sps:$4 sm:$0xff]  }
0x1ef1   :  { %14126 = vmatprep.subr.bf16.mxu1 %v17540_v26  ;;  %v17600_v26 = vld [vmem:[#allocation20 + $0x52c] ss:$16 sps:$4 sm:$0xff]  }
0x1ef3   :  { %13783 = vmatpush1.bf16.msra.mxu0 %v17535_v59  ;;  %v17595_v59 = vld [vmem:[#allocation20 + $0x520] ss:$16 sps:$4 sm:$0xff]  }
0x1ef4   :  { %14127 = vmatpush1.bf16.msra.mxu1 %v17538_v46  ;;  %13795 = vmatprep.subr.bf16.mxu0 %v17543_v49  ;;  %v17598_v46 = vld [vmem:[#allocation20 + $0x528] ss:$16 sps:$4 sm:$0xff]   ;;  %v17603_v49 = vld [vmem:[#allocation20 + $0x544] ss:$16 sps:$4 sm:$0xff]  }
0x1ef5   :  { %14139 = vmatprep.subr.bf16.mxu1 %v17546_v16  ;;  %v17606_v16 = vld [vmem:[#allocation20 + $0x54c] ss:$16 sps:$4 sm:$0xff]  }
0x1ef6   :  { %13785 = vmatmul.mubr.bf16.vlgmr.msra.gmra.mrb[96].mxu0 %v19486_v39 }
0x1ef7   :  { %14129 = vmatmul.mubr.bf16.vlgmr.msra.gmra.mrb[96].mxu1 %v19486_v39  ;;  %13796 = vmatpush1.bf16.msra.mxu0 %v17541_v43  ;;  %v17564_v39 = vld [vmem:[#allocation20 + $0x46c] ss:$16 sps:$4 sm:$0xff]   ;;  %v17601_v43 = vld [vmem:[#allocation20 + $0x540] ss:$16 sps:$4 sm:$0xff]  }
0x1ef8   :  { %13827 = vmatprep.mubr.bf16.mxu0 %v19512_v15  ;;  %14140 = vmatpush1.bf16.msra.mxu1 %v17544_v45  ;;  %v17604_v45 = vld [vmem:[#allocation20 + $0x548] ss:$16 sps:$4 sm:$0xff]  }
0x1ef9   :  { %14171 = vmatprep.mubr.bf16.mxu1 %v19512_v15  ;;  %13797 = vmatprep.subr.bf16.mxu0 %v17549_v61  ;;  %v17565_v15 = vld [vmem:[#allocation20 + $0x480] ss:$16 sps:$4 sm:$0xff]   ;;  %v17609_v61 = vld [vmem:[#allocation20 + $0x564] ss:$16 sps:$4 sm:$0xff]  }
0x1efa   :  { %14141 = vmatprep.subr.bf16.mxu1 %v17552_v56  ;;  %v17612_v56 = vld [vmem:[#allocation20 + $0x56c] ss:$16 sps:$4 sm:$0xff]  }
0x1efb   :  { %13798 = vmatpush1.bf16.msra.mxu0 %v17547_v63  ;;  %v17607_v63 = vld [vmem:[#allocation20 + $0x560] ss:$16 sps:$4 sm:$0xff]  }
0x1efc   :  { %14142 = vmatpush1.bf16.msra.mxu1 %v17550_v6  ;;  %13799 = vmatprep.subr.bf16.mxu0 %v17555_v13  ;;  %v17610_v6 = vld [vmem:[#allocation20 + $0x568] ss:$16 sps:$4 sm:$0xff]   ;;  %v17615_v13 = vld [vmem:[#allocation20 + $0x584] ss:$16 sps:$4 sm:$0xff]  }
0x1efd   :  { %14143 = vmatprep.subr.bf16.mxu1 %v17558_v22  ;;  %v17618_v22 = vld [vmem:[#allocation20 + $0x58c] ss:$16 sps:$4 sm:$0xff]  }
0x1eff   :  { %13800 = vmatpush1.bf16.msra.mxu0 %v17553_v1  ;;  %v17613_v1 = vld [vmem:[#allocation20 + $0x580] ss:$16 sps:$4 sm:$0xff]  }
0x1f00   :  { %14144 = vmatpush1.bf16.msra.mxu1 %v17556_v14  ;;  %13801 = vmatprep.subr.bf16.mxu0 %v17561_v54  ;;  %v17616_v14 = vld [vmem:[#allocation20 + $0x588] ss:$16 sps:$4 sm:$0xff]   ;;  %v17621_v54 = vld [vmem:[#allocation20 + $0x5a4] ss:$16 sps:$4 sm:$0xff]  }
0x1f01   :  { %14145 = vmatprep.subr.bf16.mxu1 %v17564_v39  ;;  %v17624_v39 = vld [vmem:[#allocation20 + $0x5ac] ss:$16 sps:$4 sm:$0xff]  }
0x1f03   :  { %13802 = vmatpush1.bf16.msra.mxu0 %v17559_v8  ;;  %v17619_v8 = vld [vmem:[#allocation20 + $0x5a0] ss:$16 sps:$4 sm:$0xff]  }
0x1f04   :  { %14146 = vmatpush1.bf16.msra.mxu1 %v17562_v34  ;;  %13803 = vmatprep.subr.bf16.mxu0 %v17567_v31  ;;  %v17622_v34 = vld [vmem:[#allocation20 + $0x5a8] ss:$16 sps:$4 sm:$0xff]   ;;  %v17627_v31 = vld [vmem:[#allocation20 + $0x5c4] ss:$16 sps:$4 sm:$0xff]  }
0x1f05   :  { %14147 = vmatprep.subr.bf16.mxu1 %v17570_v42  ;;  %v17630_v42 = vld [vmem:[#allocation20 + $0x5cc] ss:$16 sps:$4 sm:$0xff]  }
0x1f07   :  { %13804 = vmatpush1.bf16.msra.mxu0 %v17565_v15  ;;  %v17625_v15 = vld [vmem:[#allocation20 + $0x5c0] ss:$16 sps:$4 sm:$0xff]  }
0x1f08   :  { %14148 = vmatpush1.bf16.msra.mxu1 %v17568_v36  ;;  %13805 = vmatprep.subr.bf16.mxu0 %v17573_v53  ;;  %v17628_v36 = vld [vmem:[#allocation20 + $0x5c8] ss:$16 sps:$4 sm:$0xff]   ;;  %v17633_v53 = vld [vmem:[#allocation20 + $0x5e4] ss:$16 sps:$4 sm:$0xff]  }
0x1f09   :  { %14149 = vmatprep.subr.bf16.mxu1 %v17576_v55  ;;  %v17636_v55 = vld [vmem:[#allocation20 + $0x5ec] ss:$16 sps:$4 sm:$0xff]  }
0x1f0b   :  { %13806 = vmatpush1.bf16.msra.mxu0 %v17571_v0  ;;  %v17631_v0 = vld [vmem:[#allocation20 + $0x5e0] ss:$16 sps:$4 sm:$0xff]  }
0x1f0c   :  { %14150 = vmatpush1.bf16.msra.mxu1 %v17574_v28  ;;  %13807 = vmatprep.subr.bf16.mxu0 %v17579_v11  ;;  %v17634_v28 = vld [vmem:[#allocation20 + $0x5e8] ss:$16 sps:$4 sm:$0xff]   ;;  %v17639_v11 = vld [vmem:[#allocation20 + $0x604] ss:$16 sps:$4 sm:$0xff]  }
0x1f0d   :  { %14151 = vmatprep.subr.bf16.mxu1 %v17582_v10  ;;  %v17642_v10 = vld [vmem:[#allocation20 + $0x60c] ss:$16 sps:$4 sm:$0xff]  }
0x1f0f   :  { %13808 = vmatpush1.bf16.msra.mxu0 %v17577_v21  ;;  %v17637_v21 = vld [vmem:[#allocation20 + $0x600] ss:$16 sps:$4 sm:$0xff]  }
0x1f10   :  { %14152 = vmatpush1.bf16.msra.mxu1 %v17580_v23  ;;  %13809 = vmatprep.subr.bf16.mxu0 %v17585_v20  ;;  %v17640_v23 = vld [vmem:[#allocation20 + $0x608] ss:$16 sps:$4 sm:$0xff]   ;;  %v17645_v20 = vld [vmem:[#allocation20 + $0x624] ss:$16 sps:$4 sm:$0xff]  }
0x1f11   :  { %14153 = vmatprep.subr.bf16.mxu1 %v17588_v33  ;;  %v17648_v33 = vld [vmem:[#allocation20 + $0x62c] ss:$16 sps:$4 sm:$0xff]  }
0x1f13   :  { %13810 = vmatpush1.bf16.msra.mxu0 %v17583_v27  ;;  %v17643_v27 = vld [vmem:[#allocation20 + $0x620] ss:$16 sps:$4 sm:$0xff]  }
0x1f14   :  { %14154 = vmatpush1.bf16.msra.mxu1 %v17586_v41  ;;  %13811 = vmatprep.subr.bf16.mxu0 %v17591_v9  ;;  %v17646_v41 = vld [vmem:[#allocation20 + $0x628] ss:$16 sps:$4 sm:$0xff]   ;;  %v17651_v9 = vld [vmem:[#allocation20 + $0x644] ss:$16 sps:$4 sm:$0xff]  }
0x1f15   :  { %14155 = vmatprep.subr.bf16.mxu1 %v17594_v51  ;;  %v17654_v51 = vld [vmem:[#allocation20 + $0x64c] ss:$16 sps:$4 sm:$0xff]  }
0x1f17   :  { %13812 = vmatpush1.bf16.msra.mxu0 %v17589_v19  ;;  %v17649_v19 = vld [vmem:[#allocation20 + $0x640] ss:$16 sps:$4 sm:$0xff]  }
0x1f18   :  { %14156 = vmatpush1.bf16.msra.mxu1 %v17592_v48  ;;  %13813 = vmatprep.subr.bf16.mxu0 %v17597_v17  ;;  %v17652_v48 = vld [vmem:[#allocation20 + $0x648] ss:$16 sps:$4 sm:$0xff]   ;;  %v17657_v17 = vld [vmem:[#allocation20 + $0x664] ss:$16 sps:$4 sm:$0xff]  }
0x1f19   :  { %14157 = vmatprep.subr.bf16.mxu1 %v17600_v26  ;;  %v17655_v26 = vld [vmem:[#allocation20 + $0x660] ss:$16 sps:$4 sm:$0xff]  }
0x1f1b   :  { %13814 = vmatpush1.bf16.msra.mxu0 %v17595_v59  ;;  %v17658_v59 = vld [vmem:[#allocation20 + $0x668] ss:$16 sps:$4 sm:$0xff]  }
0x1f1c   :  { %14158 = vmatpush1.bf16.msra.mxu1 %v17598_v46  ;;  %13815 = vmatprep.subr.bf16.mxu0 %v17603_v49  ;;  %v17663_v46 = vld [vmem:[#allocation20 + $0x684] ss:$16 sps:$4 sm:$0xff]   ;;  %v17666_v49 = vld [vmem:[#allocation20 + $0x68c] ss:$16 sps:$4 sm:$0xff]  }
0x1f1d   :  { %14159 = vmatprep.subr.bf16.mxu1 %v17606_v16  ;;  %v17664_v16 = vld [vmem:[#allocation20 + $0x688] ss:$16 sps:$4 sm:$0xff]  }
0x1f1f   :  { %13816 = vmatpush1.bf16.msra.mxu0 %v17601_v43  ;;  %v17669_v43 = vld [vmem:[#allocation20 + $0x6a4] ss:$16 sps:$4 sm:$0xff]  }
0x1f20   :  { %14160 = vmatpush1.bf16.msra.mxu1 %v17604_v45  ;;  %13817 = vmatprep.subr.bf16.mxu0 %v17609_v61  ;;  %v17672_v45 = vld [vmem:[#allocation20 + $0x6ac] ss:$16 sps:$4 sm:$0xff]   ;;  %v7290_v61 = vrot.slane %v19524_v37, %v18922_v30 }
0x1f21   :  { %14161 = vmatprep.subr.bf16.mxu1 %v17612_v56  ;;  %v7298_v56 = vrot.slane %v19524_v37, %v19140_v47 }
0x1f23   :  { %13818 = vmatpush1.bf16.msra.mxu0 %v17607_v63  ;;  %v7294_v63 = vrot.slane %v19524_v37, %v19043_v32  ;;  %v17673_v32 = vld [vmem:[#allocation20 + $0x6c0] ss:$16 sps:$4 sm:$0xff]  }
0x1f24   :  { %14162 = vmatpush1.bf16.msra.mxu1 %v17610_v6  ;;  %13819 = vmatprep.subr.bf16.mxu0 %v17615_v13  ;;  %v17667_v6 = vld [vmem:[#allocation20 + $0x6a0] ss:$16 sps:$4 sm:$0xff]   ;;  %v7302_v13 = vrot.slane %v19524_v37, %v19241_v7  ;;  %v17676_v37 = vld [vmem:[#allocation20 + $0x6c8] ss:$16 sps:$4 sm:$0xff]  }
0x1f25   :  { %14163 = vmatprep.subr.bf16.mxu1 %v17618_v22  ;;  %v17670_v22 = vld [vmem:[#allocation20 + $0x6a8] ss:$16 sps:$4 sm:$0xff]  }
0x1f27   :  { %13820 = vmatpush1.bf16.msra.mxu0 %v17613_v1  ;;  %v17675_v1 = vld [vmem:[#allocation20 + $0x6c4] ss:$16 sps:$4 sm:$0xff]  }
0x1f28   :  { %14164 = vmatpush1.bf16.msra.mxu1 %v17616_v14  ;;  %13821 = vmatprep.subr.bf16.mxu0 %v17621_v54  ;;  %v17678_v54 = vld [vmem:[#allocation20 + $0x6cc] ss:$16 sps:$4 sm:$0xff]  }
0x1f29   :  { %14165 = vmatprep.subr.bf16.mxu1 %v17624_v39 }
0x1f2b   :  { %13822 = vmatpush1.bf16.msra.mxu0 %v17619_v8 }
0x1f2c   :  { %14166 = vmatpush1.bf16.msra.mxu1 %v17622_v34  ;;  %13823 = vmatprep.subr.bf16.mxu0 %v17627_v31 }
0x1f2d   :  { %14167 = vmatprep.subr.bf16.mxu1 %v17630_v42 }
0x1f2f   :  { %13824 = vmatpush1.bf16.msra.mxu0 %v17625_v15 }
0x1f30   :  { %14168 = vmatpush1.bf16.msra.mxu1 %v17628_v36  ;;  %13825 = vmatprep.subr.bf16.mxu0 %v17633_v53 }
0x1f31   :  { %14169 = vmatprep.subr.bf16.mxu1 %v17636_v55  ;;  %v17681_v55 = vld [vmem:[#allocation20 + $0x6e4] ss:$16 sps:$4 sm:$0xff]  }
0x1f33   :  { %13826 = vmatpush1.bf16.msra.mxu0 %v17631_v0 }
0x1f34   :  { %14170 = vmatpush1.bf16.msra.mxu1 %v17634_v28  ;;  %13838 = vmatprep.subr.bf16.mxu0 %v17639_v11 }
0x1f35   :  { %14182 = vmatprep.subr.bf16.mxu1 %v17642_v10  ;;  %v17684_v10 = vld [vmem:[#allocation20 + $0x6ec] ss:$16 sps:$4 sm:$0xff]  }
0x1f36   :  { %13828 = vmatmul.mubr.bf16.vlgmr.msra.gmra.mrb[96].mxu0 %v19508_v12 }
0x1f37   :  { %14172 = vmatmul.mubr.bf16.vlgmr.msra.gmra.mrb[96].mxu1 %v19508_v12  ;;  %13839 = vmatpush1.bf16.msra.mxu0 %v17637_v21  ;;  %v17660_v12 = vld [vmem:[#allocation20 + $0x66c] ss:$16 sps:$4 sm:$0xff]  }
0x1f38   :  { %13870 = vmatprep.mubr.bf16.mxu0 %v19514_v44  ;;  %14183 = vmatpush1.bf16.msra.mxu1 %v17640_v23 }
0x1f39   :  { %14214 = vmatprep.mubr.bf16.mxu1 %v19514_v44  ;;  %13840 = vmatprep.subr.bf16.mxu0 %v17645_v20  ;;  %v17661_v44 = vld [vmem:[#allocation20 + $0x680] ss:$16 sps:$4 sm:$0xff]  }
0x1f3a   :  { %14184 = vmatprep.subr.bf16.mxu1 %v17648_v33 }
0x1f3b   :  { %13841 = vmatpush1.bf16.msra.mxu0 %v17643_v27 }
0x1f3c   :  { %14185 = vmatpush1.bf16.msra.mxu1 %v17646_v41  ;;  %13842 = vmatprep.subr.bf16.mxu0 %v17651_v9 }
0x1f3d   :  { %14186 = vmatprep.subr.bf16.mxu1 %v17654_v51  ;;  %v17679_v51 = vld [vmem:[#allocation20 + $0x6e0] ss:$16 sps:$4 sm:$0xff]  }
0x1f3f   :  { %13843 = vmatpush1.bf16.msra.mxu0 %v17649_v19 }
0x1f40   :  { %14187 = vmatpush1.bf16.msra.mxu1 %v17652_v48  ;;  %13844 = vmatprep.subr.bf16.mxu0 %v17657_v17 }
0x1f41   :  { %14188 = vmatprep.subr.bf16.mxu1 %v17660_v12  ;;  %v17682_v12 = vld [vmem:[#allocation20 + $0x6e8] ss:$16 sps:$4 sm:$0xff]  }
0x1f43   :  { %13845 = vmatpush1.bf16.msra.mxu0 %v17655_v26  ;;  %v17687_v26 = vld [vmem:[#allocation20 + $0x704] ss:$16 sps:$4 sm:$0xff]  }
0x1f44   :  { %14189 = vmatpush1.bf16.msra.mxu1 %v17658_v59  ;;  %13846 = vmatprep.subr.bf16.mxu0 %v17663_v46 }
0x1f45   :  { %14190 = vmatprep.subr.bf16.mxu1 %v17666_v49  ;;  %v17690_v49 = vld [vmem:[#allocation20 + $0x70c] ss:$16 sps:$4 sm:$0xff]  }
0x1f47   :  { %13847 = vmatpush1.bf16.msra.mxu0 %v17661_v44 }
0x1f48   :  { %14191 = vmatpush1.bf16.msra.mxu1 %v17664_v16  ;;  %13848 = vmatprep.subr.bf16.mxu0 %v17669_v43  ;;  %v17685_v16 = vld [vmem:[#allocation20 + $0x700] ss:$16 sps:$4 sm:$0xff]   ;;  %v17688_v43 = vld [vmem:[#allocation20 + $0x708] ss:$16 sps:$4 sm:$0xff]  }
0x1f49   :  { %v10472_v14 = vpop.f32.mrb[92].mxu0  ;;  %14192 = vmatprep.subr.bf16.mxu1 %v17672_v45  ;;  %v17693_v45 = vld [vmem:[#allocation20 + $0x724] ss:$16 sps:$4 sm:$0xff]  }
0x1f4a   :  { %v16372_v39 = vadd.f32 %v10472_v14, %v7290_v61  ;;  %v10558_v30 = vpop.f32.mrb[92].mxu1  ;;  %v10474_v8 = vpop.f32.mrb[93].mxu0  ;;  %v17705_v14 = vld [vmem:[#allocation20 + $0x764] ss:$16 sps:$4 sm:$0xff]  }
0x1f4b   :  { %v16376_v34 = vadd.f32 %v10558_v30, %v7298_v56  ;;  %v16373_v31 = vadd.f32 %v10474_v8, %v7294_v63  ;;  %v10560_v47 = vpop.f32.mrb[93].mxu1  ;;  %v10476_v42 = vpop.f32.mrb[94].mxu0  ;;  %13849 = vmatpush1.bf16.msra.mxu0 %v17667_v6  ;;  %v17699_v6 = vld [vmem:[#allocation20 + $0x744] ss:$16 sps:$4 sm:$0xff]   ;;  %v17706_v30 = vld [vmem:[#allocation20 + $0x768] ss:$16 sps:$4 sm:$0xff]  }
0x1f4c   :  { %v16377_v15 = vadd.f32 %v10560_v47, %v7302_v13  ;;  %v16374_v36 = vadd.f32 %v10476_v42, %v7290_v61  ;;  %v10562_v53 = vpop.f32.mrb[94].mxu1  ;;  %14193 = vmatpush1.bf16.msra.mxu1 %v17670_v22  ;;  %v10478_v7 = vpop.f32.mrb[95].mxu0  ;;  %13850 = vmatprep.subr.bf16.mxu0 %v17675_v1  ;;  %v10579_v21 = vmax.f32 %v16372_v39, 0.0  ;;  %v17696_v61 = vld [vmem:[#allocation20 + $0x72c] ss:$16 sps:$4 sm:$0xff]  }
0x1f4d   :  { %v16378_v0 = vadd.f32 %v10562_v53, %v7298_v56  ;;  %v16375_v28 = vadd.f32 %v10478_v7, %v7294_v63  ;;  %v10564_v11 = vpop.f32.mrb[95].mxu1  ;;  %14194 = vmatprep.subr.bf16.mxu1 %v17678_v54  ;;  %v10581_v33 = vmax.f32 %v16376_v34, 0.0  ;;  %v10580_v27 = vmax.f32 %v16373_v31, 0.0  ;;  %v17691_v56 = vld [vmem:[#allocation20 + $0x720] ss:$16 sps:$4 sm:$0xff]  }
0x1f4e   :  { %v10595_v23 = vmax.f32 %v16374_v36, 0.0  ;;  %v16379_v20 = vadd.f32 %v10564_v11, %v7302_v13  ;;  %v10582_v19 = vmax.f32 %v16377_v15, 0.0  ;;  %v17694_v63 = vld [vmem:[#allocation20 + $0x728] ss:$16 sps:$4 sm:$0xff]   ;;  %v17702_v13 = vld [vmem:[#allocation20 + $0x74c] ss:$16 sps:$4 sm:$0xff]  }
0x1f4f   :  { %v10597_v41 = vmax.f32 %v16378_v0, 0.0  ;;  %v10596_v9 = vmax.f32 %v16375_v28, 0.0  ;;  %13851 = vmatpush1.bf16.msra.mxu0 %v17673_v32  ;;  %v17697_v22 = vld [vmem:[#allocation20 + $0x740] ss:$16 sps:$4 sm:$0xff]   ;;  %v17700_v1 = vld [vmem:[#allocation20 + $0x748] ss:$16 sps:$4 sm:$0xff]  }
0x1f50   :  { %v19558_v48 = vpack.c.bf16 %v10595_v23, %v10579_v21  ;;  %v10598_v17 = vmax.f32 %v16379_v20, 0.0  ;;  %14195 = vmatpush1.bf16.msra.mxu1 %v17676_v37  ;;  %13852 = vmatprep.subr.bf16.mxu0 %v17681_v55  ;;  %v17708_v54 = vld [vmem:[#allocation20 + $0x76c] ss:$16 sps:$4 sm:$0xff]   ;;  %v17703_v39 = vld [vmem:[#allocation20 + $0x760] ss:$16 sps:$4 sm:$0xff]  }
0x1f51   :  { %v19560_v59 = vpack.c.bf16 %v10597_v41, %v10581_v33  ;;  %v19562_v46 = vpack.c.bf16 %v10596_v9, %v10580_v27  ;;  %14196 = vmatprep.subr.bf16.mxu1 %v17684_v10  ;;  %v17711_v8 = vld [vmem:[#allocation20 + $0x784] ss:$16 sps:$4 sm:$0xff]   ;;  %v17714_v34 = vld [vmem:[#allocation20 + $0x78c] ss:$16 sps:$4 sm:$0xff]   ;;  %v17709_v31 = vld [vmem:[#allocation20 + $0x780] ss:$16 sps:$4 sm:$0xff]  }
0x1f52   :  { %v19564_v44 = vpack.c.bf16 %v10598_v17, %v10582_v19  ;;  %v17712_v47 = vld [vmem:[#allocation20 + $0x788] ss:$16 sps:$4 sm:$0xff]   ;;  %v17717_v42 = vld [vmem:[#allocation20 + $0x7a4] ss:$16 sps:$4 sm:$0xff]   ;;  %v17720_v32 = vld [vmem:[#allocation20 + $0x7ac] ss:$16 sps:$4 sm:$0xff]  }
0x1f53   :  { %13853 = vmatpush1.bf16.msra.mxu0 %v17679_v51  ;;  %v17715_v15 = vld [vmem:[#allocation20 + $0x7a0] ss:$16 sps:$4 sm:$0xff]   ;;  %v17718_v36 = vld [vmem:[#allocation20 + $0x7a8] ss:$16 sps:$4 sm:$0xff]   ;;  %v17723_v53 = vld [vmem:[#allocation20 + $0x7c4] ss:$16 sps:$4 sm:$0xff]  }
0x1f54   :  { %14197 = vmatpush1.bf16.msra.mxu1 %v17682_v12  ;;  %13854 = vmatprep.subr.bf16.mxu0 %v17687_v26  ;;  %v17726_v7 = vld [vmem:[#allocation20 + $0x7cc] ss:$16 sps:$4 sm:$0xff]   ;;  %v17721_v37 = vld [vmem:[#allocation20 + $0x7c0] ss:$16 sps:$4 sm:$0xff]   ;;  %v17724_v55 = vld [vmem:[#allocation20 + $0x7c8] ss:$16 sps:$4 sm:$0xff]  }
0x1f55   :  { %14198 = vmatprep.subr.bf16.mxu1 %v17690_v49  ;;  %v17729_v0 = vld [vmem:[#allocation20 + $0x7e4] ss:$16 sps:$4 sm:$0xff]   ;;  %v17732_v28 = vld [vmem:[#allocation20 + $0x7ec] ss:$16 sps:$4 sm:$0xff]   ;;  %v17727_v11 = vld [vmem:[#allocation20 + $0x7e0] ss:$16 sps:$4 sm:$0xff]  }
0x1f56   :  { %v17730_v10 = vld [vmem:[#allocation20 + $0x7e8] ss:$16 sps:$4 sm:$0xff]   ;;  %v17735_v21 = vld [vmem:[#allocation20 + $0x804] ss:$16 sps:$4 sm:$0xff]   ;;  %v17738_v23 = vld [vmem:[#allocation20 + $0x80c] ss:$16 sps:$4 sm:$0xff]  }
0x1f57   :  { %13855 = vmatpush1.bf16.msra.mxu0 %v17685_v16  ;;  %v17733_v20 = vld [vmem:[#allocation20 + $0x800] ss:$16 sps:$4 sm:$0xff]   ;;  %v17736_v33 = vld [vmem:[#allocation20 + $0x808] ss:$16 sps:$4 sm:$0xff]   ;;  %v17741_v27 = vld [vmem:[#allocation20 + $0x824] ss:$16 sps:$4 sm:$0xff]  }
0x1f58   :  { %14199 = vmatpush1.bf16.msra.mxu1 %v17688_v43  ;;  %13856 = vmatprep.subr.bf16.mxu0 %v17693_v45  ;;  %v17744_v41 = vld [vmem:[#allocation20 + $0x82c] ss:$16 sps:$4 sm:$0xff]   ;;  %v17739_v9 = vld [vmem:[#allocation20 + $0x820] ss:$16 sps:$4 sm:$0xff]   ;;  %v17742_v51 = vld [vmem:[#allocation20 + $0x828] ss:$16 sps:$4 sm:$0xff]  }
0x1f59   :  { %14200 = vmatprep.subr.bf16.mxu1 %v17696_v61  ;;  %v17747_v19 = vld [vmem:[#allocation20 + $0x844] ss:$16 sps:$4 sm:$0xff]   ;;  %v17750_v17 = vld [vmem:[#allocation20 + $0x84c] ss:$16 sps:$4 sm:$0xff]   ;;  %v17745_v12 = vld [vmem:[#allocation20 + $0x840] ss:$16 sps:$4 sm:$0xff]  }
0x1f5a   :  { %v17748_v26 = vld [vmem:[#allocation20 + $0x848] ss:$16 sps:$4 sm:$0xff]   ;;  %v17753_v49 = vld [vmem:[#allocation20 + $0x864] ss:$16 sps:$4 sm:$0xff]   ;;  %v17751_v16 = vld [vmem:[#allocation20 + $0x860] ss:$16 sps:$4 sm:$0xff]  }
0x1f5b   :  { %13857 = vmatpush1.bf16.msra.mxu0 %v17691_v56  ;;  %v17754_v43 = vld [vmem:[#allocation20 + $0x868] ss:$16 sps:$4 sm:$0xff]   ;;  %v17759_v45 = vld [vmem:[#allocation20 + $0x884] ss:$16 sps:$4 sm:$0xff]   ;;  %v17762_v61 = vld [vmem:[#allocation20 + $0x88c] ss:$16 sps:$4 sm:$0xff]  }
0x1f5c   :  { %14201 = vmatpush1.bf16.msra.mxu1 %v17694_v63  ;;  %13858 = vmatprep.subr.bf16.mxu0 %v17699_v6  ;;  %v17760_v56 = vld [vmem:[#allocation20 + $0x888] ss:$16 sps:$4 sm:$0xff]   ;;  %v17765_v63 = vld [vmem:[#allocation20 + $0x8a4] ss:$16 sps:$4 sm:$0xff]   ;;  %v17768_v6 = vld [vmem:[#allocation20 + $0x8ac] ss:$16 sps:$4 sm:$0xff]  }
0x1f5d   :  { %14202 = vmatprep.subr.bf16.mxu1 %v17702_v13  ;;  %v17763_v13 = vld [vmem:[#allocation20 + $0x8a0] ss:$16 sps:$4 sm:$0xff]  }
0x1f5f   :  { %13859 = vmatpush1.bf16.msra.mxu0 %v17697_v22  ;;  %v17766_v22 = vld [vmem:[#allocation20 + $0x8a8] ss:$16 sps:$4 sm:$0xff]  }
0x1f60   :  { %14203 = vmatpush1.bf16.msra.mxu1 %v17700_v1  ;;  %13860 = vmatprep.subr.bf16.mxu0 %v17705_v14  ;;  %v17771_v1 = vld [vmem:[#allocation20 + $0x8c4] ss:$16 sps:$4 sm:$0xff]   ;;  %v17774_v14 = vld [vmem:[#allocation20 + $0x8cc] ss:$16 sps:$4 sm:$0xff]  }
0x1f61   :  { %14204 = vmatprep.subr.bf16.mxu1 %v17708_v54  ;;  %v17769_v54 = vld [vmem:[#allocation20 + $0x8c0] ss:$16 sps:$4 sm:$0xff]  }
0x1f63   :  { %13861 = vmatpush1.bf16.msra.mxu0 %v17703_v39  ;;  %v17772_v39 = vld [vmem:[#allocation20 + $0x8c8] ss:$16 sps:$4 sm:$0xff]  }
0x1f64   :  { %14205 = vmatpush1.bf16.msra.mxu1 %v17706_v30  ;;  %13862 = vmatprep.subr.bf16.mxu0 %v17711_v8  ;;  %v17777_v30 = vld [vmem:[#allocation20 + $0x8e4] ss:$16 sps:$4 sm:$0xff]   ;;  %v17780_v8 = vld [vmem:[#allocation20 + $0x8ec] ss:$16 sps:$4 sm:$0xff]  }
0x1f65   :  { %14206 = vmatprep.subr.bf16.mxu1 %v17714_v34  ;;  %v17775_v34 = vld [vmem:[#allocation20 + $0x8e0] ss:$16 sps:$4 sm:$0xff]  }
0x1f67   :  { %13863 = vmatpush1.bf16.msra.mxu0 %v17709_v31  ;;  %v17778_v31 = vld [vmem:[#allocation20 + $0x8e8] ss:$16 sps:$4 sm:$0xff]  }
0x1f68   :  { %14207 = vmatpush1.bf16.msra.mxu1 %v17712_v47  ;;  %13864 = vmatprep.subr.bf16.mxu0 %v17717_v42  ;;  %v17783_v47 = vld [vmem:[#allocation20 + $0x904] ss:$16 sps:$4 sm:$0xff]   ;;  %v17786_v42 = vld [vmem:[#allocation20 + $0x90c] ss:$16 sps:$4 sm:$0xff]  }
0x1f69   :  { %14208 = vmatprep.subr.bf16.mxu1 %v17720_v32  ;;  %v17781_v32 = vld [vmem:[#allocation20 + $0x900] ss:$16 sps:$4 sm:$0xff]  }
0x1f6b   :  { %13865 = vmatpush1.bf16.msra.mxu0 %v17715_v15  ;;  %v17784_v15 = vld [vmem:[#allocation20 + $0x908] ss:$16 sps:$4 sm:$0xff]  }
0x1f6c   :  { %14209 = vmatpush1.bf16.msra.mxu1 %v17718_v36  ;;  %13866 = vmatprep.subr.bf16.mxu0 %v17723_v53  ;;  %v17789_v36 = vld [vmem:[#allocation20 + $0x924] ss:$16 sps:$4 sm:$0xff]   ;;  %v17792_v53 = vld [vmem:[#allocation20 + $0x92c] ss:$16 sps:$4 sm:$0xff]  }
0x1f6d   :  { %14210 = vmatprep.subr.bf16.mxu1 %v17726_v7  ;;  %v17787_v7 = vld [vmem:[#allocation20 + $0x920] ss:$16 sps:$4 sm:$0xff]  }
0x1f6f   :  { %13867 = vmatpush1.bf16.msra.mxu0 %v17721_v37  ;;  %v17790_v37 = vld [vmem:[#allocation20 + $0x928] ss:$16 sps:$4 sm:$0xff]  }
0x1f70   :  { %14211 = vmatpush1.bf16.msra.mxu1 %v17724_v55  ;;  %13868 = vmatprep.subr.bf16.mxu0 %v17729_v0  ;;  %v17795_v55 = vld [vmem:[#allocation20 + $0x944] ss:$16 sps:$4 sm:$0xff]   ;;  %v17798_v0 = vld [vmem:[#allocation20 + $0x94c] ss:$16 sps:$4 sm:$0xff]  }
0x1f71   :  { %14212 = vmatprep.subr.bf16.mxu1 %v17732_v28  ;;  %v17793_v28 = vld [vmem:[#allocation20 + $0x940] ss:$16 sps:$4 sm:$0xff]  }
0x1f73   :  { %13869 = vmatpush1.bf16.msra.mxu0 %v17727_v11  ;;  %v17796_v11 = vld [vmem:[#allocation20 + $0x948] ss:$16 sps:$4 sm:$0xff]  }
0x1f74   :  { %14213 = vmatpush1.bf16.msra.mxu1 %v17730_v10  ;;  %13881 = vmatprep.subr.bf16.mxu0 %v17735_v21  ;;  %v17801_v10 = vld [vmem:[#allocation20 + $0x964] ss:$16 sps:$4 sm:$0xff]   ;;  %v17804_v21 = vld [vmem:[#allocation20 + $0x96c] ss:$16 sps:$4 sm:$0xff]  }
0x1f75   :  { %14225 = vmatprep.subr.bf16.mxu1 %v17738_v23  ;;  %v17799_v23 = vld [vmem:[#allocation20 + $0x960] ss:$16 sps:$4 sm:$0xff]  }
0x1f76   :  { %13871 = vmatmul.mubr.bf16.vlgmr.msra.gmra.mrb[96].mxu0 %v19510_v2 }
0x1f77   :  { %14215 = vmatmul.mubr.bf16.vlgmr.msra.gmra.mrb[96].mxu1 %v19510_v2  ;;  %13882 = vmatpush1.bf16.msra.mxu0 %v17733_v20  ;;  %v17756_v2 = vld [vmem:[#allocation20 + $0x86c] ss:$16 sps:$4 sm:$0xff]   ;;  %v17802_v20 = vld [vmem:[#allocation20 + $0x968] ss:$16 sps:$4 sm:$0xff]  }
0x1f78   :  { %13913 = vmatprep.mubr.bf16.mxu0 %v19538_v24  ;;  %14226 = vmatpush1.bf16.msra.mxu1 %v17736_v33  ;;  %v17807_v33 = vld [vmem:[#allocation20 + $0x984] ss:$16 sps:$4 sm:$0xff]  }
0x1f79   :  { %14257 = vmatprep.mubr.bf16.mxu1 %v19538_v24  ;;  %13883 = vmatprep.subr.bf16.mxu0 %v17741_v27  ;;  %v17757_v24 = vld [vmem:[#allocation20 + $0x880] ss:$16 sps:$4 sm:$0xff]   ;;  %v17810_v27 = vld [vmem:[#allocation20 + $0x98c] ss:$16 sps:$4 sm:$0xff]  }
0x1f7a   :  { %14227 = vmatprep.subr.bf16.mxu1 %v17744_v41  ;;  %v17805_v41 = vld [vmem:[#allocation20 + $0x980] ss:$16 sps:$4 sm:$0xff]  }
0x1f7b   :  { %13884 = vmatpush1.bf16.msra.mxu0 %v17739_v9  ;;  %v17808_v9 = vld [vmem:[#allocation20 + $0x988] ss:$16 sps:$4 sm:$0xff]  }
0x1f7c   :  { %14228 = vmatpush1.bf16.msra.mxu1 %v17742_v51  ;;  %13885 = vmatprep.subr.bf16.mxu0 %v17747_v19  ;;  %v17813_v51 = vld [vmem:[#allocation20 + $0x9a4] ss:$16 sps:$4 sm:$0xff]   ;;  %v17816_v19 = vld [vmem:[#allocation20 + $0x9ac] ss:$16 sps:$4 sm:$0xff]  }
0x1f7d   :  { %14229 = vmatprep.subr.bf16.mxu1 %v17750_v17  ;;  %v17811_v17 = vld [vmem:[#allocation20 + $0x9a0] ss:$16 sps:$4 sm:$0xff]  }
0x1f7f   :  { %13886 = vmatpush1.bf16.msra.mxu0 %v17745_v12  ;;  %v17814_v12 = vld [vmem:[#allocation20 + $0x9a8] ss:$16 sps:$4 sm:$0xff]  }
0x1f80   :  { %14230 = vmatpush1.bf16.msra.mxu1 %v17748_v26  ;;  %13887 = vmatprep.subr.bf16.mxu0 %v17753_v49  ;;  %v17819_v26 = vld [vmem:[#allocation20 + $0x9c4] ss:$16 sps:$4 sm:$0xff]   ;;  %v17822_v49 = vld [vmem:[#allocation20 + $0x9cc] ss:$16 sps:$4 sm:$0xff]  }
0x1f81   :  { %14231 = vmatprep.subr.bf16.mxu1 %v17756_v2  ;;  %v17817_v2 = vld [vmem:[#allocation20 + $0x9c0] ss:$16 sps:$4 sm:$0xff]  }
0x1f83   :  { %13888 = vmatpush1.bf16.msra.mxu0 %v17751_v16  ;;  %v17820_v16 = vld [vmem:[#allocation20 + $0x9c8] ss:$16 sps:$4 sm:$0xff]  }
0x1f84   :  { %14232 = vmatpush1.bf16.msra.mxu1 %v17754_v43  ;;  %13889 = vmatprep.subr.bf16.mxu0 %v17759_v45  ;;  %v17825_v43 = vld [vmem:[#allocation20 + $0x9e4] ss:$16 sps:$4 sm:$0xff]   ;;  %v17828_v45 = vld [vmem:[#allocation20 + $0x9ec] ss:$16 sps:$4 sm:$0xff]  }
0x1f85   :  { %14233 = vmatprep.subr.bf16.mxu1 %v17762_v61  ;;  %v17823_v61 = vld [vmem:[#allocation20 + $0x9e0] ss:$16 sps:$4 sm:$0xff]  }
0x1f87   :  { %13890 = vmatpush1.bf16.msra.mxu0 %v17757_v24  ;;  %v17826_v24 = vld [vmem:[#allocation20 + $0x9e8] ss:$16 sps:$4 sm:$0xff]  }
0x1f88   :  { %14234 = vmatpush1.bf16.msra.mxu1 %v17760_v56  ;;  %13891 = vmatprep.subr.bf16.mxu0 %v17765_v63  ;;  %v17831_v56 = vld [vmem:[#allocation20 + $0xa04] ss:$16 sps:$4 sm:$0xff]   ;;  %v17834_v63 = vld [vmem:[#allocation20 + $0xa0c] ss:$16 sps:$4 sm:$0xff]  }
0x1f89   :  { %14235 = vmatprep.subr.bf16.mxu1 %v17768_v6  ;;  %v17829_v6 = vld [vmem:[#allocation20 + $0xa00] ss:$16 sps:$4 sm:$0xff]  }
0x1f8b   :  { %13892 = vmatpush1.bf16.msra.mxu0 %v17763_v13  ;;  %v17832_v13 = vld [vmem:[#allocation20 + $0xa08] ss:$16 sps:$4 sm:$0xff]  }
0x1f8c   :  { %14236 = vmatpush1.bf16.msra.mxu1 %v17766_v22  ;;  %13893 = vmatprep.subr.bf16.mxu0 %v17771_v1  ;;  %v17837_v22 = vld [vmem:[#allocation20 + $0xa24] ss:$16 sps:$4 sm:$0xff]   ;;  %v17840_v1 = vld [vmem:[#allocation20 + $0xa2c] ss:$16 sps:$4 sm:$0xff]  }
0x1f8d   :  { %14237 = vmatprep.subr.bf16.mxu1 %v17774_v14  ;;  %v17835_v14 = vld [vmem:[#allocation20 + $0xa20] ss:$16 sps:$4 sm:$0xff]  }
0x1f8f   :  { %13894 = vmatpush1.bf16.msra.mxu0 %v17769_v54  ;;  %v17838_v54 = vld [vmem:[#allocation20 + $0xa28] ss:$16 sps:$4 sm:$0xff]  }
0x1f90   :  { %14238 = vmatpush1.bf16.msra.mxu1 %v17772_v39  ;;  %13895 = vmatprep.subr.bf16.mxu0 %v17777_v30  ;;  %v17843_v39 = vld [vmem:[#allocation20 + $0xa44] ss:$16 sps:$4 sm:$0xff]   ;;  %v17846_v30 = vld [vmem:[#allocation20 + $0xa4c] ss:$16 sps:$4 sm:$0xff]  }
0x1f91   :  { %14239 = vmatprep.subr.bf16.mxu1 %v17780_v8  ;;  %v17841_v8 = vld [vmem:[#allocation20 + $0xa40] ss:$16 sps:$4 sm:$0xff]  }
0x1f93   :  { %13896 = vmatpush1.bf16.msra.mxu0 %v17775_v34  ;;  %v17844_v34 = vld [vmem:[#allocation20 + $0xa48] ss:$16 sps:$4 sm:$0xff]  }
0x1f94   :  { %14240 = vmatpush1.bf16.msra.mxu1 %v17778_v31  ;;  %13897 = vmatprep.subr.bf16.mxu0 %v17783_v47  ;;  %v17849_v31 = vld [vmem:[#allocation20 + $0xa64] ss:$16 sps:$4 sm:$0xff]   ;;  %v17847_v47 = vld [vmem:[#allocation20 + $0xa60] ss:$16 sps:$4 sm:$0xff]  }
0x1f95   :  { %14241 = vmatprep.subr.bf16.mxu1 %v17786_v42  ;;  %v17850_v42 = vld [vmem:[#allocation20 + $0xa68] ss:$16 sps:$4 sm:$0xff]  }
0x1f97   :  { %13898 = vmatpush1.bf16.msra.mxu0 %v17781_v32  ;;  %v17855_v32 = vld [vmem:[#allocation20 + $0xa84] ss:$16 sps:$4 sm:$0xff]  }
0x1f98   :  { %14242 = vmatpush1.bf16.msra.mxu1 %v17784_v15  ;;  %13899 = vmatprep.subr.bf16.mxu0 %v17789_v36  ;;  %v17858_v15 = vld [vmem:[#allocation20 + $0xa8c] ss:$16 sps:$4 sm:$0xff]   ;;  %v17856_v36 = vld [vmem:[#allocation20 + $0xa88] ss:$16 sps:$4 sm:$0xff]  }
0x1f99   :  { %14243 = vmatprep.subr.bf16.mxu1 %v17792_v53  ;;  %v17861_v53 = vld [vmem:[#allocation20 + $0xaa4] ss:$16 sps:$4 sm:$0xff]  }
0x1f9b   :  { %13900 = vmatpush1.bf16.msra.mxu0 %v17787_v7  ;;  %v17864_v7 = vld [vmem:[#allocation20 + $0xaac] ss:$16 sps:$4 sm:$0xff]  }
0x1f9c   :  { %14244 = vmatpush1.bf16.msra.mxu1 %v17790_v37  ;;  %13901 = vmatprep.subr.bf16.mxu0 %v17795_v55  ;;  %v17859_v37 = vld [vmem:[#allocation20 + $0xaa0] ss:$16 sps:$4 sm:$0xff]   ;;  %v17862_v55 = vld [vmem:[#allocation20 + $0xaa8] ss:$16 sps:$4 sm:$0xff]  }
0x1f9d   :  { %14245 = vmatprep.subr.bf16.mxu1 %v17798_v0  ;;  %v17867_v0 = vld [vmem:[#allocation20 + $0xac4] ss:$16 sps:$4 sm:$0xff]  }
0x1f9f   :  { %13902 = vmatpush1.bf16.msra.mxu0 %v17793_v28  ;;  %v17870_v28 = vld [vmem:[#allocation20 + $0xacc] ss:$16 sps:$4 sm:$0xff]  }
0x1fa0   :  { %14246 = vmatpush1.bf16.msra.mxu1 %v17796_v11  ;;  %13903 = vmatprep.subr.bf16.mxu0 %v17801_v10  ;;  %v17865_v11 = vld [vmem:[#allocation20 + $0xac0] ss:$16 sps:$4 sm:$0xff]   ;;  %v17868_v10 = vld [vmem:[#allocation20 + $0xac8] ss:$16 sps:$4 sm:$0xff]  }
0x1fa1   :  { %14247 = vmatprep.subr.bf16.mxu1 %v17804_v21  ;;  %v17873_v21 = vld [vmem:[#allocation20 + $0xae4] ss:$16 sps:$4 sm:$0xff]  }
0x1fa3   :  { %13904 = vmatpush1.bf16.msra.mxu0 %v17799_v23  ;;  %v17876_v23 = vld [vmem:[#allocation20 + $0xaec] ss:$16 sps:$4 sm:$0xff]  }
0x1fa4   :  { %14248 = vmatpush1.bf16.msra.mxu1 %v17802_v20  ;;  %13905 = vmatprep.subr.bf16.mxu0 %v17807_v33  ;;  %v17871_v20 = vld [vmem:[#allocation20 + $0xae0] ss:$16 sps:$4 sm:$0xff]   ;;  %v17874_v33 = vld [vmem:[#allocation20 + $0xae8] ss:$16 sps:$4 sm:$0xff]  }
0x1fa5   :  { %14249 = vmatprep.subr.bf16.mxu1 %v17810_v27  ;;  %v17879_v27 = vld [vmem:[#allocation20 + $0xb04] ss:$16 sps:$4 sm:$0xff]  }
0x1fa7   :  { %13906 = vmatpush1.bf16.msra.mxu0 %v17805_v41  ;;  %v17882_v41 = vld [vmem:[#allocation20 + $0xb0c] ss:$16 sps:$4 sm:$0xff]  }
0x1fa8   :  { %14250 = vmatpush1.bf16.msra.mxu1 %v17808_v9  ;;  %13907 = vmatprep.subr.bf16.mxu0 %v17813_v51  ;;  %v17877_v9 = vld [vmem:[#allocation20 + $0xb00] ss:$16 sps:$4 sm:$0xff]   ;;  %v17880_v51 = vld [vmem:[#allocation20 + $0xb08] ss:$16 sps:$4 sm:$0xff]  }
0x1fa9   :  { %14251 = vmatprep.subr.bf16.mxu1 %v17816_v19  ;;  %v17885_v19 = vld [vmem:[#allocation20 + $0xb24] ss:$16 sps:$4 sm:$0xff]  }
0x1fab   :  { %13908 = vmatpush1.bf16.msra.mxu0 %v17811_v17  ;;  %v17888_v17 = vld [vmem:[#allocation20 + $0xb2c] ss:$16 sps:$4 sm:$0xff]  }
0x1fac   :  { %14252 = vmatpush1.bf16.msra.mxu1 %v17814_v12  ;;  %13909 = vmatprep.subr.bf16.mxu0 %v17819_v26  ;;  %v17883_v12 = vld [vmem:[#allocation20 + $0xb20] ss:$16 sps:$4 sm:$0xff]   ;;  %v17886_v26 = vld [vmem:[#allocation20 + $0xb28] ss:$16 sps:$4 sm:$0xff]  }
0x1fad   :  { %14253 = vmatprep.subr.bf16.mxu1 %v17822_v49  ;;  %v17891_v49 = vld [vmem:[#allocation20 + $0xb44] ss:$16 sps:$4 sm:$0xff]  }
0x1faf   :  { %13910 = vmatpush1.bf16.msra.mxu0 %v17817_v2  ;;  %v17894_v2 = vld [vmem:[#allocation20 + $0xb4c] ss:$16 sps:$4 sm:$0xff]  }
0x1fb0   :  { %14254 = vmatpush1.bf16.msra.mxu1 %v17820_v16  ;;  %13911 = vmatprep.subr.bf16.mxu0 %v17825_v43  ;;  %v17889_v16 = vld [vmem:[#allocation20 + $0xb40] ss:$16 sps:$4 sm:$0xff]   ;;  %v17892_v43 = vld [vmem:[#allocation20 + $0xb48] ss:$16 sps:$4 sm:$0xff]  }
0x1fb1   :  { %14255 = vmatprep.subr.bf16.mxu1 %v17828_v45  ;;  %v17897_v45 = vld [vmem:[#allocation20 + $0xb64] ss:$16 sps:$4 sm:$0xff]  }
0x1fb3   :  { %13912 = vmatpush1.bf16.msra.mxu0 %v17823_v61  ;;  %v17900_v61 = vld [vmem:[#allocation20 + $0xb6c] ss:$16 sps:$4 sm:$0xff]  }
0x1fb4   :  { %14256 = vmatpush1.bf16.msra.mxu1 %v17826_v24  ;;  %13924 = vmatprep.subr.bf16.mxu0 %v17831_v56  ;;  %v17895_v24 = vld [vmem:[#allocation20 + $0xb60] ss:$16 sps:$4 sm:$0xff]   ;;  %v17898_v56 = vld [vmem:[#allocation20 + $0xb68] ss:$16 sps:$4 sm:$0xff]  }
0x1fb5   :  { %14268 = vmatprep.subr.bf16.mxu1 %v17834_v63  ;;  %v17903_v63 = vld [vmem:[#allocation20 + $0xb84] ss:$16 sps:$4 sm:$0xff]  }
0x1fb6   :  { %13914 = vmatmul.mubr.bf16.vlgmr.msra.gmra.mrb[96].mxu0 %v19534_v50 }
0x1fb7   :  { %14258 = vmatmul.mubr.bf16.vlgmr.msra.gmra.mrb[96].mxu1 %v19534_v50  ;;  %13925 = vmatpush1.bf16.msra.mxu0 %v17829_v6  ;;  %v17852_v50 = vld [vmem:[#allocation20 + $0xa6c] ss:$16 sps:$4 sm:$0xff]  }
0x1fb8   :  { %13956 = vmatprep.mubr.bf16.mxu0 %v19540_v38  ;;  %14269 = vmatpush1.bf16.msra.mxu1 %v17832_v13  ;;  %v17906_v6 = vld [vmem:[#allocation20 + $0xb8c] ss:$16 sps:$4 sm:$0xff]   ;;  %v17901_v13 = vld [vmem:[#allocation20 + $0xb80] ss:$16 sps:$4 sm:$0xff]  }
0x1fb9   :  { %14300 = vmatprep.mubr.bf16.mxu1 %v19540_v38  ;;  %13926 = vmatprep.subr.bf16.mxu0 %v17837_v22  ;;  %v17853_v38 = vld [vmem:[#allocation20 + $0xa80] ss:$16 sps:$4 sm:$0xff]   ;;  %v17904_v22 = vld [vmem:[#allocation20 + $0xb88] ss:$16 sps:$4 sm:$0xff]  }
0x1fba   :  { %14270 = vmatprep.subr.bf16.mxu1 %v17840_v1  ;;  %v17909_v1 = vld [vmem:[#allocation20 + $0xba4] ss:$16 sps:$4 sm:$0xff]  }
0x1fbb   :  { %13927 = vmatpush1.bf16.msra.mxu0 %v17835_v14  ;;  %v17912_v14 = vld [vmem:[#allocation20 + $0xbac] ss:$16 sps:$4 sm:$0xff]  }
0x1fbc   :  { %14271 = vmatpush1.bf16.msra.mxu1 %v17838_v54  ;;  %13928 = vmatprep.subr.bf16.mxu0 %v17843_v39  ;;  %v17907_v54 = vld [vmem:[#allocation20 + $0xba0] ss:$16 sps:$4 sm:$0xff]   ;;  %v17910_v39 = vld [vmem:[#allocation20 + $0xba8] ss:$16 sps:$4 sm:$0xff]  }
0x1fbd   :  { %14272 = vmatprep.subr.bf16.mxu1 %v17846_v30  ;;  %v17915_v30 = vld [vmem:[#allocation20 + $0xbc4] ss:$16 sps:$4 sm:$0xff]  }
0x1fbf   :  { %13929 = vmatpush1.bf16.msra.mxu0 %v17841_v8  ;;  %v17918_v8 = vld [vmem:[#allocation20 + $0xbcc] ss:$16 sps:$4 sm:$0xff]  }
0x1fc0   :  { %14273 = vmatpush1.bf16.msra.mxu1 %v17844_v34  ;;  %13930 = vmatprep.subr.bf16.mxu0 %v17849_v31  ;;  %v17913_v34 = vld [vmem:[#allocation20 + $0xbc0] ss:$16 sps:$4 sm:$0xff]   ;;  %v17916_v31 = vld [vmem:[#allocation20 + $0xbc8] ss:$16 sps:$4 sm:$0xff]  }
0x1fc1   :  { %14274 = vmatprep.subr.bf16.mxu1 %v17852_v50  ;;  %v17921_v50 = vld [vmem:[#allocation20 + $0xbe4] ss:$16 sps:$4 sm:$0xff]  }
0x1fc3   :  { %13931 = vmatpush1.bf16.msra.mxu0 %v17847_v47  ;;  %v17924_v47 = vld [vmem:[#allocation20 + $0xbec] ss:$16 sps:$4 sm:$0xff]  }
0x1fc4   :  { %14275 = vmatpush1.bf16.msra.mxu1 %v17850_v42  ;;  %13932 = vmatprep.subr.bf16.mxu0 %v17855_v32  ;;  %v17919_v42 = vld [vmem:[#allocation20 + $0xbe0] ss:$16 sps:$4 sm:$0xff]   ;;  %v17922_v32 = vld [vmem:[#allocation20 + $0xbe8] ss:$16 sps:$4 sm:$0xff]  }
0x1fc5   :  { %14276 = vmatprep.subr.bf16.mxu1 %v17858_v15  ;;  %v17927_v15 = vld [vmem:[#allocation20 + $0xc04] ss:$16 sps:$4 sm:$0xff]  }
0x1fc7   :  { %13933 = vmatpush1.bf16.msra.mxu0 %v17853_v38  ;;  %v17930_v38 = vld [vmem:[#allocation20 + $0xc0c] ss:$16 sps:$4 sm:$0xff]  }
0x1fc8   :  { %14277 = vmatpush1.bf16.msra.mxu1 %v17856_v36  ;;  %13934 = vmatprep.subr.bf16.mxu0 %v17861_v53  ;;  %v17925_v36 = vld [vmem:[#allocation20 + $0xc00] ss:$16 sps:$4 sm:$0xff]   ;;  %v17928_v53 = vld [vmem:[#allocation20 + $0xc08] ss:$16 sps:$4 sm:$0xff]  }
0x1fc9   :  { %14278 = vmatprep.subr.bf16.mxu1 %v17864_v7  ;;  %v17933_v7 = vld [vmem:[#allocation20 + $0xc24] ss:$16 sps:$4 sm:$0xff]  }
0x1fcb   :  { %13935 = vmatpush1.bf16.msra.mxu0 %v17859_v37  ;;  %v17936_v37 = vld [vmem:[#allocation20 + $0xc2c] ss:$16 sps:$4 sm:$0xff]  }
0x1fcc   :  { %14279 = vmatpush1.bf16.msra.mxu1 %v17862_v55  ;;  %13936 = vmatprep.subr.bf16.mxu0 %v17867_v0  ;;  %v17931_v55 = vld [vmem:[#allocation20 + $0xc20] ss:$16 sps:$4 sm:$0xff]   ;;  %v17934_v0 = vld [vmem:[#allocation20 + $0xc28] ss:$16 sps:$4 sm:$0xff]  }
0x1fcd   :  { %14280 = vmatprep.subr.bf16.mxu1 %v17870_v28  ;;  %v17939_v28 = vld [vmem:[#allocation20 + $0xc44] ss:$16 sps:$4 sm:$0xff]  }
0x1fcf   :  { %13937 = vmatpush1.bf16.msra.mxu0 %v17865_v11  ;;  %v17942_v11 = vld [vmem:[#allocation20 + $0xc4c] ss:$16 sps:$4 sm:$0xff]  }
0x1fd0   :  { %14281 = vmatpush1.bf16.msra.mxu1 %v17868_v10  ;;  %13938 = vmatprep.subr.bf16.mxu0 %v17873_v21  ;;  %v17937_v10 = vld [vmem:[#allocation20 + $0xc40] ss:$16 sps:$4 sm:$0xff]   ;;  %v17940_v21 = vld [vmem:[#allocation20 + $0xc48] ss:$16 sps:$4 sm:$0xff]  }
0x1fd1   :  { %14282 = vmatprep.subr.bf16.mxu1 %v17876_v23  ;;  %v17945_v23 = vld [vmem:[#allocation20 + $0xc64] ss:$16 sps:$4 sm:$0xff]  }
0x1fd3   :  { %13939 = vmatpush1.bf16.msra.mxu0 %v17871_v20  ;;  %v17943_v20 = vld [vmem:[#allocation20 + $0xc60] ss:$16 sps:$4 sm:$0xff]  }
0x1fd4   :  { %14283 = vmatpush1.bf16.msra.mxu1 %v17874_v33  ;;  %13940 = vmatprep.subr.bf16.mxu0 %v17879_v27  ;;  %v17946_v33 = vld [vmem:[#allocation20 + $0xc68] ss:$16 sps:$4 sm:$0xff]   ;;  %v17951_v27 = vld [vmem:[#allocation20 + $0xc84] ss:$16 sps:$4 sm:$0xff]  }
0x1fd5   :  { %14284 = vmatprep.subr.bf16.mxu1 %v17882_v41  ;;  %v17954_v41 = vld [vmem:[#allocation20 + $0xc8c] ss:$16 sps:$4 sm:$0xff]  }
0x1fd7   :  { %13941 = vmatpush1.bf16.msra.mxu0 %v17877_v9  ;;  %v17952_v9 = vld [vmem:[#allocation20 + $0xc88] ss:$16 sps:$4 sm:$0xff]  }
0x1fd8   :  { %14285 = vmatpush1.bf16.msra.mxu1 %v17880_v51  ;;  %13942 = vmatprep.subr.bf16.mxu0 %v17885_v19  ;;  %v17957_v51 = vld [vmem:[#allocation20 + $0xca4] ss:$16 sps:$4 sm:$0xff]   ;;  %v17960_v19 = vld [vmem:[#allocation20 + $0xcac] ss:$16 sps:$4 sm:$0xff]  }
0x1fd9   :  { %14286 = vmatprep.subr.bf16.mxu1 %v17888_v17  ;;  %v17955_v17 = vld [vmem:[#allocation20 + $0xca0] ss:$16 sps:$4 sm:$0xff]  }
0x1fdb   :  { %13943 = vmatpush1.bf16.msra.mxu0 %v17883_v12  ;;  %v17958_v12 = vld [vmem:[#allocation20 + $0xca8] ss:$16 sps:$4 sm:$0xff]  }
0x1fdc   :  { %14287 = vmatpush1.bf16.msra.mxu1 %v17886_v26  ;;  %13944 = vmatprep.subr.bf16.mxu0 %v17891_v49  ;;  %v17963_v26 = vld [vmem:[#allocation20 + $0xcc4] ss:$16 sps:$4 sm:$0xff]   ;;  %v17966_v49 = vld [vmem:[#allocation20 + $0xccc] ss:$16 sps:$4 sm:$0xff]  }
0x1fdd   :  { %14288 = vmatprep.subr.bf16.mxu1 %v17894_v2  ;;  %v17961_v2 = vld [vmem:[#allocation20 + $0xcc0] ss:$16 sps:$4 sm:$0xff]  }
0x1fdf   :  { %13945 = vmatpush1.bf16.msra.mxu0 %v17889_v16  ;;  %v17964_v16 = vld [vmem:[#allocation20 + $0xcc8] ss:$16 sps:$4 sm:$0xff]  }
0x1fe0   :  { %14289 = vmatpush1.bf16.msra.mxu1 %v17892_v43  ;;  %13946 = vmatprep.subr.bf16.mxu0 %v17897_v45  ;;  %v17969_v43 = vld [vmem:[#allocation20 + $0xce4] ss:$16 sps:$4 sm:$0xff]   ;;  %v17972_v45 = vld [vmem:[#allocation20 + $0xcec] ss:$16 sps:$4 sm:$0xff]  }
0x1fe1   :  { %14290 = vmatprep.subr.bf16.mxu1 %v17900_v61  ;;  %v17967_v61 = vld [vmem:[#allocation20 + $0xce0] ss:$16 sps:$4 sm:$0xff]  }
0x1fe3   :  { %13947 = vmatpush1.bf16.msra.mxu0 %v17895_v24  ;;  %v17970_v24 = vld [vmem:[#allocation20 + $0xce8] ss:$16 sps:$4 sm:$0xff]  }
0x1fe4   :  { %14291 = vmatpush1.bf16.msra.mxu1 %v17898_v56  ;;  %13948 = vmatprep.subr.bf16.mxu0 %v17903_v63  ;;  %v17975_v56 = vld [vmem:[#allocation20 + $0xd04] ss:$16 sps:$4 sm:$0xff]   ;;  %v17978_v63 = vld [vmem:[#allocation20 + $0xd0c] ss:$16 sps:$4 sm:$0xff]  }
0x1fe5   :  { %14292 = vmatprep.subr.bf16.mxu1 %v17906_v6  ;;  %v17973_v6 = vld [vmem:[#allocation20 + $0xd00] ss:$16 sps:$4 sm:$0xff]  }
0x1fe7   :  { %13949 = vmatpush1.bf16.msra.mxu0 %v17901_v13  ;;  %v17976_v13 = vld [vmem:[#allocation20 + $0xd08] ss:$16 sps:$4 sm:$0xff]  }
0x1fe8   :  { %14293 = vmatpush1.bf16.msra.mxu1 %v17904_v22  ;;  %13950 = vmatprep.subr.bf16.mxu0 %v17909_v1  ;;  %v17981_v22 = vld [vmem:[#allocation20 + $0xd24] ss:$16 sps:$4 sm:$0xff]   ;;  %v17984_v1 = vld [vmem:[#allocation20 + $0xd2c] ss:$16 sps:$4 sm:$0xff]  }
0x1fe9   :  { %14294 = vmatprep.subr.bf16.mxu1 %v17912_v14  ;;  %v17979_v14 = vld [vmem:[#allocation20 + $0xd20] ss:$16 sps:$4 sm:$0xff]  }
0x1feb   :  { %13951 = vmatpush1.bf16.msra.mxu0 %v17907_v54  ;;  %v17982_v54 = vld [vmem:[#allocation20 + $0xd28] ss:$16 sps:$4 sm:$0xff]  }
0x1fec   :  { %14295 = vmatpush1.bf16.msra.mxu1 %v17910_v39  ;;  %13952 = vmatprep.subr.bf16.mxu0 %v17915_v30  ;;  %v17987_v39 = vld [vmem:[#allocation20 + $0xd44] ss:$16 sps:$4 sm:$0xff]   ;;  %v17990_v30 = vld [vmem:[#allocation20 + $0xd4c] ss:$16 sps:$4 sm:$0xff]  }
0x1fed   :  { %14296 = vmatprep.subr.bf16.mxu1 %v17918_v8  ;;  %v17985_v8 = vld [vmem:[#allocation20 + $0xd40] ss:$16 sps:$4 sm:$0xff]  }
0x1fef   :  { %13953 = vmatpush1.bf16.msra.mxu0 %v17913_v34  ;;  %v17988_v34 = vld [vmem:[#allocation20 + $0xd48] ss:$16 sps:$4 sm:$0xff]  }
0x1ff0   :  { %14297 = vmatpush1.bf16.msra.mxu1 %v17916_v31  ;;  %13954 = vmatprep.subr.bf16.mxu0 %v17921_v50  ;;  %v17993_v31 = vld [vmem:[#allocation20 + $0xd64] ss:$16 sps:$4 sm:$0xff]   ;;  %v17996_v50 = vld [vmem:[#allocation20 + $0xd6c] ss:$16 sps:$4 sm:$0xff]  }
0x1ff1   :  { %14298 = vmatprep.subr.bf16.mxu1 %v17924_v47  ;;  %v17991_v47 = vld [vmem:[#allocation20 + $0xd60] ss:$16 sps:$4 sm:$0xff]  }
0x1ff3   :  { %13955 = vmatpush1.bf16.msra.mxu0 %v17919_v42  ;;  %v17994_v42 = vld [vmem:[#allocation20 + $0xd68] ss:$16 sps:$4 sm:$0xff]  }
0x1ff4   :  { %14299 = vmatpush1.bf16.msra.mxu1 %v17922_v32  ;;  %13967 = vmatprep.subr.bf16.mxu0 %v17927_v15  ;;  %v17999_v32 = vld [vmem:[#allocation20 + $0xd84] ss:$16 sps:$4 sm:$0xff]   ;;  %v18002_v15 = vld [vmem:[#allocation20 + $0xd8c] ss:$16 sps:$4 sm:$0xff]  }
0x1ff5   :  { %14311 = vmatprep.subr.bf16.mxu1 %v17930_v38  ;;  %v17997_v38 = vld [vmem:[#allocation20 + $0xd80] ss:$16 sps:$4 sm:$0xff]  }
0x1ff6   :  { %13957 = vmatmul.mubr.bf16.vlgmr.msra.gmra.mrb[96].mxu0 %v19536_v4 }
0x1ff7   :  { %14301 = vmatmul.mubr.bf16.vlgmr.msra.gmra.mrb[96].mxu1 %v19536_v4  ;;  %13968 = vmatpush1.bf16.msra.mxu0 %v17925_v36  ;;  %v17948_v4 = vld [vmem:[#allocation20 + $0xc6c] ss:$16 sps:$4 sm:$0xff]   ;;  %v18000_v36 = vld [vmem:[#allocation20 + $0xd88] ss:$16 sps:$4 sm:$0xff]  }
0x1ff8   :  { %13999 = vmatprep.mubr.bf16.mxu0 %v19562_v46  ;;  %14312 = vmatpush1.bf16.msra.mxu1 %v17928_v53  ;;  %v18005_v53 = vld [vmem:[#allocation20 + $0xda4] ss:$16 sps:$4 sm:$0xff]  }
0x1ff9   :  { %14343 = vmatprep.mubr.bf16.mxu1 %v19562_v46  ;;  %13969 = vmatprep.subr.bf16.mxu0 %v17933_v7  ;;  %v17949_v46 = vld [vmem:[#allocation20 + $0xc80] ss:$16 sps:$4 sm:$0xff]   ;;  %v18008_v7 = vld [vmem:[#allocation20 + $0xdac] ss:$16 sps:$4 sm:$0xff]  }
0x1ffa   :  { %14313 = vmatprep.subr.bf16.mxu1 %v17936_v37  ;;  %v18003_v37 = vld [vmem:[#allocation20 + $0xda0] ss:$16 sps:$4 sm:$0xff]  }
0x1ffb   :  { %13970 = vmatpush1.bf16.msra.mxu0 %v17931_v55  ;;  %v18006_v55 = vld [vmem:[#allocation20 + $0xda8] ss:$16 sps:$4 sm:$0xff]  }
0x1ffc   :  { %14314 = vmatpush1.bf16.msra.mxu1 %v17934_v0  ;;  %13971 = vmatprep.subr.bf16.mxu0 %v17939_v28  ;;  %v18011_v0 = vld [vmem:[#allocation20 + $0xdc4] ss:$16 sps:$4 sm:$0xff]   ;;  %v18014_v28 = vld [vmem:[#allocation20 + $0xdcc] ss:$16 sps:$4 sm:$0xff]  }
0x1ffd   :  { %14315 = vmatprep.subr.bf16.mxu1 %v17942_v11  ;;  %v18009_v11 = vld [vmem:[#allocation20 + $0xdc0] ss:$16 sps:$4 sm:$0xff]  }
0x1fff   :  { %13972 = vmatpush1.bf16.msra.mxu0 %v17937_v10  ;;  %v18012_v10 = vld [vmem:[#allocation20 + $0xdc8] ss:$16 sps:$4 sm:$0xff]  }
0x2000   :  { %14316 = vmatpush1.bf16.msra.mxu1 %v17940_v21  ;;  %13973 = vmatprep.subr.bf16.mxu0 %v17945_v23  ;;  %v18017_v21 = vld [vmem:[#allocation20 + $0xde4] ss:$16 sps:$4 sm:$0xff]   ;;  %v18020_v23 = vld [vmem:[#allocation20 + $0xdec] ss:$16 sps:$4 sm:$0xff]  }
0x2001   :  { %14317 = vmatprep.subr.bf16.mxu1 %v17948_v4  ;;  %v18015_v4 = vld [vmem:[#allocation20 + $0xde0] ss:$16 sps:$4 sm:$0xff]  }
0x2003   :  { %13974 = vmatpush1.bf16.msra.mxu0 %v17943_v20  ;;  %v18018_v20 = vld [vmem:[#allocation20 + $0xde8] ss:$16 sps:$4 sm:$0xff]  }
0x2004   :  { %14318 = vmatpush1.bf16.msra.mxu1 %v17946_v33  ;;  %13975 = vmatprep.subr.bf16.mxu0 %v17951_v27  ;;  %v18023_v33 = vld [vmem:[#allocation20 + $0xe04] ss:$16 sps:$4 sm:$0xff]   ;;  %v18026_v27 = vld [vmem:[#allocation20 + $0xe0c] ss:$16 sps:$4 sm:$0xff]  }
0x2005   :  { %14319 = vmatprep.subr.bf16.mxu1 %v17954_v41  ;;  %v18021_v41 = vld [vmem:[#allocation20 + $0xe00] ss:$16 sps:$4 sm:$0xff]  }
0x2007   :  { %13976 = vmatpush1.bf16.msra.mxu0 %v17949_v46  ;;  %v18024_v46 = vld [vmem:[#allocation20 + $0xe08] ss:$16 sps:$4 sm:$0xff]  }
0x2008   :  { %14320 = vmatpush1.bf16.msra.mxu1 %v17952_v9  ;;  %13977 = vmatprep.subr.bf16.mxu0 %v17957_v51  ;;  %v18029_v9 = vld [vmem:[#allocation20 + $0xe24] ss:$16 sps:$4 sm:$0xff]   ;;  %v18032_v51 = vld [vmem:[#allocation20 + $0xe2c] ss:$16 sps:$4 sm:$0xff]  }
0x2009   :  { %14321 = vmatprep.subr.bf16.mxu1 %v17960_v19  ;;  %v18027_v19 = vld [vmem:[#allocation20 + $0xe20] ss:$16 sps:$4 sm:$0xff]  }
0x200b   :  { %13978 = vmatpush1.bf16.msra.mxu0 %v17955_v17  ;;  %v18030_v17 = vld [vmem:[#allocation20 + $0xe28] ss:$16 sps:$4 sm:$0xff]  }
0x200c   :  { %14322 = vmatpush1.bf16.msra.mxu1 %v17958_v12  ;;  %13979 = vmatprep.subr.bf16.mxu0 %v17963_v26  ;;  %v18035_v12 = vld [vmem:[#allocation20 + $0xe44] ss:$16 sps:$4 sm:$0xff]   ;;  %v18038_v26 = vld [vmem:[#allocation20 + $0xe4c] ss:$16 sps:$4 sm:$0xff]  }
0x200d   :  { %14323 = vmatprep.subr.bf16.mxu1 %v17966_v49  ;;  %v18033_v49 = vld [vmem:[#allocation20 + $0xe40] ss:$16 sps:$4 sm:$0xff]  }
0x200f   :  { %13980 = vmatpush1.bf16.msra.mxu0 %v17961_v2  ;;  %v18036_v2 = vld [vmem:[#allocation20 + $0xe48] ss:$16 sps:$4 sm:$0xff]  }
0x2010   :  { %14324 = vmatpush1.bf16.msra.mxu1 %v17964_v16  ;;  %13981 = vmatprep.subr.bf16.mxu0 %v17969_v43  ;;  %v18041_v16 = vld [vmem:[#allocation20 + $0xe64] ss:$16 sps:$4 sm:$0xff]   ;;  %v18039_v43 = vld [vmem:[#allocation20 + $0xe60] ss:$16 sps:$4 sm:$0xff]  }
0x2011   :  { %14325 = vmatprep.subr.bf16.mxu1 %v17972_v45  ;;  %v18042_v45 = vld [vmem:[#allocation20 + $0xe68] ss:$16 sps:$4 sm:$0xff]  }
0x2013   :  { %13982 = vmatpush1.bf16.msra.mxu0 %v17967_v61  ;;  %v18047_v61 = vld [vmem:[#allocation20 + $0xe84] ss:$16 sps:$4 sm:$0xff]  }
0x2014   :  { %14326 = vmatpush1.bf16.msra.mxu1 %v17970_v24  ;;  %13983 = vmatprep.subr.bf16.mxu0 %v17975_v56  ;;  %v18050_v24 = vld [vmem:[#allocation20 + $0xe8c] ss:$16 sps:$4 sm:$0xff]   ;;  %v18048_v56 = vld [vmem:[#allocation20 + $0xe88] ss:$16 sps:$4 sm:$0xff]  }
0x2015   :  { %14327 = vmatprep.subr.bf16.mxu1 %v17978_v63  ;;  %v18053_v63 = vld [vmem:[#allocation20 + $0xea4] ss:$16 sps:$4 sm:$0xff]  }
0x2017   :  { %13984 = vmatpush1.bf16.msra.mxu0 %v17973_v6  ;;  %v18056_v6 = vld [vmem:[#allocation20 + $0xeac] ss:$16 sps:$4 sm:$0xff]  }
0x2018   :  { %14328 = vmatpush1.bf16.msra.mxu1 %v17976_v13  ;;  %13985 = vmatprep.subr.bf16.mxu0 %v17981_v22  ;;  %v18051_v13 = vld [vmem:[#allocation20 + $0xea0] ss:$16 sps:$4 sm:$0xff]   ;;  %v18054_v22 = vld [vmem:[#allocation20 + $0xea8] ss:$16 sps:$4 sm:$0xff]  }
0x2019   :  { %14329 = vmatprep.subr.bf16.mxu1 %v17984_v1  ;;  %v18059_v1 = vld [vmem:[#allocation20 + $0xec4] ss:$16 sps:$4 sm:$0xff]  }
0x201b   :  { %13986 = vmatpush1.bf16.msra.mxu0 %v17979_v14  ;;  %v18062_v14 = vld [vmem:[#allocation20 + $0xecc] ss:$16 sps:$4 sm:$0xff]  }
0x201c   :  { %14330 = vmatpush1.bf16.msra.mxu1 %v17982_v54  ;;  %13987 = vmatprep.subr.bf16.mxu0 %v17987_v39  ;;  %v18057_v54 = vld [vmem:[#allocation20 + $0xec0] ss:$16 sps:$4 sm:$0xff]   ;;  %v18060_v39 = vld [vmem:[#allocation20 + $0xec8] ss:$16 sps:$4 sm:$0xff]  }
0x201d   :  { %14331 = vmatprep.subr.bf16.mxu1 %v17990_v30  ;;  %v18065_v30 = vld [vmem:[#allocation20 + $0xee4] ss:$16 sps:$4 sm:$0xff]  }
0x201f   :  { %13988 = vmatpush1.bf16.msra.mxu0 %v17985_v8  ;;  %v18068_v8 = vld [vmem:[#allocation20 + $0xeec] ss:$16 sps:$4 sm:$0xff]  }
0x2020   :  { %14332 = vmatpush1.bf16.msra.mxu1 %v17988_v34  ;;  %13989 = vmatprep.subr.bf16.mxu0 %v17993_v31  ;;  %v18063_v34 = vld [vmem:[#allocation20 + $0xee0] ss:$16 sps:$4 sm:$0xff]   ;;  %v18066_v31 = vld [vmem:[#allocation20 + $0xee8] ss:$16 sps:$4 sm:$0xff]  }
0x2021   :  { %14333 = vmatprep.subr.bf16.mxu1 %v17996_v50  ;;  %v18071_v50 = vld [vmem:[#allocation20 + $0xf04] ss:$16 sps:$4 sm:$0xff]  }
0x2023   :  { %13990 = vmatpush1.bf16.msra.mxu0 %v17991_v47  ;;  %v18074_v47 = vld [vmem:[#allocation20 + $0xf0c] ss:$16 sps:$4 sm:$0xff]  }
0x2024   :  { %14334 = vmatpush1.bf16.msra.mxu1 %v17994_v42  ;;  %13991 = vmatprep.subr.bf16.mxu0 %v17999_v32  ;;  %v18069_v42 = vld [vmem:[#allocation20 + $0xf00] ss:$16 sps:$4 sm:$0xff]   ;;  %v18072_v32 = vld [vmem:[#allocation20 + $0xf08] ss:$16 sps:$4 sm:$0xff]  }
0x2025   :  { %14335 = vmatprep.subr.bf16.mxu1 %v18002_v15  ;;  %v18077_v15 = vld [vmem:[#allocation20 + $0xf24] ss:$16 sps:$4 sm:$0xff]  }
0x2027   :  { %13992 = vmatpush1.bf16.msra.mxu0 %v17997_v38  ;;  %v18080_v38 = vld [vmem:[#allocation20 + $0xf2c] ss:$16 sps:$4 sm:$0xff]  }
0x2028   :  { %14336 = vmatpush1.bf16.msra.mxu1 %v18000_v36  ;;  %13993 = vmatprep.subr.bf16.mxu0 %v18005_v53  ;;  %v18075_v36 = vld [vmem:[#allocation20 + $0xf20] ss:$16 sps:$4 sm:$0xff]   ;;  %v18078_v53 = vld [vmem:[#allocation20 + $0xf28] ss:$16 sps:$4 sm:$0xff]  }
0x2029   :  { %14337 = vmatprep.subr.bf16.mxu1 %v18008_v7  ;;  %v18083_v7 = vld [vmem:[#allocation20 + $0xf44] ss:$16 sps:$4 sm:$0xff]  }
0x202b   :  { %13994 = vmatpush1.bf16.msra.mxu0 %v18003_v37  ;;  %v18086_v37 = vld [vmem:[#allocation20 + $0xf4c] ss:$16 sps:$4 sm:$0xff]  }
0x202c   :  { %14338 = vmatpush1.bf16.msra.mxu1 %v18006_v55  ;;  %13995 = vmatprep.subr.bf16.mxu0 %v18011_v0  ;;  %v18081_v55 = vld [vmem:[#allocation20 + $0xf40] ss:$16 sps:$4 sm:$0xff]   ;;  %v18084_v0 = vld [vmem:[#allocation20 + $0xf48] ss:$16 sps:$4 sm:$0xff]  }
0x202d   :  { %14339 = vmatprep.subr.bf16.mxu1 %v18014_v28  ;;  %v18089_v28 = vld [vmem:[#allocation20 + $0xf64] ss:$16 sps:$4 sm:$0xff]  }
0x202f   :  { %13996 = vmatpush1.bf16.msra.mxu0 %v18009_v11  ;;  %v18092_v11 = vld [vmem:[#allocation20 + $0xf6c] ss:$16 sps:$4 sm:$0xff]  }
0x2030   :  { %14340 = vmatpush1.bf16.msra.mxu1 %v18012_v10  ;;  %13997 = vmatprep.subr.bf16.mxu0 %v18017_v21  ;;  %v18087_v10 = vld [vmem:[#allocation20 + $0xf60] ss:$16 sps:$4 sm:$0xff]   ;;  %v18090_v21 = vld [vmem:[#allocation20 + $0xf68] ss:$16 sps:$4 sm:$0xff]  }
0x2031   :  { %14341 = vmatprep.subr.bf16.mxu1 %v18020_v23  ;;  %v18095_v23 = vld [vmem:[#allocation20 + $0xf84] ss:$16 sps:$4 sm:$0xff]  }
0x2033   :  { %13998 = vmatpush1.bf16.msra.mxu0 %v18015_v4  ;;  %v18098_v4 = vld [vmem:[#allocation20 + $0xf8c] ss:$16 sps:$4 sm:$0xff]  }
0x2034   :  { %14342 = vmatpush1.bf16.msra.mxu1 %v18018_v20  ;;  %14010 = vmatprep.subr.bf16.mxu0 %v18023_v33  ;;  %v18093_v20 = vld [vmem:[#allocation20 + $0xf80] ss:$16 sps:$4 sm:$0xff]   ;;  %v18096_v33 = vld [vmem:[#allocation20 + $0xf88] ss:$16 sps:$4 sm:$0xff]  }
0x2035   :  { %14354 = vmatprep.subr.bf16.mxu1 %v18026_v27  ;;  %v18101_v27 = vld [vmem:[#allocation20 + $0xfa4] ss:$16 sps:$4 sm:$0xff]  }
0x2036   :  { %14000 = vmatmul.mubr.bf16.vlgmr.msra.gmra.mrb[96].mxu0 %v19558_v48 }
0x2037   :  { %14344 = vmatmul.mubr.bf16.vlgmr.msra.gmra.mrb[96].mxu1 %v19558_v48  ;;  %14011 = vmatpush1.bf16.msra.mxu0 %v18021_v41  ;;  %v18044_v48 = vld [vmem:[#allocation20 + $0xe6c] ss:$16 sps:$4 sm:$0xff]  }
0x2038   :  { %14042 = vmatprep.mubr.bf16.mxu0 %v19564_v44  ;;  %14355 = vmatpush1.bf16.msra.mxu1 %v18024_v46  ;;  %v18104_v41 = vld [vmem:[#allocation20 + $0xfac] ss:$16 sps:$4 sm:$0xff]   ;;  %v18099_v46 = vld [vmem:[#allocation20 + $0xfa0] ss:$16 sps:$4 sm:$0xff]  }
0x2039   :  { %14386 = vmatprep.mubr.bf16.mxu1 %v19564_v44  ;;  %14012 = vmatprep.subr.bf16.mxu0 %v18029_v9  ;;  %v18045_v44 = vld [vmem:[#allocation20 + $0xe80] ss:$16 sps:$4 sm:$0xff]   ;;  %v18102_v9 = vld [vmem:[#allocation20 + $0xfa8] ss:$16 sps:$4 sm:$0xff]  }
0x203a   :  { %14356 = vmatprep.subr.bf16.mxu1 %v18032_v51  ;;  %v18107_v51 = vld [vmem:[#allocation20 + $0xfc4] ss:$16 sps:$4 sm:$0xff]  }
0x203b   :  { %14013 = vmatpush1.bf16.msra.mxu0 %v18027_v19  ;;  %v18110_v19 = vld [vmem:[#allocation20 + $0xfcc] ss:$16 sps:$4 sm:$0xff]  }
0x203c   :  { %14357 = vmatpush1.bf16.msra.mxu1 %v18030_v17  ;;  %14014 = vmatprep.subr.bf16.mxu0 %v18035_v12  ;;  %v18105_v17 = vld [vmem:[#allocation20 + $0xfc0] ss:$16 sps:$4 sm:$0xff]   ;;  %v18108_v12 = vld [vmem:[#allocation20 + $0xfc8] ss:$16 sps:$4 sm:$0xff]  }
0x203d   :  { %14358 = vmatprep.subr.bf16.mxu1 %v18038_v26  ;;  %v18113_v26 = vld [vmem:[#allocation20 + $0xfe4] ss:$16 sps:$4 sm:$0xff]  }
0x203f   :  { %14015 = vmatpush1.bf16.msra.mxu0 %v18033_v49  ;;  %v18116_v49 = vld [vmem:[#allocation20 + $0xfec] ss:$16 sps:$4 sm:$0xff]  }
0x2040   :  { %14359 = vmatpush1.bf16.msra.mxu1 %v18036_v2  ;;  %14016 = vmatprep.subr.bf16.mxu0 %v18041_v16  ;;  %v18111_v2 = vld [vmem:[#allocation20 + $0xfe0] ss:$16 sps:$4 sm:$0xff]   ;;  %v18114_v16 = vld [vmem:[#allocation20 + $0xfe8] ss:$16 sps:$4 sm:$0xff]  }
0x2041   :  { %14360 = vmatprep.subr.bf16.mxu1 %v18044_v48  ;;  %v11127_v48 = vld [vmem:[#allocation22] sm:$0xf] }
0x2043   :  { %14017 = vmatpush1.bf16.msra.mxu0 %v18039_v43  ;;  %v11132_v43 = vrot.slane %v11127_v48, %v18846_v62 }
0x2044   :  { %14361 = vmatpush1.bf16.msra.mxu1 %v18042_v45  ;;  %14018 = vmatprep.subr.bf16.mxu0 %v18047_v61  ;;  %v11140_v45 = vrot.slane %v11127_v48, %v18840_v57  ;;  %v11136_v61 = vrot.slane %v11127_v48, %v18843_v60 }
0x2045   :  { %14362 = vmatprep.subr.bf16.mxu1 %v18050_v24  ;;  %v11144_v24 = vrot.slane %v11127_v48, %v18851_v5 }
0x2047   :  { %14019 = vmatpush1.bf16.msra.mxu0 %v18045_v44 }
0x2048   :  { %14363 = vmatpush1.bf16.msra.mxu1 %v18048_v56  ;;  %14020 = vmatprep.subr.bf16.mxu0 %v18053_v63 }
0x2049   :  { %14364 = vmatprep.subr.bf16.mxu1 %v18056_v6 }
0x204b   :  { %14021 = vmatpush1.bf16.msra.mxu0 %v18051_v13 }
0x204c   :  { %14365 = vmatpush1.bf16.msra.mxu1 %v18054_v22  ;;  %14022 = vmatprep.subr.bf16.mxu0 %v18059_v1 }
0x204d   :  { %14366 = vmatprep.subr.bf16.mxu1 %v18062_v14 }
0x204f   :  { %14023 = vmatpush1.bf16.msra.mxu0 %v18057_v54 }
0x2050   :  { %14367 = vmatpush1.bf16.msra.mxu1 %v18060_v39  ;;  %14024 = vmatprep.subr.bf16.mxu0 %v18065_v30 }
0x2051   :  { %14368 = vmatprep.subr.bf16.mxu1 %v18068_v8 }
0x2053   :  { %14025 = vmatpush1.bf16.msra.mxu0 %v18063_v34 }
0x2054   :  { %14369 = vmatpush1.bf16.msra.mxu1 %v18066_v31  ;;  %14026 = vmatprep.subr.bf16.mxu0 %v18071_v50 }
0x2055   :  { %14370 = vmatprep.subr.bf16.mxu1 %v18074_v47 }
0x2057   :  { %14027 = vmatpush1.bf16.msra.mxu0 %v18069_v42 }
0x2058   :  { %14371 = vmatpush1.bf16.msra.mxu1 %v18072_v32  ;;  %14028 = vmatprep.subr.bf16.mxu0 %v18077_v15 }
0x2059   :  { %14372 = vmatprep.subr.bf16.mxu1 %v18080_v38 }
0x205b   :  { %14029 = vmatpush1.bf16.msra.mxu0 %v18075_v36 }
0x205c   :  { %14373 = vmatpush1.bf16.msra.mxu1 %v18078_v53  ;;  %14030 = vmatprep.subr.bf16.mxu0 %v18083_v7 }
0x205d   :  { %14374 = vmatprep.subr.bf16.mxu1 %v18086_v37 }
0x205f   :  { %14031 = vmatpush1.bf16.msra.mxu0 %v18081_v55 }
0x2060   :  { %14375 = vmatpush1.bf16.msra.mxu1 %v18084_v0  ;;  %14032 = vmatprep.subr.bf16.mxu0 %v18089_v28 }
0x2061   :  { %14376 = vmatprep.subr.bf16.mxu1 %v18092_v11 }
0x2063   :  { %14033 = vmatpush1.bf16.msra.mxu0 %v18087_v10 }
0x2064   :  { %14377 = vmatpush1.bf16.msra.mxu1 %v18090_v21  ;;  %14034 = vmatprep.subr.bf16.mxu0 %v18095_v23 }
0x2065   :  { %14378 = vmatprep.subr.bf16.mxu1 %v18098_v4 }
0x2067   :  { %14035 = vmatpush1.bf16.msra.mxu0 %v18093_v20 }
0x2068   :  { %14379 = vmatpush1.bf16.msra.mxu1 %v18096_v33  ;;  %14036 = vmatprep.subr.bf16.mxu0 %v18101_v27 }
0x2069   :  { %14380 = vmatprep.subr.bf16.mxu1 %v18104_v41 }
0x206b   :  { %14037 = vmatpush1.bf16.msra.mxu0 %v18099_v46 }
0x206c   :  { %14381 = vmatpush1.bf16.msra.mxu1 %v18102_v9  ;;  %14038 = vmatprep.subr.bf16.mxu0 %v18107_v51 }
0x206d   :  { %14382 = vmatprep.subr.bf16.mxu1 %v18110_v19 }
0x206f   :  { %14039 = vmatpush1.bf16.msra.mxu0 %v18105_v17 }
0x2070   :  { %14383 = vmatpush1.bf16.msra.mxu1 %v18108_v12  ;;  %14040 = vmatprep.subr.bf16.mxu0 %v18113_v26 }
0x2071   :  { %14384 = vmatprep.subr.bf16.mxu1 %v18116_v49 }
0x2073   :  { %14041 = vmatpush1.bf16.msra.mxu0 %v18111_v2 }
0x2074   :  { %14385 = vmatpush1.bf16.msra.mxu1 %v18114_v16 }
0x2076   :  { %14043 = vmatmul.mubr.bf16.vlgmr.msra.gmra.mrb[96].mxu0 %v19560_v59 }
0x2077   :  { %14387 = vmatmul.mubr.bf16.vlgmr.msra.gmra.mrb[96].mxu1 %v19560_v59 }
0x2149   :  { %v14044_v44 = vpop.f32.mrb[96].mxu0 }
0x214a   :  { %v16380_v56 = vadd.f32 %v14044_v44, %v11132_v43  ;;  %v14388_v63 = vpop.f32.mrb[96].mxu1  ;;  %v14046_v6 = vpop.f32.mrb[97].mxu0 }
0x214b   :  { %v16384_v13 = vadd.f32 %v14388_v63, %v11140_v45  ;;  %v16381_v22 = vadd.f32 %v14046_v6, %v11136_v61  ;;  %v14390_v1 = vpop.f32.mrb[97].mxu1  ;;  %v14048_v14 = vpop.f32.mrb[98].mxu0 }
0x214c   :  { %v14397_v54 = vadd.f32 %v16380_v56, %v19342_v58  ;;  %v16385_v59 = vadd.f32 %v14390_v1, %v11144_v24  ;;  %v16382_v39 = vadd.f32 %v14048_v14, %v11132_v43  ;;  %v14392_v30 = vpop.f32.mrb[98].mxu1  ;;  %v14050_v62 = vpop.f32.mrb[99].mxu0 }
0x214d   :  { %v14399_v57 = vadd.f32 %v16384_v13, %v19348_v29  ;;  %v14398_v60 = vadd.f32 %v16381_v22, %v19344_v52  ;;  %v16386_v8 = vadd.f32 %v14392_v30, %v11140_v45  ;;  %v16383_v5 = vadd.f32 %v14050_v62, %v11136_v61  ;;  %v14394_v34 = vpop.f32.mrb[99].mxu1 }
0x214e   :  { %14405 = vst [vmem:[#allocation23] sm:$0xff] %v14397_v54  ;;  %v14400_v31 = vadd.f32 %v16385_v59, %v19354_v40  ;;  %v14401_v50 = vadd.f32 %v16382_v39, %v19346_v3  ;;  %v16387_v47 = vadd.f32 %v14394_v34, %v11144_v24 }
0x214f   :  { %14407 = vst [vmem:[#allocation23 + $0x10] sm:$0xff] %v14399_v57  ;;  %14406 = vst [vmem:[#allocation23 + $0x8] sm:$0xff] %v14398_v60  ;;  %v14403_v58 = vadd.f32 %v16386_v8, %v19356_v18  ;;  %v14402_v42 = vadd.f32 %v16383_v5, %v19350_v25 }
0x2150   :  { %14408 = vst [vmem:[#allocation23 + $0x18] sm:$0xff] %v14400_v31  ;;  %14409 = vst [vmem:[#allocation23 + $0x20] sm:$0xff] %v14401_v50  ;;  %v14404_v52 = vadd.f32 %v16387_v47, %v19361_v35 }
0x2151   :  { %14411 = vst [vmem:[#allocation23 + $0x30] sm:$0xff] %v14403_v58  ;;  %14410 = vst [vmem:[#allocation23 + $0x28] sm:$0xff] %v14402_v42 }
0x2152   :  { %14412 = vst [vmem:[#allocation23 + $0x38] sm:$0xff] %v14404_v52 }
0x2153   :  { %18500 = shalt.err (!%p18497_p10)
}
0x2154   :  { %s18501_s23 = scalar_lea.hbm %s19624_s13, 1024 }
0x2155   :  { %p18502_p11 = scmp.ne.s32.totalorder %s19624_s13, %s18501_s23  ;;  %p18505_p12 = scmp.lt.u32.totalorder %s18501_s23, %s19624_s13 }
0x2157   :  { %p18507_p13 = pnand %p18505_p12, %p18502_p11 }
0x2159   :  { %18510 = shalt.err (!%p18507_p13)
}
0x215a   :  { %14424 = dma.vmem_to_hbm [thread:$0]  %s14419_s21, 1024, %s19624_s13, [#allocation4], %s18540_s11, %s18540_s11, %s18541_s1  }
0x215b   :  { %18525 = dma.done.wait [#allocation4], 1024  }
0x215c   :  { %18526 = vsyncadd [#allocation4], 4294966272 }
0x215d   :  { %14428 = vsyncpa [#allocation3], 1 }
0x215e   :  { %14429 = vsyncpa [#allocation6], 1 }
0x215f   :  { %14430 = vsyncpa [#allocation9], 1 }
0x2160   :  { %14431 = vsyncpa [#allocation12], 1 }
0x2161   :  { %14432 = vsyncpa [#allocation15], 1 }
0x2162   :  { %14433 = vsyncpa [#allocation18], 1 }
0x2163   :  { %14434 = vsyncpa [#allocation21], 1 }
0x2164   :  { %14435 = vsyncpa [#allocation4], 1 }

</bundles_post_ra>
